<compile_context>
chip_gen: v6e
topology: v6e:2x2x1
jax: 0.10.0
libtpu: 0.0.40
codegen_flags: <defaults>
</compile_context>

<pallas_src>
import jax
import jax.numpy as jnp
import numpy as np
from jax.experimental import pallas as pl
from jax.experimental.pallas import tpu as pltpu


# --------------------------- fused conv-block kernel ------------------------
# One image per grid step.  Activation layout everywhere: rows = flattened
# spatial position (sublanes), lanes = channels zero-padded to 128.

def _conv_block_kernel(p1_ref, w1_ref, b1_ref, w2_ref, b2_ref, feat_ref,
                       s1_ref, a1p_ref, s3_ref):
    # conv1: im2col GEMM (784,25) x (25,128) + bias + ReLU.  rows = h*28 + w.
    y1 = jnp.dot(p1_ref[0], w1_ref[...], preferred_element_type=jnp.float32)
    s1_ref[...] = jnp.maximum(y1 + b1_ref[...], 0.0)

    # 2x2 max-pool (stride 2), fused; result goes straight into the
    # zero-padded, pitch-18 conv2 input scratch (row = y*18 + x).
    a1p_ref[...] = jnp.zeros_like(a1p_ref)
    for ph in range(14):
        r0 = 56 * ph                                   # row of (h=2ph, w=0)
        a = s1_ref[pl.ds(r0,      14, stride=2), :]    # (2ph,   even w)
        b = s1_ref[pl.ds(r0 + 1,  14, stride=2), :]    # (2ph,   odd  w)
        c = s1_ref[pl.ds(r0 + 28, 14, stride=2), :]    # (2ph+1, even w)
        d = s1_ref[pl.ds(r0 + 29, 14, stride=2), :]    # (2ph+1, odd  w)
        row = jnp.maximum(jnp.maximum(a, b), jnp.maximum(c, d))       # (14,128)
        base = (ph + 2) * 18 + 2                       # spatial pad of 2
        a1p_ref[base:base + 14, :] = row

    # conv2: 25 shifted contiguous (252,128) x (128,128) MXU matmuls
    # accumulated in f32, + bias + ReLU.  rows = h*18 + w (w<14 valid).
    acc = jnp.zeros((252, 128), jnp.float32) + b2_ref[...]
    for t in range(25):
        i, j = divmod(t, 5)
        tap = a1p_ref[i * 18 + j: i * 18 + j + 252, :]
        acc = acc + jnp.dot(tap, w2_ref[t], preferred_element_type=jnp.float32)
    s3_ref[...] = jnp.maximum(acc, 0.0)

    # 2x2 max-pool -> (49,128) feature rows (row = h*7 + w), lane-dense store.
    for ph in range(7):
        r0 = 36 * ph
        a = s3_ref[pl.ds(r0,      7, stride=2), :]
        b = s3_ref[pl.ds(r0 + 1,  7, stride=2), :]
        c = s3_ref[pl.ds(r0 + 18, 7, stride=2), :]
        d = s3_ref[pl.ds(r0 + 19, 7, stride=2), :]
        feat_ref[0, 7 * ph: 7 * ph + 7, :] = jnp.maximum(
            jnp.maximum(a, b), jnp.maximum(c, d))


def conv_block_pallas(p1, w1, b1, w2, b2):
    B = p1.shape[0]
    return pl.pallas_call(
        _conv_block_kernel,
        out_shape=jax.ShapeDtypeStruct((B, 49, 128), jnp.float32),
        grid=(B,),
        in_specs=[
            pl.BlockSpec((1, 784, 25), lambda b: (b, 0, 0)),     # patches
            pl.BlockSpec((25, 128), lambda b: (0, 0)),           # conv1 w
            pl.BlockSpec((1, 128), lambda b: (0, 0)),            # conv1 b
            pl.BlockSpec((25, 128, 128), lambda b: (0, 0, 0)),   # conv2 w
            pl.BlockSpec((1, 128), lambda b: (0, 0)),            # conv2 b
        ],
        out_specs=pl.BlockSpec((1, 49, 128), lambda b: (b, 0, 0)),
        scratch_shapes=[
            pltpu.VMEM((784, 128), jnp.float32),   # conv1 output (pre-pool)
            pltpu.VMEM((328, 128), jnp.float32),   # padded pitch-18 conv2 input
            pltpu.VMEM((252, 128), jnp.float32),   # conv2 output (pre-pool)
        ],
        compiler_params=pltpu.CompilerParams(dimension_semantics=("parallel",)),
    )(p1, w1, b1, w2, b2)


# ------------------------------- FC head kernel -----------------------------

def _fc_kernel(x_ref, w1_ref, b1_ref, w2_ref, b2_ref, o_ref):
    h = jnp.dot(x_ref[...], w1_ref[...], preferred_element_type=jnp.float32)
    h = h + b1_ref[...]
    y = jnp.dot(h, w2_ref[...], preferred_element_type=jnp.float32)
    o_ref[...] = y + b2_ref[...]


def fc_head_pallas(feat, w1, b1, w2, b2):
    B, K = feat.shape
    tb = B if B <= 128 else 128                        # fixed row tile
    return pl.pallas_call(
        _fc_kernel,
        out_shape=jax.ShapeDtypeStruct((B, 128), jnp.float32),
        grid=(pl.cdiv(B, tb),),
        in_specs=[
            pl.BlockSpec((tb, K), lambda i: (i, 0)),
            pl.BlockSpec((K, 128), lambda i: (0, 0)),
            pl.BlockSpec((1, 128), lambda i: (0, 0)),
            pl.BlockSpec((128, 128), lambda i: (0, 0)),
            pl.BlockSpec((1, 128), lambda i: (0, 0)),
        ],
        out_specs=pl.BlockSpec((tb, 128), lambda i: (i, 0)),
        compiler_params=pltpu.CompilerParams(dimension_semantics=("parallel",)),
    )(feat, w1, b1, w2, b2)


# ------------------------------ parameter prep ------------------------------

def init_params(key):
    k = jax.random.split(key, 8)

    def conv_w(kk, cout, cin, kh, kw):
        fan_in = cin * kh * kw
        return jax.random.normal(kk, (cout, cin, kh, kw), jnp.float32) / np.sqrt(fan_in)

    def lin_w(kk, out_f, in_f):
        return jax.random.normal(kk, (out_f, in_f), jnp.float32) / np.sqrt(in_f)

    return {
        "conv1_w": conv_w(k[0], 10, 1, 5, 5),
        "conv1_b": jax.random.normal(k[1], (10,), jnp.float32) * 0.01,
        "conv2_w": conv_w(k[2], 20, 10, 5, 5),
        "conv2_b": jax.random.normal(k[3], (20,), jnp.float32) * 0.01,
        "out1_w": lin_w(k[4], 50, 7 * 7 * 20),
        "out1_b": jax.random.normal(k[5], (50,), jnp.float32) * 0.01,
        "out2_w": lin_w(k[6], 10, 50),
        "out2_b": jax.random.normal(k[7], (10,), jnp.float32) * 0.01,
    }


def prepare_kernel_params(p):
    """One-time repack: GEMM layouts, lane padding to 128, and the PyTorch
    (C,H,W) flatten permutation folded into the fc1 weight."""
    f32 = jnp.float32
    # conv1: (10,1,5,5) -> rows t=i*5+j, cols Cout padded to 128.
    w1 = jnp.transpose(p["conv1_w"], (2, 3, 1, 0)).reshape(25, 10)
    w1 = jnp.pad(w1, ((0, 0), (0, 118))).astype(f32)
    b1 = jnp.pad(p["conv1_b"], (0, 118)).reshape(1, 128).astype(f32)
    # conv2: (20,10,5,5) -> (25 taps, Cin padded 128, Cout padded 128).
    w2 = jnp.transpose(p["conv2_w"], (2, 3, 1, 0)).reshape(25, 10, 20)
    w2 = jnp.pad(w2, ((0, 0), (0, 118), (0, 108))).astype(f32)
    b2 = jnp.pad(p["conv2_b"], (0, 108)).reshape(1, 128).astype(f32)
    # fc1: permute rows from PyTorch (c*49 + hw) order to our (hw*20 + c) order.
    wf1 = p["out1_w"].reshape(50, 20, 49).transpose(2, 1, 0).reshape(980, 50)
    wf1 = jnp.pad(wf1, ((0, 0), (0, 78))).astype(f32)
    bf1 = jnp.pad(p["out1_b"], (0, 78)).reshape(1, 128).astype(f32)
    # fc2: (10,50) -> (K=128, N=128) zero padded.
    wf2 = jnp.pad(p["out2_w"].T, ((0, 78), (0, 118))).astype(f32)
    bf2 = jnp.pad(p["out2_b"], (0, 118)).reshape(1, 128).astype(f32)
    return {"w1": w1, "b1": b1, "w2": w2, "b2": b2,
            "wf1": wf1, "bf1": bf1, "wf2": wf2, "bf2": bf2}


# --------------------------------- forward ----------------------------------

def my_cnn_forward(kp, x_nchw):
    B = x_nchw.shape[0]
    # conv1 patch matrix (B,784,25): rows = h*28+w, taps = i*5+j.  Tiny XLA
    # prep (78 KB/image); everything else runs inside the two fused kernels.
    xp = jnp.pad(x_nchw[:, 0], ((0, 0), (2, 2), (2, 2)))          # (B,32,32)
    cols = [xp[:, i:i + 28, j:j + 28] for i in range(5) for j in range(5)]
    p1 = jnp.stack(cols, axis=-1).reshape(B, 784, 25)

    feat_p = conv_block_pallas(p1, kp["w1"], kp["b1"], kp["w2"], kp["b2"])
    # Valid 20 channels in (h*7+w, c) order; the PyTorch (c,h,w) flatten
    # permutation is already folded into kp["wf1"].
    feat = feat_p[:, :, :20].reshape(B, 7 * 7 * 20)

    out = fc_head_pallas(feat, kp["wf1"], kp["bf1"], kp["wf2"], kp["bf2"])
    return out[:, :10]


# ------------------------------ JAX reference --------------------------------

def reference_forward(params, x_nchw):
    y = jax.lax.conv_general_dilated(
        x_nchw, params["conv1_w"], (1, 1), ((2, 2), (2, 2)),
        dimension_numbers=("NCHW", "OIHW", "NCHW"))
    y = jax.nn.relu(y + params["conv1_b"][None, :, None, None])
    y = jax.lax.reduce_window(y, -jnp.inf, jax.lax.max,
                              (1, 1, 2, 2), (1, 1, 2, 2), "VALID")
    y = jax.lax.conv_general_dilated(
        y, params["conv2_w"], (1, 1), ((2, 2), (2, 2)),
        dimension_numbers=("NCHW", "OIHW", "NCHW"))
    y = jax.nn.relu(y + params["conv2_b"][None, :, None, None])
    y = jax.lax.reduce_window(y, -jnp.inf, jax.lax.max,
                              (1, 1, 2, 2), (1, 1, 2, 2), "VALID")
    y = y.reshape(y.shape[0], -1)
    y = y @ params["out1_w"].T + params["out1_b"]
    y = y @ params["out2_w"].T + params["out2_b"]
    return y


if __name__ == "__main__":
    key = jax.random.PRNGKey(0)
    pkey, xkey = jax.random.split(key)
    params = init_params(pkey)
    kparams = prepare_kernel_params(params)          # one-time repack
    # Spatial size must be 28x28 so the flatten is 7*7*20, as in the module.
    x = jax.random.normal(xkey, (2, 1, 28, 28), jnp.float32)      # NCHW

    fwd = jax.jit(my_cnn_forward)
    out = jax.block_until_ready(fwd(kparams, x))
    assert out.shape == (2, 10), out.shape

    ref = reference_forward(params, x)
    if not np.allclose(np.asarray(out), np.asarray(ref), rtol=5e-2, atol=5e-2):
        raise AssertionError("Pallas output does not match JAX reference")
    print("KERNEL_OK")
</pallas_src>

<mosaic_0001>
module attributes {stable_mosaic.version = 11 : i64} {
  func.func @_fc_kernel(%arg0: i32, %arg1: memref<2x980xf32, #tpu.memory_space<vmem>>, %arg2: memref<980x128xf32, #tpu.memory_space<vmem>>, %arg3: memref<1x128xf32, #tpu.memory_space<vmem>>, %arg4: memref<128x128xf32, #tpu.memory_space<vmem>>, %arg5: memref<1x128xf32, #tpu.memory_space<vmem>>, %arg6: memref<2x128xf32, #tpu.memory_space<vmem>>) attributes {dimension_semantics = [#tpu.dimension_semantics<parallel>], iteration_bounds = array<i64: 1>, scalar_prefetch = 0 : i64, scratch_operands = 0 : i64, tpu.core_type = #tpu.core_type<tc>, window_params = [{transform_indices = @transform_0, window_bounds = array<i64: 2, 980>}, {pipeline_mode = #tpu.pipeline_mode<synchronous>, transform_indices = @transform_1, window_bounds = array<i64: 980, 128>}, {pipeline_mode = #tpu.pipeline_mode<synchronous>, transform_indices = @transform_2, window_bounds = array<i64: 1, 128>}, {pipeline_mode = #tpu.pipeline_mode<synchronous>, transform_indices = @transform_3, window_bounds = array<i64: 128, 128>}, {pipeline_mode = #tpu.pipeline_mode<synchronous>, transform_indices = @transform_4, window_bounds = array<i64: 1, 128>}, {transform_indices = @transform_5, window_bounds = array<i64: 2, 128>}]} {
    %c0 = arith.constant 0 : index
    %c0_0 = arith.constant 0 : index
    %0 = vector.load %arg1[%c0, %c0_0] : memref<2x980xf32, #tpu.memory_space<vmem>>, vector<2x980xf32>
    %c0_1 = arith.constant 0 : index
    %c0_2 = arith.constant 0 : index
    %1 = vector.load %arg2[%c0_1, %c0_2] : memref<980x128xf32, #tpu.memory_space<vmem>>, vector<980x128xf32>
    %cst = arith.constant dense<0.000000e+00> : vector<2x128xf32>
    %2 = tpu.matmul %0, %1, %cst {dimension_numbers = #tpu.dot_dimension_numbers<[1], [0], [0], [1], [0, 0, 1, 1], [], []>} : vector<2x980xf32>, vector<980x128xf32>, vector<2x128xf32> -> vector<2x128xf32>
    %c0_3 = arith.constant 0 : index
    %c0_4 = arith.constant 0 : index
    %3 = vector.load %arg3[%c0_3, %c0_4] : memref<1x128xf32, #tpu.memory_space<vmem>>, vector<1x128xf32>
    %4 = vector.broadcast %3 : vector<1x128xf32> to vector<2x128xf32>
    %5 = arith.addf %2, %4 : vector<2x128xf32>
    %c0_5 = arith.constant 0 : index
    %c0_6 = arith.constant 0 : index
    %6 = vector.load %arg4[%c0_5, %c0_6] : memref<128x128xf32, #tpu.memory_space<vmem>>, vector<128x128xf32>
    %cst_7 = arith.constant dense<0.000000e+00> : vector<2x128xf32>
    %7 = tpu.matmul %5, %6, %cst_7 {dimension_numbers = #tpu.dot_dimension_numbers<[1], [0], [0], [1], [0, 0, 1, 1], [], []>} : vector<2x128xf32>, vector<128x128xf32>, vector<2x128xf32> -> vector<2x128xf32>
    %c0_8 = arith.constant 0 : index
    %c0_9 = arith.constant 0 : index
    %8 = vector.load %arg5[%c0_8, %c0_9] : memref<1x128xf32, #tpu.memory_space<vmem>>, vector<1x128xf32>
    %9 = vector.broadcast %8 : vector<1x128xf32> to vector<2x128xf32>
    %10 = arith.addf %7, %9 : vector<2x128xf32>
    %c0_10 = arith.constant 0 : index
    %c0_11 = arith.constant 0 : index
    %11 = vector.load %arg6[%c0_10, %c0_11] : memref<2x128xf32, #tpu.memory_space<vmem>>, vector<2x128xf32>
    tpu.vector_store %arg6[%c0_10, %c0_11], %10 {strides = array<i32>} : memref<2x128xf32, #tpu.memory_space<vmem>>, vector<2x128xf32>,
    return
  }
  func.func @transform_0(%arg0: i32) -> (i32, i32) {
    %c0_i32 = arith.constant 0 : i32
    %c0_i32_0 = arith.constant 0 : i32
    return %arg0, %c0_i32 : i32, i32
  }
  func.func @transform_1(%arg0: i32) -> (i32, i32) {
    %c0_i32 = arith.constant 0 : i32
    %c0_i32_0 = arith.constant 0 : i32
    %c0_i32_1 = arith.constant 0 : i32
    return %c0_i32, %c0_i32_0 : i32, i32
  }
  func.func @transform_2(%arg0: i32) -> (i32, i32) {
    %c0_i32 = arith.constant 0 : i32
    %c0_i32_0 = arith.constant 0 : i32
    %c0_i32_1 = arith.constant 0 : i32
    return %c0_i32, %c0_i32_0 : i32, i32
  }
  func.func @transform_3(%arg0: i32) -> (i32, i32) {
    %c0_i32 = arith.constant 0 : i32
    %c0_i32_0 = arith.constant 0 : i32
    %c0_i32_1 = arith.constant 0 : i32
    return %c0_i32, %c0_i32_0 : i32, i32
  }
  func.func @transform_4(%arg0: i32) -> (i32, i32) {
    %c0_i32 = arith.constant 0 : i32
    %c0_i32_0 = arith.constant 0 : i32
    %c0_i32_1 = arith.constant 0 : i32
    return %c0_i32, %c0_i32_0 : i32, i32
  }
  func.func @transform_5(%arg0: i32) -> (i32, i32) {
    %c0_i32 = arith.constant 0 : i32
    %c0_i32_0 = arith.constant 0 : i32
    return %arg0, %c0_i32 : i32, i32
  }
}

module attributes {stable_mosaic.version = 11 : i64} {
  func.func @_conv_block_kernel(%arg0: i32, %arg1: memref<1x784x25xf32, #tpu.memory_space<vmem>>, %arg2: memref<25x128xf32, #tpu.memory_space<vmem>>, %arg3: memref<1x128xf32, #tpu.memory_space<vmem>>, %arg4: memref<25x128x128xf32, #tpu.memory_space<vmem>>, %arg5: memref<1x128xf32, #tpu.memory_space<vmem>>, %arg6: memref<1x49x128xf32, #tpu.memory_space<vmem>>, %arg7: memref<784x128xf32, #tpu.memory_space<vmem>>, %arg8: memref<328x128xf32, #tpu.memory_space<vmem>>, %arg9: memref<252x128xf32, #tpu.memory_space<vmem>>) attributes {dimension_semantics = [#tpu.dimension_semantics<parallel>], iteration_bounds = array<i64: 2>, scalar_prefetch = 0 : i64, scratch_operands = 3 : i64, tpu.core_type = #tpu.core_type<tc>, window_params = [{transform_indices = @transform_0, window_bounds = array<i64: 1, 784, 25>}, {pipeline_mode = #tpu.pipeline_mode<synchronous>, transform_indices = @transform_1, window_bounds = array<i64: 25, 128>}, {pipeline_mode = #tpu.pipeline_mode<synchronous>, transform_indices = @transform_2, window_bounds = array<i64: 1, 128>}, {pipeline_mode = #tpu.pipeline_mode<synchronous>, transform_indices = @transform_3, window_bounds = array<i64: 25, 128, 128>}, {pipeline_mode = #tpu.pipeline_mode<synchronous>, transform_indices = @transform_4, window_bounds = array<i64: 1, 128>}, {transform_indices = @transform_5, window_bounds = array<i64: 1, 49, 128>}]} {
    %c0 = arith.constant 0 : index
    %c0_0 = arith.constant 0 : index
    %c0_1 = arith.constant 0 : index
    %0 = vector.load %arg1[%c0, %c0_0, %c0_1] : memref<1x784x25xf32, #tpu.memory_space<vmem>>, vector<1x784x25xf32>
    %1 = vector.shape_cast %0 : vector<1x784x25xf32> to vector<784x25xf32>
    %c0_2 = arith.constant 0 : index
    %c0_3 = arith.constant 0 : index
    %2 = vector.load %arg2[%c0_2, %c0_3] : memref<25x128xf32, #tpu.memory_space<vmem>>, vector<25x128xf32>
    %cst = arith.constant dense<0.000000e+00> : vector<784x128xf32>
    %3 = tpu.matmul %1, %2, %cst {dimension_numbers = #tpu.dot_dimension_numbers<[1], [0], [0], [1], [0, 0, 1, 1], [], []>} : vector<784x25xf32>, vector<25x128xf32>, vector<784x128xf32> -> vector<784x128xf32>
    %c0_4 = arith.constant 0 : index
    %c0_5 = arith.constant 0 : index
    %4 = vector.load %arg3[%c0_4, %c0_5] : memref<1x128xf32, #tpu.memory_space<vmem>>, vector<1x128xf32>
    %5 = vector.broadcast %4 : vector<1x128xf32> to vector<784x128xf32>
    %6 = arith.addf %3, %5 : vector<784x128xf32>
    %cst_6 = arith.constant 0.000000e+00 : f32
    %7 = vector.broadcast %cst_6 : f32 to vector<784x128xf32>
    %8 = arith.maximumf %6, %7 : vector<784x128xf32>
    %c0_7 = arith.constant 0 : index
    %c0_8 = arith.constant 0 : index
    %9 = vector.load %arg7[%c0_7, %c0_8] : memref<784x128xf32, #tpu.memory_space<vmem>>, vector<784x128xf32>
    tpu.vector_store %arg7[%c0_7, %c0_8], %8 {strides = array<i32>} : memref<784x128xf32, #tpu.memory_space<vmem>>, vector<784x128xf32>,
    %cst_9 = arith.constant 0.000000e+00 : f32
    %10 = vector.broadcast %cst_9 : f32 to vector<328x128xf32>
    %c0_10 = arith.constant 0 : index
    %c0_11 = arith.constant 0 : index
    %11 = vector.load %arg8[%c0_10, %c0_11] : memref<328x128xf32, #tpu.memory_space<vmem>>, vector<328x128xf32>
    tpu.vector_store %arg8[%c0_10, %c0_11], %10 {strides = array<i32>} : memref<328x128xf32, #tpu.memory_space<vmem>>, vector<328x128xf32>,
    %c0_12 = arith.constant 0 : index
    %c0_13 = arith.constant 0 : index
    %12 = tpu.strided_load %arg7[%c0_12, %c0_13] {strides = array<i32: 2, 1>} : memref<784x128xf32, #tpu.memory_space<vmem>>, vector<14x128xf32>
    %c1 = arith.constant 1 : index
    %c0_14 = arith.constant 0 : index
    %13 = tpu.strided_load %arg7[%c1, %c0_14] {strides = array<i32: 2, 1>} : memref<784x128xf32, #tpu.memory_space<vmem>>, vector<14x128xf32>
    %c28 = arith.constant 28 : index
    %c0_15 = arith.constant 0 : index
    %14 = tpu.strided_load %arg7[%c28, %c0_15] {strides = array<i32: 2, 1>} : memref<784x128xf32, #tpu.memory_space<vmem>>, vector<14x128xf32>
    %c29 = arith.constant 29 : index
    %c0_16 = arith.constant 0 : index
    %15 = tpu.strided_load %arg7[%c29, %c0_16] {strides = array<i32: 2, 1>} : memref<784x128xf32, #tpu.memory_space<vmem>>, vector<14x128xf32>
    %16 = arith.maximumf %12, %13 : vector<14x128xf32>
    %17 = arith.maximumf %14, %15 : vector<14x128xf32>
    %18 = arith.maximumf %16, %17 : vector<14x128xf32>
    %c38 = arith.constant 38 : index
    %c0_17 = arith.constant 0 : index
    %19 = vector.load %arg8[%c38, %c0_17] : memref<328x128xf32, #tpu.memory_space<vmem>>, vector<14x128xf32>
    tpu.vector_store %arg8[%c38, %c0_17], %18 {strides = array<i32>} : memref<328x128xf32, #tpu.memory_space<vmem>>, vector<14x128xf32>,
    %c56 = arith.constant 56 : index
    %c0_18 = arith.constant 0 : index
    %20 = tpu.strided_load %arg7[%c56, %c0_18] {strides = array<i32: 2, 1>} : memref<784x128xf32, #tpu.memory_space<vmem>>, vector<14x128xf32>
    %c57 = arith.constant 57 : index
    %c0_19 = arith.constant 0 : index
    %21 = tpu.strided_load %arg7[%c57, %c0_19] {strides = array<i32: 2, 1>} : memref<784x128xf32, #tpu.memory_space<vmem>>, vector<14x128xf32>
    %c84 = arith.constant 84 : index
    %c0_20 = arith.constant 0 : index
    %22 = tpu.strided_load %arg7[%c84, %c0_20] {strides = array<i32: 2, 1>} : memref<784x128xf32, #tpu.memory_space<vmem>>, vector<14x128xf32>
    %c85 = arith.constant 85 : index
    %c0_21 = arith.constant 0 : index
    %23 = tpu.strided_load %arg7[%c85, %c0_21] {strides = array<i32: 2, 1>} : memref<784x128xf32, #tpu.memory_space<vmem>>, vector<14x128xf32>
    %24 = arith.maximumf %20, %21 : vector<14x128xf32>
    %25 = arith.maximumf %22, %23 : vector<14x128xf32>
    %26 = arith.maximumf %24, %25 : vector<14x128xf32>
    %c56_22 = arith.constant 56 : index
    %c0_23 = arith.constant 0 : index
    %27 = vector.load %arg8[%c56_22, %c0_23] : memref<328x128xf32, #tpu.memory_space<vmem>>, vector<14x128xf32>
    tpu.vector_store %arg8[%c56_22, %c0_23], %26 {strides = array<i32>} : memref<328x128xf32, #tpu.memory_space<vmem>>, vector<14x128xf32>,
    %c112 = arith.constant 112 : index
    %c0_24 = arith.constant 0 : index
    %28 = tpu.strided_load %arg7[%c112, %c0_24] {strides = array<i32: 2, 1>} : memref<784x128xf32, #tpu.memory_space<vmem>>, vector<14x128xf32>
    %c113 = arith.constant 113 : index
    %c0_25 = arith.constant 0 : index
    %29 = tpu.strided_load %arg7[%c113, %c0_25] {strides = array<i32: 2, 1>} : memref<784x128xf32, #tpu.memory_space<vmem>>, vector<14x128xf32>
    %c140 = arith.constant 140 : index
    %c0_26 = arith.constant 0 : index
    %30 = tpu.strided_load %arg7[%c140, %c0_26] {strides = array<i32: 2, 1>} : memref<784x128xf32, #tpu.memory_space<vmem>>, vector<14x128xf32>
    %c141 = arith.constant 141 : index
    %c0_27 = arith.constant 0 : index
    %31 = tpu.strided_load %arg7[%c141, %c0_27] {strides = array<i32: 2, 1>} : memref<784x128xf32, #tpu.memory_space<vmem>>, vector<14x128xf32>
    %32 = arith.maximumf %28, %29 : vector<14x128xf32>
    %33 = arith.maximumf %30, %31 : vector<14x128xf32>
    %34 = arith.maximumf %32, %33 : vector<14x128xf32>
    %c74 = arith.constant 74 : index
    %c0_28 = arith.constant 0 : index
    %35 = vector.load %arg8[%c74, %c0_28] : memref<328x128xf32, #tpu.memory_space<vmem>>, vector<14x128xf32>
    tpu.vector_store %arg8[%c74, %c0_28], %34 {strides = array<i32>} : memref<328x128xf32, #tpu.memory_space<vmem>>, vector<14x128xf32>,
    %c168 = arith.constant 168 : index
    %c0_29 = arith.constant 0 : index
    %36 = tpu.strided_load %arg7[%c168, %c0_29] {strides = array<i32: 2, 1>} : memref<784x128xf32, #tpu.memory_space<vmem>>, vector<14x128xf32>
    %c169 = arith.constant 169 : index
    %c0_30 = arith.constant 0 : index
    %37 = tpu.strided_load %arg7[%c169, %c0_30] {strides = array<i32: 2, 1>} : memref<784x128xf32, #tpu.memory_space<vmem>>, vector<14x128xf32>
    %c196 = arith.constant 196 : index
    %c0_31 = arith.constant 0 : index
    %38 = tpu.strided_load %arg7[%c196, %c0_31] {strides = array<i32: 2, 1>} : memref<784x128xf32, #tpu.memory_space<vmem>>, vector<14x128xf32>
    %c197 = arith.constant 197 : index
    %c0_32 = arith.constant 0 : index
    %39 = tpu.strided_load %arg7[%c197, %c0_32] {strides = array<i32: 2, 1>} : memref<784x128xf32, #tpu.memory_space<vmem>>, vector<14x128xf32>
    %40 = arith.maximumf %36, %37 : vector<14x128xf32>
    %41 = arith.maximumf %38, %39 : vector<14x128xf32>
    %42 = arith.maximumf %40, %41 : vector<14x128xf32>
    %c92 = arith.constant 92 : index
    %c0_33 = arith.constant 0 : index
    %43 = vector.load %arg8[%c92, %c0_33] : memref<328x128xf32, #tpu.memory_space<vmem>>, vector<14x128xf32>
    tpu.vector_store %arg8[%c92, %c0_33], %42 {strides = array<i32>} : memref<328x128xf32, #tpu.memory_space<vmem>>, vector<14x128xf32>,
    %c224 = arith.constant 224 : index
    %c0_34 = arith.constant 0 : index
    %44 = tpu.strided_load %arg7[%c224, %c0_34] {strides = array<i32: 2, 1>} : memref<784x128xf32, #tpu.memory_space<vmem>>, vector<14x128xf32>
    %c225 = arith.constant 225 : index
    %c0_35 = arith.constant 0 : index
    %45 = tpu.strided_load %arg7[%c225, %c0_35] {strides = array<i32: 2, 1>} : memref<784x128xf32, #tpu.memory_space<vmem>>, vector<14x128xf32>
    %c252 = arith.constant 252 : index
    %c0_36 = arith.constant 0 : index
    %46 = tpu.strided_load %arg7[%c252, %c0_36] {strides = array<i32: 2, 1>} : memref<784x128xf32, #tpu.memory_space<vmem>>, vector<14x128xf32>
    %c253 = arith.constant 253 : index
    %c0_37 = arith.constant 0 : index
    %47 = tpu.strided_load %arg7[%c253, %c0_37] {strides = array<i32: 2, 1>} : memref<784x128xf32, #tpu.memory_space<vmem>>, vector<14x128xf32>
    %48 = arith.maximumf %44, %45 : vector<14x128xf32>
    %49 = arith.maximumf %46, %47 : vector<14x128xf32>
    %50 = arith.maximumf %48, %49 : vector<14x128xf32>
    %c110 = arith.constant 110 : index
    %c0_38 = arith.constant 0 : index
    %51 = vector.load %arg8[%c110, %c0_38] : memref<328x128xf32, #tpu.memory_space<vmem>>, vector<14x128xf32>
    tpu.vector_store %arg8[%c110, %c0_38], %50 {strides = array<i32>} : memref<328x128xf32, #tpu.memory_space<vmem>>, vector<14x128xf32>,
    %c280 = arith.constant 280 : index
    %c0_39 = arith.constant 0 : index
    %52 = tpu.strided_load %arg7[%c280, %c0_39] {strides = array<i32: 2, 1>} : memref<784x128xf32, #tpu.memory_space<vmem>>, vector<14x128xf32>
    %c281 = arith.constant 281 : index
    %c0_40 = arith.constant 0 : index
    %53 = tpu.strided_load %arg7[%c281, %c0_40] {strides = array<i32: 2, 1>} : memref<784x128xf32, #tpu.memory_space<vmem>>, vector<14x128xf32>
    %c308 = arith.constant 308 : index
    %c0_41 = arith.constant 0 : index
    %54 = tpu.strided_load %arg7[%c308, %c0_41] {strides = array<i32: 2, 1>} : memref<784x128xf32, #tpu.memory_space<vmem>>, vector<14x128xf32>
    %c309 = arith.constant 309 : index
    %c0_42 = arith.constant 0 : index
    %55 = tpu.strided_load %arg7[%c309, %c0_42] {strides = array<i32: 2, 1>} : memref<784x128xf32, #tpu.memory_space<vmem>>, vector<14x128xf32>
    %56 = arith.maximumf %52, %53 : vector<14x128xf32>
    %57 = arith.maximumf %54, %55 : vector<14x128xf32>
    %58 = arith.maximumf %56, %57 : vector<14x128xf32>
    %c128 = arith.constant 128 : index
    %c0_43 = arith.constant 0 : index
    %59 = vector.load %arg8[%c128, %c0_43] : memref<328x128xf32, #tpu.memory_space<vmem>>, vector<14x128xf32>
    tpu.vector_store %arg8[%c128, %c0_43], %58 {strides = array<i32>} : memref<328x128xf32, #tpu.memory_space<vmem>>, vector<14x128xf32>,
    %c336 = arith.constant 336 : index
    %c0_44 = arith.constant 0 : index
    %60 = tpu.strided_load %arg7[%c336, %c0_44] {strides = array<i32: 2, 1>} : memref<784x128xf32, #tpu.memory_space<vmem>>, vector<14x128xf32>
    %c337 = arith.constant 337 : index
    %c0_45 = arith.constant 0 : index
    %61 = tpu.strided_load %arg7[%c337, %c0_45] {strides = array<i32: 2, 1>} : memref<784x128xf32, #tpu.memory_space<vmem>>, vector<14x128xf32>
    %c364 = arith.constant 364 : index
    %c0_46 = arith.constant 0 : index
    %62 = tpu.strided_load %arg7[%c364, %c0_46] {strides = array<i32: 2, 1>} : memref<784x128xf32, #tpu.memory_space<vmem>>, vector<14x128xf32>
    %c365 = arith.constant 365 : index
    %c0_47 = arith.constant 0 : index
    %63 = tpu.strided_load %arg7[%c365, %c0_47] {strides = array<i32: 2, 1>} : memref<784x128xf32, #tpu.memory_space<vmem>>, vector<14x128xf32>
    %64 = arith.maximumf %60, %61 : vector<14x128xf32>
    %65 = arith.maximumf %62, %63 : vector<14x128xf32>
    %66 = arith.maximumf %64, %65 : vector<14x128xf32>
    %c146 = arith.constant 146 : index
    %c0_48 = arith.constant 0 : index
    %67 = vector.load %arg8[%c146, %c0_48] : memref<328x128xf32, #tpu.memory_space<vmem>>, vector<14x128xf32>
    tpu.vector_store %arg8[%c146, %c0_48], %66 {strides = array<i32>} : memref<328x128xf32, #tpu.memory_space<vmem>>, vector<14x128xf32>,
    %c392 = arith.constant 392 : index
    %c0_49 = arith.constant 0 : index
    %68 = tpu.strided_load %arg7[%c392, %c0_49] {strides = array<i32: 2, 1>} : memref<784x128xf32, #tpu.memory_space<vmem>>, vector<14x128xf32>
    %c393 = arith.constant 393 : index
    %c0_50 = arith.constant 0 : index
    %69 = tpu.strided_load %arg7[%c393, %c0_50] {strides = array<i32: 2, 1>} : memref<784x128xf32, #tpu.memory_space<vmem>>, vector<14x128xf32>
    %c420 = arith.constant 420 : index
    %c0_51 = arith.constant 0 : index
    %70 = tpu.strided_load %arg7[%c420, %c0_51] {strides = array<i32: 2, 1>} : memref<784x128xf32, #tpu.memory_space<vmem>>, vector<14x128xf32>
    %c421 = arith.constant 421 : index
    %c0_52 = arith.constant 0 : index
    %71 = tpu.strided_load %arg7[%c421, %c0_52] {strides = array<i32: 2, 1>} : memref<784x128xf32, #tpu.memory_space<vmem>>, vector<14x128xf32>
    %72 = arith.maximumf %68, %69 : vector<14x128xf32>
    %73 = arith.maximumf %70, %71 : vector<14x128xf32>
    %74 = arith.maximumf %72, %73 : vector<14x128xf32>
    %c164 = arith.constant 164 : index
    %c0_53 = arith.constant 0 : index
    %75 = vector.load %arg8[%c164, %c0_53] : memref<328x128xf32, #tpu.memory_space<vmem>>, vector<14x128xf32>
    tpu.vector_store %arg8[%c164, %c0_53], %74 {strides = array<i32>} : memref<328x128xf32, #tpu.memory_space<vmem>>, vector<14x128xf32>,
    %c448 = arith.constant 448 : index
    %c0_54 = arith.constant 0 : index
    %76 = tpu.strided_load %arg7[%c448, %c0_54] {strides = array<i32: 2, 1>} : memref<784x128xf32, #tpu.memory_space<vmem>>, vector<14x128xf32>
    %c449 = arith.constant 449 : index
    %c0_55 = arith.constant 0 : index
    %77 = tpu.strided_load %arg7[%c449, %c0_55] {strides = array<i32: 2, 1>} : memref<784x128xf32, #tpu.memory_space<vmem>>, vector<14x128xf32>
    %c476 = arith.constant 476 : index
    %c0_56 = arith.constant 0 : index
    %78 = tpu.strided_load %arg7[%c476, %c0_56] {strides = array<i32: 2, 1>} : memref<784x128xf32, #tpu.memory_space<vmem>>, vector<14x128xf32>
    %c477 = arith.constant 477 : index
    %c0_57 = arith.constant 0 : index
    %79 = tpu.strided_load %arg7[%c477, %c0_57] {strides = array<i32: 2, 1>} : memref<784x128xf32, #tpu.memory_space<vmem>>, vector<14x128xf32>
    %80 = arith.maximumf %76, %77 : vector<14x128xf32>
    %81 = arith.maximumf %78, %79 : vector<14x128xf32>
    %82 = arith.maximumf %80, %81 : vector<14x128xf32>
    %c182 = arith.constant 182 : index
    %c0_58 = arith.constant 0 : index
    %83 = vector.load %arg8[%c182, %c0_58] : memref<328x128xf32, #tpu.memory_space<vmem>>, vector<14x128xf32>
    tpu.vector_store %arg8[%c182, %c0_58], %82 {strides = array<i32>} : memref<328x128xf32, #tpu.memory_space<vmem>>, vector<14x128xf32>,
    %c504 = arith.constant 504 : index
    %c0_59 = arith.constant 0 : index
    %84 = tpu.strided_load %arg7[%c504, %c0_59] {strides = array<i32: 2, 1>} : memref<784x128xf32, #tpu.memory_space<vmem>>, vector<14x128xf32>
    %c505 = arith.constant 505 : index
    %c0_60 = arith.constant 0 : index
    %85 = tpu.strided_load %arg7[%c505, %c0_60] {strides = array<i32: 2, 1>} : memref<784x128xf32, #tpu.memory_space<vmem>>, vector<14x128xf32>
    %c532 = arith.constant 532 : index
    %c0_61 = arith.constant 0 : index
    %86 = tpu.strided_load %arg7[%c532, %c0_61] {strides = array<i32: 2, 1>} : memref<784x128xf32, #tpu.memory_space<vmem>>, vector<14x128xf32>
    %c533 = arith.constant 533 : index
    %c0_62 = arith.constant 0 : index
    %87 = tpu.strided_load %arg7[%c533, %c0_62] {strides = array<i32: 2, 1>} : memref<784x128xf32, #tpu.memory_space<vmem>>, vector<14x128xf32>
    %88 = arith.maximumf %84, %85 : vector<14x128xf32>
    %89 = arith.maximumf %86, %87 : vector<14x128xf32>
    %90 = arith.maximumf %88, %89 : vector<14x128xf32>
    %c200 = arith.constant 200 : index
    %c0_63 = arith.constant 0 : index
    %91 = vector.load %arg8[%c200, %c0_63] : memref<328x128xf32, #tpu.memory_space<vmem>>, vector<14x128xf32>
    tpu.vector_store %arg8[%c200, %c0_63], %90 {strides = array<i32>} : memref<328x128xf32, #tpu.memory_space<vmem>>, vector<14x128xf32>,
    %c560 = arith.constant 560 : index
    %c0_64 = arith.constant 0 : index
    %92 = tpu.strided_load %arg7[%c560, %c0_64] {strides = array<i32: 2, 1>} : memref<784x128xf32, #tpu.memory_space<vmem>>, vector<14x128xf32>
    %c561 = arith.constant 561 : index
    %c0_65 = arith.constant 0 : index
    %93 = tpu.strided_load %arg7[%c561, %c0_65] {strides = array<i32: 2, 1>} : memref<784x128xf32, #tpu.memory_space<vmem>>, vector<14x128xf32>
    %c588 = arith.constant 588 : index
    %c0_66 = arith.constant 0 : index
    %94 = tpu.strided_load %arg7[%c588, %c0_66] {strides = array<i32: 2, 1>} : memref<784x128xf32, #tpu.memory_space<vmem>>, vector<14x128xf32>
    %c589 = arith.constant 589 : index
    %c0_67 = arith.constant 0 : index
    %95 = tpu.strided_load %arg7[%c589, %c0_67] {strides = array<i32: 2, 1>} : memref<784x128xf32, #tpu.memory_space<vmem>>, vector<14x128xf32>
    %96 = arith.maximumf %92, %93 : vector<14x128xf32>
    %97 = arith.maximumf %94, %95 : vector<14x128xf32>
    %98 = arith.maximumf %96, %97 : vector<14x128xf32>
    %c218 = arith.constant 218 : index
    %c0_68 = arith.constant 0 : index
    %99 = vector.load %arg8[%c218, %c0_68] : memref<328x128xf32, #tpu.memory_space<vmem>>, vector<14x128xf32>
    tpu.vector_store %arg8[%c218, %c0_68], %98 {strides = array<i32>} : memref<328x128xf32, #tpu.memory_space<vmem>>, vector<14x128xf32>,
    %c616 = arith.constant 616 : index
    %c0_69 = arith.constant 0 : index
    %100 = tpu.strided_load %arg7[%c616, %c0_69] {strides = array<i32: 2, 1>} : memref<784x128xf32, #tpu.memory_space<vmem>>, vector<14x128xf32>
    %c617 = arith.constant 617 : index
    %c0_70 = arith.constant 0 : index
    %101 = tpu.strided_load %arg7[%c617, %c0_70] {strides = array<i32: 2, 1>} : memref<784x128xf32, #tpu.memory_space<vmem>>, vector<14x128xf32>
    %c644 = arith.constant 644 : index
    %c0_71 = arith.constant 0 : index
    %102 = tpu.strided_load %arg7[%c644, %c0_71] {strides = array<i32: 2, 1>} : memref<784x128xf32, #tpu.memory_space<vmem>>, vector<14x128xf32>
    %c645 = arith.constant 645 : index
    %c0_72 = arith.constant 0 : index
    %103 = tpu.strided_load %arg7[%c645, %c0_72] {strides = array<i32: 2, 1>} : memref<784x128xf32, #tpu.memory_space<vmem>>, vector<14x128xf32>
    %104 = arith.maximumf %100, %101 : vector<14x128xf32>
    %105 = arith.maximumf %102, %103 : vector<14x128xf32>
    %106 = arith.maximumf %104, %105 : vector<14x128xf32>
    %c236 = arith.constant 236 : index
    %c0_73 = arith.constant 0 : index
    %107 = vector.load %arg8[%c236, %c0_73] : memref<328x128xf32, #tpu.memory_space<vmem>>, vector<14x128xf32>
    tpu.vector_store %arg8[%c236, %c0_73], %106 {strides = array<i32>} : memref<328x128xf32, #tpu.memory_space<vmem>>, vector<14x128xf32>,
    %c672 = arith.constant 672 : index
    %c0_74 = arith.constant 0 : index
    %108 = tpu.strided_load %arg7[%c672, %c0_74] {strides = array<i32: 2, 1>} : memref<784x128xf32, #tpu.memory_space<vmem>>, vector<14x128xf32>
    %c673 = arith.constant 673 : index
    %c0_75 = arith.constant 0 : index
    %109 = tpu.strided_load %arg7[%c673, %c0_75] {strides = array<i32: 2, 1>} : memref<784x128xf32, #tpu.memory_space<vmem>>, vector<14x128xf32>
    %c700 = arith.constant 700 : index
    %c0_76 = arith.constant 0 : index
    %110 = tpu.strided_load %arg7[%c700, %c0_76] {strides = array<i32: 2, 1>} : memref<784x128xf32, #tpu.memory_space<vmem>>, vector<14x128xf32>
    %c701 = arith.constant 701 : index
    %c0_77 = arith.constant 0 : index
    %111 = tpu.strided_load %arg7[%c701, %c0_77] {strides = array<i32: 2, 1>} : memref<784x128xf32, #tpu.memory_space<vmem>>, vector<14x128xf32>
    %112 = arith.maximumf %108, %109 : vector<14x128xf32>
    %113 = arith.maximumf %110, %111 : vector<14x128xf32>
    %114 = arith.maximumf %112, %113 : vector<14x128xf32>
    %c254 = arith.constant 254 : index
    %c0_78 = arith.constant 0 : index
    %115 = vector.load %arg8[%c254, %c0_78] : memref<328x128xf32, #tpu.memory_space<vmem>>, vector<14x128xf32>
    tpu.vector_store %arg8[%c254, %c0_78], %114 {strides = array<i32>} : memref<328x128xf32, #tpu.memory_space<vmem>>, vector<14x128xf32>,
    %c728 = arith.constant 728 : index
    %c0_79 = arith.constant 0 : index
    %116 = tpu.strided_load %arg7[%c728, %c0_79] {strides = array<i32: 2, 1>} : memref<784x128xf32, #tpu.memory_space<vmem>>, vector<14x128xf32>
    %c729 = arith.constant 729 : index
    %c0_80 = arith.constant 0 : index
    %117 = tpu.strided_load %arg7[%c729, %c0_80] {strides = array<i32: 2, 1>} : memref<784x128xf32, #tpu.memory_space<vmem>>, vector<14x128xf32>
    %c756 = arith.constant 756 : index
    %c0_81 = arith.constant 0 : index
    %118 = tpu.strided_load %arg7[%c756, %c0_81] {strides = array<i32: 2, 1>} : memref<784x128xf32, #tpu.memory_space<vmem>>, vector<14x128xf32>
    %c757 = arith.constant 757 : index
    %c0_82 = arith.constant 0 : index
    %119 = tpu.strided_load %arg7[%c757, %c0_82] {strides = array<i32: 2, 1>} : memref<784x128xf32, #tpu.memory_space<vmem>>, vector<14x128xf32>
    %120 = arith.maximumf %116, %117 : vector<14x128xf32>
    %121 = arith.maximumf %118, %119 : vector<14x128xf32>
    %122 = arith.maximumf %120, %121 : vector<14x128xf32>
    %c272 = arith.constant 272 : index
    %c0_83 = arith.constant 0 : index
    %123 = vector.load %arg8[%c272, %c0_83] : memref<328x128xf32, #tpu.memory_space<vmem>>, vector<14x128xf32>
    tpu.vector_store %arg8[%c272, %c0_83], %122 {strides = array<i32>} : memref<328x128xf32, #tpu.memory_space<vmem>>, vector<14x128xf32>,
    %cst_84 = arith.constant 0.000000e+00 : f32
    %124 = vector.broadcast %cst_84 : f32 to vector<252x128xf32>
    %c0_85 = arith.constant 0 : index
    %c0_86 = arith.constant 0 : index
    %125 = vector.load %arg5[%c0_85, %c0_86] : memref<1x128xf32, #tpu.memory_space<vmem>>, vector<1x128xf32>
    %126 = vector.broadcast %125 : vector<1x128xf32> to vector<252x128xf32>
    %127 = arith.addf %124, %126 : vector<252x128xf32>
    %c0_87 = arith.constant 0 : index
    %c0_88 = arith.constant 0 : index
    %128 = vector.load %arg8[%c0_87, %c0_88] : memref<328x128xf32, #tpu.memory_space<vmem>>, vector<252x128xf32>
    %c0_89 = arith.constant 0 : index
    %c0_90 = arith.constant 0 : index
    %c0_91 = arith.constant 0 : index
    %129 = vector.load %arg4[%c0_89, %c0_90, %c0_91] : memref<25x128x128xf32, #tpu.memory_space<vmem>>, vector<1x128x128xf32>
    %130 = vector.shape_cast %129 : vector<1x128x128xf32> to vector<128x128xf32>
    %cst_92 = arith.constant dense<0.000000e+00> : vector<252x128xf32>
    %131 = tpu.matmul %128, %130, %cst_92 {dimension_numbers = #tpu.dot_dimension_numbers<[1], [0], [0], [1], [0, 0, 1, 1], [], []>} : vector<252x128xf32>, vector<128x128xf32>, vector<252x128xf32> -> vector<252x128xf32>
    %132 = arith.addf %127, %131 : vector<252x128xf32>
    %c1_93 = arith.constant 1 : index
    %c0_94 = arith.constant 0 : index
    %133 = vector.load %arg8[%c1_93, %c0_94] : memref<328x128xf32, #tpu.memory_space<vmem>>, vector<252x128xf32>
    %c1_95 = arith.constant 1 : index
    %c0_96 = arith.constant 0 : index
    %c0_97 = arith.constant 0 : index
    %134 = vector.load %arg4[%c1_95, %c0_96, %c0_97] : memref<25x128x128xf32, #tpu.memory_space<vmem>>, vector<1x128x128xf32>
    %135 = vector.shape_cast %134 : vector<1x128x128xf32> to vector<128x128xf32>
    %cst_98 = arith.constant dense<0.000000e+00> : vector<252x128xf32>
    %136 = tpu.matmul %133, %135, %cst_98 {dimension_numbers = #tpu.dot_dimension_numbers<[1], [0], [0], [1], [0, 0, 1, 1], [], []>} : vector<252x128xf32>, vector<128x128xf32>, vector<252x128xf32> -> vector<252x128xf32>
    %137 = arith.addf %132, %136 : vector<252x128xf32>
    %c2 = arith.constant 2 : index
    %c0_99 = arith.constant 0 : index
    %138 = vector.load %arg8[%c2, %c0_99] : memref<328x128xf32, #tpu.memory_space<vmem>>, vector<252x128xf32>
    %c2_100 = arith.constant 2 : index
    %c0_101 = arith.constant 0 : index
    %c0_102 = arith.constant 0 : index
    %139 = vector.load %arg4[%c2_100, %c0_101, %c0_102] : memref<25x128x128xf32, #tpu.memory_space<vmem>>, vector<1x128x128xf32>
    %140 = vector.shape_cast %139 : vector<1x128x128xf32> to vector<128x128xf32>
    %cst_103 = arith.constant dense<0.000000e+00> : vector<252x128xf32>
    %141 = tpu.matmul %138, %140, %cst_103 {dimension_numbers = #tpu.dot_dimension_numbers<[1], [0], [0], [1], [0, 0, 1, 1], [], []>} : vector<252x128xf32>, vector<128x128xf32>, vector<252x128xf32> -> vector<252x128xf32>
    %142 = arith.addf %137, %141 : vector<252x128xf32>
    %c3 = arith.constant 3 : index
    %c0_104 = arith.constant 0 : index
    %143 = vector.load %arg8[%c3, %c0_104] : memref<328x128xf32, #tpu.memory_space<vmem>>, vector<252x128xf32>
    %c3_105 = arith.constant 3 : index
    %c0_106 = arith.constant 0 : index
    %c0_107 = arith.constant 0 : index
    %144 = vector.load %arg4[%c3_105, %c0_106, %c0_107] : memref<25x128x128xf32, #tpu.memory_space<vmem>>, vector<1x128x128xf32>
    %145 = vector.shape_cast %144 : vector<1x128x128xf32> to vector<128x128xf32>
    %cst_108 = arith.constant dense<0.000000e+00> : vector<252x128xf32>
    %146 = tpu.matmul %143, %145, %cst_108 {dimension_numbers = #tpu.dot_dimension_numbers<[1], [0], [0], [1], [0, 0, 1, 1], [], []>} : vector<252x128xf32>, vector<128x128xf32>, vector<252x128xf32> -> vector<252x128xf32>
    %147 = arith.addf %142, %146 : vector<252x128xf32>
    %c4 = arith.constant 4 : index
    %c0_109 = arith.constant 0 : index
    %148 = vector.load %arg8[%c4, %c0_109] : memref<328x128xf32, #tpu.memory_space<vmem>>, vector<252x128xf32>
    %c4_110 = arith.constant 4 : index
    %c0_111 = arith.constant 0 : index
    %c0_112 = arith.constant 0 : index
    %149 = vector.load %arg4[%c4_110, %c0_111, %c0_112] : memref<25x128x128xf32, #tpu.memory_space<vmem>>, vector<1x128x128xf32>
    %150 = vector.shape_cast %149 : vector<1x128x128xf32> to vector<128x128xf32>
    %cst_113 = arith.constant dense<0.000000e+00> : vector<252x128xf32>
    %151 = tpu.matmul %148, %150, %cst_113 {dimension_numbers = #tpu.dot_dimension_numbers<[1], [0], [0], [1], [0, 0, 1, 1], [], []>} : vector<252x128xf32>, vector<128x128xf32>, vector<252x128xf32> -> vector<252x128xf32>
    %152 = arith.addf %147, %151 : vector<252x128xf32>
    %c18 = arith.constant 18 : index
    %c0_114 = arith.constant 0 : index
    %153 = vector.load %arg8[%c18, %c0_114] : memref<328x128xf32, #tpu.memory_space<vmem>>, vector<252x128xf32>
    %c5 = arith.constant 5 : index
    %c0_115 = arith.constant 0 : index
    %c0_116 = arith.constant 0 : index
    %154 = vector.load %arg4[%c5, %c0_115, %c0_116] : memref<25x128x128xf32, #tpu.memory_space<vmem>>, vector<1x128x128xf32>
    %155 = vector.shape_cast %154 : vector<1x128x128xf32> to vector<128x128xf32>
    %cst_117 = arith.constant dense<0.000000e+00> : vector<252x128xf32>
    %156 = tpu.matmul %153, %155, %cst_117 {dimension_numbers = #tpu.dot_dimension_numbers<[1], [0], [0], [1], [0, 0, 1, 1], [], []>} : vector<252x128xf32>, vector<128x128xf32>, vector<252x128xf32> -> vector<252x128xf32>
    %157 = arith.addf %152, %156 : vector<252x128xf32>
    %c19 = arith.constant 19 : index
    %c0_118 = arith.constant 0 : index
    %158 = vector.load %arg8[%c19, %c0_118] : memref<328x128xf32, #tpu.memory_space<vmem>>, vector<252x128xf32>
    %c6 = arith.constant 6 : index
    %c0_119 = arith.constant 0 : index
    %c0_120 = arith.constant 0 : index
    %159 = vector.load %arg4[%c6, %c0_119, %c0_120] : memref<25x128x128xf32, #tpu.memory_space<vmem>>, vector<1x128x128xf32>
    %160 = vector.shape_cast %159 : vector<1x128x128xf32> to vector<128x128xf32>
    %cst_121 = arith.constant dense<0.000000e+00> : vector<252x128xf32>
    %161 = tpu.matmul %158, %160, %cst_121 {dimension_numbers = #tpu.dot_dimension_numbers<[1], [0], [0], [1], [0, 0, 1, 1], [], []>} : vector<252x128xf32>, vector<128x128xf32>, vector<252x128xf32> -> vector<252x128xf32>
    %162 = arith.addf %157, %161 : vector<252x128xf32>
    %c20 = arith.constant 20 : index
    %c0_122 = arith.constant 0 : index
    %163 = vector.load %arg8[%c20, %c0_122] : memref<328x128xf32, #tpu.memory_space<vmem>>, vector<252x128xf32>
    %c7 = arith.constant 7 : index
    %c0_123 = arith.constant 0 : index
    %c0_124 = arith.constant 0 : index
    %164 = vector.load %arg4[%c7, %c0_123, %c0_124] : memref<25x128x128xf32, #tpu.memory_space<vmem>>, vector<1x128x128xf32>
    %165 = vector.shape_cast %164 : vector<1x128x128xf32> to vector<128x128xf32>
    %cst_125 = arith.constant dense<0.000000e+00> : vector<252x128xf32>
    %166 = tpu.matmul %163, %165, %cst_125 {dimension_numbers = #tpu.dot_dimension_numbers<[1], [0], [0], [1], [0, 0, 1, 1], [], []>} : vector<252x128xf32>, vector<128x128xf32>, vector<252x128xf32> -> vector<252x128xf32>
    %167 = arith.addf %162, %166 : vector<252x128xf32>
    %c21 = arith.constant 21 : index
    %c0_126 = arith.constant 0 : index
    %168 = vector.load %arg8[%c21, %c0_126] : memref<328x128xf32, #tpu.memory_space<vmem>>, vector<252x128xf32>
    %c8 = arith.constant 8 : index
    %c0_127 = arith.constant 0 : index
    %c0_128 = arith.constant 0 : index
    %169 = vector.load %arg4[%c8, %c0_127, %c0_128] : memref<25x128x128xf32, #tpu.memory_space<vmem>>, vector<1x128x128xf32>
    %170 = vector.shape_cast %169 : vector<1x128x128xf32> to vector<128x128xf32>
    %cst_129 = arith.constant dense<0.000000e+00> : vector<252x128xf32>
    %171 = tpu.matmul %168, %170, %cst_129 {dimension_numbers = #tpu.dot_dimension_numbers<[1], [0], [0], [1], [0, 0, 1, 1], [], []>} : vector<252x128xf32>, vector<128x128xf32>, vector<252x128xf32> -> vector<252x128xf32>
    %172 = arith.addf %167, %171 : vector<252x128xf32>
    %c22 = arith.constant 22 : index
    %c0_130 = arith.constant 0 : index
    %173 = vector.load %arg8[%c22, %c0_130] : memref<328x128xf32, #tpu.memory_space<vmem>>, vector<252x128xf32>
    %c9 = arith.constant 9 : index
    %c0_131 = arith.constant 0 : index
    %c0_132 = arith.constant 0 : index
    %174 = vector.load %arg4[%c9, %c0_131, %c0_132] : memref<25x128x128xf32, #tpu.memory_space<vmem>>, vector<1x128x128xf32>
    %175 = vector.shape_cast %174 : vector<1x128x128xf32> to vector<128x128xf32>
    %cst_133 = arith.constant dense<0.000000e+00> : vector<252x128xf32>
    %176 = tpu.matmul %173, %175, %cst_133 {dimension_numbers = #tpu.dot_dimension_numbers<[1], [0], [0], [1], [0, 0, 1, 1], [], []>} : vector<252x128xf32>, vector<128x128xf32>, vector<252x128xf32> -> vector<252x128xf32>
    %177 = arith.addf %172, %176 : vector<252x128xf32>
    %c36 = arith.constant 36 : index
    %c0_134 = arith.constant 0 : index
    %178 = vector.load %arg8[%c36, %c0_134] : memref<328x128xf32, #tpu.memory_space<vmem>>, vector<252x128xf32>
    %c10 = arith.constant 10 : index
    %c0_135 = arith.constant 0 : index
    %c0_136 = arith.constant 0 : index
    %179 = vector.load %arg4[%c10, %c0_135, %c0_136] : memref<25x128x128xf32, #tpu.memory_space<vmem>>, vector<1x128x128xf32>
    %180 = vector.shape_cast %179 : vector<1x128x128xf32> to vector<128x128xf32>
    %cst_137 = arith.constant dense<0.000000e+00> : vector<252x128xf32>
    %181 = tpu.matmul %178, %180, %cst_137 {dimension_numbers = #tpu.dot_dimension_numbers<[1], [0], [0], [1], [0, 0, 1, 1], [], []>} : vector<252x128xf32>, vector<128x128xf32>, vector<252x128xf32> -> vector<252x128xf32>
    %182 = arith.addf %177, %181 : vector<252x128xf32>
    %c37 = arith.constant 37 : index
    %c0_138 = arith.constant 0 : index
    %183 = vector.load %arg8[%c37, %c0_138] : memref<328x128xf32, #tpu.memory_space<vmem>>, vector<252x128xf32>
    %c11 = arith.constant 11 : index
    %c0_139 = arith.constant 0 : index
    %c0_140 = arith.constant 0 : index
    %184 = vector.load %arg4[%c11, %c0_139, %c0_140] : memref<25x128x128xf32, #tpu.memory_space<vmem>>, vector<1x128x128xf32>
    %185 = vector.shape_cast %184 : vector<1x128x128xf32> to vector<128x128xf32>
    %cst_141 = arith.constant dense<0.000000e+00> : vector<252x128xf32>
    %186 = tpu.matmul %183, %185, %cst_141 {dimension_numbers = #tpu.dot_dimension_numbers<[1], [0], [0], [1], [0, 0, 1, 1], [], []>} : vector<252x128xf32>, vector<128x128xf32>, vector<252x128xf32> -> vector<252x128xf32>
    %187 = arith.addf %182, %186 : vector<252x128xf32>
    %c38_142 = arith.constant 38 : index
    %c0_143 = arith.constant 0 : index
    %188 = vector.load %arg8[%c38_142, %c0_143] : memref<328x128xf32, #tpu.memory_space<vmem>>, vector<252x128xf32>
    %c12 = arith.constant 12 : index
    %c0_144 = arith.constant 0 : index
    %c0_145 = arith.constant 0 : index
    %189 = vector.load %arg4[%c12, %c0_144, %c0_145] : memref<25x128x128xf32, #tpu.memory_space<vmem>>, vector<1x128x128xf32>
    %190 = vector.shape_cast %189 : vector<1x128x128xf32> to vector<128x128xf32>
    %cst_146 = arith.constant dense<0.000000e+00> : vector<252x128xf32>
    %191 = tpu.matmul %188, %190, %cst_146 {dimension_numbers = #tpu.dot_dimension_numbers<[1], [0], [0], [1], [0, 0, 1, 1], [], []>} : vector<252x128xf32>, vector<128x128xf32>, vector<252x128xf32> -> vector<252x128xf32>
    %192 = arith.addf %187, %191 : vector<252x128xf32>
    %c39 = arith.constant 39 : index
    %c0_147 = arith.constant 0 : index
    %193 = vector.load %arg8[%c39, %c0_147] : memref<328x128xf32, #tpu.memory_space<vmem>>, vector<252x128xf32>
    %c13 = arith.constant 13 : index
    %c0_148 = arith.constant 0 : index
    %c0_149 = arith.constant 0 : index
    %194 = vector.load %arg4[%c13, %c0_148, %c0_149] : memref<25x128x128xf32, #tpu.memory_space<vmem>>, vector<1x128x128xf32>
    %195 = vector.shape_cast %194 : vector<1x128x128xf32> to vector<128x128xf32>
    %cst_150 = arith.constant dense<0.000000e+00> : vector<252x128xf32>
    %196 = tpu.matmul %193, %195, %cst_150 {dimension_numbers = #tpu.dot_dimension_numbers<[1], [0], [0], [1], [0, 0, 1, 1], [], []>} : vector<252x128xf32>, vector<128x128xf32>, vector<252x128xf32> -> vector<252x128xf32>
    %197 = arith.addf %192, %196 : vector<252x128xf32>
    %c40 = arith.constant 40 : index
    %c0_151 = arith.constant 0 : index
    %198 = vector.load %arg8[%c40, %c0_151] : memref<328x128xf32, #tpu.memory_space<vmem>>, vector<252x128xf32>
    %c14 = arith.constant 14 : index
    %c0_152 = arith.constant 0 : index
    %c0_153 = arith.constant 0 : index
    %199 = vector.load %arg4[%c14, %c0_152, %c0_153] : memref<25x128x128xf32, #tpu.memory_space<vmem>>, vector<1x128x128xf32>
    %200 = vector.shape_cast %199 : vector<1x128x128xf32> to vector<128x128xf32>
    %cst_154 = arith.constant dense<0.000000e+00> : vector<252x128xf32>
    %201 = tpu.matmul %198, %200, %cst_154 {dimension_numbers = #tpu.dot_dimension_numbers<[1], [0], [0], [1], [0, 0, 1, 1], [], []>} : vector<252x128xf32>, vector<128x128xf32>, vector<252x128xf32> -> vector<252x128xf32>
    %202 = arith.addf %197, %201 : vector<252x128xf32>
    %c54 = arith.constant 54 : index
    %c0_155 = arith.constant 0 : index
    %203 = vector.load %arg8[%c54, %c0_155] : memref<328x128xf32, #tpu.memory_space<vmem>>, vector<252x128xf32>
    %c15 = arith.constant 15 : index
    %c0_156 = arith.constant 0 : index
    %c0_157 = arith.constant 0 : index
    %204 = vector.load %arg4[%c15, %c0_156, %c0_157] : memref<25x128x128xf32, #tpu.memory_space<vmem>>, vector<1x128x128xf32>
    %205 = vector.shape_cast %204 : vector<1x128x128xf32> to vector<128x128xf32>
    %cst_158 = arith.constant dense<0.000000e+00> : vector<252x128xf32>
    %206 = tpu.matmul %203, %205, %cst_158 {dimension_numbers = #tpu.dot_dimension_numbers<[1], [0], [0], [1], [0, 0, 1, 1], [], []>} : vector<252x128xf32>, vector<128x128xf32>, vector<252x128xf32> -> vector<252x128xf32>
    %207 = arith.addf %202, %206 : vector<252x128xf32>
    %c55 = arith.constant 55 : index
    %c0_159 = arith.constant 0 : index
    %208 = vector.load %arg8[%c55, %c0_159] : memref<328x128xf32, #tpu.memory_space<vmem>>, vector<252x128xf32>
    %c16 = arith.constant 16 : index
    %c0_160 = arith.constant 0 : index
    %c0_161 = arith.constant 0 : index
    %209 = vector.load %arg4[%c16, %c0_160, %c0_161] : memref<25x128x128xf32, #tpu.memory_space<vmem>>, vector<1x128x128xf32>
    %210 = vector.shape_cast %209 : vector<1x128x128xf32> to vector<128x128xf32>
    %cst_162 = arith.constant dense<0.000000e+00> : vector<252x128xf32>
    %211 = tpu.matmul %208, %210, %cst_162 {dimension_numbers = #tpu.dot_dimension_numbers<[1], [0], [0], [1], [0, 0, 1, 1], [], []>} : vector<252x128xf32>, vector<128x128xf32>, vector<252x128xf32> -> vector<252x128xf32>
    %212 = arith.addf %207, %211 : vector<252x128xf32>
    %c56_163 = arith.constant 56 : index
    %c0_164 = arith.constant 0 : index
    %213 = vector.load %arg8[%c56_163, %c0_164] : memref<328x128xf32, #tpu.memory_space<vmem>>, vector<252x128xf32>
    %c17 = arith.constant 17 : index
    %c0_165 = arith.constant 0 : index
    %c0_166 = arith.constant 0 : index
    %214 = vector.load %arg4[%c17, %c0_165, %c0_166] : memref<25x128x128xf32, #tpu.memory_space<vmem>>, vector<1x128x128xf32>
    %215 = vector.shape_cast %214 : vector<1x128x128xf32> to vector<128x128xf32>
    %cst_167 = arith.constant dense<0.000000e+00> : vector<252x128xf32>
    %216 = tpu.matmul %213, %215, %cst_167 {dimension_numbers = #tpu.dot_dimension_numbers<[1], [0], [0], [1], [0, 0, 1, 1], [], []>} : vector<252x128xf32>, vector<128x128xf32>, vector<252x128xf32> -> vector<252x128xf32>
    %217 = arith.addf %212, %216 : vector<252x128xf32>
    %c57_168 = arith.constant 57 : index
    %c0_169 = arith.constant 0 : index
    %218 = vector.load %arg8[%c57_168, %c0_169] : memref<328x128xf32, #tpu.memory_space<vmem>>, vector<252x128xf32>
    %c18_170 = arith.constant 18 : index
    %c0_171 = arith.constant 0 : index
    %c0_172 = arith.constant 0 : index
    %219 = vector.load %arg4[%c18_170, %c0_171, %c0_172] : memref<25x128x128xf32, #tpu.memory_space<vmem>>, vector<1x128x128xf32>
    %220 = vector.shape_cast %219 : vector<1x128x128xf32> to vector<128x128xf32>
    %cst_173 = arith.constant dense<0.000000e+00> : vector<252x128xf32>
    %221 = tpu.matmul %218, %220, %cst_173 {dimension_numbers = #tpu.dot_dimension_numbers<[1], [0], [0], [1], [0, 0, 1, 1], [], []>} : vector<252x128xf32>, vector<128x128xf32>, vector<252x128xf32> -> vector<252x128xf32>
    %222 = arith.addf %217, %221 : vector<252x128xf32>
    %c58 = arith.constant 58 : index
    %c0_174 = arith.constant 0 : index
    %223 = vector.load %arg8[%c58, %c0_174] : memref<328x128xf32, #tpu.memory_space<vmem>>, vector<252x128xf32>
    %c19_175 = arith.constant 19 : index
    %c0_176 = arith.constant 0 : index
    %c0_177 = arith.constant 0 : index
    %224 = vector.load %arg4[%c19_175, %c0_176, %c0_177] : memref<25x128x128xf32, #tpu.memory_space<vmem>>, vector<1x128x128xf32>
    %225 = vector.shape_cast %224 : vector<1x128x128xf32> to vector<128x128xf32>
    %cst_178 = arith.constant dense<0.000000e+00> : vector<252x128xf32>
    %226 = tpu.matmul %223, %225, %cst_178 {dimension_numbers = #tpu.dot_dimension_numbers<[1], [0], [0], [1], [0, 0, 1, 1], [], []>} : vector<252x128xf32>, vector<128x128xf32>, vector<252x128xf32> -> vector<252x128xf32>
    %227 = arith.addf %222, %226 : vector<252x128xf32>
    %c72 = arith.constant 72 : index
    %c0_179 = arith.constant 0 : index
    %228 = vector.load %arg8[%c72, %c0_179] : memref<328x128xf32, #tpu.memory_space<vmem>>, vector<252x128xf32>
    %c20_180 = arith.constant 20 : index
    %c0_181 = arith.constant 0 : index
    %c0_182 = arith.constant 0 : index
    %229 = vector.load %arg4[%c20_180, %c0_181, %c0_182] : memref<25x128x128xf32, #tpu.memory_space<vmem>>, vector<1x128x128xf32>
    %230 = vector.shape_cast %229 : vector<1x128x128xf32> to vector<128x128xf32>
    %cst_183 = arith.constant dense<0.000000e+00> : vector<252x128xf32>
    %231 = tpu.matmul %228, %230, %cst_183 {dimension_numbers = #tpu.dot_dimension_numbers<[1], [0], [0], [1], [0, 0, 1, 1], [], []>} : vector<252x128xf32>, vector<128x128xf32>, vector<252x128xf32> -> vector<252x128xf32>
    %232 = arith.addf %227, %231 : vector<252x128xf32>
    %c73 = arith.constant 73 : index
    %c0_184 = arith.constant 0 : index
    %233 = vector.load %arg8[%c73, %c0_184] : memref<328x128xf32, #tpu.memory_space<vmem>>, vector<252x128xf32>
    %c21_185 = arith.constant 21 : index
    %c0_186 = arith.constant 0 : index
    %c0_187 = arith.constant 0 : index
    %234 = vector.load %arg4[%c21_185, %c0_186, %c0_187] : memref<25x128x128xf32, #tpu.memory_space<vmem>>, vector<1x128x128xf32>
    %235 = vector.shape_cast %234 : vector<1x128x128xf32> to vector<128x128xf32>
    %cst_188 = arith.constant dense<0.000000e+00> : vector<252x128xf32>
    %236 = tpu.matmul %233, %235, %cst_188 {dimension_numbers = #tpu.dot_dimension_numbers<[1], [0], [0], [1], [0, 0, 1, 1], [], []>} : vector<252x128xf32>, vector<128x128xf32>, vector<252x128xf32> -> vector<252x128xf32>
    %237 = arith.addf %232, %236 : vector<252x128xf32>
    %c74_189 = arith.constant 74 : index
    %c0_190 = arith.constant 0 : index
    %238 = vector.load %arg8[%c74_189, %c0_190] : memref<328x128xf32, #tpu.memory_space<vmem>>, vector<252x128xf32>
    %c22_191 = arith.constant 22 : index
    %c0_192 = arith.constant 0 : index
    %c0_193 = arith.constant 0 : index
    %239 = vector.load %arg4[%c22_191, %c0_192, %c0_193] : memref<25x128x128xf32, #tpu.memory_space<vmem>>, vector<1x128x128xf32>
    %240 = vector.shape_cast %239 : vector<1x128x128xf32> to vector<128x128xf32>
    %cst_194 = arith.constant dense<0.000000e+00> : vector<252x128xf32>
    %241 = tpu.matmul %238, %240, %cst_194 {dimension_numbers = #tpu.dot_dimension_numbers<[1], [0], [0], [1], [0, 0, 1, 1], [], []>} : vector<252x128xf32>, vector<128x128xf32>, vector<252x128xf32> -> vector<252x128xf32>
    %242 = arith.addf %237, %241 : vector<252x128xf32>
    %c75 = arith.constant 75 : index
    %c0_195 = arith.constant 0 : index
    %243 = vector.load %arg8[%c75, %c0_195] : memref<328x128xf32, #tpu.memory_space<vmem>>, vector<252x128xf32>
    %c23 = arith.constant 23 : index
    %c0_196 = arith.constant 0 : index
    %c0_197 = arith.constant 0 : index
    %244 = vector.load %arg4[%c23, %c0_196, %c0_197] : memref<25x128x128xf32, #tpu.memory_space<vmem>>, vector<1x128x128xf32>
    %245 = vector.shape_cast %244 : vector<1x128x128xf32> to vector<128x128xf32>
    %cst_198 = arith.constant dense<0.000000e+00> : vector<252x128xf32>
    %246 = tpu.matmul %243, %245, %cst_198 {dimension_numbers = #tpu.dot_dimension_numbers<[1], [0], [0], [1], [0, 0, 1, 1], [], []>} : vector<252x128xf32>, vector<128x128xf32>, vector<252x128xf32> -> vector<252x128xf32>
    %247 = arith.addf %242, %246 : vector<252x128xf32>
    %c76 = arith.constant 76 : index
    %c0_199 = arith.constant 0 : index
    %248 = vector.load %arg8[%c76, %c0_199] : memref<328x128xf32, #tpu.memory_space<vmem>>, vector<252x128xf32>
    %c24 = arith.constant 24 : index
    %c0_200 = arith.constant 0 : index
    %c0_201 = arith.constant 0 : index
    %249 = vector.load %arg4[%c24, %c0_200, %c0_201] : memref<25x128x128xf32, #tpu.memory_space<vmem>>, vector<1x128x128xf32>
    %250 = vector.shape_cast %249 : vector<1x128x128xf32> to vector<128x128xf32>
    %cst_202 = arith.constant dense<0.000000e+00> : vector<252x128xf32>
    %251 = tpu.matmul %248, %250, %cst_202 {dimension_numbers = #tpu.dot_dimension_numbers<[1], [0], [0], [1], [0, 0, 1, 1], [], []>} : vector<252x128xf32>, vector<128x128xf32>, vector<252x128xf32> -> vector<252x128xf32>
    %252 = arith.addf %247, %251 : vector<252x128xf32>
    %cst_203 = arith.constant 0.000000e+00 : f32
    %253 = vector.broadcast %cst_203 : f32 to vector<252x128xf32>
    %254 = arith.maximumf %252, %253 : vector<252x128xf32>
    %c0_204 = arith.constant 0 : index
    %c0_205 = arith.constant 0 : index
    %255 = vector.load %arg9[%c0_204, %c0_205] : memref<252x128xf32, #tpu.memory_space<vmem>>, vector<252x128xf32>
    tpu.vector_store %arg9[%c0_204, %c0_205], %254 {strides = array<i32>} : memref<252x128xf32, #tpu.memory_space<vmem>>, vector<252x128xf32>,
    %c0_206 = arith.constant 0 : index
    %c0_207 = arith.constant 0 : index
    %256 = tpu.strided_load %arg9[%c0_206, %c0_207] {strides = array<i32: 2, 1>} : memref<252x128xf32, #tpu.memory_space<vmem>>, vector<7x128xf32>
    %c1_208 = arith.constant 1 : index
    %c0_209 = arith.constant 0 : index
    %257 = tpu.strided_load %arg9[%c1_208, %c0_209] {strides = array<i32: 2, 1>} : memref<252x128xf32, #tpu.memory_space<vmem>>, vector<7x128xf32>
    %c18_210 = arith.constant 18 : index
    %c0_211 = arith.constant 0 : index
    %258 = tpu.strided_load %arg9[%c18_210, %c0_211] {strides = array<i32: 2, 1>} : memref<252x128xf32, #tpu.memory_space<vmem>>, vector<7x128xf32>
    %c19_212 = arith.constant 19 : index
    %c0_213 = arith.constant 0 : index
    %259 = tpu.strided_load %arg9[%c19_212, %c0_213] {strides = array<i32: 2, 1>} : memref<252x128xf32, #tpu.memory_space<vmem>>, vector<7x128xf32>
    %260 = arith.maximumf %256, %257 : vector<7x128xf32>
    %261 = arith.maximumf %258, %259 : vector<7x128xf32>
    %262 = arith.maximumf %260, %261 : vector<7x128xf32>
    %c0_214 = arith.constant 0 : index
    %c0_215 = arith.constant 0 : index
    %c0_216 = arith.constant 0 : index
    %263 = vector.load %arg6[%c0_214, %c0_215, %c0_216] : memref<1x49x128xf32, #tpu.memory_space<vmem>>, vector<1x7x128xf32>
    %264 = vector.shape_cast %263 : vector<1x7x128xf32> to vector<7x128xf32>
    %265 = vector.shape_cast %262 : vector<7x128xf32> to vector<1x7x128xf32>
    tpu.vector_store %arg6[%c0_214, %c0_215, %c0_216], %265 {strides = array<i32>} : memref<1x49x128xf32, #tpu.memory_space<vmem>>, vector<1x7x128xf32>,
    %c36_217 = arith.constant 36 : index
    %c0_218 = arith.constant 0 : index
    %266 = tpu.strided_load %arg9[%c36_217, %c0_218] {strides = array<i32: 2, 1>} : memref<252x128xf32, #tpu.memory_space<vmem>>, vector<7x128xf32>
    %c37_219 = arith.constant 37 : index
    %c0_220 = arith.constant 0 : index
    %267 = tpu.strided_load %arg9[%c37_219, %c0_220] {strides = array<i32: 2, 1>} : memref<252x128xf32, #tpu.memory_space<vmem>>, vector<7x128xf32>
    %c54_221 = arith.constant 54 : index
    %c0_222 = arith.constant 0 : index
    %268 = tpu.strided_load %arg9[%c54_221, %c0_222] {strides = array<i32: 2, 1>} : memref<252x128xf32, #tpu.memory_space<vmem>>, vector<7x128xf32>
    %c55_223 = arith.constant 55 : index
    %c0_224 = arith.constant 0 : index
    %269 = tpu.strided_load %arg9[%c55_223, %c0_224] {strides = array<i32: 2, 1>} : memref<252x128xf32, #tpu.memory_space<vmem>>, vector<7x128xf32>
    %270 = arith.maximumf %266, %267 : vector<7x128xf32>
    %271 = arith.maximumf %268, %269 : vector<7x128xf32>
    %272 = arith.maximumf %270, %271 : vector<7x128xf32>
    %c0_225 = arith.constant 0 : index
    %c7_226 = arith.constant 7 : index
    %c0_227 = arith.constant 0 : index
    %273 = vector.load %arg6[%c0_225, %c7_226, %c0_227] : memref<1x49x128xf32, #tpu.memory_space<vmem>>, vector<1x7x128xf32>
    %274 = vector.shape_cast %273 : vector<1x7x128xf32> to vector<7x128xf32>
    %275 = vector.shape_cast %272 : vector<7x128xf32> to vector<1x7x128xf32>
    tpu.vector_store %arg6[%c0_225, %c7_226, %c0_227], %275 {strides = array<i32>} : memref<1x49x128xf32, #tpu.memory_space<vmem>>, vector<1x7x128xf32>,
    %c72_228 = arith.constant 72 : index
    %c0_229 = arith.constant 0 : index
    %276 = tpu.strided_load %arg9[%c72_228, %c0_229] {strides = array<i32: 2, 1>} : memref<252x128xf32, #tpu.memory_space<vmem>>, vector<7x128xf32>
    %c73_230 = arith.constant 73 : index
    %c0_231 = arith.constant 0 : index
    %277 = tpu.strided_load %arg9[%c73_230, %c0_231] {strides = array<i32: 2, 1>} : memref<252x128xf32, #tpu.memory_space<vmem>>, vector<7x128xf32>
    %c90 = arith.constant 90 : index
    %c0_232 = arith.constant 0 : index
    %278 = tpu.strided_load %arg9[%c90, %c0_232] {strides = array<i32: 2, 1>} : memref<252x128xf32, #tpu.memory_space<vmem>>, vector<7x128xf32>
    %c91 = arith.constant 91 : index
    %c0_233 = arith.constant 0 : index
    %279 = tpu.strided_load %arg9[%c91, %c0_233] {strides = array<i32: 2, 1>} : memref<252x128xf32, #tpu.memory_space<vmem>>, vector<7x128xf32>
    %280 = arith.maximumf %276, %277 : vector<7x128xf32>
    %281 = arith.maximumf %278, %279 : vector<7x128xf32>
    %282 = arith.maximumf %280, %281 : vector<7x128xf32>
    %c0_234 = arith.constant 0 : index
    %c14_235 = arith.constant 14 : index
    %c0_236 = arith.constant 0 : index
    %283 = vector.load %arg6[%c0_234, %c14_235, %c0_236] : memref<1x49x128xf32, #tpu.memory_space<vmem>>, vector<1x7x128xf32>
    %284 = vector.shape_cast %283 : vector<1x7x128xf32> to vector<7x128xf32>
    %285 = vector.shape_cast %282 : vector<7x128xf32> to vector<1x7x128xf32>
    tpu.vector_store %arg6[%c0_234, %c14_235, %c0_236], %285 {strides = array<i32>} : memref<1x49x128xf32, #tpu.memory_space<vmem>>, vector<1x7x128xf32>,
    %c108 = arith.constant 108 : index
    %c0_237 = arith.constant 0 : index
    %286 = tpu.strided_load %arg9[%c108, %c0_237] {strides = array<i32: 2, 1>} : memref<252x128xf32, #tpu.memory_space<vmem>>, vector<7x128xf32>
    %c109 = arith.constant 109 : index
    %c0_238 = arith.constant 0 : index
    %287 = tpu.strided_load %arg9[%c109, %c0_238] {strides = array<i32: 2, 1>} : memref<252x128xf32, #tpu.memory_space<vmem>>, vector<7x128xf32>
    %c126 = arith.constant 126 : index
    %c0_239 = arith.constant 0 : index
    %288 = tpu.strided_load %arg9[%c126, %c0_239] {strides = array<i32: 2, 1>} : memref<252x128xf32, #tpu.memory_space<vmem>>, vector<7x128xf32>
    %c127 = arith.constant 127 : index
    %c0_240 = arith.constant 0 : index
    %289 = tpu.strided_load %arg9[%c127, %c0_240] {strides = array<i32: 2, 1>} : memref<252x128xf32, #tpu.memory_space<vmem>>, vector<7x128xf32>
    %290 = arith.maximumf %286, %287 : vector<7x128xf32>
    %291 = arith.maximumf %288, %289 : vector<7x128xf32>
    %292 = arith.maximumf %290, %291 : vector<7x128xf32>
    %c0_241 = arith.constant 0 : index
    %c21_242 = arith.constant 21 : index
    %c0_243 = arith.constant 0 : index
    %293 = vector.load %arg6[%c0_241, %c21_242, %c0_243] : memref<1x49x128xf32, #tpu.memory_space<vmem>>, vector<1x7x128xf32>
    %294 = vector.shape_cast %293 : vector<1x7x128xf32> to vector<7x128xf32>
    %295 = vector.shape_cast %292 : vector<7x128xf32> to vector<1x7x128xf32>
    tpu.vector_store %arg6[%c0_241, %c21_242, %c0_243], %295 {strides = array<i32>} : memref<1x49x128xf32, #tpu.memory_space<vmem>>, vector<1x7x128xf32>,
    %c144 = arith.constant 144 : index
    %c0_244 = arith.constant 0 : index
    %296 = tpu.strided_load %arg9[%c144, %c0_244] {strides = array<i32: 2, 1>} : memref<252x128xf32, #tpu.memory_space<vmem>>, vector<7x128xf32>
    %c145 = arith.constant 145 : index
    %c0_245 = arith.constant 0 : index
    %297 = tpu.strided_load %arg9[%c145, %c0_245] {strides = array<i32: 2, 1>} : memref<252x128xf32, #tpu.memory_space<vmem>>, vector<7x128xf32>
    %c162 = arith.constant 162 : index
    %c0_246 = arith.constant 0 : index
    %298 = tpu.strided_load %arg9[%c162, %c0_246] {strides = array<i32: 2, 1>} : memref<252x128xf32, #tpu.memory_space<vmem>>, vector<7x128xf32>
    %c163 = arith.constant 163 : index
    %c0_247 = arith.constant 0 : index
    %299 = tpu.strided_load %arg9[%c163, %c0_247] {strides = array<i32: 2, 1>} : memref<252x128xf32, #tpu.memory_space<vmem>>, vector<7x128xf32>
    %300 = arith.maximumf %296, %297 : vector<7x128xf32>
    %301 = arith.maximumf %298, %299 : vector<7x128xf32>
    %302 = arith.maximumf %300, %301 : vector<7x128xf32>
    %c0_248 = arith.constant 0 : index
    %c28_249 = arith.constant 28 : index
    %c0_250 = arith.constant 0 : index
    %303 = vector.load %arg6[%c0_248, %c28_249, %c0_250] : memref<1x49x128xf32, #tpu.memory_space<vmem>>, vector<1x7x128xf32>
    %304 = vector.shape_cast %303 : vector<1x7x128xf32> to vector<7x128xf32>
    %305 = vector.shape_cast %302 : vector<7x128xf32> to vector<1x7x128xf32>
    tpu.vector_store %arg6[%c0_248, %c28_249, %c0_250], %305 {strides = array<i32>} : memref<1x49x128xf32, #tpu.memory_space<vmem>>, vector<1x7x128xf32>,
    %c180 = arith.constant 180 : index
    %c0_251 = arith.constant 0 : index
    %306 = tpu.strided_load %arg9[%c180, %c0_251] {strides = array<i32: 2, 1>} : memref<252x128xf32, #tpu.memory_space<vmem>>, vector<7x128xf32>
    %c181 = arith.constant 181 : index
    %c0_252 = arith.constant 0 : index
    %307 = tpu.strided_load %arg9[%c181, %c0_252] {strides = array<i32: 2, 1>} : memref<252x128xf32, #tpu.memory_space<vmem>>, vector<7x128xf32>
    %c198 = arith.constant 198 : index
    %c0_253 = arith.constant 0 : index
    %308 = tpu.strided_load %arg9[%c198, %c0_253] {strides = array<i32: 2, 1>} : memref<252x128xf32, #tpu.memory_space<vmem>>, vector<7x128xf32>
    %c199 = arith.constant 199 : index
    %c0_254 = arith.constant 0 : index
    %309 = tpu.strided_load %arg9[%c199, %c0_254] {strides = array<i32: 2, 1>} : memref<252x128xf32, #tpu.memory_space<vmem>>, vector<7x128xf32>
    %310 = arith.maximumf %306, %307 : vector<7x128xf32>
    %311 = arith.maximumf %308, %309 : vector<7x128xf32>
    %312 = arith.maximumf %310, %311 : vector<7x128xf32>
    %c0_255 = arith.constant 0 : index
    %c35 = arith.constant 35 : index
    %c0_256 = arith.constant 0 : index
    %313 = vector.load %arg6[%c0_255, %c35, %c0_256] : memref<1x49x128xf32, #tpu.memory_space<vmem>>, vector<1x7x128xf32>
    %314 = vector.shape_cast %313 : vector<1x7x128xf32> to vector<7x128xf32>
    %315 = vector.shape_cast %312 : vector<7x128xf32> to vector<1x7x128xf32>
    tpu.vector_store %arg6[%c0_255, %c35, %c0_256], %315 {strides = array<i32>} : memref<1x49x128xf32, #tpu.memory_space<vmem>>, vector<1x7x128xf32>,
    %c216 = arith.constant 216 : index
    %c0_257 = arith.constant 0 : index
    %316 = tpu.strided_load %arg9[%c216, %c0_257] {strides = array<i32: 2, 1>} : memref<252x128xf32, #tpu.memory_space<vmem>>, vector<7x128xf32>
    %c217 = arith.constant 217 : index
    %c0_258 = arith.constant 0 : index
    %317 = tpu.strided_load %arg9[%c217, %c0_258] {strides = array<i32: 2, 1>} : memref<252x128xf32, #tpu.memory_space<vmem>>, vector<7x128xf32>
    %c234 = arith.constant 234 : index
    %c0_259 = arith.constant 0 : index
    %318 = tpu.strided_load %arg9[%c234, %c0_259] {strides = array<i32: 2, 1>} : memref<252x128xf32, #tpu.memory_space<vmem>>, vector<7x128xf32>
    %c235 = arith.constant 235 : index
    %c0_260 = arith.constant 0 : index
    %319 = tpu.strided_load %arg9[%c235, %c0_260] {strides = array<i32: 2, 1>} : memref<252x128xf32, #tpu.memory_space<vmem>>, vector<7x128xf32>
    %320 = arith.maximumf %316, %317 : vector<7x128xf32>
    %321 = arith.maximumf %318, %319 : vector<7x128xf32>
    %322 = arith.maximumf %320, %321 : vector<7x128xf32>
    %c0_261 = arith.constant 0 : index
    %c42 = arith.constant 42 : index
    %c0_262 = arith.constant 0 : index
    %323 = vector.load %arg6[%c0_261, %c42, %c0_262] : memref<1x49x128xf32, #tpu.memory_space<vmem>>, vector<1x7x128xf32>
    %324 = vector.shape_cast %323 : vector<1x7x128xf32> to vector<7x128xf32>
    %325 = vector.shape_cast %322 : vector<7x128xf32> to vector<1x7x128xf32>
    tpu.vector_store %arg6[%c0_261, %c42, %c0_262], %325 {strides = array<i32>} : memref<1x49x128xf32, #tpu.memory_space<vmem>>, vector<1x7x128xf32>,
    return
  }
  func.func @transform_0(%arg0: i32) -> (i32, i32, i32) {
    %c0_i32 = arith.constant 0 : i32
    %c0_i32_0 = arith.constant 0 : i32
    %c0_i32_1 = arith.constant 0 : i32
    return %arg0, %c0_i32, %c0_i32_0 : i32, i32, i32
  }
  func.func @transform_1(%arg0: i32) -> (i32, i32) {
    %c0_i32 = arith.constant 0 : i32
    %c0_i32_0 = arith.constant 0 : i32
    %c0_i32_1 = arith.constant 0 : i32
    return %c0_i32, %c0_i32_0 : i32, i32
  }
  func.func @transform_2(%arg0: i32) -> (i32, i32) {
    %c0_i32 = arith.constant 0 : i32
    %c0_i32_0 = arith.constant 0 : i32
    %c0_i32_1 = arith.constant 0 : i32
    return %c0_i32, %c0_i32_0 : i32, i32
  }
  func.func @transform_3(%arg0: i32) -> (i32, i32, i32) {
    %c0_i32 = arith.constant 0 : i32
    %c0_i32_0 = arith.constant 0 : i32
    %c0_i32_1 = arith.constant 0 : i32
    %c0_i32_2 = arith.constant 0 : i32
    return %c0_i32, %c0_i32_0, %c0_i32_1 : i32, i32, i32
  }
  func.func @transform_4(%arg0: i32) -> (i32, i32) {
    %c0_i32 = arith.constant 0 : i32
    %c0_i32_0 = arith.constant 0 : i32
    %c0_i32_1 = arith.constant 0 : i32
    return %c0_i32, %c0_i32_0 : i32, i32
  }
  func.func @transform_5(%arg0: i32) -> (i32, i32, i32) {
    %c0_i32 = arith.constant 0 : i32
    %c0_i32_0 = arith.constant 0 : i32
    %c0_i32_1 = arith.constant 0 : i32
    return %arg0, %c0_i32, %c0_i32_0 : i32, i32, i32
  }
}

</mosaic_0001>

<bundles_post_ra>
// kernel: my_cnn_forward.3
= control target key start
LH: loop header
LB: loop body
LE: loop exit
PB: predicated region body
PF: predicated region fallthrough
CT: control target
= control target key end

     0   :  { %v780_v30 = vmov 1983009808   ;;  %v159_v32 = vlaneseq  ;;  %s1296_s0 = inlined_call_operand.vmem [shape: f32[2,980], index: 0, kind: input, shape index: {}]   ;;  %s1297_s1 = inlined_call_operand.vmem [shape: f32[980,128], index: 1, kind: input, shape index: {}]   ;;  %s1298_s2 = inlined_call_operand.vmem [shape: f32[1,128], index: 2, kind: input, shape index: {}]   ;;  %s1299_s3 = inlined_call_operand.vmem [shape: f32[128,128], index: 3, kind: input, shape index: {}]   ;;  %s1300_s4 = inlined_call_operand.vmem [shape: f32[1,128], index: 4, kind: input, shape index: {}]   ;;  %s1301_s5 = inlined_call_operand.hbm [shape: f32[2,128], index: 5, kind: output, shape index: {}]  }
   0x1   :  { %v54_v0 = vld [vmem:[%s1297_s1 + $0xf8] sm:$0xff]  ;;  %v53_v4 = vld [vmem:[%s1297_s1 + $0xf0] sm:$0xff]  ;;  %v52_v8 = vld [vmem:[%s1297_s1 + $0xe8] sm:$0xff]  ;;  %v157_v31 = vunpack.c.l.s4 %v780_v30 }
   0x2   :  { %v86_v1 = vld [vmem:[%s1297_s1 + $0x1f8] sm:$0xff]  ;;  %595 = vmatprep.subr.mxu0 %v54_v0  ;;  %v85_v5 = vld [vmem:[%s1297_s1 + $0x1f0] sm:$0xff]  ;;  %v84_v9 = vld [vmem:[%s1297_s1 + $0x1e8] sm:$0xff]  ;;  %v160_v42 = vshrl.u32 %v159_v32, 7 }
   0x3   :  { %v38_v2 = vld [vmem:[%s1297_s1 + $0x78] sm:$0xff]  ;;  %630 = vmatprep.subr.mxu1 %v86_v1  ;;  %v37_v6 = vld [vmem:[%s1297_s1 + $0x70] sm:$0xff]  ;;  %v36_v10 = vld [vmem:[%s1297_s1 + $0x68] sm:$0xff]  ;;  %v158_v41 = vunpack.c.0.s8 %v157_v31 }
   0x4   :  { %v70_v3 = vld [vmem:[%s1297_s1 + $0x178] sm:$0xff]  ;;  %596 = vmatpush3.msra.mxu0 %v38_v2  ;;  %v69_v7 = vld [vmem:[%s1297_s1 + $0x170] sm:$0xff]  ;;  %v68_v11 = vld [vmem:[%s1297_s1 + $0x168] sm:$0xff] }
   0x5   :  { %631 = vmatpush3.msra.mxu1 %v70_v3  ;;  %597 = vmatprep.subr.mxu0 %v53_v4  ;;  %v51_v12 = vld [vmem:[%s1297_s1 + $0xe0] sm:$0xff]  ;;  %v50_v16 = vld [vmem:[%s1297_s1 + $0xd8] sm:$0xff]  ;;  %v49_v20 = vld [vmem:[%s1297_s1 + $0xd0] sm:$0xff]  ;;  %v952_v51 = vsub.s32 %v158_v41, %v160_v42 }
   0x6   :  { %632 = vmatprep.subr.mxu1 %v85_v5  ;;  %598 = vmatpush3.msra.mxu0 %v37_v6  ;;  %v83_v13 = vld [vmem:[%s1297_s1 + $0x1e0] sm:$0xff]  ;;  %v82_v17 = vld [vmem:[%s1297_s1 + $0x1d8] sm:$0xff]  ;;  %v81_v21 = vld [vmem:[%s1297_s1 + $0x1d0] sm:$0xff] }
   0x7   :  { %633 = vmatpush3.msra.mxu1 %v69_v7  ;;  %599 = vmatprep.subr.mxu0 %v52_v8  ;;  %v35_v14 = vld [vmem:[%s1297_s1 + $0x60] sm:$0xff]  ;;  %v34_v18 = vld [vmem:[%s1297_s1 + $0x58] sm:$0xff]  ;;  %v33_v22 = vld [vmem:[%s1297_s1 + $0x50] sm:$0xff] }
   0x8   :  { %634 = vmatprep.subr.mxu1 %v84_v9  ;;  %v67_v15 = vld [vmem:[%s1297_s1 + $0x160] sm:$0xff]  ;;  %600 = vmatpush3.msra.mxu0 %v36_v10  ;;  %v66_v19 = vld [vmem:[%s1297_s1 + $0x158] sm:$0xff]  ;;  %v65_v23 = vld [vmem:[%s1297_s1 + $0x150] sm:$0xff] }
   0x9   :  { %635 = vmatpush3.msra.mxu1 %v68_v11  ;;  %601 = vmatprep.subr.mxu0 %v51_v12  ;;  %v48_v24 = vld [vmem:[%s1297_s1 + $0xc8] sm:$0xff]  ;;  %v47_v28 = vld [vmem:[%s1297_s1 + $0xc0] sm:$0xff]  ;;  %v46_v35 = vld [vmem:[%s1297_s1 + $0xb8] sm:$0xff] }
   0xa   :  { %636 = vmatprep.subr.mxu1 %v83_v13  ;;  %602 = vmatpush3.msra.mxu0 %v35_v14  ;;  %v80_v25 = vld [vmem:[%s1297_s1 + $0x1c8] sm:$0xff]  ;;  %v79_v29 = vld [vmem:[%s1297_s1 + $0x1c0] sm:$0xff]  ;;  %v78_v36 = vld [vmem:[%s1297_s1 + $0x1b8] sm:$0xff] }
   0xb   :  { %637 = vmatpush3.msra.mxu1 %v67_v15  ;;  %603 = vmatprep.subr.mxu0 %v50_v16  ;;  %v32_v26 = vld [vmem:[%s1297_s1 + $0x48] sm:$0xff]  ;;  %v31_v33 = vld [vmem:[%s1297_s1 + $0x40] sm:$0xff]  ;;  %v30_v37 = vld [vmem:[%s1297_s1 + $0x38] sm:$0xff]  ;;  %v781_v16 = vmov 0.0  }
   0xc   :  { %638 = vmatprep.subr.mxu1 %v82_v17  ;;  %604 = vmatpush3.msra.mxu0 %v34_v18  ;;  %v64_v27 = vld [vmem:[%s1297_s1 + $0x148] sm:$0xff]  ;;  %v63_v34 = vld [vmem:[%s1297_s1 + $0x140] sm:$0xff]  ;;  %v62_v38 = vld [vmem:[%s1297_s1 + $0x138] sm:$0xff] }
   0xd   :  { %639 = vmatpush3.msra.mxu1 %v66_v19  ;;  %605 = vmatprep.subr.mxu0 %v49_v20  ;;  %v45_v39 = vld [vmem:[%s1297_s1 + $0xb0] sm:$0xff]  ;;  %v44_v45 = vld [vmem:[%s1297_s1 + $0xa8] sm:$0xff]  ;;  %v43_v49 = vld [vmem:[%s1297_s1 + $0xa0] sm:$0xff] }
   0xe   :  { %640 = vmatprep.subr.mxu1 %v81_v21  ;;  %606 = vmatpush3.msra.mxu0 %v33_v22  ;;  %v77_v40 = vld [vmem:[%s1297_s1 + $0x1b0] sm:$0xff]  ;;  %v76_v46 = vld [vmem:[%s1297_s1 + $0x1a8] sm:$0xff]  ;;  %v75_v50 = vld [vmem:[%s1297_s1 + $0x1a0] sm:$0xff] }
   0xf   :  { %641 = vmatpush3.msra.mxu1 %v65_v23  ;;  %607 = vmatprep.subr.mxu0 %v48_v24  ;;  %v29_v43 = vld [vmem:[%s1297_s1 + $0x30] sm:$0xff]  ;;  %v28_v47 = vld [vmem:[%s1297_s1 + $0x28] sm:$0xff]  ;;  %v27_v52 = vld [vmem:[%s1297_s1 + $0x20] sm:$0xff] }
  0x10   :  { %642 = vmatprep.subr.mxu1 %v80_v25  ;;  %608 = vmatpush3.msra.mxu0 %v32_v26  ;;  %v61_v44 = vld [vmem:[%s1297_s1 + $0x130] sm:$0xff]  ;;  %v60_v48 = vld [vmem:[%s1297_s1 + $0x128] sm:$0xff]  ;;  %v59_v53 = vld [vmem:[%s1297_s1 + $0x120] sm:$0xff] }
  0x11   :  { %643 = vmatpush3.msra.mxu1 %v64_v27  ;;  %609 = vmatprep.subr.mxu0 %v47_v28  ;;  %v21_v54 = vld [vmem:[%s1296_s0] sm:$0xff]  ;;  %v42_v55 = vld [vmem:[%s1297_s1 + $0x98] sm:$0xff]  ;;  %v41_v60 = vld [vmem:[%s1297_s1 + $0x90] sm:$0xff] }
  0x12   :  { %644 = vmatprep.subr.mxu1 %v79_v29  ;;  %610 = vmatpush3.msra.mxu0 %v31_v33  ;;  %v74_v56 = vld [vmem:[%s1297_s1 + $0x198] sm:$0xff]  ;;  %v155_v57 = vcombine.high %v21_v54, %v21_v54  ;;  %v73_v61 = vld [vmem:[%s1297_s1 + $0x190] sm:$0xff]  ;;  %v162_v62 = vrot.slane %v21_v54, %v952_v51  ;;  %v40_v2 = vld [vmem:[%s1297_s1 + $0x88] sm:$0xff] }
  0x13   :  { %645 = vmatpush3.msra.mxu1 %v63_v34  ;;  %611 = vmatprep.subr.mxu0 %v46_v35  ;;  %v26_v58 = vld [vmem:[%s1297_s1 + $0x18] sm:$0xff]  ;;  %v25_v63 = vld [vmem:[%s1297_s1 + $0x10] sm:$0xff]  ;;  %v72_v3 = vld [vmem:[%s1297_s1 + $0x188] sm:$0xff] }
  0x14   :  { %646 = vmatprep.subr.mxu1 %v78_v36  ;;  %612 = vmatpush3.msra.mxu0 %v30_v37  ;;  %v58_v59 = vld [vmem:[%s1297_s1 + $0x118] sm:$0xff]  ;;  %v57_v0 = vld [vmem:[%s1297_s1 + $0x110] sm:$0xff]  ;;  %v169_v1 = vrot.slane %v155_v57, %v952_v51  ;;  %v24_v4 = vld [vmem:[%s1297_s1 + $0x8] sm:$0xff]  ;;  %v170_v8 = vcombine.high %v162_v62, %v162_v62 }
  0x15   :  { %647 = vmatpush3.msra.mxu1 %v62_v38  ;;  %613 = vmatprep.subr.mxu0 %v45_v39  ;;  %v56_v5 = vld [vmem:[%s1297_s1 + $0x108] sm:$0xff]  ;;  %v39_v6 = vld [vmem:[%s1297_s1 + $0x80] sm:$0xff]  ;;  %v118_v12 = vld [vmem:[%s1297_s1 + $0x2f8] sm:$0xff] }
  0x16   :  { %648 = vmatprep.subr.mxu1 %v77_v40  ;;  %614 = vmatpush3.msra.mxu0 %v29_v43  ;;  %v71_v7 = vld [vmem:[%s1297_s1 + $0x180] sm:$0xff]  ;;  %v171_v10 = vcombine.high %v169_v1, %v169_v1  ;;  %v102_v13 = vld [vmem:[%s1297_s1 + $0x278] sm:$0xff]  ;;  %v117_v15 = vld [vmem:[%s1297_s1 + $0x2f0] sm:$0xff] }
  0x17   :  { %649 = vmatpush3.msra.mxu1 %v61_v44  ;;  %615 = vmatprep.subr.mxu0 %v44_v45  ;;  %v23_v9 = vld [vmem:[%s1297_s1] sm:$0xff]  ;;  %v134_v14 = vld [vmem:[%s1297_s1 + $0x378] sm:$0xff]  ;;  %v101_v17 = vld [vmem:[%s1297_s1 + $0x270] sm:$0xff] }
  0x18   :  { %650 = vmatprep.subr.mxu1 %v76_v46  ;;  %616 = vmatpush3.msra.mxu0 %v28_v47  ;;  %v55_v11 = vld [vmem:[%s1297_s1 + $0x100] sm:$0xff]  ;;  %v133_v18 = vld [vmem:[%s1297_s1 + $0x370] sm:$0xff]  ;;  %v116_v19 = vld [vmem:[%s1297_s1 + $0x2e8] sm:$0xff] }
  0x19   :  { %651 = vmatpush3.msra.mxu1 %v60_v48  ;;  %617 = vmatprep.subr.mxu0 %v43_v49  ;;  %v100_v20 = vld [vmem:[%s1297_s1 + $0x268] sm:$0xff]  ;;  %v115_v22 = vld [vmem:[%s1297_s1 + $0x2e0] sm:$0xff]  ;;  %v114_v25 = vld [vmem:[%s1297_s1 + $0x2d8] sm:$0xff] }
  0x1a   :  { %652 = vmatprep.subr.mxu1 %v75_v50  ;;  %618 = vmatpush3.msra.mxu0 %v27_v52  ;;  %v132_v21 = vld [vmem:[%s1297_s1 + $0x368] sm:$0xff]  ;;  %v99_v23 = vld [vmem:[%s1297_s1 + $0x260] sm:$0xff]  ;;  %v98_v26 = vld [vmem:[%s1297_s1 + $0x258] sm:$0xff] }
  0x1b   :  { %653 = vmatpush3.msra.mxu1 %v59_v53  ;;  %619 = vmatprep.subr.mxu0 %v42_v55  ;;  %v131_v24 = vld [vmem:[%s1297_s1 + $0x360] sm:$0xff]  ;;  %v130_v27 = vld [vmem:[%s1297_s1 + $0x358] sm:$0xff] }
  0x1c   :  { %654 = vmatprep.subr.mxu1 %v74_v56  ;;  %620 = vmatpush3.msra.mxu0 %v26_v58 }
  0x1d   :  { %655 = vmatpush3.msra.mxu1 %v58_v59  ;;  %621 = vmatprep.subr.mxu0 %v41_v60 }
  0x1e   :  { %656 = vmatprep.subr.mxu1 %v73_v61  ;;  %622 = vmatpush3.msra.mxu0 %v25_v63 }
  0x1f   :  { %657 = vmatpush3.msra.mxu1 %v57_v0  ;;  %623 = vmatprep.subr.mxu0 %v40_v2 }
  0x20   :  { %658 = vmatprep.subr.mxu1 %v72_v3  ;;  %624 = vmatpush3.msra.mxu0 %v24_v4 }
  0x21   :  { %659 = vmatpush3.msra.mxu1 %v56_v5  ;;  %625 = vmatprep.subr.mxu0 %v39_v6 }
  0x22   :  { %660 = vmatprep.subr.mxu1 %v71_v7  ;;  %626 = vmatpush3.msra.mxu0 %v23_v9 }
  0x23   :  { %267 = vmatprep.mubr.f32.mxu0 %v170_v8  ;;  %661 = vmatpush3.msra.mxu1 %v55_v11 }
  0x24   :  { %337 = vmatprep.mubr.f32.mxu1 %v171_v10  ;;  %268 = vmatmul.mubr.f32.vlgmr.msra.gmra.mxu0 %v162_v62 }
  0x25   :  { %338 = vmatmul.mubr.f32.vlgmr.msra.gmra.mxu1 %v169_v1  ;;  %665 = vmatprep.subr.mxu0 %v118_v12 }
  0x26   :  { %413 = vmatprep.subr.mxu1 %v781_v16  ;;  %666 = vmatpush3.msra.mxu0 %v102_v13 }
  0x27   :  { %414 = vmatpush1.msra.mxu1 %v134_v14  ;;  %667 = vmatprep.subr.mxu0 %v117_v15 }
  0x28   :  { %415 = vmatprep.subr.mxu1 %v781_v16  ;;  %668 = vmatpush3.msra.mxu0 %v101_v17 }
  0x29   :  { %416 = vmatpush1.msra.mxu1 %v133_v18  ;;  %669 = vmatprep.subr.mxu0 %v116_v19 }
  0x2a   :  { %417 = vmatprep.subr.mxu1 %v781_v16  ;;  %670 = vmatpush3.msra.mxu0 %v100_v20 }
  0x2b   :  { %418 = vmatpush1.msra.mxu1 %v132_v21  ;;  %671 = vmatprep.subr.mxu0 %v115_v22 }
  0x2c   :  { %419 = vmatprep.subr.mxu1 %v781_v16 }
  0x2d   :  { %10 = vsyncpa [#allocation3], 0  ;;  %672 = vmatpush3.msra.mxu0 %v99_v23  ;;  %420 = vmatpush1.msra.mxu1 %v131_v24  ;;  %v113_v28 = vld [vmem:[%s1297_s1 + $0x2d0] sm:$0xff]  ;;  %v112_v31 = vld [vmem:[%s1297_s1 + $0x2c8] sm:$0xff]  ;;  %vm196_vm0 = vcmask 687104   ;;  %vm199_vm1 = vcmask 1043456  }
  0x2e   :  { %673 = vmatprep.subr.mxu0 %v114_v25  ;;  %421 = vmatprep.subr.mxu1 %v781_v16  ;;  %v97_v29 = vld [vmem:[%s1297_s1 + $0x250] sm:$0xff]  ;;  %v96_v32 = vld [vmem:[%s1297_s1 + $0x248] sm:$0xff]  ;;  %v111_v34 = vld [vmem:[%s1297_s1 + $0x2c0] sm:$0xff]  ;;  %vm782_vm2 = vmmov 0   ;;  %s783_s23 = smov [#allocation2]  }
  0x2f   :  { %v129_v30 = vld [vmem:[%s1297_s1 + $0x350] sm:$0xff]  ;;  %674 = vmatpush3.msra.mxu0 %v98_v26  ;;  %422 = vmatpush1.msra.mxu1 %v130_v27  ;;  %v128_v33 = vld [vmem:[%s1297_s1 + $0x348] sm:$0xff]  ;;  %v95_v35 = vld [vmem:[%s1297_s1 + $0x240] sm:$0xff]  ;;  %s583_s24 = sshll.u32 %s783_s23, 4  ;;  %s584_s24 = int_to_ptr.vmem [resolvable:$true] %s583_s24 }
  0x30   :  { %675 = vmatprep.subr.mxu0 %v113_v28  ;;  %423 = vmatprep.subr.mxu1 %v781_v16  ;;  %v127_v36 = vld [vmem:[%s1297_s1 + $0x340] sm:$0xff]  ;;  %v110_v37 = vld [vmem:[%s1297_s1 + $0x2b8] sm:$0xff]  ;;  %v109_v40 = vld [vmem:[%s1297_s1 + $0x2b0] sm:$0xff]  ;;  %p763_p1 = scmp.lt.s32.totalorder %s584_s24, %s584_s24 }
  0x31   :  { %676 = vmatpush3.msra.mxu0 %v97_v29  ;;  %424 = vmatpush1.msra.mxu1 %v129_v30  ;;  %v94_v38 = vld [vmem:[%s1297_s1 + $0x238] sm:$0xff]  ;;  %v93_v41 = vld [vmem:[%s1297_s1 + $0x230] sm:$0xff]  ;;  %v108_v43 = vld [vmem:[%s1297_s1 + $0x2a8] sm:$0xff] }
  0x32   :  { %677 = vmatprep.subr.mxu0 %v112_v31  ;;  %425 = vmatprep.subr.mxu1 %v781_v16  ;;  %v126_v39 = vld [vmem:[%s1297_s1 + $0x338] sm:$0xff]  ;;  %v125_v42 = vld [vmem:[%s1297_s1 + $0x330] sm:$0xff]  ;;  %v92_v44 = vld [vmem:[%s1297_s1 + $0x228] sm:$0xff] }
  0x33   :  { %678 = vmatpush3.msra.mxu0 %v96_v32  ;;  %426 = vmatpush1.msra.mxu1 %v128_v33  ;;  %v124_v45 = vld [vmem:[%s1297_s1 + $0x328] sm:$0xff]  ;;  %v107_v46 = vld [vmem:[%s1297_s1 + $0x2a0] sm:$0xff]  ;;  %v106_v50 = vld [vmem:[%s1297_s1 + $0x298] sm:$0xff] }
  0x34   :  { %679 = vmatprep.subr.mxu0 %v111_v34  ;;  %427 = vmatprep.subr.mxu1 %v781_v16  ;;  %v91_v47 = vld [vmem:[%s1297_s1 + $0x220] sm:$0xff]  ;;  %v22_v49 = vld [vmem:[%s1296_s0 + $0x8] sm:$0xff]  ;;  %v90_v53 = vld [vmem:[%s1297_s1 + $0x218] sm:$0xff] }
  0x35   :  { %680 = vmatpush3.msra.mxu0 %v95_v35  ;;  %428 = vmatpush1.msra.mxu1 %v127_v36  ;;  %v123_v48 = vld [vmem:[%s1297_s1 + $0x320] sm:$0xff]  ;;  %v172_v52 = vcombine.high %v22_v49, %v22_v49  ;;  %v122_v54 = vld [vmem:[%s1297_s1 + $0x318] sm:$0xff]  ;;  %v105_v55 = vld [vmem:[%s1297_s1 + $0x290] sm:$0xff]  ;;  %v179_v56 = vrot.slane %v22_v49, %v952_v51 }
  0x36   :  { %681 = vmatprep.subr.mxu0 %v110_v37  ;;  %429 = vmatprep.subr.mxu1 %v781_v16  ;;  %v89_v57 = vld [vmem:[%s1297_s1 + $0x210] sm:$0xff]  ;;  %v104_v59 = vld [vmem:[%s1297_s1 + $0x288] sm:$0xff]  ;;  %v103_v63 = vld [vmem:[%s1297_s1 + $0x280] sm:$0xff] }
  0x37   :  { %682 = vmatpush3.msra.mxu0 %v94_v38  ;;  %430 = vmatpush1.msra.mxu1 %v126_v39  ;;  %v121_v58 = vld [vmem:[%s1297_s1 + $0x310] sm:$0xff]  ;;  %v186_v60 = vrot.slane %v172_v52, %v952_v51  ;;  %v88_v61 = vld [vmem:[%s1297_s1 + $0x208] sm:$0xff]  ;;  %v187_v0 = vcombine.high %v179_v56, %v179_v56  ;;  %v87_v51 = vld [vmem:[%s1297_s1 + $0x200] sm:$0xff] }
  0x38   :  { %683 = vmatprep.subr.mxu0 %v109_v40  ;;  %431 = vmatprep.subr.mxu1 %v781_v16  ;;  %v120_v62 = vld [vmem:[%s1297_s1 + $0x308] sm:$0xff]  ;;  %v119_v1 = vld [vmem:[%s1297_s1 + $0x300] sm:$0xff]  ;;  %v145_v3 = vld [vmem:[%s1297_s1 + $0x3d0] sm:$0xf] }
  0x39   :  { %684 = vmatpush3.msra.mxu0 %v93_v41  ;;  %432 = vmatpush1.msra.mxu1 %v125_v42  ;;  %v188_v2 = vcombine.high %v186_v60, %v186_v60  ;;  %v144_v4 = vld [vmem:[%s1297_s1 + $0x3c8] sm:$0xff]  ;;  %v143_v5 = vld [vmem:[%s1297_s1 + $0x3c0] sm:$0xff]  ;;  %v142_v6 = vld [vmem:[%s1297_s1 + $0x3b8] sm:$0xff] }
  0x3a   :  { %685 = vmatprep.subr.mxu0 %v108_v43  ;;  %433 = vmatprep.subr.mxu1 %v781_v16  ;;  %v141_v7 = vld [vmem:[%s1297_s1 + $0x3b0] sm:$0xff]  ;;  %v140_v8 = vld [vmem:[%s1297_s1 + $0x3a8] sm:$0xff]  ;;  %v139_v9 = vld [vmem:[%s1297_s1 + $0x3a0] sm:$0xff] }
  0x3b   :  { %686 = vmatpush3.msra.mxu0 %v92_v44  ;;  %434 = vmatpush1.msra.mxu1 %v124_v45  ;;  %v138_v10 = vld [vmem:[%s1297_s1 + $0x398] sm:$0xff]  ;;  %v137_v11 = vld [vmem:[%s1297_s1 + $0x390] sm:$0xff]  ;;  %v136_v12 = vld [vmem:[%s1297_s1 + $0x388] sm:$0xff] }
  0x3c   :  { %687 = vmatprep.subr.mxu0 %v107_v46  ;;  %435 = vmatprep.subr.mxu1 %v781_v16  ;;  %v135_v13 = vld [vmem:[%s1297_s1 + $0x380] sm:$0xff]  ;;  %v498_v14 = vld [vmem:[%s1299_s3 + $0x78] sm:$0xff]  ;;  %v497_v15 = vld [vmem:[%s1299_s3 + $0x70] sm:$0xff] }
  0x3d   :  { %688 = vmatpush3.msra.mxu0 %v91_v47  ;;  %436 = vmatpush1.msra.mxu1 %v123_v48  ;;  %v496_v17 = vld [vmem:[%s1299_s3 + $0x68] sm:$0xff]  ;;  %v495_v18 = vld [vmem:[%s1299_s3 + $0x60] sm:$0xff]  ;;  %v494_v19 = vld [vmem:[%s1299_s3 + $0x58] sm:$0xff] }
  0x3e   :  { %689 = vmatprep.subr.mxu0 %v106_v50  ;;  %437 = vmatprep.subr.mxu1 %v781_v16  ;;  %v493_v20 = vld [vmem:[%s1299_s3 + $0x50] sm:$0xff]  ;;  %v492_v21 = vld [vmem:[%s1299_s3 + $0x48] sm:$0xff]  ;;  %v491_v22 = vld [vmem:[%s1299_s3 + $0x40] sm:$0xff] }
  0x3f   :  { %690 = vmatpush3.msra.mxu0 %v90_v53  ;;  %438 = vmatpush1.msra.mxu1 %v122_v54  ;;  %v490_v23 = vld [vmem:[%s1299_s3 + $0x38] sm:$0xff]  ;;  %v489_v24 = vld [vmem:[%s1299_s3 + $0x30] sm:$0xff]  ;;  %v488_v25 = vld [vmem:[%s1299_s3 + $0x28] sm:$0xff] }
  0x40   :  { %691 = vmatprep.subr.mxu0 %v105_v55  ;;  %439 = vmatprep.subr.mxu1 %v781_v16  ;;  %v487_v26 = vld [vmem:[%s1299_s3 + $0x20] sm:$0xff]  ;;  %v486_v27 = vld [vmem:[%s1299_s3 + $0x18] sm:$0xff]  ;;  %v485_v28 = vld [vmem:[%s1299_s3 + $0x10] sm:$0xff] }
  0x41   :  { %692 = vmatpush3.msra.mxu0 %v89_v57  ;;  %440 = vmatpush1.msra.mxu1 %v121_v58  ;;  %v484_v29 = vld [vmem:[%s1299_s3 + $0x8] sm:$0xff]  ;;  %v483_v30 = vld [vmem:[%s1299_s3] sm:$0xff] }
  0x42   :  { %693 = vmatprep.subr.mxu0 %v104_v59  ;;  %441 = vmatprep.subr.mxu1 %v781_v16  ;;  %v591_v36 = vld [vmem:[%s1298_s2] ss:$0 sm:$0xff]  ;;  %s758_s2 = scalar_lea.vmem %s584_s24, 32 }
  0x43   :  { %694 = vmatpush3.msra.mxu0 %v88_v61  ;;  %442 = vmatpush1.msra.mxu1 %v120_v62  ;;  %p759_p0 = scmp.ne.s32.totalorder %s584_s24, %s758_s2  ;;  %p764_p2 = scmp.lt.s32.totalorder %s758_s2, %s758_s2 }
  0x44   :  { %695 = vmatprep.subr.mxu0 %v103_v63  ;;  %443 = vmatprep.subr.mxu1 %v781_v16 }
  0x45   :  { %696 = vmatpush3.msra.mxu0 %v87_v51  ;;  %407 = vmatprep.mubr.f32.mxu0 %v187_v0  ;;  %p765_p3 = por %p764_p2, %p763_p1 }
  0x46   :  { %444 = vmatpush1.msra.mxu1 %v119_v1  ;;  %408 = vmatmul.mubr.f32.vlgmr.msra.gmra.mxu0 %v179_v56 }
  0x47   :  { %455 = vmatprep.subr.mxu1 %v781_v16  ;;  %593 = vmatprep.mubr.msk.f32.mxu1 %vm196_vm0, %v188_v2  ;;  %p766_p4 = pnand %p765_p3, %p759_p0 }
  0x48   :  { %592 = vmatpush2.msk.msra.mxu1 %vm199_vm1, %v145_v3  ;;  %717 = vmatprep.subr.mxu0 %v781_v16 }
  0x49   :  { %457 = vmatprep.subr.mxu1 %v781_v16  ;;  %718 = vmatpush3.msra.mxu0 %v498_v14 }
  0x4a   :  { %458 = vmatpush2.msra.mxu1 %v144_v4  ;;  %719 = vmatprep.subr.mxu0 %v781_v16 }
  0x4b   :  { %459 = vmatprep.subr.mxu1 %v781_v16  ;;  %720 = vmatpush3.msra.mxu0 %v497_v15 }
  0x4c   :  { %460 = vmatpush2.msra.mxu1 %v143_v5  ;;  %721 = vmatprep.subr.mxu0 %v781_v16 }
  0x4d   :  { %461 = vmatprep.subr.mxu1 %v781_v16  ;;  %722 = vmatpush3.msra.mxu0 %v496_v17 }
  0x4e   :  { %462 = vmatpush2.msra.mxu1 %v142_v6  ;;  %723 = vmatprep.subr.mxu0 %v781_v16 }
  0x4f   :  { %463 = vmatprep.subr.mxu1 %v781_v16  ;;  %724 = vmatpush3.msra.mxu0 %v495_v18 }
  0x50   :  { %464 = vmatpush2.msra.mxu1 %v141_v7  ;;  %725 = vmatprep.subr.mxu0 %v781_v16 }
  0x51   :  { %465 = vmatprep.subr.mxu1 %v781_v16  ;;  %726 = vmatpush3.msra.mxu0 %v494_v19 }
  0x52   :  { %466 = vmatpush2.msra.mxu1 %v140_v8  ;;  %727 = vmatprep.subr.mxu0 %v781_v16 }
  0x53   :  { %467 = vmatprep.subr.mxu1 %v781_v16  ;;  %728 = vmatpush3.msra.mxu0 %v493_v20 }
  0x54   :  { %468 = vmatpush2.msra.mxu1 %v139_v9  ;;  %729 = vmatprep.subr.mxu0 %v781_v16 }
  0x55   :  { %469 = vmatprep.subr.mxu1 %v781_v16  ;;  %730 = vmatpush3.msra.mxu0 %v492_v21 }
  0x56   :  { %470 = vmatpush2.msra.mxu1 %v138_v10  ;;  %731 = vmatprep.subr.mxu0 %v781_v16 }
  0x57   :  { %471 = vmatprep.subr.mxu1 %v781_v16  ;;  %732 = vmatpush3.msra.mxu0 %v491_v22 }
  0x58   :  { %472 = vmatpush2.msra.mxu1 %v137_v11  ;;  %733 = vmatprep.subr.mxu0 %v781_v16 }
  0x59   :  { %473 = vmatprep.subr.mxu1 %v781_v16  ;;  %734 = vmatpush3.msra.mxu0 %v490_v23 }
  0x5a   :  { %474 = vmatpush2.msra.mxu1 %v136_v12  ;;  %735 = vmatprep.subr.mxu0 %v781_v16 }
  0x5b   :  { %475 = vmatprep.subr.mxu1 %v781_v16  ;;  %736 = vmatpush3.msra.mxu0 %v489_v24 }
  0x5c   :  { %476 = vmatpush2.msra.mxu1 %v135_v13  ;;  %737 = vmatprep.subr.mxu0 %v781_v16 }
  0x5d   :  { %478 = vmatmul.mubr.f32.vlgmr.msra.gmra.mxu1 %v186_v60  ;;  %738 = vmatpush3.msra.mxu0 %v488_v25 }
  0x5e   :  { %739 = vmatprep.subr.mxu0 %v781_v16  ;;  %749 = vmatprep.mubr.msk.f32.mxu0 %vm782_vm2, %v781_v16 }
  0x5f   :  { %740 = vmatpush3.msra.mxu0 %v487_v26 }
  0x60   :  { %741 = vmatprep.subr.mxu0 %v781_v16 }
  0x61   :  { %742 = vmatpush3.msra.mxu0 %v486_v27 }
  0x62   :  { %743 = vmatprep.subr.mxu0 %v781_v16 }
  0x63   :  { %744 = vmatpush3.msra.mxu0 %v485_v28 }
  0x64   :  { %745 = vmatprep.subr.mxu0 %v781_v16 }
  0x65   :  { %746 = vmatpush3.msra.mxu0 %v484_v29 }
  0x66   :  { %747 = vmatprep.subr.mxu0 %v781_v16  ;;  %v594_v16 = vld [vmem:[%s1300_s4] ss:$0 sm:$0xff] }
  0x67   :  { %748 = vmatpush3.msra.mxu0 %v483_v30 }
  0xe4   :  { %v627_v31 = vpop.f32.mrf.mxu0 }
  0xe5   :  { %v662_v33 = vpop.f32.mrf.mxu1 }
  0xe6   :  { %v628_v32 = vpop.f32.mrf.mxu0 }
  0xe7   :  { %v629_v35 = vadd.f32 %v628_v32, %v627_v31  ;;  %v663_v37 = vpop.f32.mrf.mxu1 }
  0xe8   :  { %v664_v40 = vadd.f32 %v663_v37, %v662_v33 }
  0xe9   :  { %v270_v39 = vadd.f32 %v629_v35, %v591_v36 }
  0xeb   :  { %v340_v42 = vadd.f32 %v664_v40, %v270_v39 }
 0x106   :  { %v697_v34 = vpop.f32.mrf.mxu0 }
 0x108   :  { %v698_v38 = vpop.f32.mrf.mxu0 }
 0x109   :  { %v699_v41 = vadd.f32 %v698_v38, %v697_v34 }
 0x10b   :  { %v410_v43 = vadd.f32 %v699_v41, %v340_v42 }
 0x11d   :  { %v479_v44 = vpop.f32.mrf.mxu1 }
 0x11e   :  { %v480_v45 = vadd.f32 %v479_v44, %v410_v43 }
 0x11f   :  { %v481_v46 = vpop.f32.mrf.mxu1 }
 0x120   :  { %750 = vmatmul.mubr.f32.vlgmr.msra.gmra.mxu0 %v480_v45 }
 0x1e0   :  { %v572_v47 = vpop.f32.mrf.mxu0 }
 0x1e1   :  { %v573_v48 = vadd.f32 %v594_v16, %v572_v47 }
 0x1e2   :  { %v751_v49 = vpop.f32.mrf.mxu0 }
 0x1e3   :  { %576 = vst [vmem:[#allocation2] sm:$0x3] %v573_v48 }
 0x1e4   :  { %769 = shalt.err (!%p766_p4)
}
 0x1e5   :  { %586 = dma.vmem_to_hbm [thread:$0]  %s584_s24, 32, %s1301_s5, [#allocation3]  }
 0x1e6   :  { %778 = dma.done.wait [#allocation3], 32  }
 0x1e7   :  { %779 = vsyncadd [#allocation3], 4294967264 }
 0x1e8   :  { %590 = vsyncpa [#allocation3], 1 }

// kernel: my_cnn_forward.2
= control target key start
LH: loop header
LB: loop body
LE: loop exit
PB: predicated region body
PF: predicated region fallthrough
CT: control target
= control target key end

     0   :  { %s13659_s18 = smov 0   ;;  %s18277_s0 = inlined_call_operand.vmem [shape: f32[2,784,25], index: 0, kind: input, shape index: {}]   ;;  %s18278_s1 = inlined_call_operand.vmem [shape: f32[25,128], index: 1, kind: input, shape index: {}]   ;;  %s18279_s2 = inlined_call_operand.vmem [shape: f32[1,128], index: 2, kind: input, shape index: {}]   ;;  %s18280_s3 = inlined_call_operand.vmem [shape: f32[25,128,128], index: 3, kind: input, shape index: {}]   ;;  %s18281_s4 = inlined_call_operand.vmem [shape: f32[1,128], index: 4, kind: input, shape index: {}]   ;;  %s18282_s5 = inlined_call_operand.vmem [shape: f32[2,49,128], index: 5, kind: output, shape index: {}]  }
   0x1 LB: > { %s9619_s19 = sadd.s32 4294967295, %s13626_s18   ;;  %p9623_p0 = scmp.ge.s32.totalorder %s13626_s18, 1  ;;  %s13626_s18 = sphi %s13659_s18, %s15_s18  }
   0x2   : > { %p187_p1 = scmp.lt.s32.totalorder %s13626_s18, 3 }
   0x4   : > { %p188_p2 = pnand %p9623_p0, %p187_p1 }
   0x6   : > { %191 = sbr.rel (%p188_p2) target bundleno = 1445 (0x5a5), region = 40 }
   0xb   : > { %v326_v0 = vld [vmem:[%s18278_s1 + $0x18] sm:$0x1]  ;;  %vm629_vm0 = vcmask 1040384   ;;  %v325_v1 = vld [vmem:[%s18278_s1 + $0x10] sm:$0xff]  ;;  %p215_p3 = scmp.lt.s32.totalorder %s9619_s19, 1  ;;  %v324_v2 = vld [vmem:[%s18278_s1 + $0x8] sm:$0xff] }
   0xc   : > { %11415 = vmatprep.subr.msk.mxu0 %vm629_vm0, %v326_v0  ;;  %v323_v3 = vld [vmem:[%s18278_s1] sm:$0xff]  ;;  %vm334_vm1 = vcmask 203776   ;;  %v1815_v31 = vld [vmem:[%s18280_s3 + $0x78] sm:$0xff]  ;;  %v1814_v41 = vld [vmem:[%s18280_s3 + $0x70] sm:$0xff] }
   0xd   : > { %11416 = vmatpush3.msk.msra.mxu0 %vm629_vm0, %v326_v0  ;;  %s19048_s19 = smov (!%p215_p3, %s9619_s19), 1  ;;  %v9774_v32 = vld [vmem:[%s18280_s3 + $0x1f8] sm:$0xff]  ;;  %11570 = vmatprep.subr.mxu1 %v1815_v31  ;;  %v9773_v42 = vld [vmem:[%s18280_s3 + $0x1f0] sm:$0xff]  ;;  %v1813_v44 = vld [vmem:[%s18280_s3 + $0x68] sm:$0xff] }
   0xe   : > { %11417 = vmatprep.subr.mxu0 %v325_v1  ;;  %s13602_s28 = smul.u32 784, %s19048_s19  ;;  %11571 = vmatpush3.msra.mxu1 %v1815_v31  ;;  %v9772_v45 = vld [vmem:[%s18280_s3 + $0x1e8] sm:$0xff]  ;;  %v1812_v47 = vld [vmem:[%s18280_s3 + $0x60] sm:$0xff]  ;;  %v1811_v50 = vld [vmem:[%s18280_s3 + $0x58] sm:$0xff] }
   0xf   : > { %11418 = vmatpush3.msra.mxu0 %v325_v1  ;;  %11572 = vmatprep.subr.mxu1 %v1814_v41  ;;  %v9771_v48 = vld [vmem:[%s18280_s3 + $0x1e0] sm:$0xff]  ;;  %v9770_v52 = vld [vmem:[%s18280_s3 + $0x1d8] sm:$0xff]  ;;  %v1810_v53 = vld [vmem:[%s18280_s3 + $0x50] sm:$0xff]  ;;  %s13603_s20 = smul.u32 56, %s19048_s19 }
  0x10   : > { %11419 = vmatprep.subr.mxu0 %v324_v2  ;;  %s13685_s6 = scalar_lea.vmem %s18277_s0, %s13602_s28  ;;  %11573 = vmatpush3.msra.mxu1 %v1814_v41  ;;  %v9769_v54 = vld [vmem:[%s18280_s3 + $0x1d0] sm:$0xff]  ;;  %v1809_v57 = vld [vmem:[%s18280_s3 + $0x48] sm:$0xff]  ;;  %v1808_v60 = vld [vmem:[%s18280_s3 + $0x40] sm:$0xff] }
  0x11   : > { %11420 = vmatpush3.msra.mxu0 %v324_v2  ;;  %v225_v4 = vld [vmem:[%s13685_s6] sm:$0xff]  ;;  %v226_v5 = vld [vmem:[%s13685_s6 + $0x8] sm:$0xff]  ;;  %v227_v6 = vld [vmem:[%s13685_s6 + $0x10] sm:$0xff]  ;;  %11574 = vmatprep.subr.mxu1 %v1813_v44  ;;  %s18127_s23 = scalar_lea.vmem %s18282_s5, %s13603_s20 }
  0x12   : > { %11421 = vmatprep.subr.mxu0 %v323_v3  ;;  %11423 = vmatprep.mubr.msk.f32.mxu0 %vm334_vm1, %v225_v4  ;;  %v228_v7 = vld [vmem:[%s13685_s6 + $0x18] sm:$0xff]  ;;  %v229_v8 = vld [vmem:[%s13685_s6 + $0x20] sm:$0xff]  ;;  %v230_v9 = vld [vmem:[%s13685_s6 + $0x28] sm:$0xff] }
  0x13   : > { %11422 = vmatpush3.msra.mxu0 %v323_v3  ;;  %v231_v10 = vld [vmem:[%s13685_s6 + $0x30] sm:$0xff]  ;;  %v232_v11 = vld [vmem:[%s13685_s6 + $0x38] sm:$0xff]  ;;  %v233_v12 = vld [vmem:[%s13685_s6 + $0x40] sm:$0xff]  ;;  %11575 = vmatpush3.msra.mxu1 %v1813_v44 }
  0x14   : > { %11424 = vmatmul.mubr.msk.f32.vlgmr.msra.gmra.mxu0 %vm334_vm1, %v226_v5  ;;  %v234_v13 = vld [vmem:[%s13685_s6 + $0x48] sm:$0xff]  ;;  %v235_v14 = vld [vmem:[%s13685_s6 + $0x50] sm:$0xff]  ;;  %v236_v15 = vld [vmem:[%s13685_s6 + $0x58] sm:$0xff]  ;;  %11810 = vmatprep.subr.mxu0 %v9774_v32 }
  0x15   : > { %11426 = vmatprep.mubr.msk.f32.mxu0 %vm334_vm1, %v227_v6  ;;  %v237_v16 = vld [vmem:[%s13685_s6 + $0x60] sm:$0xff]  ;;  %v238_v17 = vld [vmem:[%s13685_s6 + $0x68] sm:$0xff]  ;;  %v239_v18 = vld [vmem:[%s13685_s6 + $0x70] sm:$0xff]  ;;  %11811 = vmatpush3.msra.mxu0 %v9774_v32 }
  0x16   : > { %v240_v19 = vld [vmem:[%s13685_s6 + $0x78] sm:$0xff]  ;;  %v241_v20 = vld [vmem:[%s13685_s6 + $0x80] sm:$0xff]  ;;  %v242_v21 = vld [vmem:[%s13685_s6 + $0x88] sm:$0xff]  ;;  %11812 = vmatprep.subr.mxu0 %v9773_v42  ;;  %11576 = vmatprep.subr.mxu1 %v1812_v47 }
  0x17   : > { %v243_v22 = vld [vmem:[%s13685_s6 + $0x90] sm:$0xff]  ;;  %v244_v23 = vld [vmem:[%s13685_s6 + $0x98] sm:$0xff]  ;;  %v245_v24 = vld [vmem:[%s13685_s6 + $0xa0] sm:$0xff]  ;;  %11813 = vmatpush3.msra.mxu0 %v9773_v42  ;;  %11577 = vmatpush3.msra.mxu1 %v1812_v47 }
  0x18   : > { %11427 = vmatmul.mubr.msk.f32.gmra.mxu0 %vm334_vm1, %v228_v7  ;;  %v246_v25 = vld [vmem:[%s13685_s6 + $0xa8] sm:$0xff]  ;;  %v247_v26 = vld [vmem:[%s13685_s6 + $0xb0] sm:$0xff]  ;;  %v248_v27 = vld [vmem:[%s13685_s6 + $0xb8] sm:$0xff]  ;;  %11814 = vmatprep.subr.mxu0 %v9772_v45 }
  0x19   : > { %11429 = vmatprep.mubr.msk.f32.mxu0 %vm334_vm1, %v229_v8  ;;  %v249_v28 = vld [vmem:[%s13685_s6 + $0xc0] sm:$0xff]  ;;  %v250_v29 = vld [vmem:[%s13685_s6 + $0xc8] sm:$0xff]  ;;  %v251_v30 = vld [vmem:[%s13685_s6 + $0xd0] sm:$0xff]  ;;  %11815 = vmatpush3.msra.mxu0 %v9772_v45 }
  0x1a   : > { %v252_v33 = vld [vmem:[%s13685_s6 + $0xd8] sm:$0xff]  ;;  %v253_v34 = vld [vmem:[%s13685_s6 + $0xe0] sm:$0xff]  ;;  %v254_v35 = vld [vmem:[%s13685_s6 + $0xe8] sm:$0xff]  ;;  %11816 = vmatprep.subr.mxu0 %v9771_v48  ;;  %11578 = vmatprep.subr.mxu1 %v1811_v50 }
  0x1b   : > { %v255_v36 = vld [vmem:[%s13685_s6 + $0xf0] sm:$0xff]  ;;  %v256_v37 = vld [vmem:[%s13685_s6 + $0xf8] sm:$0xff]  ;;  %v257_v38 = vld [vmem:[%s13685_s6 + $0x100] sm:$0xff]  ;;  %11817 = vmatpush3.msra.mxu0 %v9771_v48  ;;  %11579 = vmatpush3.msra.mxu1 %v1811_v50 }
  0x1c   : > { %11430 = vmatmul.mubr.msk.f32.gmra.mxu0 %vm334_vm1, %v230_v9  ;;  %v258_v39 = vld [vmem:[%s13685_s6 + $0x108] sm:$0xff]  ;;  %v259_v40 = vld [vmem:[%s13685_s6 + $0x110] sm:$0xff]  ;;  %v260_v43 = vld [vmem:[%s13685_s6 + $0x118] sm:$0xff]  ;;  %11818 = vmatprep.subr.mxu0 %v9770_v52  ;;  %v13628_v9 = vmov 0.0  }
  0x1d   : > { %11432 = vmatprep.mubr.msk.f32.mxu0 %vm334_vm1, %v231_v10  ;;  %v261_v46 = vld [vmem:[%s13685_s6 + $0x120] sm:$0xff]  ;;  %v262_v49 = vld [vmem:[%s13685_s6 + $0x128] sm:$0xff]  ;;  %v263_v51 = vld [vmem:[%s13685_s6 + $0x130] sm:$0xff]  ;;  %11819 = vmatpush3.msra.mxu0 %v9770_v52  ;;  %1384 = vst [vmem:[#allocation3] sm:$0xff] %v13628_v9 }
  0x1e   : > { %v264_v55 = vld [vmem:[%s13685_s6 + $0x138] sm:$0xff]  ;;  %v265_v56 = vld [vmem:[%s13685_s6 + $0x140] sm:$0xff]  ;;  %11580 = vmatprep.subr.mxu1 %v1810_v53  ;;  %11820 = vmatprep.subr.mxu0 %v9769_v54  ;;  %v9768_v58 = vld [vmem:[%s18280_s3 + $0x1c8] sm:$0xff]  ;;  %1385 = vst [vmem:[#allocation3 + $0x8] sm:$0xff] %v13628_v9 }
  0x1f   : > { %11581 = vmatpush3.msra.mxu1 %v1810_v53  ;;  %v266_v59 = vld [vmem:[%s13685_s6 + $0x148] sm:$0xff]  ;;  %11821 = vmatpush3.msra.mxu0 %v9769_v54  ;;  %v267_v61 = vld [vmem:[%s13685_s6 + $0x150] sm:$0xff]  ;;  %v9767_v62 = vld [vmem:[%s18280_s3 + $0x1c0] sm:$0xff]  ;;  %1386 = vst [vmem:[#allocation3 + $0x10] sm:$0xff] %v13628_v9 }
  0x20   : > { %11433 = vmatmul.mubr.msk.f32.gmra.mxu0 %vm334_vm1, %v232_v11  ;;  %11582 = vmatprep.subr.mxu1 %v1809_v57  ;;  %v1807_v63 = vld [vmem:[%s18280_s3 + $0x38] sm:$0xff]  ;;  %v269_v2 = vld [vmem:[%s13685_s6 + $0x160] sm:$0xff]  ;;  %v1806_v3 = vld [vmem:[%s18280_s3 + $0x30] sm:$0xff]  ;;  %1387 = vst [vmem:[#allocation3 + $0x18] sm:$0xff] %v13628_v9 }
  0x21   : > { %11435 = vmatprep.mubr.msk.f32.mxu0 %vm334_vm1, %v233_v12  ;;  %11822 = vmatprep.subr.mxu0 %v9768_v58  ;;  %v9766_v0 = vld [vmem:[%s18280_s3 + $0x1b8] sm:$0xff]  ;;  %v9765_v4 = vld [vmem:[%s18280_s3 + $0x1b0] sm:$0xff]  ;;  %v270_v5 = vld [vmem:[%s13685_s6 + $0x168] sm:$0xff]  ;;  %1388 = vst [vmem:[#allocation3 + $0x20] sm:$0xff] %v13628_v9 }
  0x22   : > { %11583 = vmatpush3.msra.mxu1 %v1809_v57  ;;  %11823 = vmatpush3.msra.mxu0 %v9768_v58  ;;  %v268_v1 = vld [vmem:[%s13685_s6 + $0x158] sm:$0xff]  ;;  %v1805_v6 = vld [vmem:[%s18280_s3 + $0x28] sm:$0xff]  ;;  %v271_v7 = vld [vmem:[%s13685_s6 + $0x170] sm:$0xff]  ;;  %1389 = vst [vmem:[#allocation3 + $0x28] sm:$0xff] %v13628_v9 }
  0x23   : > { %11584 = vmatprep.subr.mxu1 %v1808_v60  ;;  %11824 = vmatprep.subr.mxu0 %v9767_v62  ;;  %v9764_v8 = vld [vmem:[%s18280_s3 + $0x1a8] sm:$0xff]  ;;  %1390 = vst [vmem:[#allocation3 + $0x30] sm:$0xff] %v13628_v9  ;;  %1392 = vst [vmem:[#allocation3 + $0x40] sm:$0xff] %v13628_v9  ;;  %v1804_v10 = vld [vmem:[%s18280_s3 + $0x20] sm:$0xff] }
  0x24   : > { %11436 = vmatmul.mubr.msk.f32.gmra.mxu0 %vm334_vm1, %v234_v13  ;;  %11585 = vmatpush3.msra.mxu1 %v1808_v60  ;;  %1393 = vst [vmem:[#allocation3 + $0x48] sm:$0xff] %v13628_v9  ;;  %1394 = vst [vmem:[#allocation3 + $0x50] sm:$0xff] %v13628_v9  ;;  %v9763_v11 = vld [vmem:[%s18280_s3 + $0x1a0] sm:$0xff]  ;;  %v272_v12 = vld [vmem:[%s13685_s6 + $0x178] sm:$0xff] }
  0x25   : > { %11438 = vmatprep.mubr.msk.f32.mxu0 %vm334_vm1, %v235_v14  ;;  %11825 = vmatpush3.msra.mxu0 %v9767_v62  ;;  %1395 = vst [vmem:[#allocation3 + $0x58] sm:$0xff] %v13628_v9  ;;  %1396 = vst [vmem:[#allocation3 + $0x60] sm:$0xff] %v13628_v9  ;;  %v273_v13 = vld [vmem:[%s13685_s6 + $0x180] sm:$0xff]  ;;  %v1803_v14 = vld [vmem:[%s18280_s3 + $0x18] sm:$0xff] }
  0x26   : > { %11586 = vmatprep.subr.mxu1 %v1807_v63  ;;  %11826 = vmatprep.subr.mxu0 %v9766_v0  ;;  %1397 = vst [vmem:[#allocation3 + $0x68] sm:$0xff] %v13628_v9  ;;  %1398 = vst [vmem:[#allocation3 + $0x70] sm:$0xff] %v13628_v9  ;;  %v283_v31 = vld [vmem:[%s13685_s6 + $0x1d0] sm:$0xff]  ;;  %v284_v32 = vld [vmem:[%s13685_s6 + $0x1d8] sm:$0xff] }
  0x27   : > { %11587 = vmatpush3.msra.mxu1 %v1807_v63  ;;  %11827 = vmatpush3.msra.mxu0 %v9766_v0  ;;  %1399 = vst [vmem:[#allocation3 + $0x78] sm:$0xff] %v13628_v9  ;;  %1401 = vst [vmem:[#allocation3 + $0x88] sm:$0xff] %v13628_v9  ;;  %v293_v41 = vld [vmem:[%s13685_s6 + $0x220] sm:$0xff]  ;;  %v294_v42 = vld [vmem:[%s13685_s6 + $0x228] sm:$0xff] }
  0x28   : > { %11439 = vmatmul.mubr.msk.f32.gmra.mxu0 %vm334_vm1, %v236_v15  ;;  %11588 = vmatprep.subr.mxu1 %v1806_v3  ;;  %1402 = vst [vmem:[#allocation3 + $0x90] sm:$0xff] %v13628_v9  ;;  %1403 = vst [vmem:[#allocation3 + $0x98] sm:$0xff] %v13628_v9  ;;  %v9762_v15 = vld [vmem:[%s18280_s3 + $0x198] sm:$0xff]  ;;  %v297_v45 = vld [vmem:[%s13685_s6 + $0x240] sm:$0xff] }
  0x29   : > { %11441 = vmatprep.mubr.msk.f32.mxu0 %vm334_vm1, %v237_v16  ;;  %11828 = vmatprep.subr.mxu0 %v9765_v4  ;;  %1404 = vst [vmem:[#allocation3 + $0xa0] sm:$0xff] %v13628_v9  ;;  %1405 = vst [vmem:[#allocation3 + $0xa8] sm:$0xff] %v13628_v9  ;;  %v274_v16 = vld [vmem:[%s13685_s6 + $0x188] sm:$0xff]  ;;  %v296_v44 = vld [vmem:[%s13685_s6 + $0x238] sm:$0xff] }
  0x2a   : > { %1406 = vst [vmem:[#allocation3 + $0xb0] sm:$0xff] %v13628_v9  ;;  %1407 = vst [vmem:[#allocation3 + $0xb8] sm:$0xff] %v13628_v9  ;;  %11589 = vmatpush3.msra.mxu1 %v1806_v3  ;;  %11829 = vmatpush3.msra.mxu0 %v9765_v4  ;;  %v299_v47 = vld [vmem:[%s13685_s6 + $0x250] sm:$0xff]  ;;  %v300_v48 = vld [vmem:[%s13685_s6 + $0x258] sm:$0xff] }
  0x2b   : > { %1408 = vst [vmem:[#allocation3 + $0xc0] sm:$0xff] %v13628_v9  ;;  %1410 = vst [vmem:[#allocation3 + $0xd0] sm:$0xff] %v13628_v9  ;;  %11590 = vmatprep.subr.mxu1 %v1805_v6  ;;  %11830 = vmatprep.subr.mxu0 %v9764_v8  ;;  %v302_v50 = vld [vmem:[%s13685_s6 + $0x268] sm:$0xff]  ;;  %v304_v52 = vld [vmem:[%s13685_s6 + $0x278] sm:$0xff] }
  0x2c   : > { %11442 = vmatmul.mubr.msk.f32.gmra.mxu0 %vm334_vm1, %v238_v17  ;;  %1411 = vst [vmem:[#allocation3 + $0xd8] sm:$0xff] %v13628_v9  ;;  %1412 = vst [vmem:[#allocation3 + $0xe0] sm:$0xff] %v13628_v9  ;;  %11591 = vmatpush3.msra.mxu1 %v1805_v6  ;;  %v1802_v17 = vld [vmem:[%s18280_s3 + $0x10] sm:$0xff]  ;;  %v305_v53 = vld [vmem:[%s13685_s6 + $0x280] sm:$0xff] }
  0x2d   : > { %11444 = vmatprep.mubr.msk.f32.mxu0 %vm334_vm1, %v239_v18  ;;  %1413 = vst [vmem:[#allocation3 + $0xe8] sm:$0xff] %v13628_v9  ;;  %1414 = vst [vmem:[#allocation3 + $0xf0] sm:$0xff] %v13628_v9  ;;  %11831 = vmatpush3.msra.mxu0 %v9764_v8  ;;  %v275_v18 = vld [vmem:[%s13685_s6 + $0x190] sm:$0xff]  ;;  %v306_v54 = vld [vmem:[%s13685_s6 + $0x288] sm:$0xff] }
  0x2e   : > { %1415 = vst [vmem:[#allocation3 + $0xf8] sm:$0xff] %v13628_v9  ;;  %1416 = vst [vmem:[#allocation3 + $0x100] sm:$0xff] %v13628_v9  ;;  %11592 = vmatprep.subr.mxu1 %v1804_v10  ;;  %11832 = vmatprep.subr.mxu0 %v9763_v11  ;;  %v309_v57 = vld [vmem:[%s13685_s6 + $0x2a0] sm:$0xff]  ;;  %v310_v58 = vld [vmem:[%s13685_s6 + $0x2a8] sm:$0xff] }
  0x2f   : > { %1417 = vst [vmem:[#allocation3 + $0x108] sm:$0xff] %v13628_v9  ;;  %1419 = vst [vmem:[#allocation3 + $0x118] sm:$0xff] %v13628_v9  ;;  %11593 = vmatpush3.msra.mxu1 %v1804_v10  ;;  %11833 = vmatpush3.msra.mxu0 %v9763_v11  ;;  %v312_v60 = vld [vmem:[%s13685_s6 + $0x2b8] sm:$0xff]  ;;  %v314_v62 = vld [vmem:[%s13685_s6 + $0x2c8] sm:$0xff] }
  0x30   : > { %11445 = vmatmul.mubr.msk.f32.gmra.mxu0 %vm334_vm1, %v240_v19  ;;  %1420 = vst [vmem:[#allocation3 + $0x120] sm:$0xff] %v13628_v9  ;;  %1421 = vst [vmem:[#allocation3 + $0x128] sm:$0xff] %v13628_v9  ;;  %11594 = vmatprep.subr.mxu1 %v1803_v14  ;;  %v9761_v19 = vld [vmem:[%s18280_s3 + $0x190] sm:$0xff]  ;;  %v316_v0 = vld [vmem:[%s13685_s6 + $0x2d8] sm:$0xff] }
  0x31   : > { %11447 = vmatprep.mubr.msk.f32.mxu0 %vm334_vm1, %v241_v20  ;;  %1422 = vst [vmem:[#allocation3 + $0x130] sm:$0xff] %v13628_v9  ;;  %1423 = vst [vmem:[#allocation3 + $0x138] sm:$0xff] %v13628_v9  ;;  %11834 = vmatprep.subr.mxu0 %v9762_v15  ;;  %v1801_v20 = vld [vmem:[%s18280_s3 + $0x8] sm:$0xff]  ;;  %v315_v63 = vld [vmem:[%s13685_s6 + $0x2d0] sm:$0xff] }
  0x32   : > { %1424 = vst [vmem:[#allocation3 + $0x140] sm:$0xff] %v13628_v9  ;;  %11595 = vmatpush3.msra.mxu1 %v1803_v14  ;;  %11835 = vmatpush3.msra.mxu0 %v9762_v15  ;;  %v319_v3 = vld [vmem:[%s13685_s6 + $0x2f0] sm:$0xff]  ;;  %v320_v4 = vld [vmem:[%s13685_s6 + $0x2f8] sm:$0xff]  ;;  %v322_v6 = vld [vmem:[%s13685_s6 + $0x308] sm:$0xff] }
  0x33   : > { %11596 = vmatprep.subr.mxu1 %v1802_v17  ;;  %11836 = vmatprep.subr.mxu0 %v9761_v19  ;;  %v2685_v8 = vld [vmem:[#allocation3 + $0x3] sm:$0xff]  ;;  %v2686_v11 = vld [vmem:[#allocation3 + $0xb] sm:$0xff] }
  0x34   : > { %11448 = vmatmul.mubr.msk.f32.gmra.mxu0 %vm334_vm1, %v242_v21  ;;  %v9760_v21 = vld [vmem:[%s18280_s3 + $0x188] sm:$0xff]  ;;  %11597 = vmatpush3.msra.mxu1 %v1802_v17 }
  0x35   : > { %11450 = vmatprep.mubr.msk.f32.mxu0 %vm334_vm1, %v243_v22  ;;  %v276_v22 = vld [vmem:[%s13685_s6 + $0x198] sm:$0xff]  ;;  %11837 = vmatpush3.msra.mxu0 %v9761_v19  ;;  %v2688_v19 = vld [vmem:[#allocation3 + $0x1b] sm:$0xff] }
  0x36   : > { %11598 = vmatprep.subr.mxu1 %v1801_v20  ;;  %11838 = vmatprep.subr.mxu0 %v9760_v21 }
  0x37   : > { %11599 = vmatpush3.msra.mxu1 %v1801_v20  ;;  %11839 = vmatpush3.msra.mxu0 %v9760_v21 }
  0x38   : > { %11451 = vmatmul.mubr.msk.f32.gmra.mxu0 %vm334_vm1, %v244_v23  ;;  %v277_v23 = vld [vmem:[%s13685_s6 + $0x1a0] sm:$0xff]  ;;  %11602 = vmatprep.mubr.f32.mxu1 %v13628_v9 }
  0x39   : > { %11453 = vmatprep.mubr.msk.f32.mxu0 %vm334_vm1, %v245_v24  ;;  %v1800_v24 = vld [vmem:[%s18280_s3] sm:$0xff] }
  0x3a   : > { %11600 = vmatprep.subr.mxu1 %v1800_v24 }
  0x3b   : > { %11601 = vmatpush3.msra.mxu1 %v1800_v24 }
  0x3c   : > { %11454 = vmatmul.mubr.msk.f32.gmra.mxu0 %vm334_vm1, %v246_v25  ;;  %v9759_v25 = vld [vmem:[%s18280_s3 + $0x180] sm:$0xff]  ;;  %11603 = vmatmul.mubr.f32.vlgmr.msra.gmra.mxu1 %v13628_v9 }
  0x3d   : > { %11456 = vmatprep.mubr.msk.f32.mxu0 %vm334_vm1, %v247_v26  ;;  %v278_v26 = vld [vmem:[%s13685_s6 + $0x1a8] sm:$0xff]  ;;  %11840 = vmatprep.subr.mxu0 %v9759_v25 }
  0x3e   : > { %11841 = vmatpush3.msra.mxu0 %v9759_v25  ;;  %11605 = vmatprep.mubr.f32.mxu1 %v13628_v9 }
  0x40   : > { %11457 = vmatmul.mubr.msk.f32.gmra.mxu0 %vm334_vm1, %v248_v27  ;;  %v279_v27 = vld [vmem:[%s13685_s6 + $0x1b0] sm:$0xff]  ;;  %11606 = vmatmul.mubr.f32.gmra.mxu1 %v13628_v9 }
  0x41   : > { %11459 = vmatprep.mubr.msk.f32.mxu0 %vm334_vm1, %v249_v28  ;;  %v280_v28 = vld [vmem:[%s13685_s6 + $0x1b8] sm:$0xff] }
  0x44   : > { %11460 = vmatmul.mubr.msk.f32.gmra.mxu0 %vm334_vm1, %v250_v29  ;;  %v281_v29 = vld [vmem:[%s13685_s6 + $0x1c0] sm:$0xff] }
  0x45   : > { %11462 = vmatprep.mubr.msk.f32.mxu0 %vm334_vm1, %v251_v30  ;;  %v282_v30 = vld [vmem:[%s13685_s6 + $0x1c8] sm:$0xff] }
  0x48   : > { %11463 = vmatmul.mubr.msk.f32.gmra.mxu0 %vm334_vm1, %v252_v33  ;;  %v285_v33 = vld [vmem:[%s13685_s6 + $0x1e0] sm:$0xff] }
  0x49   : > { %11465 = vmatprep.mubr.msk.f32.mxu0 %vm334_vm1, %v253_v34  ;;  %v286_v34 = vld [vmem:[%s13685_s6 + $0x1e8] sm:$0xff] }
  0x4c   : > { %11466 = vmatmul.mubr.msk.f32.gmra.mxu0 %vm334_vm1, %v254_v35  ;;  %v287_v35 = vld [vmem:[%s13685_s6 + $0x1f0] sm:$0xff] }
  0x4d   : > { %11468 = vmatprep.mubr.msk.f32.mxu0 %vm334_vm1, %v255_v36  ;;  %v288_v36 = vld [vmem:[%s13685_s6 + $0x1f8] sm:$0xff] }
  0x50   : > { %11469 = vmatmul.mubr.msk.f32.gmra.mxu0 %vm334_vm1, %v256_v37  ;;  %v289_v37 = vld [vmem:[%s13685_s6 + $0x200] sm:$0xff] }
  0x51   : > { %11471 = vmatprep.mubr.msk.f32.mxu0 %vm334_vm1, %v257_v38  ;;  %v290_v38 = vld [vmem:[%s13685_s6 + $0x208] sm:$0xff] }
  0x54   : > { %11472 = vmatmul.mubr.msk.f32.gmra.mxu0 %vm334_vm1, %v258_v39  ;;  %v291_v39 = vld [vmem:[%s13685_s6 + $0x210] sm:$0xff] }
  0x55   : > { %11474 = vmatprep.mubr.msk.f32.mxu0 %vm334_vm1, %v259_v40  ;;  %v292_v40 = vld [vmem:[%s13685_s6 + $0x218] sm:$0xff] }
  0x58   : > { %11475 = vmatmul.mubr.msk.f32.gmra.mxu0 %vm334_vm1, %v260_v43  ;;  %v295_v43 = vld [vmem:[%s13685_s6 + $0x230] sm:$0xff] }
  0x59   : > { %11477 = vmatprep.mubr.msk.f32.mxu0 %vm334_vm1, %v261_v46  ;;  %v298_v46 = vld [vmem:[%s13685_s6 + $0x248] sm:$0xff] }
  0x5c   : > { %11478 = vmatmul.mubr.msk.f32.gmra.mxu0 %vm334_vm1, %v262_v49  ;;  %v301_v49 = vld [vmem:[%s13685_s6 + $0x260] sm:$0xff] }
  0x5d   : > { %11480 = vmatprep.mubr.msk.f32.mxu0 %vm334_vm1, %v263_v51  ;;  %v303_v51 = vld [vmem:[%s13685_s6 + $0x270] sm:$0xff] }
  0x60   : > { %11481 = vmatmul.mubr.msk.f32.gmra.mxu0 %vm334_vm1, %v264_v55  ;;  %v307_v55 = vld [vmem:[%s13685_s6 + $0x290] sm:$0xff] }
  0x61   : > { %11483 = vmatprep.mubr.msk.f32.mxu0 %vm334_vm1, %v265_v56  ;;  %v308_v56 = vld [vmem:[%s13685_s6 + $0x298] sm:$0xff] }
  0x64   : > { %11484 = vmatmul.mubr.msk.f32.gmra.mxu0 %vm334_vm1, %v266_v59  ;;  %v311_v59 = vld [vmem:[%s13685_s6 + $0x2b0] sm:$0xff] }
  0x65   : > { %11486 = vmatprep.mubr.msk.f32.mxu0 %vm334_vm1, %v267_v61  ;;  %v313_v61 = vld [vmem:[%s13685_s6 + $0x2c0] sm:$0xff] }
  0x68   : > { %11487 = vmatmul.mubr.msk.f32.gmra.mxu0 %vm334_vm1, %v268_v1  ;;  %v317_v1 = vld [vmem:[%s13685_s6 + $0x2e0] sm:$0xff] }
  0x69   : > { %11489 = vmatprep.mubr.msk.f32.mxu0 %vm334_vm1, %v269_v2  ;;  %v318_v2 = vld [vmem:[%s13685_s6 + $0x2e8] sm:$0xff] }
  0x6c   : > { %11490 = vmatmul.mubr.msk.f32.gmra.mxu0 %vm334_vm1, %v270_v5  ;;  %v321_v5 = vld [vmem:[%s13685_s6 + $0x300] sm:$0xff] }
  0x6d   : > { %11492 = vmatprep.mubr.msk.f32.mxu0 %vm334_vm1, %v271_v7  ;;  %v14022_v7 = vld [vmem:[%s18279_s2] ss:$0 sm:$0xff] }
  0x70   : > { %11493 = vmatmul.mubr.msk.f32.gmra.mxu0 %vm334_vm1, %v272_v12 }
  0x71   : > { %11495 = vmatprep.mubr.msk.f32.mxu0 %vm334_vm1, %v273_v13  ;;  %v2687_v13 = vld [vmem:[#allocation3 + $0x13] sm:$0xff] }
  0x74   : > { %11496 = vmatmul.mubr.msk.f32.gmra.mxu0 %vm334_vm1, %v274_v16 }
  0x75   : > { %11498 = vmatprep.mubr.msk.f32.mxu0 %vm334_vm1, %v275_v18 }
  0x78   : > { %11499 = vmatmul.mubr.msk.f32.gmra.mxu0 %vm334_vm1, %v276_v22 }
  0x79   : > { %11501 = vmatprep.mubr.msk.f32.mxu0 %vm334_vm1, %v277_v23 }
  0x7c   : > { %11502 = vmatmul.mubr.msk.f32.gmra.mxu0 %vm334_vm1, %v278_v26 }
  0x7d   : > { %11504 = vmatprep.mubr.msk.f32.mxu0 %vm334_vm1, %v279_v27 }
  0x80   : > { %11505 = vmatmul.mubr.msk.f32.gmra.mxu0 %vm334_vm1, %v280_v28 }
  0x81   : > { %11507 = vmatprep.mubr.msk.f32.mxu0 %vm334_vm1, %v281_v29 }
  0x84   : > { %11508 = vmatmul.mubr.msk.f32.gmra.mxu0 %vm334_vm1, %v282_v30 }
  0x85   : > { %11510 = vmatprep.mubr.msk.f32.mxu0 %vm334_vm1, %v283_v31 }
  0x88   : > { %11511 = vmatmul.mubr.msk.f32.gmra.mxu0 %vm334_vm1, %v284_v32 }
  0x89   : > { %11513 = vmatprep.mubr.msk.f32.mxu0 %vm334_vm1, %v285_v33 }
  0x8c   : > { %11514 = vmatmul.mubr.msk.f32.gmra.mxu0 %vm334_vm1, %v286_v34 }
  0x8d   : > { %11516 = vmatprep.mubr.msk.f32.mxu0 %vm334_vm1, %v287_v35 }
  0x90   : > { %11517 = vmatmul.mubr.msk.f32.gmra.mxu0 %vm334_vm1, %v288_v36 }
  0x91   : > { %11519 = vmatprep.mubr.msk.f32.mxu0 %vm334_vm1, %v289_v37 }
  0x94   : > { %11520 = vmatmul.mubr.msk.f32.gmra.mxu0 %vm334_vm1, %v290_v38 }
  0x95   : > { %11522 = vmatprep.mubr.msk.f32.mxu0 %vm334_vm1, %v291_v39 }
  0x98   : > { %11523 = vmatmul.mubr.msk.f32.gmra.mxu0 %vm334_vm1, %v292_v40 }
  0x99   : > { %11525 = vmatprep.mubr.msk.f32.mxu0 %vm334_vm1, %v293_v41  ;;  %v9742_v41 = vld [vmem:[%s18280_s3 + $0xf8] sm:$0xff] }
  0x9a   : > { %11650 = vmatprep.subr.mxu1 %v9742_v41 }
  0x9b   : > { %11651 = vmatpush3.msra.mxu1 %v9742_v41 }
  0x9c   : > { %11526 = vmatmul.mubr.msk.f32.gmra.mxu0 %vm334_vm1, %v294_v42 }
  0x9d   : > { %11528 = vmatprep.mubr.msk.f32.mxu0 %vm334_vm1, %v295_v43 }
  0xa0   : > { %11529 = vmatmul.mubr.msk.f32.gmra.mxu0 %vm334_vm1, %v296_v44 }
  0xa1   : > { %11531 = vmatprep.mubr.msk.f32.mxu0 %vm334_vm1, %v297_v45 }
  0xa4   : > { %11532 = vmatmul.mubr.msk.f32.gmra.mxu0 %vm334_vm1, %v298_v46 }
  0xa5   : > { %11534 = vmatprep.mubr.msk.f32.mxu0 %vm334_vm1, %v299_v47 }
  0xa8   : > { %11535 = vmatmul.mubr.msk.f32.gmra.mxu0 %vm334_vm1, %v300_v48 }
  0xa9   : > { %11537 = vmatprep.mubr.msk.f32.mxu0 %vm334_vm1, %v301_v49 }
  0xac   : > { %11538 = vmatmul.mubr.msk.f32.gmra.mxu0 %vm334_vm1, %v302_v50 }
  0xad   : > { %11540 = vmatprep.mubr.msk.f32.mxu0 %vm334_vm1, %v303_v51 }
  0xb0   : > { %11541 = vmatmul.mubr.msk.f32.gmra.mxu0 %vm334_vm1, %v304_v52 }
  0xb1   : > { %11543 = vmatprep.mubr.msk.f32.mxu0 %vm334_vm1, %v305_v53 }
  0xb4   : > { %11544 = vmatmul.mubr.msk.f32.gmra.mxu0 %vm334_vm1, %v306_v54 }
  0xb5   : > { %11546 = vmatprep.mubr.msk.f32.mxu0 %vm334_vm1, %v307_v55 }
  0xb8   : > { %11547 = vmatmul.mubr.msk.f32.gmra.mxu0 %vm334_vm1, %v308_v56 }
  0xb9   : > { %11549 = vmatprep.mubr.msk.f32.mxu0 %vm334_vm1, %v309_v57  ;;  %v9741_v57 = vld [vmem:[%s18280_s3 + $0xf0] sm:$0xff] }
  0xba   : > { %11652 = vmatprep.subr.mxu1 %v9741_v57 }
  0xbb   : > { %11653 = vmatpush3.msra.mxu1 %v9741_v57 }
  0xbc   : > { %11550 = vmatmul.mubr.msk.f32.gmra.mxu0 %vm334_vm1, %v310_v58 }
  0xbd   : > { %11552 = vmatprep.mubr.msk.f32.mxu0 %vm334_vm1, %v311_v59 }
  0xc0   : > { %11553 = vmatmul.mubr.msk.f32.gmra.mxu0 %vm334_vm1, %v312_v60 }
  0xc1   : > { %11555 = vmatprep.mubr.msk.f32.mxu0 %vm334_vm1, %v313_v61 }
  0xc4   : > { %11556 = vmatmul.mubr.msk.f32.gmra.mxu0 %vm334_vm1, %v314_v62 }
  0xc5   : > { %11558 = vmatprep.mubr.msk.f32.mxu0 %vm334_vm1, %v315_v63 }
  0xc8   : > { %11559 = vmatmul.mubr.msk.f32.gmra.mxu0 %vm334_vm1, %v316_v0 }
  0xc9   : > { %11561 = vmatprep.mubr.msk.f32.mxu0 %vm334_vm1, %v317_v1 }
  0xcc   : > { %11562 = vmatmul.mubr.msk.f32.gmra.mxu0 %vm334_vm1, %v318_v2 }
  0xcd   : > { %11564 = vmatprep.mubr.msk.f32.mxu0 %vm334_vm1, %v319_v3 }
  0xd0   : > { %11565 = vmatmul.mubr.msk.f32.gmra.mxu0 %vm334_vm1, %v320_v4  ;;  %v9740_v4 = vld [vmem:[%s18280_s3 + $0xe8] sm:$0xff] }
  0xd1   : > { %11567 = vmatprep.mubr.msk.f32.mxu0 %vm334_vm1, %v321_v5  ;;  %11654 = vmatprep.subr.mxu1 %v9740_v4 }
  0xd2   : > { %11655 = vmatpush3.msra.mxu1 %v9740_v4 }
  0xd4   : > { %v11425_v9 = vpop.f32.mrf.mxu0  ;;  %11568 = vmatmul.mubr.msk.f32.gmra.mxu0 %vm334_vm1, %v322_v6 }
  0xd5   : > { %v705_v10 = vadd.f32 %v11425_v9, %v14022_v7  ;;  %11842 = vmatprep.mubr.f32.mxu0 %v2685_v8 }
  0xd6   : > { %v699_v12 = vpop.f32.mrf.mxu0 }
  0xd7   : > { %v1189_v14 = vmax.f32 %v705_v10, 0.0  ;;  %v700_v15 = vadd.f32 %v14022_v7, %v699_v12 }
  0xd8   : > { %v11428_v16 = vpop.f32.mrf.mxu0  ;;  %11843 = vmatmul.mubr.f32.vlgmr.msra.gmra.mxu0 %v2686_v11 }
  0xd9   : > { %1287 = vst [vmem:[#allocation2 + $0x8] sm:$0xff] %v1189_v14  ;;  %v1188_v17 = vmax.f32 %v700_v15, 0.0  ;;  %v715_v18 = vadd.f32 %v11428_v16, %v14022_v7  ;;  %11845 = vmatprep.mubr.f32.mxu0 %v2687_v13  ;;  %v9739_v13 = vld [vmem:[%s18280_s3 + $0xe0] sm:$0xff] }
  0xda   : > { %v709_v20 = vpop.f32.mrf.mxu0  ;;  %11656 = vmatprep.subr.mxu1 %v9739_v13 }
  0xdb   : > { %1286 = vst [vmem:[#allocation2] sm:$0xff] %v1188_v17  ;;  %v1191_v21 = vmax.f32 %v715_v18, 0.0  ;;  %v710_v22 = vadd.f32 %v14022_v7, %v709_v20  ;;  %11657 = vmatpush3.msra.mxu1 %v9739_v13 }
  0xdc   : > { %v11431_v23 = vpop.f32.mrf.mxu0  ;;  %11846 = vmatmul.mubr.f32.gmra.mxu0 %v2688_v19 }
  0xdd   : > { %1289 = vst [vmem:[#allocation2 + $0x18] sm:$0xff] %v1191_v21  ;;  %v1190_v24 = vmax.f32 %v710_v22, 0.0  ;;  %v725_v25 = vadd.f32 %v11431_v23, %v14022_v7 }
  0xde   : > { %v719_v26 = vpop.f32.mrf.mxu0 }
  0xdf   : > { %1288 = vst [vmem:[#allocation2 + $0x10] sm:$0xff] %v1190_v24  ;;  %v1193_v27 = vmax.f32 %v725_v25, 0.0  ;;  %v720_v28 = vadd.f32 %v14022_v7, %v719_v26 }
  0xe0   : > { %v11434_v29 = vpop.f32.mrf.mxu0 }
  0xe1   : > { %1291 = vst [vmem:[#allocation2 + $0x28] sm:$0xff] %v1193_v27  ;;  %v1192_v30 = vmax.f32 %v720_v28, 0.0  ;;  %v735_v31 = vadd.f32 %v11434_v29, %v14022_v7 }
  0xe2   : > { %v729_v32 = vpop.f32.mrf.mxu0  ;;  %v1425_v42 = vld [vmem:[#allocation2] ss:$2 sm:$0xff]  ;;  %v1429_v43 = vld [vmem:[#allocation2 + $0x1] ss:$2 sm:$0xff] }
  0xe3   : > { %1290 = vst [vmem:[#allocation2 + $0x20] sm:$0xff] %v1192_v30  ;;  %v1195_v33 = vmax.f32 %v735_v31, 0.0  ;;  %v730_v34 = vadd.f32 %v14022_v7, %v729_v32  ;;  %v1440_v50 = vmax.f32 %v1425_v42, %v1429_v43 }
  0xe4   : > { %v11437_v35 = vpop.f32.mrf.mxu0 }
  0xe5   : > { %1293 = vst [vmem:[#allocation2 + $0x38] sm:$0xff] %v1195_v33  ;;  %v1194_v36 = vmax.f32 %v730_v34, 0.0  ;;  %v745_v37 = vadd.f32 %v11437_v35, %v14022_v7 }
  0xe6   : > { %v739_v38 = vpop.f32.mrf.mxu0  ;;  %v1427_v51 = vld [vmem:[#allocation2 + $0x10] ss:$2 sm:$0x3f]  ;;  %v1431_v55 = vld [vmem:[#allocation2 + $0x11] ss:$2 sm:$0x3f] }
  0xe7   : > { %1292 = vst [vmem:[#allocation2 + $0x30] sm:$0xff] %v1194_v36  ;;  %v1197_v39 = vmax.f32 %v745_v37, 0.0  ;;  %v740_v40 = vadd.f32 %v14022_v7, %v739_v38  ;;  %v1441_v0 = vmax.f32 %v1427_v51, %v1431_v55 }
  0xe8   : > { %v11440_v44 = vpop.f32.mrf.mxu0 }
  0xe9   : > { %1295 = vst [vmem:[#allocation2 + $0x48] sm:$0xff] %v1197_v39  ;;  %v1196_v45 = vmax.f32 %v740_v40, 0.0  ;;  %v755_v46 = vadd.f32 %v11440_v44, %v14022_v7  ;;  %v9738_v44 = vld [vmem:[%s18280_s3 + $0xd8] sm:$0xff] }
  0xea   : > { %v1433_v47 = vld [vmem:[#allocation2 + $0x1c] ss:$2 sm:$0xff]  ;;  %v1437_v48 = vld [vmem:[#allocation2 + $0x1d] ss:$2 sm:$0xff]  ;;  %v749_v49 = vpop.f32.mrf.mxu0  ;;  %11658 = vmatprep.subr.mxu1 %v9738_v44 }
  0xeb   : > { %v1442_v52 = vmax.f32 %v1433_v47, %v1437_v48  ;;  %1294 = vst [vmem:[#allocation2 + $0x40] sm:$0xff] %v1196_v45  ;;  %v1199_v53 = vmax.f32 %v755_v46, 0.0  ;;  %v750_v54 = vadd.f32 %v14022_v7, %v749_v49  ;;  %v9737_v47 = vld [vmem:[%s18280_s3 + $0xd0] sm:$0xff]  ;;  %11659 = vmatpush3.msra.mxu1 %v9738_v44 }
  0xec   : > { %v11443_v56 = vpop.f32.mrf.mxu0  ;;  %11660 = vmatprep.subr.mxu1 %v9737_v47 }
  0xed   : > { %v1444_v58 = vmax.f32 %v1440_v50, %v1442_v52  ;;  %1297 = vst [vmem:[#allocation2 + $0x58] sm:$0xff] %v1199_v53  ;;  %v1198_v59 = vmax.f32 %v750_v54, 0.0  ;;  %v765_v60 = vadd.f32 %v11443_v56, %v14022_v7  ;;  %v9736_v53 = vld [vmem:[%s18280_s3 + $0xc8] sm:$0xff]  ;;  %11661 = vmatpush3.msra.mxu1 %v9737_v47 }
  0xee   : > { %v1435_v61 = vld [vmem:[#allocation2 + $0x2c] ss:$2 sm:$0x3f]  ;;  %v1439_v62 = vld [vmem:[#allocation2 + $0x2d] ss:$2 sm:$0x3f]  ;;  %v759_v63 = vpop.f32.mrf.mxu0  ;;  %11662 = vmatprep.subr.mxu1 %v9736_v53 }
  0xef   : > { %v1443_v1 = vmax.f32 %v1435_v61, %v1439_v62  ;;  %1296 = vst [vmem:[#allocation2 + $0x50] sm:$0xff] %v1198_v59  ;;  %v1201_v2 = vmax.f32 %v765_v60, 0.0  ;;  %v760_v3 = vadd.f32 %v14022_v7, %v759_v63  ;;  %1446 = vst [vmem:[#allocation3 + $0x26] sm:$0xff] %v1444_v58  ;;  %11663 = vmatpush3.msra.mxu1 %v9736_v53  ;;  %v9735_v60 = vld [vmem:[%s18280_s3 + $0xc0] sm:$0xff] }
  0xf0   : > { %v11446_v5 = vpop.f32.mrf.mxu0  ;;  %11664 = vmatprep.subr.mxu1 %v9735_v60  ;;  %v9731_v53 = vld [vmem:[%s18280_s3 + $0xa0] sm:$0xff] }
  0xf1   : > { %v1445_v6 = vmax.f32 %v1441_v0, %v1443_v1  ;;  %1299 = vst [vmem:[#allocation2 + $0x68] sm:$0xff] %v1201_v2  ;;  %v1200_v8 = vmax.f32 %v760_v3, 0.0  ;;  %v775_v9 = vadd.f32 %v11446_v5, %v14022_v7  ;;  %v9806_v0 = vld [vmem:[%s18280_s3 + $0x2f8] sm:$0xff]  ;;  %11665 = vmatpush3.msra.mxu1 %v9735_v60 }
  0xf2   : > { %v769_v10 = vpop.f32.mrf.mxu0  ;;  %v1449_v22 = vld [vmem:[#allocation2 + $0x38] ss:$2 sm:$0xff]  ;;  %v1453_v25 = vld [vmem:[#allocation2 + $0x39] ss:$2 sm:$0xff]  ;;  %11970 = vmatprep.subr.mxu0 %v9806_v0 }
  0xf3   : > { %1298 = vst [vmem:[#allocation2 + $0x60] sm:$0xff] %v1200_v8  ;;  %v1203_v11 = vmax.f32 %v775_v9, 0.0  ;;  %1447 = vst [vmem:[#allocation3 + $0x2e] sm:$0x3f] %v1445_v6  ;;  %v770_v12 = vadd.f32 %v14022_v7, %v769_v10  ;;  %v1464_v37 = vmax.f32 %v1449_v22, %v1453_v25  ;;  %11971 = vmatpush3.msra.mxu0 %v9806_v0  ;;  %v9805_v8 = vld [vmem:[%s18280_s3 + $0x2f0] sm:$0xff] }
  0xf4   : > { %v11449_v14 = vpop.f32.mrf.mxu0  ;;  %11972 = vmatprep.subr.mxu0 %v9805_v8 }
  0xf5   : > { %1301 = vst [vmem:[#allocation2 + $0x78] sm:$0xff] %v1203_v11  ;;  %v1202_v15 = vmax.f32 %v770_v12, 0.0  ;;  %v785_v16 = vadd.f32 %v11449_v14, %v14022_v7  ;;  %11973 = vmatpush3.msra.mxu0 %v9805_v8 }
  0xf6   : > { %v779_v17 = vpop.f32.mrf.mxu0  ;;  %v1772_v20 = vld [vmem:[#allocation3 + $0x20] sm:$0xff] }
  0xf7   : > { %1300 = vst [vmem:[#allocation2 + $0x70] sm:$0xff] %v1202_v15  ;;  %v1205_v18 = vmax.f32 %v785_v16, 0.0  ;;  %v780_v19 = vadd.f32 %v14022_v7, %v779_v17  ;;  %v2689_v21 = vld [vmem:[#allocation3 + $0x23] sm:$0xff]  ;;  %v1451_v23 = vld [vmem:[#allocation2 + $0x48] ss:$2 sm:$0x3f]  ;;  %11608 = vmatprep.mubr.f32.mxu1 %v1772_v20 }
  0xf8   : > { %11848 = vmatprep.mubr.f32.mxu0 %v2689_v21  ;;  %v11452_v24 = vpop.f32.mrf.mxu0  ;;  %v1455_v26 = vld [vmem:[#allocation2 + $0x49] ss:$2 sm:$0x3f] }
  0xf9   : > { %1303 = vst [vmem:[#allocation2 + $0x88] sm:$0xff] %v1205_v18  ;;  %v1204_v27 = vmax.f32 %v780_v19, 0.0  ;;  %v795_v28 = vadd.f32 %v11452_v24, %v14022_v7  ;;  %v1465_v38 = vmax.f32 %v1451_v23, %v1455_v26  ;;  %v9804_v18 = vld [vmem:[%s18280_s3 + $0x2e8] sm:$0xff] }
  0xfa   : > { %v1457_v29 = vld [vmem:[#allocation2 + $0x54] ss:$2 sm:$0xff]  ;;  %v1459_v30 = vld [vmem:[#allocation2 + $0x64] ss:$2 sm:$0x3f]  ;;  %v789_v31 = vpop.f32.mrf.mxu0  ;;  %11974 = vmatprep.subr.mxu0 %v9804_v18 }
  0xfb   : > { %v1773_v32 = vld [vmem:[#allocation3 + $0x28] sm:$0xff]  ;;  %v1463_v34 = vld [vmem:[#allocation2 + $0x65] ss:$2 sm:$0x3f]  ;;  %1302 = vst [vmem:[#allocation2 + $0x80] sm:$0xff] %v1204_v27  ;;  %v1207_v35 = vmax.f32 %v795_v28, 0.0  ;;  %v790_v36 = vadd.f32 %v14022_v7, %v789_v31  ;;  %11975 = vmatpush3.msra.mxu0 %v9804_v18 }
  0xfc   : > { %v1461_v33 = vld [vmem:[#allocation2 + $0x55] ss:$2 sm:$0xff]  ;;  %11609 = vmatmul.mubr.f32.gmra.mxu1 %v1773_v32  ;;  %v1467_v40 = vmax.f32 %v1459_v30, %v1463_v34  ;;  %v11455_v42 = vpop.f32.mrf.mxu0 }
  0xfd   : > { %v1466_v39 = vmax.f32 %v1457_v29, %v1461_v33  ;;  %v2690_v41 = vld [vmem:[#allocation3 + $0x2b] sm:$0xff]  ;;  %1305 = vst [vmem:[#allocation2 + $0x98] sm:$0xff] %v1207_v35  ;;  %v1206_v45 = vmax.f32 %v790_v36, 0.0  ;;  %v805_v46 = vadd.f32 %v11455_v42, %v14022_v7  ;;  %v9733_v32 = vld [vmem:[%s18280_s3 + $0xb0] sm:$0xff] }
  0xfe   : > { %v1774_v43 = vld [vmem:[#allocation3 + $0x30] sm:$0xff]  ;;  %11849 = vmatmul.mubr.f32.gmra.mxu0 %v2690_v41  ;;  %v799_v48 = vpop.f32.mrf.mxu0  ;;  %v1469_v50 = vmax.f32 %v1465_v38, %v1467_v40  ;;  %v1473_v61 = vld [vmem:[#allocation2 + $0x70] ss:$2 sm:$0xff]  ;;  %v1477_v62 = vld [vmem:[#allocation2 + $0x71] ss:$2 sm:$0xff] }
  0xff   : > { %11611 = vmatprep.mubr.f32.mxu1 %v1774_v43  ;;  %v1468_v49 = vmax.f32 %v1464_v37, %v1466_v39  ;;  %1304 = vst [vmem:[#allocation2 + $0x90] sm:$0xff] %v1206_v45  ;;  %v1209_v51 = vmax.f32 %v805_v46, 0.0  ;;  %v800_v52 = vadd.f32 %v14022_v7, %v799_v48  ;;  %v1488_v9 = vmax.f32 %v1473_v61, %v1477_v62  ;;  %v9803_v29 = vld [vmem:[%s18280_s3 + $0x2e0] sm:$0xff]  ;;  %v9734_v31 = vld [vmem:[%s18280_s3 + $0xb8] sm:$0xff]  ;;  %v9801_v38 = vld [vmem:[%s18280_s3 + $0x2d0] sm:$0xff] }
 0x100   : > { %v11458_v54 = vpop.f32.mrf.mxu0  ;;  %1471 = vst [vmem:[#allocation3 + $0x40] sm:$0x3f] %v1469_v50  ;;  %v9802_v33 = vld [vmem:[%s18280_s3 + $0x2d8] sm:$0xff]  ;;  %11666 = vmatprep.subr.mxu1 %v9734_v31  ;;  %11976 = vmatprep.subr.mxu0 %v9803_v29  ;;  %v9732_v41 = vld [vmem:[%s18280_s3 + $0xa8] sm:$0xff] }
 0x101   : > { %1470 = vst [vmem:[#allocation3 + $0x38] sm:$0xff] %v1468_v49  ;;  %11612 = vmatmul.mubr.f32.gmra.mxu1 %v1468_v49  ;;  %1307 = vst [vmem:[#allocation2 + $0xa8] sm:$0xff] %v1209_v51  ;;  %v1208_v55 = vmax.f32 %v800_v52, 0.0  ;;  %v815_v56 = vadd.f32 %v11458_v54, %v14022_v7  ;;  %11977 = vmatpush3.msra.mxu0 %v9803_v29  ;;  %v9800_v43 = vld [vmem:[%s18280_s3 + $0x2c8] sm:$0xff] }
 0x102   : > { %v809_v57 = vpop.f32.mrf.mxu0  ;;  %v1475_v3 = vld [vmem:[#allocation2 + $0x80] ss:$2 sm:$0x3f]  ;;  %v1479_v16 = vld [vmem:[#allocation2 + $0x81] ss:$2 sm:$0x3f]  ;;  %11667 = vmatpush3.msra.mxu1 %v9734_v31  ;;  %11978 = vmatprep.subr.mxu0 %v9802_v33 }
 0x103   : > { %1306 = vst [vmem:[#allocation2 + $0xa0] sm:$0xff] %v1208_v55  ;;  %v1211_v58 = vmax.f32 %v815_v56, 0.0  ;;  %v810_v59 = vadd.f32 %v14022_v7, %v809_v57  ;;  %v1489_v25 = vmax.f32 %v1475_v3, %v1479_v16  ;;  %11668 = vmatprep.subr.mxu1 %v9733_v32  ;;  %11979 = vmatpush3.msra.mxu0 %v9802_v33  ;;  %v9730_v56 = vld [vmem:[%s18280_s3 + $0x98] sm:$0xff]  ;;  %v9799_v57 = vld [vmem:[%s18280_s3 + $0x2c0] sm:$0xff] }
 0x104   : > { %v11461_v63 = vpop.f32.mrf.mxu0  ;;  %11669 = vmatpush3.msra.mxu1 %v9733_v32  ;;  %11980 = vmatprep.subr.mxu0 %v9801_v38  ;;  %v9795_v31 = vld [vmem:[%s18280_s3 + $0x2a0] sm:$0xff] }
 0x105   : > { %1309 = vst [vmem:[#allocation2 + $0xb8] sm:$0xff] %v1211_v58  ;;  %v1210_v1 = vmax.f32 %v810_v59, 0.0  ;;  %v825_v2 = vadd.f32 %v11461_v63, %v14022_v7  ;;  %11670 = vmatprep.subr.mxu1 %v9732_v41  ;;  %11981 = vmatpush3.msra.mxu0 %v9801_v38 }
 0x106   : > { %v1481_v4 = vld [vmem:[#allocation2 + $0x8c] ss:$2 sm:$0xff]  ;;  %v1485_v5 = vld [vmem:[#allocation2 + $0x8d] ss:$2 sm:$0xff]  ;;  %v819_v6 = vpop.f32.mrf.mxu0  ;;  %11671 = vmatpush3.msra.mxu1 %v9732_v41  ;;  %11982 = vmatprep.subr.mxu0 %v9800_v43 }
 0x107   : > { %v1490_v10 = vmax.f32 %v1481_v4, %v1485_v5  ;;  %1308 = vst [vmem:[#allocation2 + $0xb0] sm:$0xff] %v1210_v1  ;;  %v1213_v11 = vmax.f32 %v825_v2, 0.0  ;;  %v820_v12 = vadd.f32 %v14022_v7, %v819_v6  ;;  %v1776_v14 = vld [vmem:[#allocation3 + $0x40] sm:$0xff]  ;;  %11672 = vmatprep.subr.mxu1 %v9731_v53  ;;  %11983 = vmatpush3.msra.mxu0 %v9800_v43  ;;  %v9798_v1 = vld [vmem:[%s18280_s3 + $0x2b8] sm:$0xff] }
 0x108   : > { %v2691_v13 = vld [vmem:[#allocation3 + $0x33] sm:$0xff]  ;;  %v2692_v15 = vld [vmem:[#allocation3 + $0x3b] sm:$0xff]  ;;  %v11464_v17 = vpop.f32.mrf.mxu0  ;;  %11614 = vmatprep.mubr.f32.mxu1 %v1776_v14  ;;  %11673 = vmatpush3.msra.mxu1 %v9731_v53 }
 0x109   : > { %11851 = vmatprep.mubr.f32.mxu0 %v2691_v13  ;;  %v1492_v19 = vmax.f32 %v1488_v9, %v1490_v10  ;;  %1311 = vst [vmem:[#allocation2 + $0xc8] sm:$0xff] %v1213_v11  ;;  %v1212_v20 = vmax.f32 %v820_v12, 0.0  ;;  %v835_v21 = vadd.f32 %v11464_v17, %v14022_v7  ;;  %11984 = vmatprep.subr.mxu0 %v9799_v57  ;;  %v9729_v14 = vld [vmem:[%s18280_s3 + $0x90] sm:$0xff]  ;;  %v9728_v17 = vld [vmem:[%s18280_s3 + $0x88] sm:$0xff] }
 0x10a   : > { %11852 = vmatmul.mubr.f32.gmra.mxu0 %v2692_v15  ;;  %v1483_v22 = vld [vmem:[#allocation2 + $0x9c] ss:$2 sm:$0x3f]  ;;  %v1487_v23 = vld [vmem:[#allocation2 + $0x9d] ss:$2 sm:$0x3f]  ;;  %v829_v24 = vpop.f32.mrf.mxu0  ;;  %11674 = vmatprep.subr.mxu1 %v9730_v56 }
 0x10b   : > { %1494 = vst [vmem:[#allocation3 + $0x4a] sm:$0xff] %v1492_v19  ;;  %v1491_v26 = vmax.f32 %v1483_v22, %v1487_v23  ;;  %1310 = vst [vmem:[#allocation2 + $0xc0] sm:$0xff] %v1212_v20  ;;  %v1215_v27 = vmax.f32 %v835_v21, 0.0  ;;  %v830_v28 = vadd.f32 %v14022_v7, %v829_v24  ;;  %11675 = vmatpush3.msra.mxu1 %v9730_v56  ;;  %11985 = vmatpush3.msra.mxu0 %v9799_v57  ;;  %v9797_v21 = vld [vmem:[%s18280_s3 + $0x2b0] sm:$0xff]  ;;  %v9727_v22 = vld [vmem:[%s18280_s3 + $0x80] sm:$0xff] }
 0x10c   : > { %v11467_v30 = vpop.f32.mrf.mxu0  ;;  %11676 = vmatprep.subr.mxu1 %v9729_v14  ;;  %11986 = vmatprep.subr.mxu0 %v9798_v1 }
 0x10d   : > { %1313 = vst [vmem:[#allocation2 + $0xd8] sm:$0xff] %v1215_v27  ;;  %v1214_v34 = vmax.f32 %v830_v28, 0.0  ;;  %v845_v35 = vadd.f32 %v11467_v30, %v14022_v7  ;;  %v1493_v36 = vmax.f32 %v1489_v25, %v1491_v26  ;;  %11677 = vmatpush3.msra.mxu1 %v9729_v14  ;;  %11987 = vmatpush3.msra.mxu0 %v9798_v1  ;;  %v9796_v26 = vld [vmem:[%s18280_s3 + $0x2a8] sm:$0xff]  ;;  %v14145_v27 = vld [vmem:[%s18280_s3 + $0x178] sm:$0xff] }
 0x10e   : > { %v839_v37 = vpop.f32.mrf.mxu0  ;;  %v1497_v46 = vld [vmem:[#allocation2 + $0xa8] ss:$2 sm:$0xff]  ;;  %v1501_v47 = vld [vmem:[#allocation2 + $0xa9] ss:$2 sm:$0xff]  ;;  %11678 = vmatprep.subr.mxu1 %v9728_v17  ;;  %11988 = vmatprep.subr.mxu0 %v9797_v21 }
 0x10f   : > { %1312 = vst [vmem:[#allocation2 + $0xd0] sm:$0xff] %v1214_v34  ;;  %v1217_v39 = vmax.f32 %v845_v35, 0.0  ;;  %v840_v40 = vadd.f32 %v14022_v7, %v839_v37  ;;  %1495 = vst [vmem:[#allocation3 + $0x52] sm:$0x3f] %v1493_v36  ;;  %v1512_v2 = vmax.f32 %v1497_v46, %v1501_v47  ;;  %11679 = vmatpush3.msra.mxu1 %v9728_v17  ;;  %11989 = vmatpush3.msra.mxu0 %v9797_v21  ;;  %v9794_v37 = vld [vmem:[%s18280_s3 + $0x298] sm:$0xff] }
 0x110   : > { %v11470_v42 = vpop.f32.mrf.mxu0  ;;  %11680 = vmatprep.subr.mxu1 %v9727_v22  ;;  %11990 = vmatprep.subr.mxu0 %v9796_v26 }
 0x111   : > { %1315 = vst [vmem:[#allocation2 + $0xe8] sm:$0xff] %v1217_v39  ;;  %v1216_v44 = vmax.f32 %v840_v40, 0.0  ;;  %v855_v45 = vadd.f32 %v11470_v42, %v14022_v7  ;;  %11681 = vmatpush3.msra.mxu1 %v9727_v22  ;;  %11991 = vmatpush3.msra.mxu0 %v9796_v26 }
 0x112   : > { %v849_v48 = vpop.f32.mrf.mxu0  ;;  %v1777_v51 = vld [vmem:[#allocation3 + $0x48] sm:$0xff]  ;;  %11730 = vmatprep.subr.mxu1 %v14145_v27  ;;  %11992 = vmatprep.subr.mxu0 %v9795_v31 }
 0x113   : > { %1314 = vst [vmem:[#allocation2 + $0xe0] sm:$0xff] %v1216_v44  ;;  %v1219_v49 = vmax.f32 %v855_v45, 0.0  ;;  %v850_v50 = vadd.f32 %v14022_v7, %v849_v48  ;;  %v2693_v52 = vld [vmem:[#allocation3 + $0x43] sm:$0xff]  ;;  %11615 = vmatmul.mubr.f32.gmra.mxu1 %v1777_v51  ;;  %11993 = vmatpush3.msra.mxu0 %v9795_v31 }
 0x114   : > { %v1499_v54 = vld [vmem:[#allocation2 + $0xb8] ss:$2 sm:$0x3f]  ;;  %11854 = vmatprep.mubr.f32.mxu0 %v2693_v52  ;;  %v11473_v55 = vpop.f32.mrf.mxu0  ;;  %v1503_v58 = vld [vmem:[#allocation2 + $0xb9] ss:$2 sm:$0x3f]  ;;  %11994 = vmatprep.subr.mxu0 %v9794_v37 }
 0x115   : > { %1317 = vst [vmem:[#allocation2 + $0xf8] sm:$0xff] %v1219_v49  ;;  %v1218_v59 = vmax.f32 %v850_v50, 0.0  ;;  %v865_v60 = vadd.f32 %v11473_v55, %v14022_v7  ;;  %v1513_v8 = vmax.f32 %v1499_v54, %v1503_v58  ;;  %v9793_v54 = vld [vmem:[%s18280_s3 + $0x290] sm:$0xff]  ;;  %v9792_v58 = vld [vmem:[%s18280_s3 + $0x288] sm:$0xff]  ;;  %11995 = vmatpush3.msra.mxu0 %v9794_v37 }
 0x116   : > { %v1505_v61 = vld [vmem:[#allocation2 + $0xc4] ss:$2 sm:$0xff]  ;;  %v1507_v62 = vld [vmem:[#allocation2 + $0xd4] ss:$2 sm:$0x3f]  ;;  %v859_v63 = vpop.f32.mrf.mxu0  ;;  %11996 = vmatprep.subr.mxu0 %v9793_v54 }
 0x117   : > { %v1778_v0 = vld [vmem:[#allocation3 + $0x50] sm:$0xff]  ;;  %v1511_v4 = vld [vmem:[#allocation2 + $0xd5] ss:$2 sm:$0x3f]  ;;  %1316 = vst [vmem:[#allocation2 + $0xf0] sm:$0xff] %v1218_v59  ;;  %v1221_v5 = vmax.f32 %v865_v60, 0.0  ;;  %v860_v6 = vadd.f32 %v14022_v7, %v859_v63  ;;  %11997 = vmatpush3.msra.mxu0 %v9793_v54 }
 0x118   : > { %v1509_v3 = vld [vmem:[#allocation2 + $0xc5] ss:$2 sm:$0xff]  ;;  %11617 = vmatprep.mubr.f32.mxu1 %v1778_v0  ;;  %v1515_v10 = vmax.f32 %v1507_v62, %v1511_v4  ;;  %v2694_v11 = vld [vmem:[#allocation3 + $0x4b] sm:$0xff]  ;;  %v11476_v12 = vpop.f32.mrf.mxu0  ;;  %11998 = vmatprep.subr.mxu0 %v9792_v58 }
 0x119   : > { %v1514_v9 = vmax.f32 %v1505_v61, %v1509_v3  ;;  %v2695_v13 = vld [vmem:[#allocation3 + $0x53] sm:$0xff]  ;;  %1319 = vst [vmem:[#allocation2 + $0x108] sm:$0xff] %v1221_v5  ;;  %v1220_v15 = vmax.f32 %v860_v6, 0.0  ;;  %11855 = vmatmul.mubr.f32.gmra.mxu0 %v2694_v11  ;;  %v875_v16 = vadd.f32 %v11476_v12, %v14022_v7 }
 0x11a   : > { %v1517_v19 = vmax.f32 %v1513_v8, %v1515_v10  ;;  %11857 = vmatprep.mubr.f32.mxu0 %v2695_v13  ;;  %v869_v20 = vpop.f32.mrf.mxu0  ;;  %v1521_v34 = vld [vmem:[#allocation2 + $0xe0] ss:$2 sm:$0xff]  ;;  %v1525_v35 = vld [vmem:[#allocation2 + $0xe1] ss:$2 sm:$0xff]  ;;  %11999 = vmatpush3.msra.mxu0 %v9792_v58 }
 0x11b   : > { %v1516_v18 = vmax.f32 %v1512_v2, %v1514_v9  ;;  %1318 = vst [vmem:[#allocation2 + $0x100] sm:$0xff] %v1220_v15  ;;  %v1223_v23 = vmax.f32 %v875_v16, 0.0  ;;  %v870_v24 = vadd.f32 %v14022_v7, %v869_v20  ;;  %v1536_v44 = vmax.f32 %v1521_v34, %v1525_v35  ;;  %v9791_v3 = vld [vmem:[%s18280_s3 + $0x280] sm:$0xff] }
 0x11c   : > { %1519 = vst [vmem:[#allocation3 + $0x64] sm:$0x3f] %v1517_v19  ;;  %v11479_v25 = vpop.f32.mrf.mxu0  ;;  %12000 = vmatprep.subr.mxu0 %v9791_v3 }
 0x11d   : > { %1518 = vst [vmem:[#allocation3 + $0x5c] sm:$0xff] %v1516_v18  ;;  %1321 = vst [vmem:[#allocation2 + $0x118] sm:$0xff] %v1223_v23  ;;  %v1222_v28 = vmax.f32 %v870_v24, 0.0  ;;  %v885_v29 = vadd.f32 %v11479_v25, %v14022_v7  ;;  %12001 = vmatpush3.msra.mxu0 %v9791_v3 }
 0x11e   : > { %v879_v30 = vpop.f32.mrf.mxu0  ;;  %v1523_v40 = vld [vmem:[#allocation2 + $0xf0] ss:$2 sm:$0x3f]  ;;  %v1527_v51 = vld [vmem:[#allocation2 + $0xf1] ss:$2 sm:$0x3f] }
 0x11f   : > { %1320 = vst [vmem:[#allocation2 + $0x110] sm:$0xff] %v1222_v28  ;;  %v1225_v32 = vmax.f32 %v885_v29, 0.0  ;;  %v880_v33 = vadd.f32 %v14022_v7, %v879_v30  ;;  %v1537_v62 = vmax.f32 %v1523_v40, %v1527_v51 }
 0x120   : > { %v11482_v36 = vpop.f32.mrf.mxu0 }
 0x121   : > { %1323 = vst [vmem:[#allocation2 + $0x128] sm:$0xff] %v1225_v32  ;;  %v1224_v38 = vmax.f32 %v880_v33, 0.0  ;;  %v895_v39 = vadd.f32 %v11482_v36, %v14022_v7 }
 0x122   : > { %v1529_v41 = vld [vmem:[#allocation2 + $0xfc] ss:$2 sm:$0xff]  ;;  %v1533_v42 = vld [vmem:[#allocation2 + $0xfd] ss:$2 sm:$0xff]  ;;  %v889_v43 = vpop.f32.mrf.mxu0 }
 0x123   : > { %v1538_v45 = vmax.f32 %v1529_v41, %v1533_v42  ;;  %1322 = vst [vmem:[#allocation2 + $0x120] sm:$0xff] %v1224_v38  ;;  %v1227_v46 = vmax.f32 %v895_v39, 0.0  ;;  %v890_v47 = vadd.f32 %v14022_v7, %v889_v43 }
 0x124   : > { %v1779_v48 = vld [vmem:[#allocation3 + $0x58] sm:$0xff]  ;;  %v1780_v50 = vld [vmem:[#allocation3 + $0x60] sm:$0xff]  ;;  %v11485_v52 = vpop.f32.mrf.mxu0 }
 0x125   : > { %v2696_v49 = vld [vmem:[#allocation3 + $0x5b] sm:$0xff]  ;;  %11618 = vmatmul.mubr.f32.gmra.mxu1 %v1779_v48  ;;  %v2697_v53 = vld [vmem:[#allocation3 + $0x63] sm:$0xff]  ;;  %v1540_v55 = vmax.f32 %v1536_v44, %v1538_v45  ;;  %1325 = vst [vmem:[#allocation2 + $0x138] sm:$0xff] %v1227_v46  ;;  %v1226_v56 = vmax.f32 %v890_v47, 0.0  ;;  %v905_v57 = vadd.f32 %v11485_v52, %v14022_v7 }
 0x126   : > { %11858 = vmatmul.mubr.f32.gmra.mxu0 %v2696_v49  ;;  %11620 = vmatprep.mubr.f32.mxu1 %v1780_v50  ;;  %v1531_v59 = vld [vmem:[#allocation2 + $0x10c] ss:$2 sm:$0x3f]  ;;  %v1535_v60 = vld [vmem:[#allocation2 + $0x10d] ss:$2 sm:$0x3f]  ;;  %v899_v61 = vpop.f32.mrf.mxu0 }
 0x127   : > { %11860 = vmatprep.mubr.f32.mxu0 %v2697_v53  ;;  %1542 = vst [vmem:[#allocation3 + $0x6e] sm:$0xff] %v1540_v55  ;;  %v1539_v63 = vmax.f32 %v1531_v59, %v1535_v60  ;;  %1324 = vst [vmem:[#allocation2 + $0x130] sm:$0xff] %v1226_v56  ;;  %v1229_v0 = vmax.f32 %v905_v57, 0.0  ;;  %v900_v1 = vadd.f32 %v14022_v7, %v899_v61 }
 0x128   : > { %v11488_v2 = vpop.f32.mrf.mxu0 }
 0x129   : > { %v1541_v4 = vmax.f32 %v1537_v62, %v1539_v63  ;;  %1327 = vst [vmem:[#allocation2 + $0x148] sm:$0xff] %v1229_v0  ;;  %v1228_v5 = vmax.f32 %v900_v1, 0.0  ;;  %v915_v6 = vadd.f32 %v11488_v2, %v14022_v7 }
 0x12a   : > { %v909_v8 = vpop.f32.mrf.mxu0  ;;  %v1545_v19 = vld [vmem:[#allocation2 + $0x118] ss:$2 sm:$0xff]  ;;  %v1549_v22 = vld [vmem:[#allocation2 + $0x119] ss:$2 sm:$0xff] }
 0x12b   : > { %1543 = vst [vmem:[#allocation3 + $0x76] sm:$0x3f] %v1541_v4  ;;  %1326 = vst [vmem:[#allocation2 + $0x140] sm:$0xff] %v1228_v5  ;;  %v1231_v9 = vmax.f32 %v915_v6, 0.0  ;;  %v910_v10 = vadd.f32 %v14022_v7, %v909_v8  ;;  %v1560_v35 = vmax.f32 %v1545_v19, %v1549_v22 }
 0x12c   : > { %v11491_v11 = vpop.f32.mrf.mxu0 }
 0x12d   : > { %1329 = vst [vmem:[#allocation2 + $0x158] sm:$0xff] %v1231_v9  ;;  %v1230_v12 = vmax.f32 %v910_v10, 0.0  ;;  %v925_v13 = vadd.f32 %v11491_v11, %v14022_v7 }
 0x12e   : > { %v919_v14 = vpop.f32.mrf.mxu0  ;;  %v1781_v17 = vld [vmem:[#allocation3 + $0x68] sm:$0xff]  ;;  %v1547_v20 = vld [vmem:[#allocation2 + $0x128] ss:$2 sm:$0x3f] }
 0x12f   : > { %1328 = vst [vmem:[#allocation2 + $0x150] sm:$0xff] %v1230_v12  ;;  %v1233_v15 = vmax.f32 %v925_v13, 0.0  ;;  %v920_v16 = vadd.f32 %v14022_v7, %v919_v14  ;;  %v2698_v18 = vld [vmem:[#allocation3 + $0x6b] sm:$0xff]  ;;  %11621 = vmatmul.mubr.f32.gmra.mxu1 %v1781_v17  ;;  %v1551_v23 = vld [vmem:[#allocation2 + $0x129] ss:$2 sm:$0x3f] }
 0x130   : > { %11861 = vmatmul.mubr.f32.gmra.mxu0 %v2698_v18  ;;  %v11494_v21 = vpop.f32.mrf.mxu0  ;;  %v1561_v36 = vmax.f32 %v1547_v20, %v1551_v23 }
 0x131   : > { %1331 = vst [vmem:[#allocation2 + $0x168] sm:$0xff] %v1233_v15  ;;  %v1232_v24 = vmax.f32 %v920_v16, 0.0  ;;  %v935_v25 = vadd.f32 %v11494_v21, %v14022_v7  ;;  %v14186_v21 = vld [vmem:[%s18280_s3 + $0x3f8] sm:$0xff] }
 0x132   : > { %v1553_v26 = vld [vmem:[#allocation2 + $0x134] ss:$2 sm:$0xff]  ;;  %v1555_v28 = vld [vmem:[#allocation2 + $0x144] ss:$2 sm:$0x3f]  ;;  %v929_v29 = vpop.f32.mrf.mxu0  ;;  %12130 = vmatprep.subr.mxu0 %v14186_v21 }
 0x133   : > { %v1782_v30 = vld [vmem:[#allocation3 + $0x70] sm:$0xff]  ;;  %1330 = vst [vmem:[#allocation2 + $0x160] sm:$0xff] %v1232_v24  ;;  %v1235_v33 = vmax.f32 %v935_v25, 0.0  ;;  %v930_v34 = vadd.f32 %v14022_v7, %v929_v29  ;;  %v1783_v41 = vld [vmem:[#allocation3 + $0x78] sm:$0xff] }
 0x134   : > { %v1557_v31 = vld [vmem:[#allocation2 + $0x135] ss:$2 sm:$0xff]  ;;  %v1559_v32 = vld [vmem:[#allocation2 + $0x145] ss:$2 sm:$0x3f]  ;;  %11623 = vmatprep.mubr.f32.mxu1 %v1782_v30  ;;  %v11497_v40 = vpop.f32.mrf.mxu0 }
 0x135   : > { %v1562_v37 = vmax.f32 %v1553_v26, %v1557_v31  ;;  %v1563_v38 = vmax.f32 %v1555_v28, %v1559_v32  ;;  %v2699_v39 = vld [vmem:[#allocation3 + $0x73] sm:$0xff]  ;;  %1333 = vst [vmem:[#allocation2 + $0x178] sm:$0xff] %v1235_v33  ;;  %v1234_v42 = vmax.f32 %v930_v34, 0.0  ;;  %v945_v43 = vadd.f32 %v11497_v40, %v14022_v7  ;;  %11624 = vmatmul.mubr.f32.gmra.mxu1 %v1783_v41 }
 0x136   : > { %11863 = vmatprep.mubr.f32.mxu0 %v2699_v39  ;;  %v939_v44 = vpop.f32.mrf.mxu0  ;;  %v1569_v55 = vld [vmem:[#allocation2 + $0x150] ss:$2 sm:$0xff]  ;;  %v1573_v56 = vld [vmem:[#allocation2 + $0x151] ss:$2 sm:$0xff] }
 0x137   : > { %v1564_v45 = vmax.f32 %v1560_v35, %v1562_v37  ;;  %v1565_v46 = vmax.f32 %v1561_v36, %v1563_v38  ;;  %1332 = vst [vmem:[#allocation2 + $0x170] sm:$0xff] %v1234_v42  ;;  %v1237_v47 = vmax.f32 %v945_v43, 0.0  ;;  %v940_v48 = vadd.f32 %v14022_v7, %v939_v44  ;;  %v14196_v43 = vld [vmem:[%s18279_s2] ss:$0 sm:$0xff] }
 0x138   : > { %v11500_v49 = vpop.f32.mrf.mxu0  ;;  %v1584_v63 = vmax.f32 %v1569_v55, %v1573_v56 }
 0x139   : > { %1566 = vst [vmem:[#allocation3 + $0x80] sm:$0xff] %v1564_v45  ;;  %11626 = vmatprep.mubr.f32.mxu1 %v1564_v45  ;;  %1567 = vst [vmem:[#allocation3 + $0x88] sm:$0x3f] %v1565_v46  ;;  %v1236_v50 = vmax.f32 %v940_v48, 0.0  ;;  %v955_v51 = vadd.f32 %v11500_v49, %v14022_v7 }
 0x13a   : > { %1335 = vst [vmem:[#allocation2 + $0x188] sm:$0xff] %v1237_v47  ;;  %v949_v52 = vpop.f32.mrf.mxu0  ;;  %v1571_v6 = vld [vmem:[#allocation2 + $0x160] ss:$2 sm:$0x3f] }
 0x13b   : > { %1334 = vst [vmem:[#allocation2 + $0x180] sm:$0xff] %v1236_v50  ;;  %v1239_v53 = vmax.f32 %v955_v51, 0.0  ;;  %v950_v54 = vadd.f32 %v14022_v7, %v949_v52  ;;  %v1575_v8 = vld [vmem:[#allocation2 + $0x161] ss:$2 sm:$0x3f] }
 0x13c   : > { %v11503_v57 = vpop.f32.mrf.mxu0  ;;  %v1585_v16 = vmax.f32 %v1571_v6, %v1575_v8 }
 0x13d   : > { %1337 = vst [vmem:[#allocation2 + $0x198] sm:$0xff] %v1239_v53  ;;  %v1238_v58 = vmax.f32 %v950_v54, 0.0  ;;  %v965_v59 = vadd.f32 %v11503_v57, %v14022_v7 }
 0x13e   : > { %v1577_v60 = vld [vmem:[#allocation2 + $0x16c] ss:$2 sm:$0xff]  ;;  %v1581_v61 = vld [vmem:[#allocation2 + $0x16d] ss:$2 sm:$0xff]  ;;  %v959_v62 = vpop.f32.mrf.mxu0 }
 0x13f   : > { %v1586_v0 = vmax.f32 %v1577_v60, %v1581_v61  ;;  %1336 = vst [vmem:[#allocation2 + $0x190] sm:$0xff] %v1238_v58  ;;  %v1241_v1 = vmax.f32 %v965_v59, 0.0  ;;  %v960_v2 = vadd.f32 %v14022_v7, %v959_v62 }
 0x140   : > { %v2700_v3 = vld [vmem:[#allocation3 + $0x7b] sm:$0xff]  ;;  %v1785_v4 = vld [vmem:[#allocation3 + $0x88] sm:$0xff]  ;;  %v11506_v9 = vpop.f32.mrf.mxu0 }
 0x141   : > { %v2701_v5 = vld [vmem:[#allocation3 + $0x83] sm:$0xff]  ;;  %11864 = vmatmul.mubr.f32.gmra.mxu0 %v2700_v3  ;;  %11627 = vmatmul.mubr.f32.gmra.mxu1 %v1785_v4  ;;  %v1588_v10 = vmax.f32 %v1584_v63, %v1586_v0  ;;  %1339 = vst [vmem:[#allocation2 + $0x1a8] sm:$0xff] %v1241_v1  ;;  %v1240_v11 = vmax.f32 %v960_v2, 0.0  ;;  %v975_v12 = vadd.f32 %v11506_v9, %v14022_v7 }
 0x142   : > { %11866 = vmatprep.mubr.f32.mxu0 %v2701_v5  ;;  %v1579_v13 = vld [vmem:[#allocation2 + $0x17c] ss:$2 sm:$0x3f]  ;;  %v1583_v14 = vld [vmem:[#allocation2 + $0x17d] ss:$2 sm:$0x3f]  ;;  %v969_v15 = vpop.f32.mrf.mxu0 }
 0x143   : > { %1590 = vst [vmem:[#allocation3 + $0x92] sm:$0xff] %v1588_v10  ;;  %v1587_v17 = vmax.f32 %v1579_v13, %v1583_v14  ;;  %1338 = vst [vmem:[#allocation2 + $0x1a0] sm:$0xff] %v1240_v11  ;;  %v1243_v18 = vmax.f32 %v975_v12, 0.0  ;;  %v970_v19 = vadd.f32 %v14022_v7, %v969_v15 }
 0x144   : > { %v11509_v20 = vpop.f32.mrf.mxu0 }
 0x145   : > { %1341 = vst [vmem:[#allocation2 + $0x1b8] sm:$0xff] %v1243_v18  ;;  %v1242_v22 = vmax.f32 %v970_v19, 0.0  ;;  %v985_v23 = vadd.f32 %v11509_v20, %v14022_v7  ;;  %v1589_v24 = vmax.f32 %v1585_v16, %v1587_v17 }
 0x146   : > { %v979_v25 = vpop.f32.mrf.mxu0  ;;  %v1593_v37 = vld [vmem:[#allocation2 + $0x188] ss:$2 sm:$0xff]  ;;  %v1597_v40 = vld [vmem:[#allocation2 + $0x189] ss:$2 sm:$0xff] }
 0x147   : > { %1340 = vst [vmem:[#allocation2 + $0x1b0] sm:$0xff] %v1242_v22  ;;  %v1245_v26 = vmax.f32 %v985_v23, 0.0  ;;  %v980_v28 = vadd.f32 %v14022_v7, %v979_v25  ;;  %1591 = vst [vmem:[#allocation3 + $0x9a] sm:$0x3f] %v1589_v24  ;;  %v1608_v52 = vmax.f32 %v1593_v37, %v1597_v40 }
 0x148   : > { %v11512_v29 = vpop.f32.mrf.mxu0 }
 0x149   : > { %1343 = vst [vmem:[#allocation2 + $0x1c8] sm:$0xff] %v1245_v26  ;;  %v1244_v30 = vmax.f32 %v980_v28, 0.0  ;;  %v995_v31 = vadd.f32 %v11512_v29, %v14022_v7 }
 0x14a   : > { %v989_v32 = vpop.f32.mrf.mxu0  ;;  %v1786_v35 = vld [vmem:[#allocation3 + $0x90] sm:$0xff] }
 0x14b   : > { %1342 = vst [vmem:[#allocation2 + $0x1c0] sm:$0xff] %v1244_v30  ;;  %v1247_v33 = vmax.f32 %v995_v31, 0.0  ;;  %v990_v34 = vadd.f32 %v14022_v7, %v989_v32  ;;  %v2702_v36 = vld [vmem:[#allocation3 + $0x8b] sm:$0xff]  ;;  %11629 = vmatprep.mubr.f32.mxu1 %v1786_v35 }
 0x14c   : > { %v1595_v38 = vld [vmem:[#allocation2 + $0x198] ss:$2 sm:$0x3f]  ;;  %11867 = vmatmul.mubr.f32.gmra.mxu0 %v2702_v36  ;;  %v11515_v39 = vpop.f32.mrf.mxu0  ;;  %v1599_v41 = vld [vmem:[#allocation2 + $0x199] ss:$2 sm:$0x3f] }
 0x14d   : > { %1345 = vst [vmem:[#allocation2 + $0x1d8] sm:$0xff] %v1247_v33  ;;  %v1246_v42 = vmax.f32 %v990_v34, 0.0  ;;  %v1005_v44 = vadd.f32 %v14196_v43, %v11515_v39  ;;  %v1609_v53 = vmax.f32 %v1595_v38, %v1599_v41 }
 0x14e   : > { %v1601_v45 = vld [vmem:[#allocation2 + $0x1a4] ss:$2 sm:$0xff]  ;;  %v1603_v7 = vld [vmem:[#allocation2 + $0x1b4] ss:$2 sm:$0x3f]  ;;  %v999_v46 = vpop.f32.mrf.mxu0 }
 0x14f   : > { %v1787_v47 = vld [vmem:[#allocation3 + $0x98] sm:$0xff]  ;;  %v1607_v49 = vld [vmem:[#allocation2 + $0x1b5] ss:$2 sm:$0x3f]  ;;  %1344 = vst [vmem:[#allocation2 + $0x1d0] sm:$0xff] %v1246_v42  ;;  %v1249_v50 = vmax.f32 %v1005_v44, 0.0  ;;  %v1000_v51 = vadd.f32 %v14196_v43, %v999_v46 }
 0x150   : > { %v1605_v48 = vld [vmem:[#allocation2 + $0x1a5] ss:$2 sm:$0xff]  ;;  %11630 = vmatmul.mubr.f32.gmra.mxu1 %v1787_v47  ;;  %v1611_v55 = vmax.f32 %v1603_v7, %v1607_v49  ;;  %v11518_v57 = vpop.f32.mrf.mxu0 }
 0x151   : > { %v1610_v54 = vmax.f32 %v1601_v45, %v1605_v48  ;;  %v2703_v56 = vld [vmem:[#allocation3 + $0x93] sm:$0xff]  ;;  %v2704_v58 = vld [vmem:[#allocation3 + $0x9b] sm:$0xff]  ;;  %1347 = vst [vmem:[#allocation2 + $0x1e8] sm:$0xff] %v1249_v50  ;;  %v1248_v59 = vmax.f32 %v1000_v51, 0.0  ;;  %v1015_v60 = vadd.f32 %v14196_v43, %v11518_v57 }
 0x152   : > { %11869 = vmatprep.mubr.f32.mxu0 %v2703_v56  ;;  %v1613_v62 = vmax.f32 %v1609_v53, %v1611_v55  ;;  %v1009_v63 = vpop.f32.mrf.mxu0  ;;  %v1617_v9 = vld [vmem:[#allocation2 + $0x1c0] ss:$2 sm:$0xff]  ;;  %v1621_v10 = vld [vmem:[#allocation2 + $0x1c1] ss:$2 sm:$0xff] }
 0x153   : > { %v1612_v61 = vmax.f32 %v1608_v52, %v1610_v54  ;;  %11870 = vmatmul.mubr.f32.gmra.mxu0 %v2704_v58  ;;  %1346 = vst [vmem:[#allocation2 + $0x1e0] sm:$0xff] %v1248_v59  ;;  %v1251_v0 = vmax.f32 %v1015_v60, 0.0  ;;  %v1010_v1 = vadd.f32 %v14196_v43, %v1009_v63  ;;  %v1632_v18 = vmax.f32 %v1617_v9, %v1621_v10 }
 0x154   : > { %1615 = vst [vmem:[#allocation3 + $0xac] sm:$0x3f] %v1613_v62  ;;  %v11521_v2 = vpop.f32.mrf.mxu0 }
 0x155   : > { %1614 = vst [vmem:[#allocation3 + $0xa4] sm:$0xff] %v1612_v61  ;;  %1349 = vst [vmem:[#allocation2 + $0x1f8] sm:$0xff] %v1251_v0  ;;  %v1250_v3 = vmax.f32 %v1010_v1, 0.0  ;;  %v1025_v4 = vadd.f32 %v14196_v43, %v11521_v2 }
 0x156   : > { %v1019_v5 = vpop.f32.mrf.mxu0  ;;  %v1619_v14 = vld [vmem:[#allocation2 + $0x1d0] ss:$2 sm:$0x3f]  ;;  %v1623_v26 = vld [vmem:[#allocation2 + $0x1d1] ss:$2 sm:$0x3f] }
 0x157   : > { %1348 = vst [vmem:[#allocation2 + $0x1f0] sm:$0xff] %v1250_v3  ;;  %v1253_v6 = vmax.f32 %v1025_v4, 0.0  ;;  %v1020_v8 = vadd.f32 %v14196_v43, %v1019_v5  ;;  %v1633_v36 = vmax.f32 %v1619_v14, %v1623_v26 }
 0x158   : > { %v11524_v11 = vpop.f32.mrf.mxu0 }
 0x159   : > { %1351 = vst [vmem:[#allocation2 + $0x208] sm:$0xff] %v1253_v6  ;;  %v1252_v12 = vmax.f32 %v1020_v8, 0.0  ;;  %v1035_v13 = vadd.f32 %v14196_v43, %v11524_v11 }
 0x15a   : > { %v1625_v15 = vld [vmem:[#allocation2 + $0x1dc] ss:$2 sm:$0xff]  ;;  %v1629_v16 = vld [vmem:[#allocation2 + $0x1dd] ss:$2 sm:$0xff]  ;;  %v1029_v17 = vpop.f32.mrf.mxu0 }
 0x15b   : > { %v1634_v19 = vmax.f32 %v1625_v15, %v1629_v16  ;;  %1350 = vst [vmem:[#allocation2 + $0x200] sm:$0xff] %v1252_v12  ;;  %v1255_v20 = vmax.f32 %v1035_v13, 0.0  ;;  %v1030_v22 = vadd.f32 %v14196_v43, %v1029_v17 }
 0x15c   : > { %v1788_v23 = vld [vmem:[#allocation3 + $0xa0] sm:$0xff]  ;;  %v1789_v25 = vld [vmem:[#allocation3 + $0xa8] sm:$0xff]  ;;  %v11527_v28 = vpop.f32.mrf.mxu0 }
 0x15d   : > { %v2705_v24 = vld [vmem:[#allocation3 + $0xa3] sm:$0xff]  ;;  %11632 = vmatprep.mubr.f32.mxu1 %v1788_v23  ;;  %v2706_v29 = vld [vmem:[#allocation3 + $0xab] sm:$0xff]  ;;  %v1636_v30 = vmax.f32 %v1632_v18, %v1634_v19  ;;  %1353 = vst [vmem:[#allocation2 + $0x218] sm:$0xff] %v1255_v20  ;;  %v1254_v31 = vmax.f32 %v1030_v22, 0.0  ;;  %v1045_v32 = vadd.f32 %v14196_v43, %v11527_v28 }
 0x15e   : > { %11872 = vmatprep.mubr.f32.mxu0 %v2705_v24  ;;  %11633 = vmatmul.mubr.f32.gmra.mxu1 %v1789_v25  ;;  %v1627_v33 = vld [vmem:[#allocation2 + $0x1ec] ss:$2 sm:$0x3f]  ;;  %v1631_v34 = vld [vmem:[#allocation2 + $0x1ed] ss:$2 sm:$0x3f]  ;;  %v1039_v35 = vpop.f32.mrf.mxu0 }
 0x15f   : > { %11873 = vmatmul.mubr.f32.gmra.mxu0 %v2706_v29  ;;  %1638 = vst [vmem:[#allocation3 + $0xb6] sm:$0xff] %v1636_v30  ;;  %v1635_v37 = vmax.f32 %v1627_v33, %v1631_v34  ;;  %1352 = vst [vmem:[#allocation2 + $0x210] sm:$0xff] %v1254_v31  ;;  %v1257_v38 = vmax.f32 %v1045_v32, 0.0  ;;  %v1040_v39 = vadd.f32 %v14196_v43, %v1039_v35 }
 0x160   : > { %v11530_v40 = vpop.f32.mrf.mxu0 }
 0x161   : > { %v1637_v41 = vmax.f32 %v1633_v36, %v1635_v37  ;;  %1355 = vst [vmem:[#allocation2 + $0x228] sm:$0xff] %v1257_v38  ;;  %v1256_v42 = vmax.f32 %v1040_v39, 0.0  ;;  %v1055_v44 = vadd.f32 %v14196_v43, %v11530_v40 }
 0x162   : > { %v1049_v45 = vpop.f32.mrf.mxu0  ;;  %v1641_v55 = vld [vmem:[#allocation2 + $0x1f8] ss:$2 sm:$0xff]  ;;  %v1645_v58 = vld [vmem:[#allocation2 + $0x1f9] ss:$2 sm:$0xff] }
 0x163   : > { %1639 = vst [vmem:[#allocation3 + $0xbe] sm:$0x3f] %v1637_v41  ;;  %1354 = vst [vmem:[#allocation2 + $0x220] sm:$0xff] %v1256_v42  ;;  %v1259_v7 = vmax.f32 %v1055_v44, 0.0  ;;  %v1050_v46 = vadd.f32 %v14196_v43, %v1049_v45  ;;  %v1656_v6 = vmax.f32 %v1641_v55, %v1645_v58 }
 0x164   : > { %v11533_v47 = vpop.f32.mrf.mxu0 }
 0x165   : > { %1357 = vst [vmem:[#allocation2 + $0x238] sm:$0xff] %v1259_v7  ;;  %v1258_v48 = vmax.f32 %v1050_v46, 0.0  ;;  %v1065_v49 = vadd.f32 %v14196_v43, %v11533_v47 }
 0x166   : > { %v1059_v50 = vpop.f32.mrf.mxu0  ;;  %v1790_v53 = vld [vmem:[#allocation3 + $0xb0] sm:$0xff]  ;;  %v1643_v56 = vld [vmem:[#allocation2 + $0x208] ss:$2 sm:$0x3f] }
 0x167   : > { %1356 = vst [vmem:[#allocation2 + $0x230] sm:$0xff] %v1258_v48  ;;  %v1261_v51 = vmax.f32 %v1065_v49, 0.0  ;;  %v1060_v52 = vadd.f32 %v14196_v43, %v1059_v50  ;;  %v2707_v54 = vld [vmem:[#allocation3 + $0xb3] sm:$0xff]  ;;  %11635 = vmatprep.mubr.f32.mxu1 %v1790_v53 }
 0x168   : > { %11875 = vmatprep.mubr.f32.mxu0 %v2707_v54  ;;  %v11536_v57 = vpop.f32.mrf.mxu0  ;;  %v1647_v59 = vld [vmem:[#allocation2 + $0x209] ss:$2 sm:$0x3f] }
 0x169   : > { %1359 = vst [vmem:[#allocation2 + $0x248] sm:$0xff] %v1261_v51  ;;  %v1260_v60 = vmax.f32 %v1060_v52, 0.0  ;;  %v1075_v61 = vadd.f32 %v14196_v43, %v11536_v57  ;;  %v1657_v8 = vmax.f32 %v1643_v56, %v1647_v59 }
 0x16a   : > { %v1649_v62 = vld [vmem:[#allocation2 + $0x214] ss:$2 sm:$0xff]  ;;  %v1651_v63 = vld [vmem:[#allocation2 + $0x224] ss:$2 sm:$0x3f]  ;;  %v1069_v0 = vpop.f32.mrf.mxu0 }
 0x16b   : > { %v1791_v1 = vld [vmem:[#allocation3 + $0xb8] sm:$0xff]  ;;  %v1653_v2 = vld [vmem:[#allocation2 + $0x215] ss:$2 sm:$0xff]  ;;  %1358 = vst [vmem:[#allocation2 + $0x240] sm:$0xff] %v1260_v60  ;;  %v1263_v4 = vmax.f32 %v1075_v61, 0.0  ;;  %v1070_v5 = vadd.f32 %v14196_v43, %v1069_v0 }
 0x16c   : > { %v1655_v3 = vld [vmem:[#allocation2 + $0x225] ss:$2 sm:$0x3f]  ;;  %11636 = vmatmul.mubr.f32.gmra.mxu1 %v1791_v1  ;;  %v1658_v9 = vmax.f32 %v1649_v62, %v1653_v2  ;;  %v11539_v12 = vpop.f32.mrf.mxu0  ;;  %v1792_v13 = vld [vmem:[#allocation3 + $0xc0] sm:$0xff] }
 0x16d   : > { %v1659_v10 = vmax.f32 %v1651_v63, %v1655_v3  ;;  %v2708_v11 = vld [vmem:[#allocation3 + $0xbb] sm:$0xff]  ;;  %1361 = vst [vmem:[#allocation2 + $0x258] sm:$0xff] %v1263_v4  ;;  %v1262_v14 = vmax.f32 %v1070_v5, 0.0  ;;  %v1085_v15 = vadd.f32 %v14196_v43, %v11539_v12  ;;  %11638 = vmatprep.mubr.f32.mxu1 %v1792_v13 }
 0x16e   : > { %11876 = vmatmul.mubr.f32.gmra.mxu0 %v2708_v11  ;;  %v1079_v16 = vpop.f32.mrf.mxu0  ;;  %v1660_v17 = vmax.f32 %v1656_v6, %v1658_v9  ;;  %v1665_v29 = vld [vmem:[#allocation2 + $0x230] ss:$2 sm:$0xff]  ;;  %v1669_v30 = vld [vmem:[#allocation2 + $0x231] ss:$2 sm:$0xff] }
 0x16f   : > { %v1661_v18 = vmax.f32 %v1657_v8, %v1659_v10  ;;  %1360 = vst [vmem:[#allocation2 + $0x250] sm:$0xff] %v1262_v14  ;;  %v1265_v19 = vmax.f32 %v1085_v15, 0.0  ;;  %v1080_v20 = vadd.f32 %v14196_v43, %v1079_v16  ;;  %v1680_v37 = vmax.f32 %v1665_v29, %v1669_v30 }
 0x170   : > { %v11542_v22 = vpop.f32.mrf.mxu0  ;;  %1662 = vst [vmem:[#allocation3 + $0xc8] sm:$0xff] %v1660_v17  ;;  %11639 = vmatmul.mubr.f32.gmra.mxu1 %v1660_v17 }
 0x171   : > { %1663 = vst [vmem:[#allocation3 + $0xd0] sm:$0x3f] %v1661_v18  ;;  %1363 = vst [vmem:[#allocation2 + $0x268] sm:$0xff] %v1265_v19  ;;  %v1264_v23 = vmax.f32 %v1080_v20, 0.0  ;;  %v1095_v24 = vadd.f32 %v14196_v43, %v11542_v22 }
 0x172   : > { %v1089_v25 = vpop.f32.mrf.mxu0  ;;  %v1667_v45 = vld [vmem:[#allocation2 + $0x240] ss:$2 sm:$0x3f]  ;;  %v1671_v7 = vld [vmem:[#allocation2 + $0x241] ss:$2 sm:$0x3f] }
 0x173   : > { %1362 = vst [vmem:[#allocation2 + $0x260] sm:$0xff] %v1264_v23  ;;  %v1267_v26 = vmax.f32 %v1095_v24, 0.0  ;;  %v1090_v28 = vadd.f32 %v14196_v43, %v1089_v25  ;;  %v1681_v53 = vmax.f32 %v1667_v45, %v1671_v7 }
 0x174   : > { %v11545_v31 = vpop.f32.mrf.mxu0 }
 0x175   : > { %1365 = vst [vmem:[#allocation2 + $0x278] sm:$0xff] %v1267_v26  ;;  %v1266_v32 = vmax.f32 %v1090_v28, 0.0  ;;  %v1105_v33 = vadd.f32 %v14196_v43, %v11545_v31 }
 0x176   : > { %v1673_v34 = vld [vmem:[#allocation2 + $0x24c] ss:$2 sm:$0xff]  ;;  %v1677_v35 = vld [vmem:[#allocation2 + $0x24d] ss:$2 sm:$0xff]  ;;  %v1099_v36 = vpop.f32.mrf.mxu0 }
 0x177   : > { %v1682_v38 = vmax.f32 %v1673_v34, %v1677_v35  ;;  %1364 = vst [vmem:[#allocation2 + $0x270] sm:$0xff] %v1266_v32  ;;  %v1269_v39 = vmax.f32 %v1105_v33, 0.0  ;;  %v1100_v40 = vadd.f32 %v14196_v43, %v1099_v36  ;;  %v2709_v41 = vld [vmem:[#allocation3 + $0xc3] sm:$0xff] }
 0x178   : > { %v1794_v42 = vld [vmem:[#allocation3 + $0xd0] sm:$0xff]  ;;  %11878 = vmatprep.mubr.f32.mxu0 %v2709_v41  ;;  %v11548_v46 = vpop.f32.mrf.mxu0 }
 0x179   : > { %v2710_v44 = vld [vmem:[#allocation3 + $0xcb] sm:$0xff]  ;;  %11641 = vmatprep.mubr.f32.mxu1 %v1794_v42  ;;  %v14220_v47 = vmax.f32 %v1680_v37, %v1682_v38  ;;  %1367 = vst [vmem:[#allocation2 + $0x288] sm:$0xff] %v1269_v39  ;;  %v1268_v48 = vmax.f32 %v1100_v40, 0.0  ;;  %v1115_v49 = vadd.f32 %v14196_v43, %v11548_v46 }
 0x17a   : > { %11879 = vmatmul.mubr.f32.gmra.mxu0 %v2710_v44  ;;  %v1675_v50 = vld [vmem:[#allocation2 + $0x25c] ss:$2 sm:$0x3f]  ;;  %v1679_v51 = vld [vmem:[#allocation2 + $0x25d] ss:$2 sm:$0x3f]  ;;  %v1109_v52 = vpop.f32.mrf.mxu0 }
 0x17b   : > { %1686 = vst [vmem:[#allocation3 + $0xda] sm:$0xff] %v14220_v47  ;;  %v1683_v54 = vmax.f32 %v1675_v50, %v1679_v51  ;;  %1366 = vst [vmem:[#allocation2 + $0x280] sm:$0xff] %v1268_v48  ;;  %v1271_v55 = vmax.f32 %v1115_v49, 0.0  ;;  %v1110_v56 = vadd.f32 %v14196_v43, %v1109_v52 }
 0x17c   : > { %v11551_v57 = vpop.f32.mrf.mxu0 }
 0x17d   : > { %1369 = vst [vmem:[#allocation2 + $0x298] sm:$0xff] %v1271_v55  ;;  %v1270_v58 = vmax.f32 %v1110_v56, 0.0  ;;  %v1125_v59 = vadd.f32 %v14196_v43, %v11551_v57  ;;  %v1685_v60 = vmax.f32 %v1681_v53, %v1683_v54 }
 0x17e   : > { %v1119_v61 = vpop.f32.mrf.mxu0  ;;  %v1689_v9 = vld [vmem:[#allocation2 + $0x268] ss:$2 sm:$0xff]  ;;  %v1693_v12 = vld [vmem:[#allocation2 + $0x269] ss:$2 sm:$0xff] }
 0x17f   : > { %1368 = vst [vmem:[#allocation2 + $0x290] sm:$0xff] %v1270_v58  ;;  %v1273_v62 = vmax.f32 %v1125_v59, 0.0  ;;  %v1120_v63 = vadd.f32 %v14196_v43, %v1119_v61  ;;  %1687 = vst [vmem:[#allocation3 + $0xe2] sm:$0x3f] %v1685_v60  ;;  %v1704_v25 = vmax.f32 %v1689_v9, %v1693_v12 }
 0x180   : > { %v11554_v0 = vpop.f32.mrf.mxu0 }
 0x181   : > { %1371 = vst [vmem:[#allocation2 + $0x2a8] sm:$0xff] %v1273_v62  ;;  %v1272_v1 = vmax.f32 %v1120_v63, 0.0  ;;  %v1135_v2 = vadd.f32 %v14196_v43, %v11554_v0 }
 0x182   : > { %v1129_v3 = vpop.f32.mrf.mxu0  ;;  %v1795_v6 = vld [vmem:[#allocation3 + $0xd8] sm:$0xff]  ;;  %v1691_v10 = vld [vmem:[#allocation2 + $0x278] ss:$2 sm:$0x3f] }
 0x183   : > { %1370 = vst [vmem:[#allocation2 + $0x2a0] sm:$0xff] %v1272_v1  ;;  %v1275_v4 = vmax.f32 %v1135_v2, 0.0  ;;  %v1130_v5 = vadd.f32 %v14196_v43, %v1129_v3  ;;  %v2711_v8 = vld [vmem:[#allocation3 + $0xd3] sm:$0xff]  ;;  %11642 = vmatmul.mubr.f32.gmra.mxu1 %v1795_v6 }
 0x184   : > { %11881 = vmatprep.mubr.f32.mxu0 %v2711_v8  ;;  %v11557_v11 = vpop.f32.mrf.mxu0  ;;  %v1695_v13 = vld [vmem:[#allocation2 + $0x279] ss:$2 sm:$0x3f] }
 0x185   : > { %1373 = vst [vmem:[#allocation2 + $0x2b8] sm:$0xff] %v1275_v4  ;;  %v1274_v14 = vmax.f32 %v1130_v5, 0.0  ;;  %v1145_v15 = vadd.f32 %v14196_v43, %v11557_v11  ;;  %v1705_v26 = vmax.f32 %v1691_v10, %v1695_v13  ;;  %v2073_v4 = vld [vmem:[#allocation3 + $0x1] sm:$0xff] }
 0x186   : > { %v1697_v16 = vld [vmem:[#allocation2 + $0x284] ss:$2 sm:$0xff]  ;;  %v1699_v17 = vld [vmem:[#allocation2 + $0x294] ss:$2 sm:$0x3f]  ;;  %v1139_v18 = vpop.f32.mrf.mxu0 }
 0x187   : > { %v1796_v19 = vld [vmem:[#allocation3 + $0xe0] sm:$0xff]  ;;  %1372 = vst [vmem:[#allocation2 + $0x2b0] sm:$0xff] %v1274_v14  ;;  %v1277_v23 = vmax.f32 %v1145_v15, 0.0  ;;  %v1140_v24 = vadd.f32 %v14196_v43, %v1139_v18  ;;  %v2074_v15 = vld [vmem:[#allocation3 + $0x9] sm:$0xff]  ;;  %v2075_v18 = vld [vmem:[#allocation3 + $0x11] sm:$0xff] }
 0x188   : > { %v1701_v20 = vld [vmem:[#allocation2 + $0x285] ss:$2 sm:$0xff]  ;;  %v1703_v22 = vld [vmem:[#allocation2 + $0x295] ss:$2 sm:$0x3f]  ;;  %11644 = vmatprep.mubr.f32.mxu1 %v1796_v19  ;;  %v11560_v32 = vpop.f32.mrf.mxu0 }
 0x189   : > { %v1706_v28 = vmax.f32 %v1697_v16, %v1701_v20  ;;  %v1707_v29 = vmax.f32 %v1699_v17, %v1703_v22  ;;  %v2712_v30 = vld [vmem:[#allocation3 + $0xdb] sm:$0xff]  ;;  %v2713_v31 = vld [vmem:[#allocation3 + $0xe3] sm:$0xff]  ;;  %1375 = vst [vmem:[#allocation2 + $0x2c8] sm:$0xff] %v1277_v23  ;;  %v1276_v33 = vmax.f32 %v1140_v24, 0.0  ;;  %v1155_v34 = vadd.f32 %v14196_v43, %v11560_v32  ;;  %v14246_v23 = vld [vmem:[#allocation3 + $0x12] sm:$0xff] }
 0x18a   : > { %11882 = vmatmul.mubr.f32.gmra.mxu0 %v2712_v30  ;;  %v1149_v37 = vpop.f32.mrf.mxu0  ;;  %v1713_v44 = vld [vmem:[#allocation2 + $0x2a0] ss:$2 sm:$0xff]  ;;  %v1717_v45 = vld [vmem:[#allocation2 + $0x2a1] ss:$2 sm:$0xff]  ;;  %v9757_v19 = vld [vmem:[%s18280_s3 + $0x170] sm:$0xff] }
 0x18b   : > { %v1708_v35 = vmax.f32 %v1704_v25, %v1706_v28  ;;  %v1709_v36 = vmax.f32 %v1705_v26, %v1707_v29  ;;  %11884 = vmatprep.mubr.f32.mxu0 %v2713_v31  ;;  %1374 = vst [vmem:[#allocation2 + $0x2c0] sm:$0xff] %v1276_v33  ;;  %v1279_v38 = vmax.f32 %v1155_v34, 0.0  ;;  %v1150_v39 = vadd.f32 %v14196_v43, %v1149_v37  ;;  %v2076_v20 = vld [vmem:[#allocation3 + $0x19] sm:$0xff]  ;;  %v2077_v24 = vld [vmem:[#allocation3 + $0x21] sm:$0xff]  ;;  %v2078_v26 = vld [vmem:[#allocation3 + $0x29] sm:$0xff] }
 0x18c   : > { %v11563_v40 = vpop.f32.mrf.mxu0  ;;  %v1728_v51 = vmax.f32 %v1713_v44, %v1717_v45  ;;  %v14248_v25 = vld [vmem:[#allocation3 + $0x1a] sm:$0xff]  ;;  %v14255_v28 = vld [vmem:[#allocation3 + $0x22] sm:$0xff]  ;;  %v2079_v30 = vld [vmem:[#allocation3 + $0x31] sm:$0xff] }
 0x18d   : > { %1710 = vst [vmem:[#allocation3 + $0xec] sm:$0xff] %v1708_v35  ;;  %1711 = vst [vmem:[#allocation3 + $0xf4] sm:$0x3f] %v1709_v36  ;;  %v1278_v41 = vmax.f32 %v1150_v39, 0.0  ;;  %v1165_v42 = vadd.f32 %v14196_v43, %v11563_v40  ;;  %v9754_v29 = vld [vmem:[%s18280_s3 + $0x158] sm:$0xff]  ;;  %v9753_v32 = vld [vmem:[%s18280_s3 + $0x150] sm:$0xff] }
 0x18e   : > { %1377 = vst [vmem:[#allocation2 + $0x2d8] sm:$0xff] %v1279_v38  ;;  %v1159_v7 = vpop.f32.mrf.mxu0  ;;  %v1715_v49 = vld [vmem:[#allocation2 + $0x2b0] ss:$2 sm:$0x3f]  ;;  %v14268_v34 = vld [vmem:[#allocation3 + $0x32] sm:$0xff] }
 0x18f   : > { %1376 = vst [vmem:[#allocation2 + $0x2d0] sm:$0xff] %v1278_v41  ;;  %v1281_v46 = vmax.f32 %v1165_v42, 0.0  ;;  %v1160_v48 = vadd.f32 %v14196_v43, %v1159_v7  ;;  %v1719_v52 = vld [vmem:[#allocation2 + $0x2b1] ss:$2 sm:$0x3f]  ;;  %v2080_v33 = vld [vmem:[#allocation3 + $0x39] sm:$0xff] }
 0x190   : > { %v11566_v50 = vpop.f32.mrf.mxu0  ;;  %v1729_v2 = vmax.f32 %v1715_v49, %v1719_v52  ;;  %v14261_v31 = vld [vmem:[#allocation3 + $0x2a] sm:$0xff]  ;;  %v9837_v35 = vld [vmem:[%s18280_s3 + $0x3f0] sm:$0xff]  ;;  %v9752_v37 = vld [vmem:[%s18280_s3 + $0x148] sm:$0xff] }
 0x191   : > { %1379 = vst [vmem:[#allocation2 + $0x2e8] sm:$0xff] %v1281_v46  ;;  %v1280_v53 = vmax.f32 %v1160_v48, 0.0  ;;  %v1175_v54 = vadd.f32 %v14196_v43, %v11566_v50  ;;  %v2081_v36 = vld [vmem:[#allocation3 + $0x41] sm:$0xff]  ;;  %v2082_v38 = vld [vmem:[#allocation3 + $0x49] sm:$0xff]  ;;  %v2083_v41 = vld [vmem:[#allocation3 + $0x51] sm:$0xff] }
 0x192   : > { %v1721_v55 = vld [vmem:[#allocation2 + $0x2bc] ss:$2 sm:$0xff]  ;;  %v1725_v56 = vld [vmem:[#allocation2 + $0x2bd] ss:$2 sm:$0xff]  ;;  %v1169_v57 = vpop.f32.mrf.mxu0  ;;  %v14280_v39 = vld [vmem:[#allocation3 + $0x42] sm:$0xff] }
 0x193   : > { %v1730_v58 = vmax.f32 %v1721_v55, %v1725_v56  ;;  %1378 = vst [vmem:[#allocation2 + $0x2e0] sm:$0xff] %v1280_v53  ;;  %v1283_v62 = vmax.f32 %v1175_v54, 0.0  ;;  %v1170_v63 = vadd.f32 %v14196_v43, %v1169_v57  ;;  %v9751_v40 = vld [vmem:[%s18280_s3 + $0x140] sm:$0xff]  ;;  %v9750_v44 = vld [vmem:[%s18280_s3 + $0x138] sm:$0xff]  ;;  %v2084_v45 = vld [vmem:[#allocation3 + $0x59] sm:$0xff] }
 0x194   : > { %v1797_v59 = vld [vmem:[#allocation3 + $0xe8] sm:$0xff]  ;;  %v1798_v61 = vld [vmem:[#allocation3 + $0xf0] sm:$0xff]  ;;  %v11569_v1 = vpop.f32.mrf.mxu0  ;;  %v1799_v11 = vld [vmem:[#allocation3 + $0xf8] sm:$0xf] }
 0x195   : > { %v2714_v60 = vld [vmem:[#allocation3 + $0xeb] sm:$0xff]  ;;  %11645 = vmatmul.mubr.f32.gmra.mxu1 %v1797_v59  ;;  %v2715_v0 = vld [vmem:[#allocation3 + $0xf3] sm:$0xff]  ;;  %v1732_v3 = vmax.f32 %v1728_v51, %v1730_v58  ;;  %1381 = vst [vmem:[#allocation2 + $0x2f8] sm:$0xff] %v1283_v62  ;;  %v1282_v5 = vmax.f32 %v1170_v63, 0.0  ;;  %v1185_v6 = vadd.f32 %v14196_v43, %v11569_v1  ;;  %v2085_v48 = vld [vmem:[#allocation3 + $0x61] sm:$0xff] }
 0x196   : > { %11885 = vmatmul.mubr.f32.gmra.mxu0 %v2714_v60  ;;  %11647 = vmatprep.mubr.f32.mxu1 %v1798_v61  ;;  %v1723_v8 = vld [vmem:[#allocation2 + $0x2cc] ss:$2 sm:$0x3f]  ;;  %v1727_v9 = vld [vmem:[#allocation2 + $0x2cd] ss:$2 sm:$0x3f]  ;;  %v1179_v10 = vpop.f32.mrf.mxu0 }
 0x197   : > { %11887 = vmatprep.mubr.f32.mxu0 %v2715_v0  ;;  %1734 = vst [vmem:[#allocation3 + $0xfe] sm:$0xff] %v1732_v3  ;;  %v1731_v12 = vmax.f32 %v1723_v8, %v1727_v9  ;;  %1380 = vst [vmem:[#allocation2 + $0x2f0] sm:$0xff] %v1282_v5  ;;  %v1285_v13 = vmax.f32 %v1185_v6, 0.0  ;;  %v1180_v14 = vadd.f32 %v14196_v43, %v1179_v10  ;;  %v9756_v43 = vld [vmem:[%s18280_s3 + $0x168] sm:$0xff]  ;;  %v14286_v42 = vld [vmem:[#allocation3 + $0x4a] sm:$0xff] }
 0x198   : > { %v14292_v7 = vld [vmem:[#allocation3 + $0x52] sm:$0xff]  ;;  %v9749_v49 = vld [vmem:[%s18280_s3 + $0x130] sm:$0xff]  ;;  %v2086_v51 = vld [vmem:[#allocation3 + $0x69] sm:$0xff] }
 0x199   : > { %11648 = vmatmul.mubr.f32.gmra.mxu1 %v1799_v11  ;;  %v1733_v16 = vmax.f32 %v1729_v2, %v1731_v12  ;;  %1383 = vst [vmem:[#allocation2 + $0x308] sm:$0xff] %v1285_v13  ;;  %v1284_v17 = vmax.f32 %v1180_v14, 0.0  ;;  %v9836_v46 = vld [vmem:[%s18280_s3 + $0x3e8] sm:$0xff]  ;;  %v14304_v52 = vld [vmem:[#allocation3 + $0x62] sm:$0xff]  ;;  %v14310_v55 = vld [vmem:[#allocation3 + $0x6a] sm:$0xff] }
 0x19a   : > { %11682 = vmatprep.mubr.f32.mxu1 %v2073_v4  ;;  %v14301_v50 = vld [vmem:[#allocation3 + $0x5a] sm:$0xff]  ;;  %v2087_v54 = vld [vmem:[#allocation3 + $0x71] sm:$0xff]  ;;  %v9746_v61 = vld [vmem:[%s18280_s3 + $0x118] sm:$0xff] }
 0x19b   : > { %1735 = vst [vmem:[#allocation3 + $0x106] sm:$0x3f] %v1733_v16  ;;  %1382 = vst [vmem:[#allocation2 + $0x300] sm:$0xff] %v1284_v17  ;;  %v9748_v53 = vld [vmem:[%s18280_s3 + $0x128] sm:$0xff]  ;;  %v9747_v56 = vld [vmem:[%s18280_s3 + $0x120] sm:$0xff] }
 0x19c   : > { %v2088_v57 = vld [vmem:[#allocation3 + $0x79] sm:$0xff]  ;;  %v9835_v59 = vld [vmem:[%s18280_s3 + $0x3e0] sm:$0xff]  ;;  %v2089_v60 = vld [vmem:[#allocation3 + $0x81] sm:$0xff] }
 0x19d   : > { %11683 = vmatmul.mubr.f32.vlgmr.msra.gmra.mxu1 %v2074_v15  ;;  %v14316_v58 = vld [vmem:[#allocation3 + $0x72] sm:$0xff]  ;;  %v14325_v62 = vld [vmem:[#allocation3 + $0x7a] sm:$0xff]  ;;  %v2090_v63 = vld [vmem:[#allocation3 + $0x89] sm:$0xff] }
 0x19e   : > { %11731 = vmatpush3.msra.mxu1 %v14145_v27  ;;  %11685 = vmatprep.mubr.f32.mxu1 %v2075_v18  ;;  %v2716_v22 = vld [vmem:[#allocation3 + $0xfb] sm:$0xf]  ;;  %v9755_v27 = vld [vmem:[%s18280_s3 + $0x160] sm:$0xff]  ;;  %v14328_v0 = vld [vmem:[#allocation3 + $0x82] sm:$0xff] }
 0x19f   : > { %11732 = vmatprep.subr.mxu1 %v9757_v19  ;;  %11888 = vmatmul.mubr.f32.gmra.mxu0 %v2716_v22  ;;  %v9834_v1 = vld [vmem:[%s18280_s3 + $0x3d8] sm:$0xff]  ;;  %v2091_v2 = vld [vmem:[#allocation3 + $0x91] sm:$0xff]  ;;  %v9745_v3 = vld [vmem:[%s18280_s3 + $0x110] sm:$0xff] }
 0x1a0   : > { %11733 = vmatpush3.msra.mxu1 %v9757_v19  ;;  %12002 = vmatprep.mubr.f32.mxu0 %v14246_v23  ;;  %v1737_v4 = vld [vmem:[#allocation2 + $0x2d8] ss:$2 sm:$0xff]  ;;  %v1741_v6 = vld [vmem:[#allocation2 + $0x2d9] ss:$2 sm:$0xff]  ;;  %v2092_v10 = vld [vmem:[#allocation3 + $0x99] sm:$0xff] }
 0x1a1   : > { %11686 = vmatmul.mubr.f32.gmra.mxu1 %v2076_v20  ;;  %11734 = vmatprep.subr.mxu1 %v9756_v43  ;;  %v14337_v5 = vld [vmem:[#allocation3 + $0x8a] sm:$0xff]  ;;  %v14340_v11 = vld [vmem:[#allocation3 + $0x92] sm:$0xff]  ;;  %v9833_v12 = vld [vmem:[%s18280_s3 + $0x3d0] sm:$0xff]  ;;  %v1752_v15 = vmax.f32 %v1737_v4, %v1741_v6 }
 0x1a2   : > { %11688 = vmatprep.mubr.f32.mxu1 %v2077_v24  ;;  %11735 = vmatpush3.msra.mxu1 %v9756_v43  ;;  %v1745_v8 = vld [vmem:[#allocation2 + $0x2f4] ss:$2 sm:$0xff]  ;;  %v1749_v9 = vld [vmem:[#allocation2 + $0x2f5] ss:$2 sm:$0xff]  ;;  %v9744_v14 = vld [vmem:[%s18280_s3 + $0x108] sm:$0xff] }
 0x1a3   : > { %12003 = vmatmul.mubr.f32.vlgmr.msra.gmra.mxu0 %v14248_v25  ;;  %11736 = vmatprep.subr.mxu1 %v9755_v27  ;;  %v2093_v13 = vld [vmem:[#allocation3 + $0xa1] sm:$0xff]  ;;  %v1754_v16 = vmax.f32 %v1745_v8, %v1749_v9  ;;  %v2094_v18 = vld [vmem:[#allocation3 + $0xa9] sm:$0xff]  ;;  %v9832_v20 = vld [vmem:[%s18280_s3 + $0x3c8] sm:$0xff] }
 0x1a4   : > { %12005 = vmatprep.mubr.f32.mxu0 %v14255_v28  ;;  %11737 = vmatpush3.msra.mxu1 %v9755_v27  ;;  %v14349_v17 = vld [vmem:[#allocation3 + $0x9a] sm:$0xff]  ;;  %v14352_v19 = vld [vmem:[#allocation3 + $0xa2] sm:$0xff]  ;;  %v2095_v43 = vld [vmem:[#allocation3 + $0xb1] sm:$0xff] }
 0x1a5   : > { %11689 = vmatmul.mubr.f32.gmra.mxu1 %v2078_v26  ;;  %11738 = vmatprep.subr.mxu1 %v9754_v29  ;;  %v9743_v22 = vld [vmem:[%s18280_s3 + $0x100] sm:$0xff]  ;;  %v1756_v24 = vmax.f32 %v1752_v15, %v1754_v16  ;;  %v2096_v26 = vld [vmem:[#allocation3 + $0xb9] sm:$0xff]  ;;  %v3327_v4 = vld [vmem:[#allocation3 + $0x102] sm:$0xff] }
 0x1a6   : > { %11691 = vmatprep.mubr.f32.mxu1 %v2079_v30  ;;  %12131 = vmatpush3.msra.mxu0 %v14186_v21  ;;  %v14277_v21 = vld [vmem:[#allocation3 + $0x3a] sm:$0xff]  ;;  %v14361_v27 = vld [vmem:[#allocation3 + $0xaa] sm:$0xff] }
 0x1a7   : > { %12006 = vmatmul.mubr.f32.gmra.mxu0 %v14261_v31  ;;  %11739 = vmatpush3.msra.mxu1 %v9754_v29  ;;  %v14364_v29 = vld [vmem:[#allocation3 + $0xb2] sm:$0xff]  ;;  %1758 = vst [vmem:[#allocation3 + $0x110] sm:$0xff] %v1756_v24  ;;  %v3328_v6 = vld [vmem:[#allocation3 + $0x10a] sm:$0xf]  ;;  %v14459_v16 = vld [vmem:[#allocation3 + $0x3c] sm:$0xff]  ;;  %v14492_v24 = vpop.f32.mrf.mxu1 }
 0x1a8   : > { %12008 = vmatprep.mubr.f32.mxu0 %v14268_v34  ;;  %11740 = vmatprep.subr.mxu1 %v9753_v32  ;;  %v9831_v30 = vld [vmem:[%s18280_s3 + $0x3c0] sm:$0xff]  ;;  %v9824_v8 = vld [vmem:[%s18280_s3 + $0x388] sm:$0xff] }
 0x1a9   : > { %11692 = vmatmul.mubr.f32.gmra.mxu1 %v2080_v33  ;;  %12132 = vmatprep.subr.mxu0 %v9837_v35  ;;  %v9790_v33 = vld [vmem:[%s18280_s3 + $0x278] sm:$0xff]  ;;  %v9823_v9 = vld [vmem:[%s18280_s3 + $0x380] sm:$0xff] }
 0x1aa   : > { %11694 = vmatprep.mubr.f32.mxu1 %v2081_v36  ;;  %11741 = vmatpush3.msra.mxu1 %v9753_v32  ;;  %v2097_v32 = vld [vmem:[#allocation3 + $0xc1] sm:$0xff]  ;;  %v2098_v36 = vld [vmem:[#allocation3 + $0xc9] sm:$0xff]  ;;  %v14452_v15 = vld [vmem:[#allocation3 + $0x34] sm:$0xff] }
 0x1ab   : > { %12009 = vmatmul.mubr.f32.gmra.mxu0 %v14277_v21  ;;  %11742 = vmatprep.subr.mxu1 %v9752_v37 }
 0x1ac   : > { %12011 = vmatprep.mubr.f32.mxu0 %v14280_v39  ;;  %11743 = vmatpush3.msra.mxu1 %v9752_v37  ;;  %v14376_v37 = vld [vmem:[#allocation3 + $0xc2] sm:$0xff] }
 0x1ad   : > { %11695 = vmatmul.mubr.f32.gmra.mxu1 %v2082_v38  ;;  %11744 = vmatprep.subr.mxu1 %v9751_v40  ;;  %v9830_v38 = vld [vmem:[%s18280_s3 + $0x3b8] sm:$0xff] }
 0x1ae   : > { %11697 = vmatprep.mubr.f32.mxu1 %v2083_v41  ;;  %12133 = vmatpush3.msra.mxu0 %v9837_v35  ;;  %v14373_v35 = vld [vmem:[#allocation3 + $0xba] sm:$0xff]  ;;  %v14382_v41 = vld [vmem:[#allocation3 + $0xca] sm:$0xff] }
 0x1af   : > { %12012 = vmatmul.mubr.f32.gmra.mxu0 %v14286_v42  ;;  %11745 = vmatpush3.msra.mxu1 %v9751_v40  ;;  %v2099_v40 = vld [vmem:[#allocation3 + $0xd1] sm:$0xff] }
 0x1b0   : > { %12014 = vmatprep.mubr.f32.mxu0 %v14292_v7  ;;  %11746 = vmatprep.subr.mxu1 %v9750_v44 }
 0x1b1   : > { %11698 = vmatmul.mubr.f32.gmra.mxu1 %v2084_v45  ;;  %12134 = vmatprep.subr.mxu0 %v9836_v46  ;;  %v14385_v45 = vld [vmem:[#allocation3 + $0xd2] sm:$0xff] }
 0x1b2   : > { %11700 = vmatprep.mubr.f32.mxu1 %v2085_v48  ;;  %11747 = vmatpush3.msra.mxu1 %v9750_v44  ;;  %v2100_v44 = vld [vmem:[#allocation3 + $0xd9] sm:$0xff]  ;;  %v2101_v48 = vld [vmem:[#allocation3 + $0xe1] sm:$0xff] }
 0x1b3   : > { %12015 = vmatmul.mubr.f32.gmra.mxu0 %v14301_v50  ;;  %11748 = vmatprep.subr.mxu1 %v9749_v49 }
 0x1b4   : > { %12017 = vmatprep.mubr.f32.mxu0 %v14304_v52  ;;  %11749 = vmatpush3.msra.mxu1 %v9749_v49  ;;  %v2102_v49 = vld [vmem:[#allocation3 + $0xe9] sm:$0xff] }
 0x1b5   : > { %11701 = vmatmul.mubr.f32.gmra.mxu1 %v2086_v51  ;;  %11750 = vmatprep.subr.mxu1 %v9748_v53  ;;  %v14392_v51 = vld [vmem:[#allocation3 + $0xe2] sm:$0xff] }
 0x1b6   : > { %11703 = vmatprep.mubr.f32.mxu1 %v2087_v54  ;;  %12135 = vmatpush3.msra.mxu0 %v9836_v46  ;;  %v9829_v46 = vld [vmem:[%s18280_s3 + $0x3b0] sm:$0xff]  ;;  %v2103_v54 = vld [vmem:[#allocation3 + $0xf1] sm:$0xff] }
 0x1b7   : > { %12018 = vmatmul.mubr.f32.gmra.mxu0 %v14310_v55  ;;  %11751 = vmatpush3.msra.mxu1 %v9748_v53  ;;  %v9828_v53 = vld [vmem:[%s18280_s3 + $0x3a8] sm:$0xff] }
 0x1b8   : > { %12020 = vmatprep.mubr.f32.mxu0 %v14316_v58  ;;  %11752 = vmatprep.subr.mxu1 %v9747_v56 }
 0x1b9   : > { %11704 = vmatmul.mubr.f32.gmra.mxu1 %v2088_v57  ;;  %12136 = vmatprep.subr.mxu0 %v9835_v59  ;;  %v2379_v57 = vld [vmem:[#allocation3 + $0x2] sm:$0xff] }
 0x1ba   : > { %11706 = vmatprep.mubr.f32.mxu1 %v2089_v60  ;;  %11753 = vmatpush3.msra.mxu1 %v9747_v56  ;;  %v14398_v56 = vld [vmem:[#allocation3 + $0xea] sm:$0xff] }
 0x1bb   : > { %12021 = vmatmul.mubr.f32.gmra.mxu0 %v14325_v62  ;;  %11754 = vmatprep.subr.mxu1 %v9746_v61  ;;  %v9827_v60 = vld [vmem:[%s18280_s3 + $0x3a0] sm:$0xff] }
 0x1bc   : > { %12023 = vmatprep.mubr.f32.mxu0 %v14328_v0  ;;  %12137 = vmatpush3.msra.mxu0 %v9835_v59  ;;  %v2104_v59 = vld [vmem:[#allocation3 + $0xf9] sm:$0xf] }
 0x1bd   : > { %11707 = vmatmul.mubr.f32.gmra.mxu1 %v2090_v63  ;;  %12138 = vmatprep.subr.mxu0 %v9834_v1  ;;  %v3326_v63 = vld [vmem:[#allocation3 + $0xfa] sm:$0xff] }
 0x1be   : > { %11709 = vmatprep.mubr.f32.mxu1 %v2091_v2  ;;  %11755 = vmatpush3.msra.mxu1 %v9746_v61  ;;  %v2380_v61 = vld [vmem:[#allocation3 + $0xa] sm:$0xff]  ;;  %v9825_v2 = vld [vmem:[%s18280_s3 + $0x390] sm:$0xff] }
 0x1bf   : > { %12024 = vmatmul.mubr.f32.gmra.mxu0 %v14337_v5  ;;  %11756 = vmatprep.subr.mxu1 %v9745_v3 }
 0x1c0   : > { %12026 = vmatprep.mubr.f32.mxu0 %v14340_v11  ;;  %12139 = vmatpush3.msra.mxu0 %v9834_v1  ;;  %v9826_v1 = vld [vmem:[%s18280_s3 + $0x398] sm:$0xff] }
 0x1c1   : > { %11710 = vmatmul.mubr.f32.gmra.mxu1 %v2092_v10  ;;  %12140 = vmatprep.subr.mxu0 %v9833_v12  ;;  %v14427_v10 = vld [vmem:[#allocation3 + $0x14] sm:$0xff] }
 0x1c2   : > { %11712 = vmatprep.mubr.f32.mxu1 %v2093_v13  ;;  %11757 = vmatpush3.msra.mxu1 %v9745_v3  ;;  %v9789_v3 = vld [vmem:[%s18280_s3 + $0x270] sm:$0xff] }
 0x1c3   : > { %12027 = vmatmul.mubr.f32.gmra.mxu0 %v14349_v17  ;;  %11758 = vmatprep.subr.mxu1 %v9744_v14  ;;  %v14442_v13 = vld [vmem:[#allocation3 + $0x24] sm:$0xff] }
 0x1c4   : > { %12029 = vmatprep.mubr.f32.mxu0 %v14352_v19  ;;  %12141 = vmatpush3.msra.mxu0 %v9833_v12  ;;  %v14430_v12 = vld [vmem:[#allocation3 + $0x1c] sm:$0xff] }
 0x1c5   : > { %11713 = vmatmul.mubr.f32.gmra.mxu1 %v2094_v18  ;;  %12142 = vmatprep.subr.mxu0 %v9832_v20  ;;  %v14466_v18 = vld [vmem:[#allocation3 + $0x44] sm:$0xff] }
 0x1c6   : > { %11715 = vmatprep.mubr.f32.mxu1 %v2095_v43  ;;  %11759 = vmatpush3.msra.mxu1 %v9744_v14  ;;  %v14445_v14 = vld [vmem:[#allocation3 + $0x2c] sm:$0xff]  ;;  %v14480_v43 = vld [vmem:[#allocation3 + $0x54] sm:$0xff] }
 0x1c7   : > { %12030 = vmatmul.mubr.f32.gmra.mxu0 %v14361_v27  ;;  %11760 = vmatprep.subr.mxu1 %v9743_v22 }
 0x1c8   : > { %12032 = vmatprep.mubr.f32.mxu0 %v14364_v29  ;;  %12143 = vmatpush3.msra.mxu0 %v9832_v20  ;;  %v14473_v20 = vld [vmem:[#allocation3 + $0x4c] sm:$0xff] }
 0x1c9   : > { %11716 = vmatmul.mubr.f32.gmra.mxu1 %v2096_v26  ;;  %12144 = vmatprep.subr.mxu0 %v9831_v30  ;;  %v14496_v26 = vld [vmem:[#allocation3 + $0x64] sm:$0xff] }
 0x1ca   : > { %11718 = vmatprep.mubr.f32.mxu1 %v2097_v32  ;;  %11761 = vmatpush3.msra.mxu1 %v9743_v22  ;;  %v14487_v22 = vld [vmem:[#allocation3 + $0x5c] sm:$0xff]  ;;  %v14508_v32 = vpop.f32.mrf.mxu1 }
 0x1cb   : > { %12033 = vmatmul.mubr.f32.gmra.mxu0 %v14373_v35  ;;  %11890 = vmatprep.subr.mxu1 %v9790_v33 }
 0x1cc   : > { %12035 = vmatprep.mubr.f32.mxu0 %v14376_v37  ;;  %12145 = vmatpush3.msra.mxu0 %v9831_v30  ;;  %v14503_v30 = vld [vmem:[#allocation3 + $0x6c] sm:$0xff] }
 0x1cd   : > { %11719 = vmatmul.mubr.f32.gmra.mxu1 %v2098_v36  ;;  %12146 = vmatprep.subr.mxu0 %v9830_v38  ;;  %v14519_v36 = vld [vmem:[#allocation3 + $0x7c] sm:$0xff] }
 0x1ce   : > { %11721 = vmatprep.mubr.f32.mxu1 %v2099_v40  ;;  %12147 = vmatpush3.msra.mxu0 %v9830_v38  ;;  %v14524_v38 = vpop.f32.mrf.mxu1  ;;  %v14528_v40 = vld [vmem:[#allocation3 + $0x84] sm:$0xff] }
 0x1cf   : > { %12036 = vmatmul.mubr.f32.gmra.mxu0 %v14382_v41  ;;  %12148 = vmatprep.subr.mxu0 %v9829_v46 }
 0x1d0   : > { %12038 = vmatprep.mubr.f32.mxu0 %v14385_v45  ;;  %12149 = vmatpush3.msra.mxu0 %v9829_v46  ;;  %v14537_v46 = vld [vmem:[#allocation3 + $0x8c] sm:$0xff] }
 0x1d1   : > { %11722 = vmatmul.mubr.f32.gmra.mxu1 %v2100_v44  ;;  %12150 = vmatprep.subr.mxu0 %v9828_v53  ;;  %v14533_v44 = vpop.f32.mrf.mxu0 }
 0x1d2   : > { %11724 = vmatprep.mubr.f32.mxu1 %v2101_v48  ;;  %12151 = vmatpush3.msra.mxu0 %v9828_v53  ;;  %18295 = vst [vmem:[#allocation5_spill] sm:$0xff] %v14533_v44  ;;  %v14542_v48 = vpop.f32.mrf.mxu1 }
 0x1d3   : > { %12039 = vmatmul.mubr.f32.gmra.mxu0 %v14220_v47  ;;  %v14401_v47 = vld [vmem:[#allocation3 + $0xf2] sm:$0xff]  ;;  %12152 = vmatprep.subr.mxu0 %v9827_v60  ;;  %v14551_v53 = vpop.f32.mrf.mxu0 }
 0x1d4   : > { %12041 = vmatprep.mubr.f32.mxu0 %v14392_v51  ;;  %12153 = vmatpush3.msra.mxu0 %v9827_v60  ;;  %18296 = vst [vmem:[#allocation6_spill] sm:$0xff] %v14551_v53 }
 0x1d5   : > { %11725 = vmatmul.mubr.f32.gmra.mxu1 %v2102_v49  ;;  %12154 = vmatprep.subr.mxu0 %v9826_v1  ;;  %v14546_v49 = vld [vmem:[#allocation3 + $0x94] sm:$0xff]  ;;  %v14569_v60 = vpop.f32.mrf.mxu0 }
 0x1d6   : > { %11727 = vmatprep.mubr.f32.mxu1 %v2103_v54  ;;  %12155 = vmatpush3.msra.mxu0 %v9826_v1  ;;  %v14555_v54 = vld [vmem:[#allocation3 + $0x9c] sm:$0xff]  ;;  %18297 = vst [vmem:[#allocation7_spill] sm:$0xff] %v14569_v60  ;;  %v14582_v1 = vld [vmem:[#allocation3 + $0xb4] sm:$0xff] }
 0x1d7   : > { %12042 = vmatmul.mubr.f32.gmra.mxu0 %v14398_v56  ;;  %12156 = vmatprep.subr.mxu0 %v9825_v2  ;;  %v3620_v60 = vld [vmem:[#allocation3 + $0x9b] sm:$0xff] }
 0x1d8   : > { %12044 = vmatprep.mubr.f32.mxu0 %v14401_v47  ;;  %12157 = vmatpush3.msra.mxu0 %v9825_v2  ;;  %v1739_v2 = vld [vmem:[#allocation2 + $0x2e8] ss:$2 sm:$0x3f] }
 0x1d9   : > { %11728 = vmatmul.mubr.f32.gmra.mxu1 %v2104_v59  ;;  %12158 = vmatprep.subr.mxu0 %v9824_v8  ;;  %v14564_v59 = vld [vmem:[#allocation3 + $0xa4] sm:$0xff] }
 0x1da   : > { %11762 = vmatprep.mubr.f32.mxu1 %v2379_v57  ;;  %12159 = vmatpush3.msra.mxu0 %v9824_v8  ;;  %v14560_v57 = vpop.f32.mrf.mxu1  ;;  %v1751_v8 = vld [vmem:[#allocation2 + $0x305] ss:$2 sm:$0x3f] }
 0x1db   : > { %12045 = vmatmul.mubr.f32.gmra.mxu0 %v3326_v63  ;;  %12160 = vmatprep.subr.mxu0 %v9823_v9 }
 0x1dc   : > { %12047 = vmatprep.mubr.f32.mxu0 %v3327_v4  ;;  %12161 = vmatpush3.msra.mxu0 %v9823_v9  ;;  %v14578_v63 = vpop.f32.mrf.mxu1  ;;  %v14587_v4 = vpop.f32.mrf.mxu0  ;;  %v9777_v9 = vld [vmem:[%s18280_s3 + $0x210] sm:$0xff] }
 0x1dd   : > { %11763 = vmatmul.mubr.f32.vlgmr.msra.gmra.mxu1 %v2380_v61  ;;  %v14573_v61 = vld [vmem:[#allocation3 + $0xac] sm:$0xff]  ;;  %18298 = vst [vmem:[#allocation8_spill] sm:$0xff] %v14587_v4 }
 0x1de   : > { %11891 = vmatpush3.msra.mxu1 %v9790_v33  ;;  %11765 = vmatprep.mubr.f32.mxu1 %v14246_v23  ;;  %v9788_v23 = vld [vmem:[%s18280_s3 + $0x268] sm:$0xff] }
 0x1df   : > { %11892 = vmatprep.subr.mxu1 %v9789_v3  ;;  %12048 = vmatmul.mubr.f32.gmra.mxu0 %v3328_v6  ;;  %v14512_v33 = vld [vmem:[#allocation3 + $0x74] sm:$0xff] }
 0x1e0   : > { %11893 = vmatpush3.msra.mxu1 %v9789_v3  ;;  %12162 = vmatprep.mubr.f32.mxu0 %v14427_v10  ;;  %v1743_v3 = vld [vmem:[#allocation2 + $0x2e9] ss:$2 sm:$0x3f]  ;;  %v1747_v6 = vld [vmem:[#allocation2 + $0x304] ss:$2 sm:$0x3f] }
 0x1e1   : > { %11766 = vmatmul.mubr.f32.gmra.mxu1 %v14248_v25  ;;  %11894 = vmatprep.subr.mxu1 %v9788_v23  ;;  %v9787_v25 = vld [vmem:[%s18280_s3 + $0x260] sm:$0xff] }
 0x1e2   : > { %11768 = vmatprep.mubr.f32.mxu1 %v14255_v28  ;;  %v9870_v28 = vld [vmem:[%s18280_s3 + $0x4f8] sm:$0xff]  ;;  %11895 = vmatpush3.msra.mxu1 %v9788_v23  ;;  %v14596_v23 = vpop.f32.mrf.mxu1 }
 0x1e3   : > { %12163 = vmatmul.mubr.f32.vlgmr.msra.gmra.mxu0 %v14430_v12  ;;  %11896 = vmatprep.subr.mxu1 %v9787_v25 }
 0x1e4   : > { %12165 = vmatprep.mubr.f32.mxu0 %v14442_v13  ;;  %11897 = vmatpush3.msra.mxu1 %v9787_v25  ;;  %v9860_v25 = vld [vmem:[%s18280_s3 + $0x4a8] sm:$0xff] }
 0x1e5   : > { %11769 = vmatmul.mubr.f32.gmra.mxu1 %v14261_v31  ;;  %v9786_v31 = vld [vmem:[%s18280_s3 + $0x258] sm:$0xff]  ;;  %12290 = vmatprep.subr.mxu0 %v9870_v28 }
 0x1e6   : > { %11771 = vmatprep.mubr.f32.mxu1 %v14268_v34  ;;  %v9869_v34 = vld [vmem:[%s18280_s3 + $0x4f0] sm:$0xff]  ;;  %11898 = vmatprep.subr.mxu1 %v9786_v31 }
 0x1e7   : > { %12166 = vmatmul.mubr.f32.gmra.mxu0 %v14445_v14  ;;  %11899 = vmatpush3.msra.mxu1 %v9786_v31  ;;  %v1755_v31 = vmax.f32 %v1747_v6, %v1751_v8  ;;  %v2992_v8 = vld [vmem:[#allocation3 + $0xc] sm:$0xff] }
 0x1e8   : > { %12168 = vmatprep.mubr.f32.mxu0 %v14452_v15  ;;  %12291 = vmatpush3.msra.mxu0 %v9870_v28  ;;  %v1753_v28 = vmax.f32 %v1739_v2, %v1743_v3  ;;  %v9857_v3 = vld [vmem:[%s18280_s3 + $0x490] sm:$0xff] }
 0x1e9   : > { %11772 = vmatmul.mubr.f32.gmra.mxu1 %v14277_v21  ;;  %v9785_v21 = vld [vmem:[%s18280_s3 + $0x250] sm:$0xff]  ;;  %12292 = vmatprep.subr.mxu0 %v9869_v34 }
 0x1ea   : > { %11774 = vmatprep.mubr.f32.mxu1 %v14280_v39  ;;  %v9868_v39 = vld [vmem:[%s18280_s3 + $0x4e8] sm:$0xff]  ;;  %11900 = vmatprep.subr.mxu1 %v9785_v21 }
 0x1eb   : > { %12169 = vmatmul.mubr.f32.gmra.mxu0 %v14459_v16  ;;  %11901 = vmatpush3.msra.mxu1 %v9785_v21  ;;  %v2406_v21 = vld [vmem:[#allocation3 + $0xda] sm:$0xff] }
 0x1ec   : > { %12171 = vmatprep.mubr.f32.mxu0 %v14466_v18  ;;  %12293 = vmatpush3.msra.mxu0 %v9869_v34  ;;  %v14605_v34 = vpop.f32.mrf.mxu0 }
 0x1ed   : > { %11775 = vmatmul.mubr.f32.gmra.mxu1 %v14286_v42  ;;  %v9784_v42 = vld [vmem:[%s18280_s3 + $0x248] sm:$0xff]  ;;  %12294 = vmatprep.subr.mxu0 %v9868_v39  ;;  %18299 = vst [vmem:[#allocation9_spill] sm:$0xff] %v14605_v34 }
 0x1ee   : > { %11777 = vmatprep.mubr.f32.mxu1 %v14292_v7  ;;  %v9867_v7 = vld [vmem:[%s18280_s3 + $0x4e0] sm:$0xff]  ;;  %11902 = vmatprep.subr.mxu1 %v9784_v42 }
 0x1ef   : > { %12172 = vmatmul.mubr.f32.gmra.mxu0 %v14473_v20  ;;  %11903 = vmatpush3.msra.mxu1 %v9784_v42  ;;  %v14614_v42 = vpop.f32.mrf.mxu1 }
 0x1f0   : > { %12174 = vmatprep.mubr.f32.mxu0 %v14480_v43  ;;  %12295 = vmatpush3.msra.mxu0 %v9868_v39  ;;  %v9776_v39 = vld [vmem:[%s18280_s3 + $0x208] sm:$0xff] }
 0x1f1   : > { %11778 = vmatmul.mubr.f32.gmra.mxu1 %v14301_v50  ;;  %v9783_v50 = vld [vmem:[%s18280_s3 + $0x240] sm:$0xff]  ;;  %12296 = vmatprep.subr.mxu0 %v9867_v7 }
 0x1f2   : > { %11780 = vmatprep.mubr.f32.mxu1 %v14304_v52  ;;  %v9866_v52 = vld [vmem:[%s18280_s3 + $0x4d8] sm:$0xff]  ;;  %11904 = vmatprep.subr.mxu1 %v9783_v50 }
 0x1f3   : > { %12175 = vmatmul.mubr.f32.gmra.mxu0 %v14487_v22  ;;  %11905 = vmatpush3.msra.mxu1 %v9783_v50  ;;  %v14622_v50 = vpop.f32.mrf.mxu0 }
 0x1f4   : > { %12177 = vmatprep.mubr.f32.mxu0 %v14496_v26  ;;  %12297 = vmatpush3.msra.mxu0 %v9867_v7  ;;  %v14617_v7 = vld [vmem:[#allocation3 + $0xd4] sm:$0xff]  ;;  %18300 = vst [vmem:[#allocation10_spill] sm:$0xff] %v14622_v50  ;;  %v3618_v50 = vld [vmem:[#allocation3 + $0x8b] sm:$0xff] }
 0x1f5   : > { %11781 = vmatmul.mubr.f32.gmra.mxu1 %v14310_v55  ;;  %v9782_v55 = vld [vmem:[%s18280_s3 + $0x238] sm:$0xff]  ;;  %12298 = vmatprep.subr.mxu0 %v9866_v52 }
 0x1f6   : > { %11783 = vmatprep.mubr.f32.mxu1 %v14316_v58  ;;  %v9865_v58 = vld [vmem:[%s18280_s3 + $0x4d0] sm:$0xff]  ;;  %11906 = vmatprep.subr.mxu1 %v9782_v55 }
 0x1f7   : > { %12178 = vmatmul.mubr.f32.gmra.mxu0 %v14503_v30  ;;  %11907 = vmatpush3.msra.mxu1 %v9782_v55  ;;  %v14626_v55 = vpop.f32.mrf.mxu1 }
 0x1f8   : > { %12180 = vmatprep.mubr.f32.mxu0 %v14512_v33  ;;  %12299 = vmatpush3.msra.mxu0 %v9866_v52  ;;  %v1757_v52 = vmax.f32 %v1753_v28, %v1755_v31  ;;  %v3939_v28 = vld [vmem:[#allocation3 + $0x104] sm:$0xff] }
 0x1f9   : > { %11784 = vmatmul.mubr.f32.gmra.mxu1 %v14325_v62  ;;  %v9781_v62 = vld [vmem:[%s18280_s3 + $0x230] sm:$0xff]  ;;  %12300 = vmatprep.subr.mxu0 %v9865_v58 }
 0x1fa   : > { %11786 = vmatprep.mubr.f32.mxu1 %v14328_v0  ;;  %v9864_v0 = vld [vmem:[%s18280_s3 + $0x4c8] sm:$0xff]  ;;  %11908 = vmatprep.subr.mxu1 %v9781_v62  ;;  %1759 = vst [vmem:[#allocation3 + $0x118] sm:$0x3f] %v1757_v52 }
 0x1fb   : > { %12181 = vmatmul.mubr.f32.gmra.mxu0 %v14519_v36  ;;  %11909 = vmatpush3.msra.mxu1 %v9781_v62  ;;  %v14630_v62 = vld [vmem:[#allocation3 + $0xdc] sm:$0xff] }
 0x1fc   : > { %12183 = vmatprep.mubr.f32.mxu0 %v14528_v40  ;;  %12301 = vmatpush3.msra.mxu0 %v9865_v58  ;;  %v14628_v58 = vpop.f32.mrf.mxu0  ;;  %v9856_v52 = vld [vmem:[%s18280_s3 + $0x488] sm:$0xff] }
 0x1fd   : > { %11787 = vmatmul.mubr.f32.gmra.mxu1 %v14337_v5  ;;  %v9780_v5 = vld [vmem:[%s18280_s3 + $0x228] sm:$0xff]  ;;  %12302 = vmatprep.subr.mxu0 %v9864_v0  ;;  %18301 = vst [vmem:[#allocation11_spill] sm:$0xff] %v14628_v58 }
 0x1fe   : > { %11789 = vmatprep.mubr.f32.mxu1 %v14340_v11  ;;  %v9863_v11 = vld [vmem:[%s18280_s3 + $0x4c0] sm:$0xff]  ;;  %11910 = vmatprep.subr.mxu1 %v9780_v5 }
 0x1ff   : > { %12184 = vmatmul.mubr.f32.gmra.mxu0 %v14537_v46  ;;  %11911 = vmatpush3.msra.mxu1 %v9780_v5  ;;  %v9858_v5 = vld [vmem:[%s18280_s3 + $0x498] sm:$0xff] }
 0x200   : > { %12186 = vmatprep.mubr.f32.mxu0 %v14546_v49  ;;  %12303 = vmatpush3.msra.mxu0 %v9864_v0  ;;  %v9775_v0 = vld [vmem:[%s18280_s3 + $0x200] sm:$0xff] }
 0x201   : > { %11790 = vmatmul.mubr.f32.gmra.mxu1 %v14349_v17  ;;  %v9779_v17 = vld [vmem:[%s18280_s3 + $0x220] sm:$0xff]  ;;  %12304 = vmatprep.subr.mxu0 %v9863_v11 }
 0x202   : > { %11792 = vmatprep.mubr.f32.mxu1 %v14352_v19  ;;  %v9862_v19 = vld [vmem:[%s18280_s3 + $0x4b8] sm:$0xff]  ;;  %11912 = vmatprep.subr.mxu1 %v9779_v17 }
 0x203   : > { %12187 = vmatmul.mubr.f32.gmra.mxu0 %v14555_v54  ;;  %11913 = vmatpush3.msra.mxu1 %v9779_v17  ;;  %v14644_v17 = vpop.f32.mrf.mxu1 }
 0x204   : > { %12189 = vmatprep.mubr.f32.mxu0 %v14564_v59  ;;  %12305 = vmatpush3.msra.mxu0 %v9863_v11  ;;  %v2410_v11 = vld [vmem:[#allocation3 + $0xfa] sm:$0xf] }
 0x205   : > { %11793 = vmatmul.mubr.f32.gmra.mxu1 %v14361_v27  ;;  %v9778_v27 = vld [vmem:[%s18280_s3 + $0x218] sm:$0xff]  ;;  %12306 = vmatprep.subr.mxu0 %v9862_v19  ;;  %v14653_v2 = vpop.f32.mrf.mxu1 }
 0x206   : > { %11795 = vmatprep.mubr.f32.mxu1 %v14364_v29  ;;  %v9861_v29 = vld [vmem:[%s18280_s3 + $0x4b0] sm:$0xff]  ;;  %11914 = vmatprep.subr.mxu1 %v9778_v27 }
 0x207   : > { %12190 = vmatmul.mubr.f32.gmra.mxu0 %v14573_v61  ;;  %11915 = vmatpush3.msra.mxu1 %v9778_v27  ;;  %v14646_v27 = vpop.f32.mrf.mxu0  ;;  %v14667_v31 = vpop.f32.mrf.mxu1 }
 0x208   : > { %12192 = vmatprep.mubr.f32.mxu0 %v14582_v1  ;;  %12307 = vmatpush3.msra.mxu0 %v9862_v19  ;;  %v2991_v19 = vld [vmem:[#allocation3 + $0x4] sm:$0xff]  ;;  %18302 = vst [vmem:[#allocation12_spill] sm:$0xff] %v14646_v27 }
 0x209   : > { %11796 = vmatmul.mubr.f32.gmra.mxu1 %v14373_v35  ;;  %v14591_v35 = vld [vmem:[#allocation3 + $0xbc] sm:$0xff]  ;;  %12308 = vmatprep.subr.mxu0 %v9861_v29  ;;  %v14661_v6 = vpop.f32.mrf.mxu0 }
 0x20a   : > { %11798 = vmatprep.mubr.f32.mxu1 %v14376_v37  ;;  %v14600_v37 = vld [vmem:[#allocation3 + $0xc4] sm:$0xff]  ;;  %11916 = vmatprep.subr.mxu1 %v9777_v9  ;;  %18303 = vst [vmem:[#allocation13_spill] sm:$0xff] %v14661_v6  ;;  %v3616_v6 = vld [vmem:[#allocation3 + $0x7b] sm:$0xff] }
 0x20b   : > { %12193 = vmatmul.mubr.f32.gmra.mxu0 %v14591_v35  ;;  %11917 = vmatpush3.msra.mxu1 %v9777_v9  ;;  %v3938_v9 = vld [vmem:[#allocation3 + $0xfc] sm:$0xff] }
 0x20c   : > { %12195 = vmatprep.mubr.f32.mxu0 %v14600_v37  ;;  %12309 = vmatpush3.msra.mxu0 %v9861_v29  ;;  %v9822_v29 = vld [vmem:[%s18280_s3 + $0x378] sm:$0xff] }
 0x20d   : > { %11799 = vmatmul.mubr.f32.gmra.mxu1 %v14382_v41  ;;  %v14609_v41 = vld [vmem:[#allocation3 + $0xcc] sm:$0xff]  ;;  %12310 = vmatprep.subr.mxu0 %v9860_v25 }
 0x20e   : > { %11801 = vmatprep.mubr.f32.mxu1 %v14385_v45  ;;  %v9859_v45 = vld [vmem:[%s18280_s3 + $0x4a0] sm:$0xff]  ;;  %11918 = vmatprep.subr.mxu1 %v9776_v39 }
 0x20f   : > { %12196 = vmatmul.mubr.f32.gmra.mxu0 %v14609_v41  ;;  %11919 = vmatpush3.msra.mxu1 %v9776_v39  ;;  %v3940_v39 = vld [vmem:[#allocation3 + $0x10c] sm:$0xf] }
 0x210   : > { %12198 = vmatprep.mubr.f32.mxu0 %v14617_v7  ;;  %12311 = vmatpush3.msra.mxu0 %v9860_v25  ;;  %v9821_v25 = vld [vmem:[%s18280_s3 + $0x370] sm:$0xff] }
 0x211   : > { %11802 = vmatmul.mubr.f32.gmra.mxu1 %v2406_v21  ;;  %12312 = vmatprep.subr.mxu0 %v9859_v45  ;;  %v14669_v21 = vpop.f32.mrf.mxu0 }
 0x212   : > { %11804 = vmatprep.mubr.f32.mxu1 %v14392_v51  ;;  %v14637_v51 = vld [vmem:[#allocation3 + $0xe4] sm:$0xff]  ;;  %11920 = vmatprep.subr.mxu1 %v9775_v0  ;;  %18304 = vst [vmem:[#allocation14_spill] sm:$0xff] %v14669_v21 }
 0x213   : > { %12199 = vmatmul.mubr.f32.gmra.mxu0 %v14630_v62  ;;  %11921 = vmatpush3.msra.mxu1 %v9775_v0  ;;  %v14677_v0 = vpop.f32.mrf.mxu0 }
 0x214   : > { %12201 = vmatprep.mubr.f32.mxu0 %v14637_v51  ;;  %12313 = vmatpush3.msra.mxu0 %v9859_v45  ;;  %v14672_v45 = vpop.f32.mrf.mxu1  ;;  %18305 = vst [vmem:[#allocation15_spill] sm:$0xff] %v14677_v0 }
 0x215   : > { %11805 = vmatmul.mubr.f32.gmra.mxu1 %v14398_v56  ;;  %v14648_v56 = vld [vmem:[#allocation3 + $0xec] sm:$0xff]  ;;  %12314 = vmatprep.subr.mxu0 %v9858_v5 }
 0x216   : > { %11807 = vmatprep.mubr.f32.mxu1 %v14401_v47  ;;  %v14656_v47 = vld [vmem:[#allocation3 + $0xf4] sm:$0xff]  ;;  %12050 = vmatprep.subr.mxu1 %v9822_v29 }
 0x217   : > { %12202 = vmatmul.mubr.f32.gmra.mxu0 %v14648_v56 }
 0x218   : > { %12204 = vmatprep.mubr.f32.mxu0 %v14656_v47  ;;  %12315 = vmatpush3.msra.mxu0 %v9858_v5  ;;  %v9820_v5 = vld [vmem:[%s18280_s3 + $0x368] sm:$0xff] }
 0x219   : > { %11808 = vmatmul.mubr.f32.gmra.mxu1 %v2410_v11  ;;  %12316 = vmatprep.subr.mxu0 %v9857_v3  ;;  %v4521_v11 = vld [vmem:[#allocation3 + $0x16] sm:$0xff] }
 0x21a   : > { %11922 = vmatprep.mubr.f32.mxu1 %v2991_v19  ;;  %12317 = vmatpush3.msra.mxu0 %v9857_v3  ;;  %v14687_v19 = vpop.f32.mrf.mxu1  ;;  %v14689_v3 = vpop.f32.mrf.mxu0 }
 0x21b   : > { %12205 = vmatmul.mubr.f32.gmra.mxu0 %v3938_v9  ;;  %12318 = vmatprep.subr.mxu0 %v9856_v52  ;;  %18306 = vst [vmem:[#allocation16_spill] sm:$0xff] %v14689_v3  ;;  %v4523_v9 = vld [vmem:[#allocation3 + $0x26] sm:$0xff] }
 0x21c   : > { %12207 = vmatprep.mubr.f32.mxu0 %v3939_v28  ;;  %12319 = vmatpush3.msra.mxu0 %v9856_v52  ;;  %v9818_v28 = vld [vmem:[%s18280_s3 + $0x358] sm:$0xff] }
 0x21d   : > { %11923 = vmatmul.mubr.f32.vlgmr.msra.gmra.mxu1 %v2992_v8  ;;  %v14698_v8 = vpop.f32.mrf.mxu0  ;;  %v3614_v3 = vld [vmem:[#allocation3 + $0x6b] sm:$0xff] }
 0x21e   : > { %12051 = vmatpush3.msra.mxu1 %v9822_v29  ;;  %11925 = vmatprep.mubr.f32.mxu1 %v14427_v10  ;;  %v9855_v10 = vld [vmem:[%s18280_s3 + $0x480] sm:$0xff]  ;;  %v4522_v29 = vld [vmem:[#allocation3 + $0x1e] sm:$0xff]  ;;  %18307 = vst [vmem:[#allocation17_spill] sm:$0xff] %v14698_v8 }
 0x21f   : > { %12052 = vmatprep.subr.mxu1 %v9821_v25  ;;  %12208 = vmatmul.mubr.f32.gmra.mxu0 %v3940_v39  ;;  %v9901_v39 = vld [vmem:[%s18280_s3 + $0x5f0] sm:$0xff]  ;;  %v14710_v52 = vpop.f32.mrf.mxu0 }
 0x220   : > { %12053 = vmatpush3.msra.mxu1 %v9821_v25  ;;  %12320 = vmatprep.subr.mxu0 %v9855_v10  ;;  %v14700_v25 = vpop.f32.mrf.mxu1  ;;  %18308 = vst [vmem:[#allocation18_spill] sm:$0xff] %v14710_v52 }
 0x221   : > { %11926 = vmatmul.mubr.f32.gmra.mxu1 %v14430_v12  ;;  %12054 = vmatprep.subr.mxu1 %v9820_v5  ;;  %v9819_v12 = vld [vmem:[%s18280_s3 + $0x360] sm:$0xff] }
 0x222   : > { %11928 = vmatprep.mubr.f32.mxu1 %v14442_v13  ;;  %12322 = vmatprep.mubr.f32.mxu0 %v4521_v11  ;;  %v9902_v13 = vld [vmem:[%s18280_s3 + $0x5f8] sm:$0xff]  ;;  %v4526_v11 = vld [vmem:[#allocation3 + $0x3e] sm:$0xff] }
 0x223   : > { %12321 = vmatpush3.msra.mxu0 %v9855_v10  ;;  %12055 = vmatpush3.msra.mxu1 %v9820_v5  ;;  %v14712_v5 = vpop.f32.mrf.mxu1 }
 0x224   : > { %12323 = vmatmul.mubr.f32.vlgmr.msra.gmra.mxu0 %v4522_v29  ;;  %12056 = vmatprep.subr.mxu1 %v9819_v12  ;;  %v9817_v29 = vld [vmem:[%s18280_s3 + $0x350] sm:$0xff] }
 0x225   : > { %11929 = vmatmul.mubr.f32.gmra.mxu1 %v14445_v14  ;;  %12325 = vmatprep.mubr.f32.mxu0 %v4523_v9  ;;  %v4524_v14 = vld [vmem:[#allocation3 + $0x2e] sm:$0xff]  ;;  %v14717_v10 = vpop.f32.mrf.mxu1 }
 0x226   : > { %11931 = vmatprep.mubr.f32.mxu1 %v14452_v15  ;;  %12450 = vmatprep.subr.mxu0 %v9902_v13  ;;  %v4525_v15 = vld [vmem:[#allocation3 + $0x36] sm:$0xff]  ;;  %v4528_v9 = vld [vmem:[#allocation3 + $0x4e] sm:$0xff] }
 0x227   : > { %12451 = vmatpush3.msra.mxu0 %v9902_v13  ;;  %12057 = vmatpush3.msra.mxu1 %v9819_v12  ;;  %v9900_v12 = vld [vmem:[%s18280_s3 + $0x5e8] sm:$0xff] }
 0x228   : > { %12326 = vmatmul.mubr.f32.gmra.mxu0 %v4524_v14  ;;  %12058 = vmatprep.subr.mxu1 %v9818_v28  ;;  %v9816_v14 = vld [vmem:[%s18280_s3 + $0x348] sm:$0xff] }
 0x229   : > { %11932 = vmatmul.mubr.f32.gmra.mxu1 %v14459_v16  ;;  %12328 = vmatprep.mubr.f32.mxu0 %v4525_v15  ;;  %v14715_v16 = vpop.f32.mrf.mxu0 }
 0x22a   : > { %11934 = vmatprep.mubr.f32.mxu1 %v14466_v18  ;;  %18309 = vst [vmem:[#allocation19_spill] sm:$0xff] %v14715_v16  ;;  %12452 = vmatprep.subr.mxu0 %v9901_v39  ;;  %v4527_v18 = vld [vmem:[#allocation3 + $0x46] sm:$0xff]  ;;  %v3612_v16 = vld [vmem:[#allocation3 + $0x5b] sm:$0xff] }
 0x22b   : > { %12453 = vmatpush3.msra.mxu0 %v9901_v39  ;;  %12059 = vmatpush3.msra.mxu1 %v9818_v28  ;;  %v14727_v13 = vpop.f32.mrf.mxu0  ;;  %v9899_v28 = vld [vmem:[%s18280_s3 + $0x5e0] sm:$0xff] }
 0x22c   : > { %12329 = vmatmul.mubr.f32.gmra.mxu0 %v4526_v11  ;;  %18310 = vst [vmem:[#allocation20_spill] sm:$0xff] %v14727_v13  ;;  %12060 = vmatprep.subr.mxu1 %v9817_v29  ;;  %v4529_v39 = vld [vmem:[#allocation3 + $0x56] sm:$0xff] }
 0x22d   : > { %11935 = vmatmul.mubr.f32.gmra.mxu1 %v14473_v20  ;;  %12331 = vmatprep.mubr.f32.mxu0 %v4527_v18  ;;  %v14729_v20 = vpop.f32.mrf.mxu1  ;;  %v9815_v11 = vld [vmem:[%s18280_s3 + $0x340] sm:$0xff] }
 0x22e   : > { %11937 = vmatprep.mubr.f32.mxu1 %v14480_v43  ;;  %12454 = vmatprep.subr.mxu0 %v9900_v12  ;;  %v14738_v43 = vpop.f32.mrf.mxu0 }
 0x22f   : > { %12455 = vmatpush3.msra.mxu0 %v9900_v12  ;;  %18311 = vst [vmem:[#allocation21_spill] sm:$0xff] %v14738_v43  ;;  %12061 = vmatpush3.msra.mxu1 %v9817_v29  ;;  %v14740_v15 = vpop.f32.mrf.mxu1  ;;  %v9898_v29 = vld [vmem:[%s18280_s3 + $0x5d8] sm:$0xff] }
 0x230   : > { %12332 = vmatmul.mubr.f32.gmra.mxu0 %v4528_v9  ;;  %12062 = vmatprep.subr.mxu1 %v9816_v14  ;;  %v14750_v12 = vpop.f32.mrf.mxu0  ;;  %v4532_v9 = vld [vmem:[#allocation3 + $0x6e] sm:$0xff] }
 0x231   : > { %11938 = vmatmul.mubr.f32.gmra.mxu1 %v14487_v22  ;;  %12334 = vmatprep.mubr.f32.mxu0 %v4529_v39  ;;  %v4530_v22 = vld [vmem:[#allocation3 + $0x5e] sm:$0xff]  ;;  %18312 = vst [vmem:[#allocation22_spill] sm:$0xff] %v14750_v12  ;;  %v14752_v18 = vpop.f32.mrf.mxu1 }
 0x232   : > { %11940 = vmatprep.mubr.f32.mxu1 %v14496_v26  ;;  %12456 = vmatprep.subr.mxu0 %v9899_v28  ;;  %v4531_v26 = vld [vmem:[#allocation3 + $0x66] sm:$0xff]  ;;  %18313 = vst [vmem:[#allocation23_spill] sm:$0xff] %v14752_v18  ;;  %v14764_v39 = vpop.f32.mrf.mxu0 }
 0x233   : > { %12457 = vmatpush3.msra.mxu0 %v9899_v28  ;;  %12063 = vmatpush3.msra.mxu1 %v9816_v14  ;;  %v9814_v28 = vld [vmem:[%s18280_s3 + $0x338] sm:$0xff]  ;;  %v9897_v14 = vld [vmem:[%s18280_s3 + $0x5d0] sm:$0xff]  ;;  %18314 = vst [vmem:[#allocation24_spill] sm:$0xff] %v14764_v39 }
 0x234   : > { %12335 = vmatmul.mubr.f32.gmra.mxu0 %v4530_v22  ;;  %12064 = vmatprep.subr.mxu1 %v9815_v11  ;;  %v4534_v22 = vld [vmem:[#allocation3 + $0x7e] sm:$0xff] }
 0x235   : > { %11941 = vmatmul.mubr.f32.gmra.mxu1 %v14503_v30  ;;  %12337 = vmatprep.mubr.f32.mxu0 %v4531_v26  ;;  %v14755_v30 = vpop.f32.mrf.mxu1  ;;  %v14776_v26 = vpop.f32.mrf.mxu0 }
 0x236   : > { %11943 = vmatprep.mubr.f32.mxu1 %v14512_v33  ;;  %12458 = vmatprep.subr.mxu0 %v9898_v29  ;;  %v4533_v33 = vld [vmem:[#allocation3 + $0x76] sm:$0xff]  ;;  %18316 = vst [vmem:[#allocation26_spill] sm:$0xff] %v14776_v26 }
 0x237   : > { %12459 = vmatpush3.msra.mxu0 %v9898_v29  ;;  %12065 = vmatpush3.msra.mxu1 %v9815_v11  ;;  %v9813_v29 = vld [vmem:[%s18280_s3 + $0x330] sm:$0xff]  ;;  %v9896_v11 = vld [vmem:[%s18280_s3 + $0x5c8] sm:$0xff] }
 0x238   : > { %12338 = vmatmul.mubr.f32.gmra.mxu0 %v4532_v9  ;;  %12066 = vmatprep.subr.mxu1 %v9814_v28 }
 0x239   : > { %11944 = vmatmul.mubr.f32.gmra.mxu1 %v14519_v36  ;;  %12340 = vmatprep.mubr.f32.mxu0 %v4533_v33  ;;  %v14767_v36 = vpop.f32.mrf.mxu1  ;;  %v9812_v33 = vld [vmem:[%s18280_s3 + $0x328] sm:$0xff] }
 0x23a   : > { %11946 = vmatprep.mubr.f32.mxu1 %v14528_v40  ;;  %12460 = vmatprep.subr.mxu0 %v9897_v14  ;;  %18315 = vst [vmem:[#allocation25_spill] sm:$0xff] %v14767_v36  ;;  %v4535_v40 = vld [vmem:[#allocation3 + $0x86] sm:$0xff] }
 0x23b   : > { %12461 = vmatpush3.msra.mxu0 %v9897_v14  ;;  %12067 = vmatpush3.msra.mxu1 %v9814_v28  ;;  %v14778_v9 = vpop.f32.mrf.mxu1  ;;  %v4536_v14 = vld [vmem:[#allocation3 + $0x8e] sm:$0xff] }
 0x23c   : > { %12341 = vmatmul.mubr.f32.gmra.mxu0 %v4534_v22  ;;  %12068 = vmatprep.subr.mxu1 %v9813_v29  ;;  %v9895_v28 = vld [vmem:[%s18280_s3 + $0x5c0] sm:$0xff] }
 0x23d   : > { %11947 = vmatmul.mubr.f32.gmra.mxu1 %v14537_v46  ;;  %12343 = vmatprep.mubr.f32.mxu0 %v4535_v40  ;;  %v14781_v46 = vpop.f32.mrf.mxu0  ;;  %v14790_v22 = vpop.f32.mrf.mxu1  ;;  %v3622_v36 = vld [vmem:[#allocation3 + $0xab] sm:$0xff] }
 0x23e   : > { %11949 = vmatprep.mubr.f32.mxu1 %v14546_v49  ;;  %18317 = vst [vmem:[#allocation27_spill] sm:$0xff] %v14781_v46  ;;  %12462 = vmatprep.subr.mxu0 %v9896_v11  ;;  %v4537_v49 = vld [vmem:[#allocation3 + $0x96] sm:$0xff] }
 0x23f   : > { %12463 = vmatpush3.msra.mxu0 %v9896_v11  ;;  %12069 = vmatpush3.msra.mxu1 %v9813_v29  ;;  %v14793_v40 = vpop.f32.mrf.mxu0  ;;  %v9811_v11 = vld [vmem:[%s18280_s3 + $0x320] sm:$0xff]  ;;  %v9894_v29 = vld [vmem:[%s18280_s3 + $0x5b8] sm:$0xff] }
 0x240   : > { %12344 = vmatmul.mubr.f32.gmra.mxu0 %v4536_v14  ;;  %18318 = vst [vmem:[#allocation28_spill] sm:$0xff] %v14793_v40  ;;  %12070 = vmatprep.subr.mxu1 %v9812_v33 }
 0x241   : > { %11950 = vmatmul.mubr.f32.gmra.mxu1 %v14555_v54  ;;  %12346 = vmatprep.mubr.f32.mxu0 %v4537_v49  ;;  %v4538_v54 = vld [vmem:[#allocation3 + $0x9e] sm:$0xff]  ;;  %v14802_v14 = vpop.f32.mrf.mxu0  ;;  %v14804_v49 = vpop.f32.mrf.mxu1 }
 0x242   : > { %11952 = vmatprep.mubr.f32.mxu1 %v14564_v59  ;;  %12464 = vmatprep.subr.mxu0 %v9895_v28  ;;  %18319 = vst [vmem:[#allocation29_spill] sm:$0xff] %v14802_v14  ;;  %v4539_v59 = vld [vmem:[#allocation3 + $0xa6] sm:$0xff] }
 0x243   : > { %12465 = vmatpush3.msra.mxu0 %v9895_v28  ;;  %12071 = vmatpush3.msra.mxu1 %v9812_v33  ;;  %v9810_v28 = vld [vmem:[%s18280_s3 + $0x318] sm:$0xff]  ;;  %v9893_v33 = vld [vmem:[%s18280_s3 + $0x5b0] sm:$0xff] }
 0x244   : > { %12347 = vmatmul.mubr.f32.gmra.mxu0 %v4538_v54  ;;  %12072 = vmatprep.subr.mxu1 %v9811_v11  ;;  %v14814_v54 = vpop.f32.mrf.mxu0 }
 0x245   : > { %11953 = vmatmul.mubr.f32.gmra.mxu1 %v14573_v61  ;;  %12349 = vmatprep.mubr.f32.mxu0 %v4539_v59  ;;  %v4540_v61 = vld [vmem:[#allocation3 + $0xae] sm:$0xff]  ;;  %18320 = vst [vmem:[#allocation30_spill] sm:$0xff] %v14814_v54  ;;  %v14816_v59 = vpop.f32.mrf.mxu1 }
 0x246   : > { %11955 = vmatprep.mubr.f32.mxu1 %v14582_v1  ;;  %12466 = vmatprep.subr.mxu0 %v9894_v29  ;;  %v4541_v1 = vld [vmem:[#allocation3 + $0xb6] sm:$0xff] }
 0x247   : > { %12467 = vmatpush3.msra.mxu0 %v9894_v29  ;;  %12073 = vmatpush3.msra.mxu1 %v9811_v11  ;;  %v14821_v14 = vpop.f32.mrf.mxu1  ;;  %v4542_v29 = vld [vmem:[#allocation3 + $0xbe] sm:$0xff]  ;;  %v3603_v54 = vld [vmem:[#allocation3 + $0x13] sm:$0xff] }
 0x248   : > { %12350 = vmatmul.mubr.f32.gmra.mxu0 %v4540_v61  ;;  %12074 = vmatprep.subr.mxu1 %v9810_v28  ;;  %v9809_v11 = vld [vmem:[%s18280_s3 + $0x310] sm:$0xff]  ;;  %v9892_v61 = vld [vmem:[%s18280_s3 + $0x5a8] sm:$0xff] }
 0x249   : > { %11956 = vmatmul.mubr.f32.gmra.mxu1 %v14591_v35  ;;  %12352 = vmatprep.mubr.f32.mxu0 %v4541_v1  ;;  %v14819_v35 = vpop.f32.mrf.mxu0 }
 0x24a   : > { %11958 = vmatprep.mubr.f32.mxu1 %v14600_v37  ;;  %18321 = vst [vmem:[#allocation31_spill] sm:$0xff] %v14819_v35  ;;  %12468 = vmatprep.subr.mxu0 %v9893_v33  ;;  %v4543_v37 = vld [vmem:[#allocation3 + $0xc6] sm:$0xff]  ;;  %v4544_v35 = vld [vmem:[#allocation3 + $0xce] sm:$0xff] }
 0x24b   : > { %12469 = vmatpush3.msra.mxu0 %v9893_v33  ;;  %12075 = vmatpush3.msra.mxu1 %v9810_v28  ;;  %v14831_v1 = vpop.f32.mrf.mxu0  ;;  %v9808_v33 = vld [vmem:[%s18280_s3 + $0x308] sm:$0xff]  ;;  %v9891_v28 = vld [vmem:[%s18280_s3 + $0x5a0] sm:$0xff] }
 0x24c   : > { %12353 = vmatmul.mubr.f32.gmra.mxu0 %v4542_v29  ;;  %18322 = vst [vmem:[#allocation32_spill] sm:$0xff] %v14831_v1  ;;  %12076 = vmatprep.subr.mxu1 %v9809_v11  ;;  %v4545_v29 = vld [vmem:[#allocation3 + $0xd6] sm:$0xff] }
 0x24d   : > { %11959 = vmatmul.mubr.f32.gmra.mxu1 %v14609_v41  ;;  %12355 = vmatprep.mubr.f32.mxu0 %v4543_v37  ;;  %v14833_v41 = vpop.f32.mrf.mxu1  ;;  %v9807_v1 = vld [vmem:[%s18280_s3 + $0x300] sm:$0xff] }
 0x24e   : > { %11961 = vmatprep.mubr.f32.mxu1 %v14617_v7  ;;  %12470 = vmatprep.subr.mxu0 %v9892_v61  ;;  %v14842_v7 = vpop.f32.mrf.mxu0 }
 0x24f   : > { %12471 = vmatpush3.msra.mxu0 %v9892_v61  ;;  %18323 = vst [vmem:[#allocation33_spill] sm:$0xff] %v14842_v7  ;;  %12077 = vmatpush3.msra.mxu1 %v9809_v11  ;;  %v4547_v11 = vld [vmem:[#allocation3 + $0xe6] sm:$0xff] }
 0x250   : > { %12356 = vmatmul.mubr.f32.gmra.mxu0 %v4544_v35  ;;  %12078 = vmatprep.subr.mxu1 %v9808_v33  ;;  %v9890_v35 = vld [vmem:[%s18280_s3 + $0x598] sm:$0xff] }
 0x251   : > { %11962 = vmatmul.mubr.f32.gmra.mxu1 %v14630_v62  ;;  %12358 = vmatprep.mubr.f32.mxu0 %v4545_v29  ;;  %v4546_v62 = vld [vmem:[#allocation3 + $0xde] sm:$0xff]  ;;  %v14862_v29 = vld [vmem:[%s18281_s4] ss:$0 sm:$0xff] }
 0x252   : > { %11964 = vmatprep.mubr.f32.mxu1 %v14637_v51  ;;  %12472 = vmatprep.subr.mxu0 %v9891_v28  ;;  %v14856_v51 = vpop.f32.mrf.mxu0 }
 0x253   : > { %12473 = vmatpush3.msra.mxu0 %v9891_v28  ;;  %18324 = vst [vmem:[#allocation34_spill] sm:$0xff] %v14856_v51  ;;  %12079 = vmatpush3.msra.mxu1 %v9808_v33  ;;  %v3022_v28 = vld [vmem:[#allocation3 + $0xfc] sm:$0xf]  ;;  %v4548_v51 = vld [vmem:[#allocation3 + $0xee] sm:$0xff] }
 0x254   : > { %12359 = vmatmul.mubr.f32.gmra.mxu0 %v4546_v62  ;;  %12080 = vmatprep.subr.mxu1 %v9807_v1  ;;  %v9889_v62 = vld [vmem:[%s18280_s3 + $0x590] sm:$0xff] }
 0x255   : > { %v14845_v37 = vpop.f32.mrf.mxu1  ;;  %11965 = vmatmul.mubr.f32.gmra.mxu1 %v14648_v56  ;;  %12361 = vmatprep.mubr.f32.mxu0 %v4547_v11  ;;  %v2042_v11 = vadd.f32 %v14492_v24, %v14862_v29  ;;  %v9853_v24 = vld [vmem:[%s18280_s3 + $0x470] sm:$0xff] }
 0x256   : > { %11967 = vmatprep.mubr.f32.mxu1 %v14656_v47  ;;  %v14864_v7 = vpop.f32.mrf.mxu0  ;;  %12474 = vmatprep.subr.mxu0 %v9890_v35  ;;  %v9854_v47 = vld [vmem:[%s18280_s3 + $0x478] sm:$0xff] }
 0x257   : > { %v14848_v61 = vpop.f32.mrf.mxu1  ;;  %18325 = vst [vmem:[#allocation35_spill] sm:$0xff] %v14864_v7  ;;  %12475 = vmatpush3.msra.mxu0 %v9890_v35  ;;  %12081 = vmatpush3.msra.mxu1 %v9807_v1  ;;  %v3604_v7 = vld [vmem:[#allocation3 + $0x1b] sm:$0xff]  ;;  %v2044_v1 = vadd.f32 %v14524_v38, %v14862_v29  ;;  %v9887_v38 = vld [vmem:[%s18280_s3 + $0x580] sm:$0xff] }
 0x258   : > { %12362 = vmatmul.mubr.f32.gmra.mxu0 %v4548_v51  ;;  %v14876_v40 = vpop.f32.mrf.mxu0  ;;  %12210 = vmatprep.subr.mxu1 %v9854_v47  ;;  %v4550_v35 = vld [vmem:[#allocation3 + $0xfe] sm:$0xff] }
 0x259   : > { %v11649_v56 = vpop.f32.mrf.mxu1  ;;  %11968 = vmatmul.mubr.f32.gmra.mxu1 %v3022_v28  ;;  %18326 = vst [vmem:[#allocation36_spill] sm:$0xff] %v14876_v40  ;;  %12476 = vmatprep.subr.mxu0 %v9889_v62  ;;  %v3605_v51 = vld [vmem:[#allocation3 + $0x23] sm:$0xff] }
 0x25a   : > { %v4549_v56 = vld [vmem:[#allocation3 + $0xf6] sm:$0xff]  ;;  %12082 = vmatprep.mubr.f32.mxu1 %v3603_v54  ;;  %12477 = vmatpush3.msra.mxu0 %v9889_v62  ;;  %v3606_v62 = vld [vmem:[#allocation3 + $0x2b] sm:$0xff] }
 0x25b   : > { %v14866_v33 = vpop.f32.mrf.mxu1  ;;  %12364 = vmatprep.mubr.f32.mxu0 %v4549_v56  ;;  %v9888_v54 = vld [vmem:[%s18280_s3 + $0x588] sm:$0xff] }
 0x25c   : > { %12365 = vmatmul.mubr.f32.gmra.mxu0 %v4550_v35  ;;  %12478 = vmatprep.subr.mxu0 %v9888_v54  ;;  %v2046_v35 = vadd.f32 %v14560_v57, %v14862_v29  ;;  %v14913_v57 = vld [vmem:[#allocation3 + $0x2d] sm:$0xff] }
 0x25d   : > { %v11684_v28 = vpop.f32.mrf.mxu1  ;;  %12083 = vmatmul.mubr.f32.vlgmr.msra.gmra.mxu1 %v3604_v7  ;;  %12479 = vmatpush3.msra.mxu0 %v9888_v54 }
 0x25e   : > { %v14878_v46 = vadd.f32 %v11684_v28, %v2042_v11  ;;  %12211 = vmatpush3.msra.mxu1 %v9854_v47  ;;  %v4551_v11 = vld [vmem:[#allocation3 + $0x106] sm:$0xff]  ;;  %12085 = vmatprep.mubr.f32.mxu1 %v3605_v51  ;;  %v4552_v28 = vld [vmem:[#allocation3 + $0x10e] sm:$0xf]  ;;  %v9852_v47 = vld [vmem:[%s18280_s3 + $0x468] sm:$0xff] }
 0x25f   : > { %v14880_v26 = vpop.f32.mrf.mxu1  ;;  %v11889_v7 = vpop.f32.mrf.mxu0  ;;  %12367 = vmatprep.mubr.f32.mxu0 %v4551_v11  ;;  %12212 = vmatprep.subr.mxu1 %v9853_v24  ;;  %v14904_v51 = vld [vmem:[#allocation3 + $0x25] sm:$0xff] }
 0x260   : > { %12213 = vmatpush3.msra.mxu1 %v9853_v24  ;;  %12368 = vmatmul.mubr.f32.gmra.mxu0 %v4552_v28  ;;  %v9851_v28 = vld [vmem:[%s18280_s3 + $0x460] sm:$0xff] }
 0x261   : > { %v11687_v56 = vpop.f32.mrf.mxu1  ;;  %v14892_v39 = vpop.f32.mrf.mxu0  ;;  %12086 = vmatmul.mubr.f32.gmra.mxu1 %v3606_v62  ;;  %12482 = vmatprep.mubr.f32.mxu0 %v14904_v51 }
 0x262   : > { %v14890_v40 = vadd.f32 %v11687_v56, %v2044_v1  ;;  %18327 = vst [vmem:[#allocation37_spill] sm:$0xff] %v14892_v39  ;;  %v3607_v1 = vld [vmem:[#allocation3 + $0x33] sm:$0xff]  ;;  %12480 = vmatprep.subr.mxu0 %v9887_v38  ;;  %12214 = vmatprep.subr.mxu1 %v9852_v47  ;;  %v3608_v56 = vld [vmem:[#allocation3 + $0x3b] sm:$0xff]  ;;  %v3610_v39 = vld [vmem:[#allocation3 + $0x4b] sm:$0xff] }
 0x263   : > { %v14894_v12 = vpop.f32.mrf.mxu1  ;;  %v14906_v11 = vpop.f32.mrf.mxu0  ;;  %12088 = vmatprep.mubr.f32.mxu1 %v3607_v1  ;;  %12481 = vmatpush3.msra.mxu0 %v9887_v38  ;;  %v9934_v1 = vld [vmem:[%s18280_s3 + $0x6f8] sm:$0xff] }
 0x264   : > { %18328 = vst [vmem:[#allocation38_spill] sm:$0xff] %v14906_v11  ;;  %12215 = vmatpush3.msra.mxu1 %v9852_v47  ;;  %12483 = vmatmul.mubr.f32.vlgmr.msra.gmra.mxu0 %v14913_v57  ;;  %v3609_v38 = vld [vmem:[#allocation3 + $0x43] sm:$0xff] }
 0x265   : > { %v11690_v54 = vpop.f32.mrf.mxu1  ;;  %v14911_v62 = vpop.f32.mrf.mxu0  ;;  %12089 = vmatmul.mubr.f32.gmra.mxu1 %v3608_v56  ;;  %12216 = vmatprep.subr.mxu1 %v9851_v28 }
 0x266   : > { %v14909_v7 = vadd.f32 %v11690_v54, %v2046_v35  ;;  %18329 = vst [vmem:[#allocation39_spill] sm:$0xff] %v14911_v62  ;;  %v2048_v35 = vadd.f32 %v14596_v23, %v14862_v29  ;;  %v14926_v54 = vld [vmem:[#allocation3 + $0x35] sm:$0xff]  ;;  %12091 = vmatprep.mubr.f32.mxu1 %v3609_v38  ;;  %12610 = vmatprep.subr.mxu0 %v9934_v1  ;;  %v14935_v23 = vld [vmem:[#allocation3 + $0x3d] sm:$0xff] }
 0x267   : > { %v14915_v24 = vpop.f32.mrf.mxu1  ;;  %v14928_v56 = vpop.f32.mrf.mxu0  ;;  %12485 = vmatprep.mubr.f32.mxu0 %v14926_v54  ;;  %12611 = vmatpush3.msra.mxu0 %v9934_v1  ;;  %v9933_v38 = vld [vmem:[%s18280_s3 + $0x6f0] sm:$0xff] }
 0x268   : > { %18330 = vst [vmem:[#allocation40_spill] sm:$0xff] %v14928_v56  ;;  %v9850_v56 = vld [vmem:[%s18280_s3 + $0x458] sm:$0xff]  ;;  %12217 = vmatpush3.msra.mxu1 %v9851_v28  ;;  %12486 = vmatmul.mubr.f32.gmra.mxu0 %v14935_v23 }
 0x269   : > { %v11693_v62 = vpop.f32.mrf.mxu1  ;;  %v14933_v43 = vpop.f32.mrf.mxu0  ;;  %12092 = vmatmul.mubr.f32.gmra.mxu1 %v3610_v39  ;;  %v3611_v39 = vld [vmem:[#allocation3 + $0x53] sm:$0xff]  ;;  %12218 = vmatprep.subr.mxu1 %v9850_v56 }
 0x26a   : > { %v14931_v11 = vadd.f32 %v11693_v62, %v2048_v35  ;;  %18331 = vst [vmem:[#allocation41_spill] sm:$0xff] %v14933_v43  ;;  %v2050_v62 = vadd.f32 %v14626_v55, %v14862_v29  ;;  %v14948_v35 = vld [vmem:[#allocation3 + $0x45] sm:$0xff]  ;;  %12094 = vmatprep.mubr.f32.mxu1 %v3611_v39  ;;  %12612 = vmatprep.subr.mxu0 %v9933_v38  ;;  %v14957_v55 = vld [vmem:[#allocation3 + $0x4d] sm:$0xff]  ;;  %v9932_v39 = vld [vmem:[%s18280_s3 + $0x6e8] sm:$0xff] }
 0x26b   : > { %v14937_v47 = vpop.f32.mrf.mxu1  ;;  %v14950_v43 = vpop.f32.mrf.mxu0  ;;  %12488 = vmatprep.mubr.f32.mxu0 %v14948_v35  ;;  %12613 = vmatpush3.msra.mxu0 %v9933_v38 }
 0x26c   : > { %18332 = vst [vmem:[#allocation42_spill] sm:$0xff] %v14950_v43  ;;  %v9849_v43 = vld [vmem:[%s18280_s3 + $0x450] sm:$0xff]  ;;  %12219 = vmatpush3.msra.mxu1 %v9850_v56  ;;  %12489 = vmatmul.mubr.f32.gmra.mxu0 %v14957_v55 }
 0x26d   : > { %v11696_v13 = vpop.f32.mrf.mxu1  ;;  %v14955_v52 = vpop.f32.mrf.mxu0  ;;  %12095 = vmatmul.mubr.f32.gmra.mxu1 %v3612_v16  ;;  %v3613_v16 = vld [vmem:[#allocation3 + $0x63] sm:$0xff]  ;;  %12220 = vmatprep.subr.mxu1 %v9849_v43 }
 0x26e   : > { %v14953_v1 = vadd.f32 %v11696_v13, %v2050_v62  ;;  %18333 = vst [vmem:[#allocation43_spill] sm:$0xff] %v14955_v52  ;;  %v2052_v13 = vadd.f32 %v14653_v2, %v14862_v29  ;;  %v14970_v62 = vld [vmem:[#allocation3 + $0x55] sm:$0xff]  ;;  %12097 = vmatprep.mubr.f32.mxu1 %v3613_v16  ;;  %12614 = vmatprep.subr.mxu0 %v9932_v39  ;;  %v14979_v2 = vld [vmem:[#allocation3 + $0x5d] sm:$0xff] }
 0x26f   : > { %v14959_v28 = vpop.f32.mrf.mxu1  ;;  %v14972_v52 = vpop.f32.mrf.mxu0  ;;  %12491 = vmatprep.mubr.f32.mxu0 %v14970_v62  ;;  %12615 = vmatpush3.msra.mxu0 %v9932_v39  ;;  %v9931_v16 = vld [vmem:[%s18280_s3 + $0x6e0] sm:$0xff] }
 0x270   : > { %18334 = vst [vmem:[#allocation44_spill] sm:$0xff] %v14972_v52  ;;  %v9848_v52 = vld [vmem:[%s18280_s3 + $0x448] sm:$0xff]  ;;  %12221 = vmatpush3.msra.mxu1 %v9849_v43  ;;  %12492 = vmatmul.mubr.f32.gmra.mxu0 %v14979_v2 }
 0x271   : > { %v11699_v8 = vpop.f32.mrf.mxu1  ;;  %v14977_v0 = vpop.f32.mrf.mxu0  ;;  %12098 = vmatmul.mubr.f32.gmra.mxu1 %v3614_v3  ;;  %v3615_v3 = vld [vmem:[#allocation3 + $0x73] sm:$0xff]  ;;  %12222 = vmatprep.subr.mxu1 %v9848_v52 }
 0x272   : > { %v14975_v38 = vadd.f32 %v11699_v8, %v2052_v13  ;;  %18335 = vst [vmem:[#allocation45_spill] sm:$0xff] %v14977_v0  ;;  %v2054_v8 = vadd.f32 %v14672_v45, %v14862_v29  ;;  %v14992_v13 = vld [vmem:[#allocation3 + $0x65] sm:$0xff]  ;;  %12100 = vmatprep.mubr.f32.mxu1 %v3615_v3  ;;  %12616 = vmatprep.subr.mxu0 %v9931_v16  ;;  %v15001_v45 = vld [vmem:[#allocation3 + $0x6d] sm:$0xff] }
 0x273   : > { %v14981_v56 = vpop.f32.mrf.mxu1  ;;  %v14994_v0 = vpop.f32.mrf.mxu0  ;;  %12494 = vmatprep.mubr.f32.mxu0 %v14992_v13  ;;  %12617 = vmatpush3.msra.mxu0 %v9931_v16  ;;  %v9930_v3 = vld [vmem:[%s18280_s3 + $0x6d8] sm:$0xff] }
 0x274   : > { %18336 = vst [vmem:[#allocation46_spill] sm:$0xff] %v14994_v0  ;;  %v9847_v0 = vld [vmem:[%s18280_s3 + $0x440] sm:$0xff]  ;;  %12223 = vmatpush3.msra.mxu1 %v9848_v52  ;;  %12495 = vmatmul.mubr.f32.gmra.mxu0 %v15001_v45 }
 0x275   : > { %v11702_v21 = vpop.f32.mrf.mxu1  ;;  %v14999_v27 = vpop.f32.mrf.mxu0  ;;  %12101 = vmatmul.mubr.f32.gmra.mxu1 %v3616_v6  ;;  %v3617_v6 = vld [vmem:[#allocation3 + $0x83] sm:$0xff]  ;;  %12224 = vmatprep.subr.mxu1 %v9847_v0 }
 0x276   : > { %v14997_v39 = vadd.f32 %v11702_v21, %v2054_v8  ;;  %18337 = vst [vmem:[#allocation47_spill] sm:$0xff] %v14999_v27  ;;  %v2056_v21 = vadd.f32 %v14700_v25, %v14862_v29  ;;  %v15014_v8 = vld [vmem:[#allocation3 + $0x75] sm:$0xff]  ;;  %12103 = vmatprep.mubr.f32.mxu1 %v3617_v6  ;;  %12618 = vmatprep.subr.mxu0 %v9930_v3  ;;  %v15023_v25 = vld [vmem:[#allocation3 + $0x7d] sm:$0xff] }
 0x277   : > { %v15003_v43 = vpop.f32.mrf.mxu1  ;;  %v15016_v27 = vpop.f32.mrf.mxu0  ;;  %12497 = vmatprep.mubr.f32.mxu0 %v15014_v8  ;;  %12619 = vmatpush3.msra.mxu0 %v9930_v3  ;;  %v9929_v6 = vld [vmem:[%s18280_s3 + $0x6d0] sm:$0xff] }
 0x278   : > { %18338 = vst [vmem:[#allocation48_spill] sm:$0xff] %v15016_v27  ;;  %v9846_v27 = vld [vmem:[%s18280_s3 + $0x438] sm:$0xff]  ;;  %12225 = vmatpush3.msra.mxu1 %v9847_v0  ;;  %12498 = vmatmul.mubr.f32.gmra.mxu0 %v15023_v25 }
 0x279   : > { %v11705_v58 = vpop.f32.mrf.mxu1  ;;  %v15021_v34 = vpop.f32.mrf.mxu0  ;;  %12104 = vmatmul.mubr.f32.gmra.mxu1 %v3618_v50  ;;  %v3619_v50 = vld [vmem:[#allocation3 + $0x93] sm:$0xff]  ;;  %12226 = vmatprep.subr.mxu1 %v9846_v27 }
 0x27a   : > { %v15019_v16 = vadd.f32 %v11705_v58, %v2056_v21  ;;  %18339 = vst [vmem:[#allocation49_spill] sm:$0xff] %v15021_v34  ;;  %v2058_v58 = vadd.f32 %v14717_v10, %v14862_v29  ;;  %v15036_v21 = vld [vmem:[#allocation3 + $0x85] sm:$0xff]  ;;  %12106 = vmatprep.mubr.f32.mxu1 %v3619_v50  ;;  %12620 = vmatprep.subr.mxu0 %v9929_v6  ;;  %v15045_v0 = vld [vmem:[#allocation3 + $0x8d] sm:$0xff]  ;;  %v9928_v50 = vld [vmem:[%s18280_s3 + $0x6c8] sm:$0xff] }
 0x27b   : > { %v15025_v52 = vpop.f32.mrf.mxu1  ;;  %v15038_v34 = vpop.f32.mrf.mxu0  ;;  %12500 = vmatprep.mubr.f32.mxu0 %v15036_v21  ;;  %12621 = vmatpush3.msra.mxu0 %v9929_v6 }
 0x27c   : > { %18340 = vst [vmem:[#allocation50_spill] sm:$0xff] %v15038_v34  ;;  %v9845_v34 = vld [vmem:[%s18280_s3 + $0x430] sm:$0xff]  ;;  %12227 = vmatpush3.msra.mxu1 %v9846_v27  ;;  %12501 = vmatmul.mubr.f32.gmra.mxu0 %v15045_v0 }
 0x27d   : > { %v11708_v4 = vpop.f32.mrf.mxu1  ;;  %v15043_v53 = vpop.f32.mrf.mxu0  ;;  %12107 = vmatmul.mubr.f32.gmra.mxu1 %v3620_v60  ;;  %v3621_v60 = vld [vmem:[#allocation3 + $0xa3] sm:$0xff]  ;;  %12228 = vmatprep.subr.mxu1 %v9845_v34 }
 0x27e   : > { %v15041_v3 = vadd.f32 %v11708_v4, %v2058_v58  ;;  %18342 = vst [vmem:[#allocation52_spill] sm:$0xff] %v15043_v53  ;;  %v2060_v4 = vadd.f32 %v14740_v15, %v14862_v29  ;;  %v15058_v58 = vld [vmem:[#allocation3 + $0x95] sm:$0xff]  ;;  %12109 = vmatprep.mubr.f32.mxu1 %v3621_v60  ;;  %12622 = vmatprep.subr.mxu0 %v9928_v50  ;;  %v15067_v27 = vld [vmem:[#allocation3 + $0x9d] sm:$0xff] }
 0x27f   : > { %v15047_v10 = vpop.f32.mrf.mxu1  ;;  %v15060_v53 = vpop.f32.mrf.mxu0  ;;  %12503 = vmatprep.mubr.f32.mxu0 %v15058_v58  ;;  %12623 = vmatpush3.msra.mxu0 %v9928_v50  ;;  %v9927_v60 = vld [vmem:[%s18280_s3 + $0x6c0] sm:$0xff] }
 0x280   : > { %18341 = vst [vmem:[#allocation51_spill] sm:$0xff] %v15041_v3  ;;  %18343 = vst [vmem:[#allocation53_spill] sm:$0xff] %v15060_v53  ;;  %v9844_v53 = vld [vmem:[%s18280_s3 + $0x428] sm:$0xff]  ;;  %12229 = vmatpush3.msra.mxu1 %v9845_v34  ;;  %12504 = vmatmul.mubr.f32.gmra.mxu0 %v15067_v27  ;;  %v15089_v34 = vld [vmem:[#allocation3 + $0xad] sm:$0xff] }
 0x281   : > { %v11711_v44 = vpop.f32.mrf.mxu1  ;;  %v15065_v18 = vpop.f32.mrf.mxu0  ;;  %12110 = vmatmul.mubr.f32.gmra.mxu1 %v3622_v36  ;;  %v3623_v36 = vld [vmem:[#allocation3 + $0xb3] sm:$0xff]  ;;  %12230 = vmatprep.subr.mxu1 %v9844_v53  ;;  %18351 = vst [vmem:[#allocation61_spill] sm:$0xff] %v15089_v34 }
 0x282   : > { %v15063_v6 = vadd.f32 %v11711_v44, %v2060_v4  ;;  %18345 = vst [vmem:[#allocation55_spill] sm:$0xff] %v15065_v18  ;;  %v2062_v44 = vadd.f32 %v14755_v30, %v14862_v29  ;;  %v15080_v4 = vld [vmem:[#allocation3 + $0xa5] sm:$0xff]  ;;  %12112 = vmatprep.mubr.f32.mxu1 %v3623_v36  ;;  %12624 = vmatprep.subr.mxu0 %v9927_v60 }
 0x283   : > { %v15069_v15 = vpop.f32.mrf.mxu1  ;;  %18347 = vst [vmem:[#allocation57_spill] sm:$0xff] %v15080_v4  ;;  %v15082_v18 = vpop.f32.mrf.mxu0  ;;  %12506 = vmatprep.mubr.f32.mxu0 %v15080_v4  ;;  %12625 = vmatpush3.msra.mxu0 %v9927_v60  ;;  %v9926_v36 = vld [vmem:[%s18280_s3 + $0x6b8] sm:$0xff]  ;;  %v2063_v60 = vadd.f32 %v14862_v29, %v14790_v22  ;;  %v9925_v22 = vld [vmem:[%s18280_s3 + $0x6b0] sm:$0xff] }
 0x284   : > { %18344 = vst [vmem:[#allocation54_spill] sm:$0xff] %v15063_v6  ;;  %18346 = vst [vmem:[#allocation56_spill] sm:$0xff] %v15069_v15  ;;  %v3624_v15 = vld [vmem:[#allocation3 + $0xbb] sm:$0xff]  ;;  %12231 = vmatpush3.msra.mxu1 %v9844_v53  ;;  %12507 = vmatmul.mubr.f32.gmra.mxu0 %v15089_v34  ;;  %v3626_v4 = vld [vmem:[#allocation3 + $0xcb] sm:$0xff] }
 0x285   : > { %18348 = vst [vmem:[#allocation58_spill] sm:$0xff] %v15082_v18  ;;  %v11714_v6 = vpop.f32.mrf.mxu1  ;;  %v15087_v3 = vpop.f32.mrf.mxu0  ;;  %12113 = vmatmul.mubr.f32.gmra.mxu1 %v3624_v15  ;;  %v9843_v18 = vld [vmem:[%s18280_s3 + $0x420] sm:$0xff]  ;;  %v3625_v15 = vld [vmem:[#allocation3 + $0xc3] sm:$0xff]  ;;  %12626 = vmatprep.subr.mxu0 %v9926_v36 }
 0x286   : > { %v15085_v50 = vadd.f32 %v11714_v6, %v2062_v44  ;;  %18350 = vst [vmem:[#allocation60_spill] sm:$0xff] %v15087_v3  ;;  %v2064_v6 = vadd.f32 %v14778_v9, %v14862_v29  ;;  %v15102_v44 = vld [vmem:[#allocation3 + $0xb5] sm:$0xff]  ;;  %12115 = vmatprep.mubr.f32.mxu1 %v3625_v15  ;;  %12232 = vmatprep.subr.mxu1 %v9843_v18  ;;  %v15113_v53 = vld [vmem:[#allocation3 + $0xbd] sm:$0xff]  ;;  %v9842_v15 = vld [vmem:[%s18280_s3 + $0x418] sm:$0xff] }
 0x287   : > { %v15091_v30 = vpop.f32.mrf.mxu1  ;;  %18353 = vst [vmem:[#allocation63_spill] sm:$0xff] %v15102_v44  ;;  %v15104_v3 = vpop.f32.mrf.mxu0  ;;  %12509 = vmatprep.mubr.f32.mxu0 %v15102_v44  ;;  %18357 = vst [vmem:[#allocation67_spill] sm:$0xff] %v15113_v53  ;;  %12627 = vmatpush3.msra.mxu0 %v9926_v36 }
 0x288   : > { %18349 = vst [vmem:[#allocation59_spill] sm:$0xff] %v15085_v50  ;;  %18352 = vst [vmem:[#allocation62_spill] sm:$0xff] %v15091_v30  ;;  %12233 = vmatpush3.msra.mxu1 %v9843_v18  ;;  %12510 = vmatmul.mubr.f32.gmra.mxu0 %v15113_v53  ;;  %v3628_v18 = vld [vmem:[#allocation3 + $0xdb] sm:$0xff]  ;;  %v15137_v53 = vld [vmem:[#allocation3 + $0xcd] sm:$0xff] }
 0x289   : > { %18354 = vst [vmem:[#allocation64_spill] sm:$0xff] %v15104_v3  ;;  %v11717_v50 = vpop.f32.mrf.mxu1  ;;  %v15111_v9 = vpop.f32.mrf.mxu0  ;;  %12116 = vmatmul.mubr.f32.gmra.mxu1 %v3626_v4  ;;  %v15124_v4 = vld [vmem:[#allocation3 + $0xc5] sm:$0xff]  ;;  %12234 = vmatprep.subr.mxu1 %v9842_v15 }
 0x28a   : > { %v15109_v30 = vadd.f32 %v11717_v50, %v2064_v6  ;;  %18356 = vst [vmem:[#allocation66_spill] sm:$0xff] %v15111_v9  ;;  %v2066_v50 = vadd.f32 %v14804_v49, %v14862_v29  ;;  %v3627_v6 = vld [vmem:[#allocation3 + $0xd3] sm:$0xff]  ;;  %12512 = vmatprep.mubr.f32.mxu0 %v15124_v4  ;;  %12628 = vmatprep.subr.mxu0 %v9925_v22 }
 0x28b   : > { %v2298_v34 = vpop.f32.mrf.mxu1  ;;  %v15128_v3 = vpop.f32.mrf.mxu0  ;;  %12118 = vmatprep.mubr.f32.mxu1 %v3627_v6  ;;  %12629 = vmatpush3.msra.mxu0 %v9925_v22  ;;  %v3629_v6 = vld [vmem:[#allocation3 + $0xe3] sm:$0xff] }
 0x28c   : > { %18355 = vst [vmem:[#allocation65_spill] sm:$0xff] %v15109_v30  ;;  %v15126_v9 = vadd.f32 %v2298_v34, %v2063_v60  ;;  %18359 = vst [vmem:[#allocation69_spill] sm:$0xff] %v15128_v3  ;;  %v2065_v30 = vadd.f32 %v14862_v29, %v14816_v59  ;;  %v9841_v60 = vld [vmem:[%s18280_s3 + $0x410] sm:$0xff]  ;;  %v9924_v59 = vld [vmem:[%s18280_s3 + $0x6a8] sm:$0xff]  ;;  %12235 = vmatpush3.msra.mxu1 %v9842_v15  ;;  %12513 = vmatmul.mubr.f32.gmra.mxu0 %v15137_v53 }
 0x28d   : > { %v11720_v36 = vpop.f32.mrf.mxu1  ;;  %v15135_v49 = vpop.f32.mrf.mxu0  ;;  %12119 = vmatmul.mubr.f32.gmra.mxu1 %v3628_v18  ;;  %v2067_v3 = vadd.f32 %v14862_v29, %v14833_v41  ;;  %12236 = vmatprep.subr.mxu1 %v9841_v60  ;;  %v9923_v41 = vld [vmem:[%s18280_s3 + $0x6a0] sm:$0xff] }
 0x28e   : > { %18358 = vst [vmem:[#allocation68_spill] sm:$0xff] %v15126_v9  ;;  %v15133_v44 = vadd.f32 %v11720_v36, %v2066_v50  ;;  %18361 = vst [vmem:[#allocation71_spill] sm:$0xff] %v15135_v49  ;;  %v2068_v50 = vadd.f32 %v14821_v14, %v14862_v29  ;;  %v15148_v36 = vld [vmem:[#allocation3 + $0xd5] sm:$0xff]  ;;  %12121 = vmatprep.mubr.f32.mxu1 %v3629_v6  ;;  %v3630_v14 = vld [vmem:[#allocation3 + $0xeb] sm:$0xff]  ;;  %12630 = vmatprep.subr.mxu0 %v9924_v59 }
 0x28f   : > { %v2308_v34 = vpop.f32.mrf.mxu1  ;;  %v15152_v49 = vpop.f32.mrf.mxu0  ;;  %12515 = vmatprep.mubr.f32.mxu0 %v15148_v36  ;;  %v15161_v9 = vld [vmem:[#allocation3 + $0xdd] sm:$0xff]  ;;  %12631 = vmatpush3.msra.mxu0 %v9924_v59  ;;  %v3631_v6 = vld [vmem:[#allocation3 + $0xf3] sm:$0xff] }
 0x290   : > { %18360 = vst [vmem:[#allocation70_spill] sm:$0xff] %v15133_v44  ;;  %v15150_v18 = vadd.f32 %v2308_v34, %v2065_v30  ;;  %18363 = vst [vmem:[#allocation73_spill] sm:$0xff] %v15152_v49  ;;  %v9840_v34 = vld [vmem:[%s18280_s3 + $0x408] sm:$0xff]  ;;  %12237 = vmatpush3.msra.mxu1 %v9841_v60  ;;  %12516 = vmatmul.mubr.f32.gmra.mxu0 %v15161_v9  ;;  %v2069_v49 = vadd.f32 %v14862_v29, %v14848_v61  ;;  %v9922_v61 = vld [vmem:[%s18280_s3 + $0x698] sm:$0xff] }
 0x291   : > { %v11723_v22 = vpop.f32.mrf.mxu1  ;;  %v15159_v15 = vpop.f32.mrf.mxu0  ;;  %12122 = vmatmul.mubr.f32.gmra.mxu1 %v3630_v14  ;;  %12238 = vmatprep.subr.mxu1 %v9840_v34 }
 0x292   : > { %18362 = vst [vmem:[#allocation72_spill] sm:$0xff] %v15150_v18  ;;  %v15157_v44 = vadd.f32 %v11723_v22, %v2068_v50  ;;  %18365 = vst [vmem:[#allocation75_spill] sm:$0xff] %v15159_v15  ;;  %v2070_v50 = vadd.f32 %v14845_v37, %v14862_v29  ;;  %v15172_v22 = vld [vmem:[#allocation3 + $0xe5] sm:$0xff]  ;;  %12124 = vmatprep.mubr.f32.mxu1 %v3631_v6  ;;  %v3632_v37 = vld [vmem:[#allocation3 + $0xfb] sm:$0xff]  ;;  %12632 = vmatprep.subr.mxu0 %v9923_v41 }
 0x293   : > { %v2318_v30 = vpop.f32.mrf.mxu1  ;;  %v15176_v15 = vpop.f32.mrf.mxu0  ;;  %12518 = vmatprep.mubr.f32.mxu0 %v15172_v22  ;;  %v15185_v18 = vld [vmem:[#allocation3 + $0xed] sm:$0xff]  ;;  %12633 = vmatpush3.msra.mxu0 %v9923_v41  ;;  %v15194_v6 = vld [vmem:[#allocation3 + $0xf5] sm:$0xff]  ;;  %v2071_v41 = vadd.f32 %v14862_v29, %v14866_v33  ;;  %v2041_v33 = vadd.f32 %v14862_v29, %v14508_v32 }
 0x294   : > { %18364 = vst [vmem:[#allocation74_spill] sm:$0xff] %v15157_v44  ;;  %v15174_v14 = vadd.f32 %v2318_v30, %v2067_v3  ;;  %18367 = vst [vmem:[#allocation77_spill] sm:$0xff] %v15176_v15  ;;  %v9839_v30 = vld [vmem:[%s18280_s3 + $0x400] sm:$0xff]  ;;  %12239 = vmatpush3.msra.mxu1 %v9840_v34  ;;  %12519 = vmatmul.mubr.f32.gmra.mxu0 %v15185_v18  ;;  %v3634_v15 = vld [vmem:[#allocation3 + $0x10b] sm:$0xf] }
 0x295   : > { %v11726_v59 = vpop.f32.mrf.mxu1  ;;  %v15183_v60 = vpop.f32.mrf.mxu0  ;;  %12125 = vmatmul.mubr.f32.gmra.mxu1 %v3632_v37  ;;  %18370 = vst [vmem:[#allocation80_spill] sm:$0xff] %v15194_v6  ;;  %12521 = vmatprep.mubr.f32.mxu0 %v15194_v6  ;;  %v4215_v34 = vld [vmem:[#allocation3 + $0x15] sm:$0xff]  ;;  %v5162_v32 = vld [vmem:[#allocation3 + $0x10d] sm:$0xff] }
 0x296   : > { %18366 = vst [vmem:[#allocation76_spill] sm:$0xff] %v15174_v14  ;;  %v15181_v44 = vadd.f32 %v11726_v59, %v2070_v50  ;;  %18369 = vst [vmem:[#allocation79_spill] sm:$0xff] %v15183_v60  ;;  %v3633_v50 = vld [vmem:[#allocation3 + $0x103] sm:$0xff]  ;;  %12240 = vmatprep.subr.mxu1 %v9839_v30  ;;  %12634 = vmatprep.subr.mxu0 %v9922_v61 }
 0x297   : > { %v2328_v3 = vpop.f32.mrf.mxu1  ;;  %v15198_v37 = vpop.f32.mrf.mxu0  ;;  %12127 = vmatprep.mubr.f32.mxu1 %v3633_v50  ;;  %v15205_v14 = vld [vmem:[#allocation3 + $0xfd] sm:$0xff]  ;;  %12635 = vmatpush3.msra.mxu0 %v9922_v61  ;;  %v15216_v50 = vld [vmem:[#allocation3 + $0x105] sm:$0xff] }
 0x298   : > { %18368 = vst [vmem:[#allocation78_spill] sm:$0xff] %v15181_v44  ;;  %v15196_v59 = vadd.f32 %v2328_v3, %v2069_v49  ;;  %18372 = vst [vmem:[#allocation82_spill] sm:$0xff] %v15198_v37  ;;  %v9886_v3 = vld [vmem:[%s18280_s3 + $0x578] sm:$0xff]  ;;  %12241 = vmatpush3.msra.mxu1 %v9839_v30  ;;  %12522 = vmatmul.mubr.f32.gmra.mxu0 %v15205_v14 }
 0x299   : > { %v11729_v60 = vpop.f32.mrf.mxu1  ;;  %v15203_v44 = vpop.f32.mrf.mxu0  ;;  %12128 = vmatmul.mubr.f32.gmra.mxu1 %v3634_v15  ;;  %18374 = vst [vmem:[#allocation84_spill] sm:$0xff] %v15205_v14  ;;  %12524 = vmatprep.mubr.f32.mxu0 %v15216_v50 }
 0x29a   : > { %18371 = vst [vmem:[#allocation81_spill] sm:$0xff] %v15196_v59  ;;  %18373 = vst [vmem:[#allocation83_spill] sm:$0xff] %v15203_v44  ;;  %v9921_v60 = vld [vmem:[%s18280_s3 + $0x690] sm:$0xff]  ;;  %12242 = vmatprep.mubr.f32.mxu1 %v4215_v34  ;;  %v2347_v59 = vadd.f32 %v14880_v26, %v2041_v33  ;;  %12370 = vmatprep.subr.mxu1 %v9886_v3  ;;  %v9920_v34 = vld [vmem:[%s18280_s3 + $0x688] sm:$0xff] }
 0x29b   : > { %v2338_v49 = vpop.f32.mrf.mxu1  ;;  %v4216_v44 = vld [vmem:[#allocation3 + $0x1d] sm:$0xff]  ;;  %v15221_v61 = vpop.f32.mrf.mxu0  ;;  %12636 = vmatprep.subr.mxu0 %v9921_v60  ;;  %v5163_v26 = vld [vmem:[#allocation3 + $0x115] sm:$0xff] }
 0x29c   : > { %v15218_v15 = vadd.f32 %v2338_v49, %v2071_v41  ;;  %18375 = vst [vmem:[#allocation85_spill] sm:$0xff] %v15221_v61  ;;  %v9885_v41 = vld [vmem:[%s18280_s3 + $0x570] sm:$0xff]  ;;  %12637 = vmatpush3.msra.mxu0 %v9921_v60 }
 0x29d   : > { %v11764_v37 = vpop.f32.mrf.mxu1  ;;  %12243 = vmatmul.mubr.f32.vlgmr.msra.gmra.mxu1 %v4216_v44  ;;  %v15227_v14 = vpop.f32.mrf.mxu0  ;;  %12525 = vmatmul.mubr.f32.gmra.mxu0 %v5162_v32  ;;  %v2043_v44 = vadd.f32 %v14862_v29, %v14542_v48  ;;  %v9919_v48 = vld [vmem:[%s18280_s3 + $0x680] sm:$0xff] }
 0x29e   : > { %v15225_v6 = vadd.f32 %v11764_v37, %v14878_v46  ;;  %18376 = vst [vmem:[#allocation86_spill] sm:$0xff] %v15227_v14  ;;  %12371 = vmatpush3.msra.mxu1 %v9886_v3  ;;  %12245 = vmatprep.mubr.f32.mxu1 %v14904_v51  ;;  %v5164_v37 = vld [vmem:[#allocation3 + $0x11d] sm:$0xf] }
 0x29f   : > { %v2494_v30 = vpop.f32.mrf.mxu1  ;;  %12527 = vmatprep.mubr.f32.mxu0 %v5163_v26  ;;  %12372 = vmatprep.subr.mxu1 %v9885_v41  ;;  %v12049_v33 = vpop.f32.mrf.mxu0  ;;  %v2349_v60 = vadd.f32 %v14894_v12, %v2043_v44  ;;  %v9884_v51 = vld [vmem:[%s18280_s3 + $0x568] sm:$0xff] }
 0x2a0   : > { %v15235_v46 = vadd.f32 %v2494_v30, %v2347_v59  ;;  %12638 = vmatprep.subr.mxu0 %v9920_v34  ;;  %12373 = vmatpush3.msra.mxu1 %v9885_v41  ;;  %v5745_v59 = vld [vmem:[#allocation3 + $0x27] sm:$0xff]  ;;  %v5746_v41 = vld [vmem:[#allocation3 + $0x2f] sm:$0xff]  ;;  %v5747_v44 = vld [vmem:[#allocation3 + $0x37] sm:$0xff] }
 0x2a1   : > { %v11767_v49 = vpop.f32.mrf.mxu1  ;;  %12246 = vmatmul.mubr.f32.gmra.mxu1 %v14913_v57  ;;  %12639 = vmatpush3.msra.mxu0 %v9920_v34  ;;  %v15251_v32 = vpop.f32.mrf.mxu0  ;;  %v9883_v34 = vld [vmem:[%s18280_s3 + $0x560] sm:$0xff] }
 0x2a2   : > { %v15242_v14 = vadd.f32 %v11767_v49, %v14890_v40  ;;  %12528 = vmatmul.mubr.f32.gmra.mxu0 %v5164_v37  ;;  %18377 = vst [vmem:[#allocation87_spill] sm:$0xff] %v15251_v32  ;;  %12248 = vmatprep.mubr.f32.mxu1 %v14926_v54  ;;  %v2045_v40 = vadd.f32 %v14862_v29, %v14578_v63  ;;  %v9966_v54 = vld [vmem:[%s18280_s3 + $0x7f8] sm:$0xff] }
 0x2a3   : > { %v2504_v3 = vpop.f32.mrf.mxu1  ;;  %12642 = vmatprep.mubr.f32.mxu0 %v5745_v59  ;;  %12640 = vmatprep.subr.mxu0 %v9919_v48  ;;  %v15258_v30 = vpop.f32.mrf.mxu0  ;;  %v2047_v49 = vadd.f32 %v14862_v29, %v14614_v42  ;;  %v5749_v59 = vld [vmem:[#allocation3 + $0x47] sm:$0xff] }
 0x2a4   : > { %v15254_v12 = vadd.f32 %v2504_v3, %v2349_v60  ;;  %12374 = vmatprep.subr.mxu1 %v9884_v51  ;;  %12641 = vmatpush3.msra.mxu0 %v9919_v48  ;;  %18378 = vst [vmem:[#allocation88_spill] sm:$0xff] %v15258_v30  ;;  %v2351_v26 = vadd.f32 %v14915_v24, %v2045_v40  ;;  %v9965_v48 = vld [vmem:[%s18280_s3 + $0x7f0] sm:$0xff]  ;;  %v15777_v32 = vld [vmem:[#allocation3 + $0xce] sm:$0xff] }
 0x2a5   : > { %v11770_v57 = vpop.f32.mrf.mxu1  ;;  %12249 = vmatmul.mubr.f32.gmra.mxu1 %v14935_v23  ;;  %v15272_v37 = vpop.f32.mrf.mxu0  ;;  %12770 = vmatprep.subr.mxu0 %v9966_v54  ;;  %v2353_v42 = vadd.f32 %v14937_v47, %v2047_v49  ;;  %v2049_v40 = vadd.f32 %v14862_v29, %v14644_v17 }
 0x2a6   : > { %v15269_v63 = vadd.f32 %v11770_v57, %v14909_v7  ;;  %12375 = vmatpush3.msra.mxu1 %v9884_v51  ;;  %12643 = vmatmul.mubr.f32.vlgmr.msra.gmra.mxu0 %v5746_v41  ;;  %18379 = vst [vmem:[#allocation89_spill] sm:$0xff] %v15272_v37  ;;  %v5748_v7 = vld [vmem:[#allocation3 + $0x3f] sm:$0xff] }
 0x2a7   : > { %12251 = vmatprep.mubr.f32.mxu1 %v14948_v35  ;;  %12645 = vmatprep.mubr.f32.mxu0 %v5747_v44  ;;  %v2514_v23 = vpop.f32.mrf.mxu1  ;;  %v15278_v60 = vpop.f32.mrf.mxu0  ;;  %v9882_v35 = vld [vmem:[%s18280_s3 + $0x558] sm:$0xff]  ;;  %v2355_v17 = vadd.f32 %v14959_v28, %v2049_v40  ;;  %v15753_v37 = vld [vmem:[#allocation3 + $0xbe] sm:$0xff] }
 0x2a8   : > { %v15276_v33 = vadd.f32 %v2514_v23, %v2351_v26  ;;  %12376 = vmatprep.subr.mxu1 %v9883_v34  ;;  %18380 = vst [vmem:[#allocation90_spill] sm:$0xff] %v15278_v60  ;;  %12771 = vmatpush3.msra.mxu0 %v9966_v54  ;;  %v5751_v26 = vld [vmem:[#allocation3 + $0x57] sm:$0xff]  ;;  %v2051_v23 = vadd.f32 %v14862_v29, %v14667_v31 }
 0x2a9   : > { %v11773_v24 = vpop.f32.mrf.mxu1  ;;  %12252 = vmatmul.mubr.f32.gmra.mxu1 %v14957_v55  ;;  %v15292_v3 = vpop.f32.mrf.mxu0  ;;  %12772 = vmatprep.subr.mxu0 %v9965_v48 }
 0x2aa   : > { %v15289_v51 = vadd.f32 %v11773_v24, %v14931_v11  ;;  %12377 = vmatpush3.msra.mxu1 %v9883_v34  ;;  %12646 = vmatmul.mubr.f32.gmra.mxu0 %v5748_v7  ;;  %18381 = vst [vmem:[#allocation91_spill] sm:$0xff] %v15292_v3  ;;  %v5750_v11 = vld [vmem:[#allocation3 + $0x4f] sm:$0xff]  ;;  %v9964_v34 = vld [vmem:[%s18280_s3 + $0x7e8] sm:$0xff]  ;;  %v2357_v31 = vadd.f32 %v14981_v56, %v2051_v23  ;;  %v9961_v23 = vld [vmem:[%s18280_s3 + $0x7d0] sm:$0xff] }
 0x2ab   : > { %12254 = vmatprep.mubr.f32.mxu1 %v14970_v62  ;;  %12648 = vmatprep.mubr.f32.mxu0 %v5749_v59  ;;  %v2524_v55 = vpop.f32.mrf.mxu1  ;;  %v15298_v41 = vpop.f32.mrf.mxu0  ;;  %v9881_v62 = vld [vmem:[%s18280_s3 + $0x550] sm:$0xff]  ;;  %v9963_v7 = vld [vmem:[%s18280_s3 + $0x7e0] sm:$0xff]  ;;  %v2053_v59 = vadd.f32 %v14862_v29, %v14687_v19 }
 0x2ac   : > { %v15296_v57 = vadd.f32 %v2524_v55, %v2353_v42  ;;  %12378 = vmatprep.subr.mxu1 %v9882_v35  ;;  %18382 = vst [vmem:[#allocation92_spill] sm:$0xff] %v15298_v41  ;;  %12773 = vmatpush3.msra.mxu0 %v9965_v48  ;;  %v5753_v48 = vld [vmem:[#allocation3 + $0x67] sm:$0xff] }
 0x2ad   : > { %v11776_v47 = vpop.f32.mrf.mxu1  ;;  %12255 = vmatmul.mubr.f32.gmra.mxu1 %v14979_v2  ;;  %v15312_v44 = vpop.f32.mrf.mxu0  ;;  %12774 = vmatprep.subr.mxu0 %v9964_v34  ;;  %v2359_v19 = vadd.f32 %v15003_v43, %v2053_v59  ;;  %v15729_v3 = vld [vmem:[#allocation3 + $0xae] sm:$0xff] }
 0x2ae   : > { %v15309_v54 = vadd.f32 %v11776_v47, %v14953_v1  ;;  %12379 = vmatpush3.msra.mxu1 %v9882_v35  ;;  %12649 = vmatmul.mubr.f32.gmra.mxu0 %v5750_v11  ;;  %18383 = vst [vmem:[#allocation93_spill] sm:$0xff] %v15312_v44  ;;  %v5752_v1 = vld [vmem:[#allocation3 + $0x5f] sm:$0xff]  ;;  %v9962_v47 = vld [vmem:[%s18280_s3 + $0x7d8] sm:$0xff] }
 0x2af   : > { %12257 = vmatprep.mubr.f32.mxu1 %v14992_v13  ;;  %12651 = vmatprep.mubr.f32.mxu0 %v5751_v26  ;;  %v2534_v2 = vpop.f32.mrf.mxu1  ;;  %v15318_v24 = vpop.f32.mrf.mxu0  ;;  %v9880_v13 = vld [vmem:[%s18280_s3 + $0x548] sm:$0xff] }
 0x2b0   : > { %v15316_v49 = vadd.f32 %v2534_v2, %v2355_v17  ;;  %12380 = vmatprep.subr.mxu1 %v9881_v62  ;;  %18384 = vst [vmem:[#allocation94_spill] sm:$0xff] %v15318_v24  ;;  %12775 = vmatpush3.msra.mxu0 %v9964_v34  ;;  %v2055_v17 = vadd.f32 %v14862_v29, %v14712_v5  ;;  %v15705_v44 = vld [vmem:[#allocation3 + $0x9e] sm:$0xff] }
 0x2b1   : > { %v11779_v28 = vpop.f32.mrf.mxu1  ;;  %12258 = vmatmul.mubr.f32.gmra.mxu1 %v15001_v45  ;;  %v15332_v42 = vpop.f32.mrf.mxu0  ;;  %12776 = vmatprep.subr.mxu0 %v9963_v7 }
 0x2b2   : > { %v15329_v35 = vadd.f32 %v11779_v28, %v14975_v38  ;;  %12381 = vmatpush3.msra.mxu1 %v9881_v62  ;;  %12652 = vmatmul.mubr.f32.gmra.mxu0 %v5752_v1  ;;  %18385 = vst [vmem:[#allocation95_spill] sm:$0xff] %v15332_v42  ;;  %v5754_v38 = vld [vmem:[#allocation3 + $0x6f] sm:$0xff]  ;;  %v5755_v62 = vld [vmem:[#allocation3 + $0x77] sm:$0xff]  ;;  %v2361_v5 = vadd.f32 %v15025_v52, %v2055_v17  ;;  %v5757_v1 = vld [vmem:[#allocation3 + $0x87] sm:$0xff] }
 0x2b3   : > { %12260 = vmatprep.mubr.f32.mxu1 %v15014_v8  ;;  %12654 = vmatprep.mubr.f32.mxu0 %v5753_v48  ;;  %v2544_v45 = vpop.f32.mrf.mxu1  ;;  %v15338_v40 = vpop.f32.mrf.mxu0  ;;  %v9879_v8 = vld [vmem:[%s18280_s3 + $0x540] sm:$0xff] }
 0x2b4   : > { %v15336_v55 = vadd.f32 %v2544_v45, %v2357_v31  ;;  %12382 = vmatprep.subr.mxu1 %v9880_v13  ;;  %18386 = vst [vmem:[#allocation96_spill] sm:$0xff] %v15338_v40  ;;  %12777 = vmatpush3.msra.mxu0 %v9963_v7  ;;  %v2057_v7 = vadd.f32 %v14862_v29, %v14729_v20  ;;  %v9960_v45 = vld [vmem:[%s18280_s3 + $0x7c8] sm:$0xff]  ;;  %v15681_v42 = vld [vmem:[#allocation3 + $0x8e] sm:$0xff] }
 0x2b5   : > { %v11782_v56 = vpop.f32.mrf.mxu1  ;;  %12261 = vmatmul.mubr.f32.gmra.mxu1 %v15023_v25  ;;  %v15352_v34 = vpop.f32.mrf.mxu0  ;;  %12778 = vmatprep.subr.mxu0 %v9962_v47  ;;  %v18391_v29 = vld [vmem:[#allocation51_spill] sm:$0xff] }
 0x2b6   : > { %v15349_v11 = vadd.f32 %v11782_v56, %v14997_v39  ;;  %12383 = vmatpush3.msra.mxu1 %v9880_v13  ;;  %12655 = vmatmul.mubr.f32.gmra.mxu0 %v5754_v38  ;;  %18387 = vst [vmem:[#allocation97_spill] sm:$0xff] %v15352_v34  ;;  %v5756_v39 = vld [vmem:[#allocation3 + $0x7f] sm:$0xff]  ;;  %v2363_v20 = vadd.f32 %v15047_v10, %v2057_v7  ;;  %v5759_v56 = vld [vmem:[#allocation3 + $0x97] sm:$0xff]  ;;  %v18392_v38 = vld [vmem:[#allocation57_spill] sm:$0xff] }
 0x2b7   : > { %12263 = vmatprep.mubr.f32.mxu1 %v15036_v21  ;;  %12657 = vmatprep.mubr.f32.mxu0 %v5755_v62  ;;  %v2554_v25 = vpop.f32.mrf.mxu1  ;;  %v15358_v2 = vpop.f32.mrf.mxu0  ;;  %v9878_v21 = vld [vmem:[%s18280_s3 + $0x538] sm:$0xff]  ;;  %v15657_v34 = vld [vmem:[#allocation3 + $0x7e] sm:$0xff] }
 0x2b8   : > { %v15356_v26 = vadd.f32 %v2554_v25, %v2359_v19  ;;  %12384 = vmatprep.subr.mxu1 %v9879_v8  ;;  %18388 = vst [vmem:[#allocation98_spill] sm:$0xff] %v15358_v2  ;;  %12779 = vmatpush3.msra.mxu0 %v9962_v47  ;;  %v13614_v47 = vld [vmem:[%s18281_s4] ss:$0 sm:$0xff]  ;;  %v18394_v19 = vld [vmem:[#allocation23_spill] sm:$0xff] }
 0x2b9   : > { %v11785_v43 = vpop.f32.mrf.mxu1  ;;  %12264 = vmatmul.mubr.f32.gmra.mxu1 %v15045_v0  ;;  %v15372_v13 = vpop.f32.mrf.mxu0  ;;  %12780 = vmatprep.subr.mxu0 %v9961_v23  ;;  %v2059_v62 = vadd.f32 %v13614_v47, %v18394_v19 }
 0x2ba   : > { %v15369_v28 = vadd.f32 %v11785_v43, %v15019_v16  ;;  %12385 = vmatpush3.msra.mxu1 %v9879_v8  ;;  %12658 = vmatmul.mubr.f32.gmra.mxu0 %v5756_v39  ;;  %18389 = vst [vmem:[#allocation99_spill] sm:$0xff] %v15372_v13  ;;  %v5758_v16 = vld [vmem:[#allocation3 + $0x8f] sm:$0xff]  ;;  %v5760_v39 = vld [vmem:[#allocation3 + $0x9f] sm:$0xff] }
 0x2bb   : > { %12266 = vmatprep.mubr.f32.mxu1 %v15058_v58  ;;  %12660 = vmatprep.mubr.f32.mxu0 %v5757_v1  ;;  %v2564_v0 = vpop.f32.mrf.mxu1  ;;  %v15378_v48 = vpop.f32.mrf.mxu0  ;;  %v9877_v58 = vld [vmem:[%s18280_s3 + $0x530] sm:$0xff]  ;;  %v18396_v43 = vld [vmem:[#allocation61_spill] sm:$0xff] }
 0x2bc   : > { %v15376_v31 = vadd.f32 %v2564_v0, %v2361_v5  ;;  %12386 = vmatprep.subr.mxu1 %v9878_v21  ;;  %18390 = vst [vmem:[#allocation100_spill] sm:$0xff] %v15378_v48  ;;  %12781 = vmatpush3.msra.mxu0 %v9961_v23  ;;  %v9959_v23 = vld [vmem:[%s18280_s3 + $0x7c0] sm:$0xff]  ;;  %v18397_v5 = vld [vmem:[#allocation56_spill] sm:$0xff] }
 0x2bd   : > { %v11788_v52 = vpop.f32.mrf.mxu1  ;;  %12267 = vmatmul.mubr.f32.gmra.mxu1 %v15067_v27  ;;  %v15392_v8 = vpop.f32.mrf.mxu0  ;;  %12782 = vmatprep.subr.mxu0 %v9960_v45  ;;  %v2365_v1 = vadd.f32 %v18397_v5, %v2059_v62  ;;  %v18398_v0 = vld [vmem:[#allocation54_spill] sm:$0xff]  ;;  %v18403_v62 = vld [vmem:[#allocation67_spill] sm:$0xff] }
 0x2be   : > { %v15389_v59 = vadd.f32 %v11788_v52, %v18391_v29  ;;  %12387 = vmatpush3.msra.mxu1 %v9878_v21  ;;  %12661 = vmatmul.mubr.f32.gmra.mxu0 %v5758_v16  ;;  %18393 = vst [vmem:[#allocation51_spill] sm:$0xff] %v15392_v8  ;;  %v9876_v21 = vld [vmem:[%s18280_s3 + $0x528] sm:$0xff]  ;;  %v5761_v52 = vld [vmem:[#allocation3 + $0xa7] sm:$0xff] }
 0x2bf   : > { %12269 = vmatprep.mubr.f32.mxu1 %v18392_v38  ;;  %12663 = vmatprep.mubr.f32.mxu0 %v5759_v56  ;;  %v2574_v27 = vpop.f32.mrf.mxu1  ;;  %v15400_v17 = vpop.f32.mrf.mxu0  ;;  %v18399_v16 = vld [vmem:[#allocation63_spill] sm:$0xff]  ;;  %v18401_v56 = vld [vmem:[#allocation25_spill] sm:$0xff] }
 0x2c0   : > { %v15398_v25 = vadd.f32 %v2574_v27, %v2363_v20  ;;  %12388 = vmatprep.subr.mxu1 %v9877_v58  ;;  %18395 = vst [vmem:[#allocation57_spill] sm:$0xff] %v15400_v17  ;;  %12783 = vmatpush3.msra.mxu0 %v9960_v45  ;;  %v2061_v45 = vadd.f32 %v13614_v47, %v18401_v56  ;;  %v18404_v47 = vld [vmem:[#allocation62_spill] sm:$0xff]  ;;  %v18405_v5 = vld [vmem:[#allocation59_spill] sm:$0xff] }
 0x2c1   : > { %v11791_v10 = vpop.f32.mrf.mxu1  ;;  %12270 = vmatmul.mubr.f32.gmra.mxu1 %v18396_v43  ;;  %v15414_v29 = vpop.f32.mrf.mxu0  ;;  %12784 = vmatprep.subr.mxu0 %v9959_v23  ;;  %v9958_v43 = vld [vmem:[%s18280_s3 + $0x7b8] sm:$0xff]  ;;  %v15609_v8 = vld [vmem:[#allocation3 + $0x5e] sm:$0xff] }
 0x2c2   : > { %v15411_v7 = vadd.f32 %v11791_v10, %v18398_v0  ;;  %12389 = vmatpush3.msra.mxu1 %v9877_v58  ;;  %12664 = vmatmul.mubr.f32.gmra.mxu0 %v5760_v39  ;;  %18400 = vst [vmem:[#allocation23_spill] sm:$0xff] %v15414_v29  ;;  %v5762_v58 = vld [vmem:[#allocation3 + $0xaf] sm:$0xff]  ;;  %v2367_v39 = vadd.f32 %v18404_v47, %v2061_v45  ;;  %v5763_v0 = vld [vmem:[#allocation3 + $0xb7] sm:$0xff]  ;;  %v5764_v45 = vld [vmem:[#allocation3 + $0xbf] sm:$0xff] }
 0x2c3   : > { %12272 = vmatprep.mubr.f32.mxu1 %v18399_v16  ;;  %12666 = vmatprep.mubr.f32.mxu0 %v5761_v52  ;;  %v2584_v20 = vpop.f32.mrf.mxu1  ;;  %v15419_v19 = vpop.f32.mrf.mxu0  ;;  %v9875_v10 = vld [vmem:[%s18280_s3 + $0x520] sm:$0xff] }
 0x2c4   : > { %v15417_v38 = vadd.f32 %v2584_v20, %v2365_v1  ;;  %12390 = vmatprep.subr.mxu1 %v9876_v21  ;;  %18402 = vst [vmem:[#allocation61_spill] sm:$0xff] %v15419_v19  ;;  %12785 = vmatpush3.msra.mxu0 %v9959_v23  ;;  %v18431_v19 = vld [vmem:[#allocation7_spill] sm:$0xff]  ;;  %v15585_v29 = vld [vmem:[#allocation3 + $0x4e] sm:$0xff] }
 0x2c5   : > { %v11794_v27 = vpop.f32.mrf.mxu1  ;;  %12273 = vmatmul.mubr.f32.gmra.mxu1 %v18403_v62  ;;  %v15433_v16 = vpop.f32.mrf.mxu0  ;;  %12786 = vmatprep.subr.mxu0 %v9958_v43  ;;  %v15633_v13 = vld [vmem:[#allocation3 + $0x6e] sm:$0xff] }
 0x2c6   : > { %v15430_v1 = vadd.f32 %v11794_v27, %v18405_v5  ;;  %12391 = vmatpush3.msra.mxu1 %v9876_v21  ;;  %12667 = vmatmul.mubr.f32.gmra.mxu0 %v5762_v58  ;;  %18406 = vst [vmem:[#allocation56_spill] sm:$0xff] %v15433_v16  ;;  %v9874_v21 = vld [vmem:[%s18280_s3 + $0x518] sm:$0xff] }
 0x2c7   : > { %12275 = vmatprep.mubr.f32.mxu1 %v15124_v4  ;;  %12669 = vmatprep.mubr.f32.mxu0 %v5763_v0  ;;  %v2594_v52 = vpop.f32.mrf.mxu1  ;;  %v15437_v56 = vpop.f32.mrf.mxu0  ;;  %v9957_v4 = vld [vmem:[%s18280_s3 + $0x7b0] sm:$0xff]  ;;  %v18408_v27 = vld [vmem:[#allocation65_spill] sm:$0xff] }
 0x2c8   : > { %v15435_v20 = vadd.f32 %v2594_v52, %v2367_v39  ;;  %12392 = vmatprep.subr.mxu1 %v9875_v10  ;;  %18407 = vst [vmem:[#allocation54_spill] sm:$0xff] %v15437_v56  ;;  %12787 = vmatpush3.msra.mxu0 %v9958_v43  ;;  %v5765_v58 = vld [vmem:[#allocation3 + $0xc7] sm:$0xff]  ;;  %v5766_v52 = vld [vmem:[#allocation3 + $0xcf] sm:$0xff] }
 0x2c9   : > { %v11797_v23 = vpop.f32.mrf.mxu1  ;;  %12276 = vmatmul.mubr.f32.gmra.mxu1 %v15137_v53  ;;  %v15450_v47 = vpop.f32.mrf.mxu0  ;;  %v18410_v39 = vld [vmem:[#allocation68_spill] sm:$0xff]  ;;  %12788 = vmatprep.subr.mxu0 %v9957_v4 }
 0x2ca   : > { %v15447_v62 = vadd.f32 %v11797_v23, %v18408_v27  ;;  %12393 = vmatpush3.msra.mxu1 %v9875_v10  ;;  %12670 = vmatmul.mubr.f32.gmra.mxu0 %v5764_v45  ;;  %18409 = vst [vmem:[#allocation63_spill] sm:$0xff] %v15450_v47  ;;  %v9873_v10 = vld [vmem:[%s18280_s3 + $0x510] sm:$0xff]  ;;  %v18412_v23 = vld [vmem:[#allocation70_spill] sm:$0xff] }
 0x2cb   : > { %12278 = vmatprep.mubr.f32.mxu1 %v15148_v36  ;;  %12672 = vmatprep.mubr.f32.mxu0 %v5765_v58  ;;  %v2604_v53 = vpop.f32.mrf.mxu1  ;;  %v15455_v0 = vpop.f32.mrf.mxu0  ;;  %v9956_v36 = vld [vmem:[%s18280_s3 + $0x7a8] sm:$0xff]  ;;  %v18421_v56 = vld [vmem:[#allocation84_spill] sm:$0xff] }
 0x2cc   : > { %v15453_v5 = vadd.f32 %v2604_v53, %v18410_v39  ;;  %12394 = vmatprep.subr.mxu1 %v9874_v21  ;;  %18411 = vst [vmem:[#allocation25_spill] sm:$0xff] %v15455_v0  ;;  %12789 = vmatpush3.msra.mxu0 %v9957_v4  ;;  %v5767_v27 = vld [vmem:[#allocation3 + $0xd7] sm:$0xff]  ;;  %v18414_v53 = vld [vmem:[#allocation72_spill] sm:$0xff] }
 0x2cd   : > { %v11800_v43 = vpop.f32.mrf.mxu1  ;;  %12279 = vmatmul.mubr.f32.gmra.mxu1 %v15161_v9  ;;  %v15468_v58 = vpop.f32.mrf.mxu0  ;;  %12790 = vmatprep.subr.mxu0 %v9956_v36 }
 0x2ce   : > { %v15465_v45 = vadd.f32 %v11800_v43, %v18412_v23  ;;  %12395 = vmatpush3.msra.mxu1 %v9874_v21  ;;  %12673 = vmatmul.mubr.f32.gmra.mxu0 %v5766_v52  ;;  %18413 = vst [vmem:[#allocation67_spill] sm:$0xff] %v15468_v58  ;;  %v5768_v43 = vld [vmem:[#allocation3 + $0xdf] sm:$0xff]  ;;  %v18416_v52 = vld [vmem:[#allocation74_spill] sm:$0xff] }
 0x2cf   : > { %12281 = vmatprep.mubr.f32.mxu1 %v15172_v22  ;;  %12675 = vmatprep.mubr.f32.mxu0 %v5767_v27  ;;  %v2614_v9 = vpop.f32.mrf.mxu1  ;;  %v15473_v0 = vpop.f32.mrf.mxu0  ;;  %v9872_v21 = vld [vmem:[%s18280_s3 + $0x508] sm:$0xff]  ;;  %v9955_v22 = vld [vmem:[%s18280_s3 + $0x7a0] sm:$0xff]  ;;  %v5769_v27 = vld [vmem:[#allocation3 + $0xe7] sm:$0xff] }
 0x2d0   : > { %v15471_v39 = vadd.f32 %v2614_v9, %v18414_v53  ;;  %12396 = vmatprep.subr.mxu1 %v9873_v10  ;;  %18415 = vst [vmem:[#allocation62_spill] sm:$0xff] %v15473_v0  ;;  %12791 = vmatpush3.msra.mxu0 %v9956_v36  ;;  %v18417_v9 = vld [vmem:[#allocation80_spill] sm:$0xff] }
 0x2d1   : > { %v11803_v4 = vpop.f32.mrf.mxu1  ;;  %12282 = vmatmul.mubr.f32.gmra.mxu1 %v15185_v18  ;;  %v15486_v53 = vpop.f32.mrf.mxu0  ;;  %v18419_v0 = vld [vmem:[#allocation76_spill] sm:$0xff]  ;;  %12792 = vmatprep.subr.mxu0 %v9955_v22 }
 0x2d2   : > { %v15483_v23 = vadd.f32 %v11803_v4, %v18416_v52  ;;  %12397 = vmatpush3.msra.mxu1 %v9873_v10  ;;  %12676 = vmatmul.mubr.f32.gmra.mxu0 %v5768_v43  ;;  %18418 = vst [vmem:[#allocation59_spill] sm:$0xff] %v15486_v53  ;;  %v5770_v4 = vld [vmem:[#allocation3 + $0xef] sm:$0xff] }
 0x2d3   : > { %12284 = vmatprep.mubr.f32.mxu1 %v18417_v9  ;;  %12678 = vmatprep.mubr.f32.mxu0 %v5769_v27  ;;  %v2624_v18 = vpop.f32.mrf.mxu1  ;;  %v15491_v47 = vpop.f32.mrf.mxu0  ;;  %v9871_v10 = vld [vmem:[%s18280_s3 + $0x500] sm:$0xff]  ;;  %v9954_v43 = vld [vmem:[%s18280_s3 + $0x798] sm:$0xff] }
 0x2d4   : > { %v15489_v58 = vadd.f32 %v2624_v18, %v18419_v0  ;;  %12398 = vmatprep.subr.mxu1 %v9872_v21  ;;  %18420 = vst [vmem:[#allocation65_spill] sm:$0xff] %v15491_v47  ;;  %12793 = vmatpush3.msra.mxu0 %v9955_v22  ;;  %v18422_v52 = vld [vmem:[#allocation78_spill] sm:$0xff]  ;;  %v18424_v18 = vld [vmem:[#allocation81_spill] sm:$0xff] }
 0x2d5   : > { %v11806_v36 = vpop.f32.mrf.mxu1  ;;  %12285 = vmatmul.mubr.f32.gmra.mxu1 %v18421_v56  ;;  %v5771_v27 = vld [vmem:[#allocation3 + $0xf7] sm:$0xff]  ;;  %v15504_v9 = vpop.f32.mrf.mxu0  ;;  %v4246_v22 = vld [vmem:[#allocation3 + $0x10d] sm:$0xf]  ;;  %12794 = vmatprep.subr.mxu0 %v9954_v43 }
 0x2d6   : > { %v15501_v0 = vadd.f32 %v11806_v36, %v18422_v52  ;;  %12399 = vmatpush3.msra.mxu1 %v9872_v21  ;;  %12679 = vmatmul.mubr.f32.gmra.mxu0 %v5770_v4  ;;  %18423 = vst [vmem:[#allocation68_spill] sm:$0xff] %v15504_v9  ;;  %v5772_v36 = vld [vmem:[#allocation3 + $0xff] sm:$0xff]  ;;  %v9918_v21 = vld [vmem:[%s18280_s3 + $0x678] sm:$0xff] }
 0x2d7   : > { %12287 = vmatprep.mubr.f32.mxu1 %v15216_v50  ;;  %12681 = vmatprep.mubr.f32.mxu0 %v5771_v27  ;;  %v2634_v56 = vpop.f32.mrf.mxu1  ;;  %v15509_v16 = vpop.f32.mrf.mxu0  ;;  %v9953_v50 = vld [vmem:[%s18280_s3 + $0x790] sm:$0xff] }
 0x2d8   : > { %v15507_v47 = vadd.f32 %v2634_v56, %v18424_v18  ;;  %12400 = vmatprep.subr.mxu1 %v9871_v10  ;;  %18425 = vst [vmem:[#allocation70_spill] sm:$0xff] %v15509_v16  ;;  %12795 = vmatpush3.msra.mxu0 %v9954_v43  ;;  %v4827_v4 = vld [vmem:[#allocation3 + $0x24] sm:$0xff] }
 0x2d9   : > { %v11809_v53 = vpop.f32.mrf.mxu1  ;;  %12288 = vmatmul.mubr.f32.gmra.mxu1 %v4246_v22  ;;  %v5773_v52 = vld [vmem:[#allocation3 + $0x107] sm:$0xff]  ;;  %v15517_v27 = vpop.f32.mrf.mxu0  ;;  %12796 = vmatprep.subr.mxu0 %v9953_v50 }
 0x2da   : > { %12401 = vmatpush3.msra.mxu1 %v9871_v10  ;;  %12682 = vmatmul.mubr.f32.gmra.mxu0 %v5772_v36  ;;  %18426 = vst [vmem:[#allocation72_spill] sm:$0xff] %v15517_v27  ;;  %v18427_v18 = vld [vmem:[#allocation5_spill] sm:$0xff]  ;;  %v9917_v36 = vld [vmem:[%s18280_s3 + $0x670] sm:$0xff] }
 0x2db   : > { %12402 = vmatprep.mubr.f32.mxu1 %v4827_v4  ;;  %12684 = vmatprep.mubr.f32.mxu0 %v5773_v52  ;;  %v2644_v53 = vpop.f32.mrf.mxu1  ;;  %v2960_v43 = vadd.f32 %v18427_v18, %v15225_v6  ;;  %v4828_v22 = vld [vmem:[#allocation3 + $0x2c] sm:$0xff]  ;;  %v15524_v9 = vpop.f32.mrf.mxu0  ;;  %v4829_v6 = vld [vmem:[#allocation3 + $0x34] sm:$0xff]  ;;  %v5776_v27 = vld [vmem:[#allocation3 + $0x11f] sm:$0xf] }
 0x2dc   : > { %v15520_v56 = vadd.f32 %v2644_v53, %v15218_v15  ;;  %12530 = vmatprep.subr.mxu1 %v9918_v21  ;;  %18428 = vst [vmem:[#allocation74_spill] sm:$0xff] %v15524_v9  ;;  %v5774_v10 = vld [vmem:[#allocation3 + $0x10f] sm:$0xff]  ;;  %12797 = vmatpush3.msra.mxu0 %v9953_v50  ;;  %v9952_v15 = vld [vmem:[%s18280_s3 + $0x788] sm:$0xff] }
 0x2dd   : > { %v11924_v16 = vpop.f32.mrf.mxu1  ;;  %12403 = vmatmul.mubr.f32.vlgmr.msra.gmra.mxu1 %v4828_v22  ;;  %v5775_v52 = vld [vmem:[#allocation3 + $0x117] sm:$0xff]  ;;  %v15536_v9 = vpop.f32.mrf.mxu0  ;;  %12798 = vmatprep.subr.mxu0 %v9952_v15 }
 0x2de   : > { %v15532_v4 = vadd.f32 %v11924_v16, %v2960_v43  ;;  %12531 = vmatpush3.msra.mxu1 %v9918_v21  ;;  %12685 = vmatmul.mubr.f32.gmra.mxu0 %v5774_v10  ;;  %v18429_v53 = vld [vmem:[#allocation6_spill] sm:$0xff]  ;;  %18430 = vst [vmem:[#allocation80_spill] sm:$0xff] %v15536_v9  ;;  %v2962_v16 = vadd.f32 %v18431_v19, %v15242_v14  ;;  %v4830_v43 = vld [vmem:[#allocation3 + $0x3c] sm:$0xff] }
 0x2df   : > { %v2959_v18 = vadd.f32 %v18429_v53, %v15235_v46  ;;  %12405 = vmatprep.mubr.f32.mxu1 %v4829_v6  ;;  %12687 = vmatprep.mubr.f32.mxu0 %v5775_v52  ;;  %v3106_v22 = vpop.f32.mrf.mxu1  ;;  %v12209_v10 = vpop.f32.mrf.mxu0  ;;  %v9951_v46 = vld [vmem:[%s18280_s3 + $0x780] sm:$0xff]  ;;  %v9916_v6 = vld [vmem:[%s18280_s3 + $0x668] sm:$0xff]  ;;  %v4831_v53 = vld [vmem:[#allocation3 + $0x44] sm:$0xff] }
 0x2e0   : > { %12532 = vmatprep.subr.mxu1 %v9917_v36  ;;  %12799 = vmatpush3.msra.mxu0 %v9952_v15  ;;  %v15550_v14 = vld [vmem:[#allocation3 + $0x36] sm:$0xff]  ;;  %v18432_v19 = vld [vmem:[#allocation8_spill] sm:$0xff] }
 0x2e1   : > { %v15538_v50 = vadd.f32 %v3106_v22, %v2959_v18  ;;  %v11927_v21 = vpop.f32.mrf.mxu1  ;;  %12406 = vmatmul.mubr.f32.gmra.mxu1 %v4830_v43  ;;  %v2961_v18 = vadd.f32 %v18432_v19, %v15254_v12  ;;  %v15555_v22 = vpop.f32.mrf.mxu0  ;;  %12800 = vmatprep.subr.mxu0 %v9951_v46  ;;  %v15561_v10 = vld [vmem:[#allocation3 + $0x3e] sm:$0xff]  ;;  %v9915_v12 = vld [vmem:[%s18280_s3 + $0x660] sm:$0xff] }
 0x2e2   : > { %v15548_v52 = vadd.f32 %v11927_v21, %v2962_v16  ;;  %12533 = vmatpush3.msra.mxu1 %v9917_v36  ;;  %12688 = vmatmul.mubr.f32.gmra.mxu0 %v5776_v27  ;;  %18433 = vst [vmem:[#allocation76_spill] sm:$0xff] %v15555_v22  ;;  %v18434_v16 = vld [vmem:[#allocation9_spill] sm:$0xff] }
 0x2e3   : > { %12408 = vmatprep.mubr.f32.mxu1 %v4831_v53  ;;  %12802 = vmatprep.mubr.f32.mxu0 %v15550_v14  ;;  %v3116_v15 = vpop.f32.mrf.mxu1  ;;  %v2964_v36 = vadd.f32 %v18434_v16, %v15269_v63  ;;  %v4832_v27 = vld [vmem:[#allocation3 + $0x4c] sm:$0xff]  ;;  %v4833_v63 = vld [vmem:[#allocation3 + $0x54] sm:$0xff] }
 0x2e4   : > { %v15557_v43 = vadd.f32 %v3116_v15, %v2961_v18  ;;  %12534 = vmatprep.subr.mxu1 %v9916_v6  ;;  %12801 = vmatpush3.msra.mxu0 %v9951_v46  ;;  %v9998_v53 = vld [vmem:[%s18280_s3 + $0x8f8] sm:$0xff]  ;;  %v15571_v18 = vpop.f32.mrf.mxu0  ;;  %v18436_v15 = vld [vmem:[#allocation10_spill] sm:$0xff] }
 0x2e5   : > { %v11930_v21 = vpop.f32.mrf.mxu1  ;;  %12409 = vmatmul.mubr.f32.gmra.mxu1 %v4832_v27  ;;  %18435 = vst [vmem:[#allocation84_spill] sm:$0xff] %v15571_v18  ;;  %v15574_v46 = vld [vmem:[#allocation3 + $0x46] sm:$0xff]  ;;  %v2963_v16 = vadd.f32 %v18436_v15, %v15276_v33  ;;  %12930 = vmatprep.subr.mxu0 %v9998_v53 }
 0x2e6   : > { %v15569_v19 = vadd.f32 %v11930_v21, %v2964_v36  ;;  %12535 = vmatpush3.msra.mxu1 %v9916_v6  ;;  %12803 = vmatmul.mubr.f32.vlgmr.msra.gmra.mxu0 %v15561_v10  ;;  %v15581_v9 = vpop.f32.mrf.mxu0  ;;  %v18438_v36 = vld [vmem:[#allocation11_spill] sm:$0xff]  ;;  %v9914_v33 = vld [vmem:[%s18280_s3 + $0x658] sm:$0xff] }
 0x2e7   : > { %12411 = vmatprep.mubr.f32.mxu1 %v4833_v63  ;;  %12805 = vmatprep.mubr.f32.mxu0 %v15574_v46  ;;  %v3126_v27 = vpop.f32.mrf.mxu1  ;;  %18437 = vst [vmem:[#allocation78_spill] sm:$0xff] %v15581_v9  ;;  %v2966_v6 = vadd.f32 %v18438_v36, %v15289_v51  ;;  %v4834_v21 = vld [vmem:[#allocation3 + $0x5c] sm:$0xff]  ;;  %v4835_v51 = vld [vmem:[#allocation3 + $0x64] sm:$0xff] }
 0x2e8   : > { %v15579_v22 = vadd.f32 %v3126_v27, %v2963_v16  ;;  %12536 = vmatprep.subr.mxu1 %v9915_v12  ;;  %12931 = vmatpush3.msra.mxu0 %v9998_v53  ;;  %v9997_v63 = vld [vmem:[%s18280_s3 + $0x8f0] sm:$0xff]  ;;  %v15595_v16 = vpop.f32.mrf.mxu0  ;;  %v15598_v27 = vld [vmem:[#allocation3 + $0x56] sm:$0xff] }
 0x2e9   : > { %v11933_v18 = vpop.f32.mrf.mxu1  ;;  %12412 = vmatmul.mubr.f32.gmra.mxu1 %v4834_v21  ;;  %18439 = vst [vmem:[#allocation81_spill] sm:$0xff] %v15595_v16  ;;  %v18440_v36 = vld [vmem:[#allocation12_spill] sm:$0xff]  ;;  %12932 = vmatprep.subr.mxu0 %v9997_v63 }
 0x2ea   : > { %v15593_v15 = vadd.f32 %v11933_v18, %v2966_v6  ;;  %12537 = vmatpush3.msra.mxu1 %v9915_v12  ;;  %12806 = vmatmul.mubr.f32.gmra.mxu0 %v15585_v29  ;;  %v2965_v21 = vadd.f32 %v18440_v36, %v15296_v57  ;;  %v15605_v17 = vpop.f32.mrf.mxu0  ;;  %v18442_v18 = vld [vmem:[#allocation13_spill] sm:$0xff]  ;;  %v9913_v57 = vld [vmem:[%s18280_s3 + $0x650] sm:$0xff] }
 0x2eb   : > { %12414 = vmatprep.mubr.f32.mxu1 %v4835_v51  ;;  %12808 = vmatprep.mubr.f32.mxu0 %v15598_v27  ;;  %v3136_v53 = vpop.f32.mrf.mxu1  ;;  %18441 = vst [vmem:[#allocation5_spill] sm:$0xff] %v15605_v17  ;;  %v2968_v12 = vadd.f32 %v18442_v18, %v15309_v54  ;;  %v4836_v6 = vld [vmem:[#allocation3 + $0x6c] sm:$0xff]  ;;  %v9996_v51 = vld [vmem:[%s18280_s3 + $0x8e8] sm:$0xff] }
 0x2ec   : > { %v15603_v9 = vadd.f32 %v3136_v53, %v2965_v21  ;;  %12538 = vmatprep.subr.mxu1 %v9914_v33  ;;  %12933 = vmatpush3.msra.mxu0 %v9997_v63  ;;  %v15619_v21 = vpop.f32.mrf.mxu0  ;;  %v4837_v54 = vld [vmem:[#allocation3 + $0x74] sm:$0xff]  ;;  %v15622_v53 = vld [vmem:[#allocation3 + $0x66] sm:$0xff] }
 0x2ed   : > { %v11936_v16 = vpop.f32.mrf.mxu1  ;;  %12415 = vmatmul.mubr.f32.gmra.mxu1 %v4836_v6  ;;  %18443 = vst [vmem:[#allocation6_spill] sm:$0xff] %v15619_v21  ;;  %v18444_v18 = vld [vmem:[#allocation14_spill] sm:$0xff]  ;;  %12934 = vmatprep.subr.mxu0 %v9996_v51 }
 0x2ee   : > { %v15617_v36 = vadd.f32 %v11936_v16, %v2968_v12  ;;  %12539 = vmatpush3.msra.mxu1 %v9914_v33  ;;  %12809 = vmatmul.mubr.f32.gmra.mxu0 %v15609_v8  ;;  %v2967_v6 = vadd.f32 %v18444_v18, %v15316_v49  ;;  %v15629_v48 = vpop.f32.mrf.mxu0  ;;  %v18446_v16 = vld [vmem:[#allocation15_spill] sm:$0xff] }
 0x2ef   : > { %12417 = vmatprep.mubr.f32.mxu1 %v4837_v54  ;;  %12811 = vmatprep.mubr.f32.mxu0 %v15622_v53  ;;  %v3146_v63 = vpop.f32.mrf.mxu1  ;;  %18445 = vst [vmem:[#allocation7_spill] sm:$0xff] %v15629_v48  ;;  %v2970_v33 = vadd.f32 %v18446_v16, %v15329_v35  ;;  %v4838_v12 = vld [vmem:[#allocation3 + $0x7c] sm:$0xff]  ;;  %v9995_v54 = vld [vmem:[%s18280_s3 + $0x8e0] sm:$0xff]  ;;  %v4839_v35 = vld [vmem:[#allocation3 + $0x84] sm:$0xff] }
 0x2f0   : > { %v15627_v17 = vadd.f32 %v3146_v63, %v2967_v6  ;;  %12540 = vmatprep.subr.mxu1 %v9913_v57  ;;  %v9912_v49 = vld [vmem:[%s18280_s3 + $0x648] sm:$0xff]  ;;  %12935 = vmatpush3.msra.mxu0 %v9996_v51  ;;  %v15643_v6 = vpop.f32.mrf.mxu0  ;;  %v18448_v16 = vld [vmem:[#allocation16_spill] sm:$0xff] }
 0x2f1   : > { %v11939_v21 = vpop.f32.mrf.mxu1  ;;  %12418 = vmatmul.mubr.f32.gmra.mxu1 %v4838_v12  ;;  %18447 = vst [vmem:[#allocation8_spill] sm:$0xff] %v15643_v6  ;;  %v15646_v63 = vld [vmem:[#allocation3 + $0x76] sm:$0xff]  ;;  %v2969_v12 = vadd.f32 %v18448_v16, %v15336_v55  ;;  %12936 = vmatprep.subr.mxu0 %v9995_v54 }
 0x2f2   : > { %v15641_v18 = vadd.f32 %v11939_v21, %v2970_v33  ;;  %12541 = vmatpush3.msra.mxu1 %v9913_v57  ;;  %12812 = vmatmul.mubr.f32.gmra.mxu0 %v15633_v13  ;;  %v15653_v2 = vpop.f32.mrf.mxu0  ;;  %v18450_v21 = vld [vmem:[#allocation17_spill] sm:$0xff]  ;;  %v9911_v55 = vld [vmem:[%s18280_s3 + $0x640] sm:$0xff] }
 0x2f3   : > { %12420 = vmatprep.mubr.f32.mxu1 %v4839_v35  ;;  %12814 = vmatprep.mubr.f32.mxu0 %v15646_v63  ;;  %v3156_v51 = vpop.f32.mrf.mxu1  ;;  %18449 = vst [vmem:[#allocation9_spill] sm:$0xff] %v15653_v2  ;;  %v2972_v57 = vadd.f32 %v18450_v21, %v15349_v11  ;;  %v4840_v33 = vld [vmem:[#allocation3 + $0x8c] sm:$0xff]  ;;  %v4841_v11 = vld [vmem:[#allocation3 + $0x94] sm:$0xff] }
 0x2f4   : > { %v15651_v48 = vadd.f32 %v3156_v51, %v2969_v12  ;;  %12542 = vmatprep.subr.mxu1 %v9912_v49  ;;  %12937 = vmatpush3.msra.mxu0 %v9995_v54  ;;  %v9994_v35 = vld [vmem:[%s18280_s3 + $0x8d8] sm:$0xff]  ;;  %v15667_v12 = vpop.f32.mrf.mxu0  ;;  %v18452_v21 = vld [vmem:[#allocation18_spill] sm:$0xff] }
 0x2f5   : > { %v11942_v6 = vpop.f32.mrf.mxu1  ;;  %12421 = vmatmul.mubr.f32.gmra.mxu1 %v4840_v33  ;;  %18451 = vst [vmem:[#allocation10_spill] sm:$0xff] %v15667_v12  ;;  %v15670_v51 = vld [vmem:[#allocation3 + $0x86] sm:$0xff]  ;;  %v2971_v33 = vadd.f32 %v18452_v21, %v15356_v26  ;;  %12938 = vmatprep.subr.mxu0 %v9994_v35 }
 0x2f6   : > { %v15665_v16 = vadd.f32 %v11942_v6, %v2972_v57  ;;  %12543 = vmatpush3.msra.mxu1 %v9912_v49  ;;  %12815 = vmatmul.mubr.f32.gmra.mxu0 %v15657_v34  ;;  %v15677_v40 = vpop.f32.mrf.mxu0  ;;  %v18454_v6 = vld [vmem:[#allocation19_spill] sm:$0xff]  ;;  %v9910_v26 = vld [vmem:[%s18280_s3 + $0x638] sm:$0xff] }
 0x2f7   : > { %12423 = vmatprep.mubr.f32.mxu1 %v4841_v11  ;;  %12817 = vmatprep.mubr.f32.mxu0 %v15670_v51  ;;  %v3166_v54 = vpop.f32.mrf.mxu1  ;;  %18453 = vst [vmem:[#allocation11_spill] sm:$0xff] %v15677_v40  ;;  %v2974_v49 = vadd.f32 %v18454_v6, %v15369_v28  ;;  %v4842_v57 = vld [vmem:[#allocation3 + $0x9c] sm:$0xff]  ;;  %v4843_v28 = vld [vmem:[#allocation3 + $0xa4] sm:$0xff] }
 0x2f8   : > { %v15675_v2 = vadd.f32 %v3166_v54, %v2971_v33  ;;  %12544 = vmatprep.subr.mxu1 %v9911_v55  ;;  %12939 = vmatpush3.msra.mxu0 %v9994_v35  ;;  %v9993_v11 = vld [vmem:[%s18280_s3 + $0x8d0] sm:$0xff]  ;;  %v15691_v33 = vpop.f32.mrf.mxu0  ;;  %v15694_v54 = vld [vmem:[#allocation3 + $0x96] sm:$0xff] }
 0x2f9   : > { %v11945_v12 = vpop.f32.mrf.mxu1  ;;  %12424 = vmatmul.mubr.f32.gmra.mxu1 %v4842_v57  ;;  %18455 = vst [vmem:[#allocation12_spill] sm:$0xff] %v15691_v33  ;;  %v18456_v6 = vld [vmem:[#allocation20_spill] sm:$0xff]  ;;  %12940 = vmatprep.subr.mxu0 %v9993_v11 }
 0x2fa   : > { %v15689_v21 = vadd.f32 %v11945_v12, %v2974_v49  ;;  %12545 = vmatpush3.msra.mxu1 %v9911_v55  ;;  %12818 = vmatmul.mubr.f32.gmra.mxu0 %v15681_v42  ;;  %v2973_v57 = vadd.f32 %v18456_v6, %v15376_v31  ;;  %v15701_v24 = vpop.f32.mrf.mxu0  ;;  %v18458_v12 = vld [vmem:[#allocation21_spill] sm:$0xff]  ;;  %v9909_v31 = vld [vmem:[%s18280_s3 + $0x630] sm:$0xff] }
 0x2fb   : > { %12426 = vmatprep.mubr.f32.mxu1 %v4843_v28  ;;  %12820 = vmatprep.mubr.f32.mxu0 %v15694_v54  ;;  %v3176_v35 = vpop.f32.mrf.mxu1  ;;  %18457 = vst [vmem:[#allocation13_spill] sm:$0xff] %v15701_v24  ;;  %v2976_v55 = vadd.f32 %v18458_v12, %v15389_v59  ;;  %v4844_v49 = vld [vmem:[#allocation3 + $0xac] sm:$0xff]  ;;  %v9992_v28 = vld [vmem:[%s18280_s3 + $0x8c8] sm:$0xff] }
 0x2fc   : > { %v15699_v40 = vadd.f32 %v3176_v35, %v2973_v57  ;;  %12546 = vmatprep.subr.mxu1 %v9910_v26  ;;  %12941 = vmatpush3.msra.mxu0 %v9993_v11  ;;  %v15715_v57 = vpop.f32.mrf.mxu0  ;;  %v4845_v59 = vld [vmem:[#allocation3 + $0xb4] sm:$0xff]  ;;  %v15718_v35 = vld [vmem:[#allocation3 + $0xa6] sm:$0xff] }
 0x2fd   : > { %v11948_v33 = vpop.f32.mrf.mxu1  ;;  %12427 = vmatmul.mubr.f32.gmra.mxu1 %v4844_v49  ;;  %18459 = vst [vmem:[#allocation14_spill] sm:$0xff] %v15715_v57  ;;  %v18460_v12 = vld [vmem:[#allocation22_spill] sm:$0xff]  ;;  %12942 = vmatprep.subr.mxu0 %v9992_v28 }
 0x2fe   : > { %v15713_v6 = vadd.f32 %v11948_v33, %v2976_v55  ;;  %12547 = vmatpush3.msra.mxu1 %v9910_v26  ;;  %12821 = vmatmul.mubr.f32.gmra.mxu0 %v15705_v44  ;;  %v2975_v49 = vadd.f32 %v18460_v12, %v15398_v25  ;;  %v15725_v41 = vpop.f32.mrf.mxu0  ;;  %v18462_v33 = vld [vmem:[#allocation24_spill] sm:$0xff]  ;;  %v9908_v25 = vld [vmem:[%s18280_s3 + $0x628] sm:$0xff] }
 0x2ff   : > { %12429 = vmatprep.mubr.f32.mxu1 %v4845_v59  ;;  %12823 = vmatprep.mubr.f32.mxu0 %v15718_v35  ;;  %v3186_v11 = vpop.f32.mrf.mxu1  ;;  %18461 = vst [vmem:[#allocation15_spill] sm:$0xff] %v15725_v41  ;;  %v2978_v26 = vadd.f32 %v18462_v33, %v15411_v7  ;;  %v4846_v55 = vld [vmem:[#allocation3 + $0xbc] sm:$0xff]  ;;  %v9991_v59 = vld [vmem:[%s18280_s3 + $0x8c0] sm:$0xff]  ;;  %v4847_v7 = vld [vmem:[#allocation3 + $0xc4] sm:$0xff] }
 0x300   : > { %v15723_v24 = vadd.f32 %v3186_v11, %v2975_v49  ;;  %12548 = vmatprep.subr.mxu1 %v9909_v31  ;;  %12943 = vmatpush3.msra.mxu0 %v9992_v28  ;;  %v15739_v49 = vpop.f32.mrf.mxu0  ;;  %v15742_v11 = vld [vmem:[#allocation3 + $0xb6] sm:$0xff] }
 0x301   : > { %v11951_v57 = vpop.f32.mrf.mxu1  ;;  %12430 = vmatmul.mubr.f32.gmra.mxu1 %v4846_v55  ;;  %18463 = vst [vmem:[#allocation16_spill] sm:$0xff] %v15739_v49  ;;  %v18464_v33 = vld [vmem:[#allocation26_spill] sm:$0xff]  ;;  %12944 = vmatprep.subr.mxu0 %v9991_v59 }
 0x302   : > { %v15737_v12 = vadd.f32 %v11951_v57, %v2978_v26  ;;  %12549 = vmatpush3.msra.mxu1 %v9909_v31  ;;  %12824 = vmatmul.mubr.f32.gmra.mxu0 %v15729_v3  ;;  %v2977_v55 = vadd.f32 %v18464_v33, %v15417_v38  ;;  %v15749_v60 = vpop.f32.mrf.mxu0  ;;  %v18466_v57 = vld [vmem:[#allocation27_spill] sm:$0xff]  ;;  %v4848_v26 = vld [vmem:[#allocation3 + $0xcc] sm:$0xff] }
 0x303   : > { %12432 = vmatprep.mubr.f32.mxu1 %v4847_v7  ;;  %12826 = vmatprep.mubr.f32.mxu0 %v15742_v11  ;;  %v3196_v28 = vpop.f32.mrf.mxu1  ;;  %18465 = vst [vmem:[#allocation17_spill] sm:$0xff] %v15749_v60  ;;  %v2980_v31 = vadd.f32 %v18466_v57, %v15430_v1  ;;  %v9907_v38 = vld [vmem:[%s18280_s3 + $0x620] sm:$0xff]  ;;  %v9990_v7 = vld [vmem:[%s18280_s3 + $0x8b8] sm:$0xff]  ;;  %v18468_v57 = vld [vmem:[#allocation28_spill] sm:$0xff] }
 0x304   : > { %v15747_v41 = vadd.f32 %v3196_v28, %v2977_v55  ;;  %12550 = vmatprep.subr.mxu1 %v9908_v25  ;;  %12945 = vmatpush3.msra.mxu0 %v9991_v59  ;;  %v15763_v55 = vpop.f32.mrf.mxu0  ;;  %v4849_v1 = vld [vmem:[#allocation3 + $0xd4] sm:$0xff]  ;;  %v15766_v28 = vld [vmem:[#allocation3 + $0xc6] sm:$0xff] }
 0x305   : > { %v11954_v49 = vpop.f32.mrf.mxu1  ;;  %12433 = vmatmul.mubr.f32.gmra.mxu1 %v4848_v26  ;;  %18467 = vst [vmem:[#allocation18_spill] sm:$0xff] %v15763_v55  ;;  %v2979_v26 = vadd.f32 %v18468_v57, %v15435_v20  ;;  %12946 = vmatprep.subr.mxu0 %v9990_v7  ;;  %v9906_v20 = vld [vmem:[%s18280_s3 + $0x618] sm:$0xff] }
 0x306   : > { %v15761_v33 = vadd.f32 %v11954_v49, %v2980_v31  ;;  %12551 = vmatpush3.msra.mxu1 %v9908_v25  ;;  %12827 = vmatmul.mubr.f32.gmra.mxu0 %v15753_v37  ;;  %v15773_v30 = vpop.f32.mrf.mxu0  ;;  %v18470_v49 = vld [vmem:[#allocation29_spill] sm:$0xff]  ;;  %v4850_v31 = vld [vmem:[#allocation3 + $0xdc] sm:$0xff] }
 0x307   : > { %12435 = vmatprep.mubr.f32.mxu1 %v4849_v1  ;;  %12829 = vmatprep.mubr.f32.mxu0 %v15766_v28  ;;  %v3206_v59 = vpop.f32.mrf.mxu1  ;;  %18469 = vst [vmem:[#allocation19_spill] sm:$0xff] %v15773_v30  ;;  %v2982_v25 = vadd.f32 %v18470_v49, %v15447_v62  ;;  %v9989_v1 = vld [vmem:[%s18280_s3 + $0x8b0] sm:$0xff]  ;;  %v18473_v49 = vld [vmem:[#allocation30_spill] sm:$0xff] }
 0x308   : > { %v15771_v60 = vadd.f32 %v3206_v59, %v2979_v26  ;;  %12552 = vmatprep.subr.mxu1 %v9907_v38  ;;  %12947 = vmatpush3.msra.mxu0 %v9990_v7  ;;  %v15787_v26 = vpop.f32.mrf.mxu0  ;;  %v4851_v62 = vld [vmem:[#allocation3 + $0xe4] sm:$0xff]  ;;  %v15790_v59 = vld [vmem:[#allocation3 + $0xd6] sm:$0xff] }
 0x309   : > { %v11957_v55 = vpop.f32.mrf.mxu1  ;;  %12436 = vmatmul.mubr.f32.gmra.mxu1 %v4850_v31  ;;  %18472 = vst [vmem:[#allocation21_spill] sm:$0xff] %v15787_v26  ;;  %v2981_v31 = vadd.f32 %v18473_v49, %v15453_v5  ;;  %12948 = vmatprep.subr.mxu0 %v9989_v1  ;;  %v9905_v5 = vld [vmem:[%s18280_s3 + $0x610] sm:$0xff] }
 0x30a   : > { %v15785_v57 = vadd.f32 %v11957_v55, %v2982_v25  ;;  %12553 = vmatpush3.msra.mxu1 %v9907_v38  ;;  %12830 = vmatmul.mubr.f32.gmra.mxu0 %v15777_v32  ;;  %v15797_v61 = vpop.f32.mrf.mxu0  ;;  %v18476_v55 = vld [vmem:[#allocation31_spill] sm:$0xff]  ;;  %v4852_v25 = vld [vmem:[#allocation3 + $0xec] sm:$0xff] }
 0x30b   : > { %12438 = vmatprep.mubr.f32.mxu1 %v4851_v62  ;;  %12832 = vmatprep.mubr.f32.mxu0 %v15790_v59  ;;  %v3216_v7 = vpop.f32.mrf.mxu1  ;;  %18475 = vst [vmem:[#allocation24_spill] sm:$0xff] %v15797_v61  ;;  %v2984_v38 = vadd.f32 %v18476_v55, %v15465_v45  ;;  %v9988_v62 = vld [vmem:[%s18280_s3 + $0x8a8] sm:$0xff]  ;;  %v18479_v55 = vld [vmem:[#allocation32_spill] sm:$0xff] }
 0x30c   : > { %18471 = vst [vmem:[#allocation20_spill] sm:$0xff] %v15785_v57  ;;  %v15795_v30 = vadd.f32 %v3216_v7, %v2981_v31  ;;  %12554 = vmatprep.subr.mxu1 %v9906_v20  ;;  %v15801_v57 = vld [vmem:[#allocation3 + $0xde] sm:$0xff]  ;;  %12949 = vmatpush3.msra.mxu0 %v9989_v1  ;;  %v15811_v31 = vpop.f32.mrf.mxu0  ;;  %v4853_v45 = vld [vmem:[#allocation3 + $0xf4] sm:$0xff]  ;;  %v15814_v7 = vld [vmem:[#allocation3 + $0xe6] sm:$0xff] }
 0x30d   : > { %v11960_v26 = vpop.f32.mrf.mxu1  ;;  %12439 = vmatmul.mubr.f32.gmra.mxu1 %v4852_v25  ;;  %18478 = vst [vmem:[#allocation27_spill] sm:$0xff] %v15811_v31  ;;  %v2983_v25 = vadd.f32 %v18479_v55, %v15471_v39  ;;  %12950 = vmatprep.subr.mxu0 %v9988_v62  ;;  %v9904_v39 = vld [vmem:[%s18280_s3 + $0x608] sm:$0xff] }
 0x30e   : > { %18474 = vst [vmem:[#allocation22_spill] sm:$0xff] %v15795_v30  ;;  %v15809_v49 = vadd.f32 %v11960_v26, %v2984_v38  ;;  %12555 = vmatpush3.msra.mxu1 %v9906_v20  ;;  %12833 = vmatmul.mubr.f32.gmra.mxu0 %v15801_v57  ;;  %v15821_v30 = vpop.f32.mrf.mxu0  ;;  %v18482_v26 = vld [vmem:[#allocation33_spill] sm:$0xff]  ;;  %v4854_v38 = vld [vmem:[#allocation3 + $0xfc] sm:$0xff] }
 0x30f   : > { %12441 = vmatprep.mubr.f32.mxu1 %v4853_v45  ;;  %12835 = vmatprep.mubr.f32.mxu0 %v15814_v7  ;;  %v3226_v1 = vpop.f32.mrf.mxu1  ;;  %18481 = vst [vmem:[#allocation29_spill] sm:$0xff] %v15821_v30  ;;  %v2986_v20 = vadd.f32 %v18482_v26, %v15483_v23  ;;  %v9987_v45 = vld [vmem:[%s18280_s3 + $0x8a0] sm:$0xff]  ;;  %v4855_v23 = vld [vmem:[#allocation3 + $0x104] sm:$0xff] }
 0x310   : > { %18477 = vst [vmem:[#allocation26_spill] sm:$0xff] %v15809_v49  ;;  %v15819_v61 = vadd.f32 %v3226_v1, %v2983_v25  ;;  %12556 = vmatprep.subr.mxu1 %v9905_v5  ;;  %v15825_v49 = vld [vmem:[#allocation3 + $0xee] sm:$0xff]  ;;  %12951 = vmatpush3.msra.mxu0 %v9988_v62  ;;  %v15835_v25 = vpop.f32.mrf.mxu0  ;;  %v15838_v1 = vld [vmem:[#allocation3 + $0xf6] sm:$0xff] }
 0x311   : > { %v11963_v31 = vpop.f32.mrf.mxu1  ;;  %12442 = vmatmul.mubr.f32.gmra.mxu1 %v4854_v38  ;;  %18484 = vst [vmem:[#allocation31_spill] sm:$0xff] %v15835_v25  ;;  %v18485_v26 = vld [vmem:[#allocation34_spill] sm:$0xff]  ;;  %12952 = vmatprep.subr.mxu0 %v9987_v45 }
 0x312   : > { %18480 = vst [vmem:[#allocation28_spill] sm:$0xff] %v15819_v61  ;;  %v15833_v55 = vadd.f32 %v11963_v31, %v2986_v20  ;;  %12557 = vmatpush3.msra.mxu1 %v9905_v5  ;;  %12836 = vmatmul.mubr.f32.gmra.mxu0 %v15825_v49  ;;  %v2985_v38 = vadd.f32 %v18485_v26, %v15489_v58  ;;  %v15845_v61 = vpop.f32.mrf.mxu0  ;;  %v18488_v31 = vld [vmem:[#allocation35_spill] sm:$0xff]  ;;  %v4856_v20 = vld [vmem:[#allocation3 + $0x10c] sm:$0xff] }
 0x313   : > { %12444 = vmatprep.mubr.f32.mxu1 %v4855_v23  ;;  %12838 = vmatprep.mubr.f32.mxu0 %v15838_v1  ;;  %v3236_v62 = vpop.f32.mrf.mxu1  ;;  %18487 = vst [vmem:[#allocation33_spill] sm:$0xff] %v15845_v61  ;;  %v2988_v5 = vadd.f32 %v18488_v31, %v15501_v0  ;;  %v9903_v58 = vld [vmem:[%s18280_s3 + $0x600] sm:$0xff]  ;;  %v9986_v23 = vld [vmem:[%s18280_s3 + $0x898] sm:$0xff]  ;;  %v18491_v31 = vld [vmem:[#allocation36_spill] sm:$0xff] }
 0x314   : > { %18483 = vst [vmem:[#allocation30_spill] sm:$0xff] %v15833_v55  ;;  %v15843_v30 = vadd.f32 %v3236_v62, %v2985_v38  ;;  %12558 = vmatprep.subr.mxu1 %v9904_v39  ;;  %v15849_v55 = vld [vmem:[#allocation3 + $0xfe] sm:$0xff]  ;;  %12953 = vmatpush3.msra.mxu0 %v9987_v45  ;;  %v15859_v38 = vpop.f32.mrf.mxu0  ;;  %v4857_v0 = vld [vmem:[#allocation3 + $0x114] sm:$0xff]  ;;  %v15862_v62 = vld [vmem:[#allocation3 + $0x106] sm:$0xff] }
 0x315   : > { %v11966_v25 = vpop.f32.mrf.mxu1  ;;  %12445 = vmatmul.mubr.f32.gmra.mxu1 %v4856_v20  ;;  %18490 = vst [vmem:[#allocation35_spill] sm:$0xff] %v15859_v38  ;;  %v2987_v20 = vadd.f32 %v18491_v31, %v15507_v47  ;;  %12954 = vmatprep.subr.mxu0 %v9986_v23  ;;  %v9950_v38 = vld [vmem:[%s18280_s3 + $0x778] sm:$0xff]  ;;  %v9985_v47 = vld [vmem:[%s18280_s3 + $0x890] sm:$0xff] }
 0x316   : > { %18486 = vst [vmem:[#allocation32_spill] sm:$0xff] %v15843_v30  ;;  %v15857_v26 = vadd.f32 %v11966_v25, %v2988_v5  ;;  %12559 = vmatpush3.msra.mxu1 %v9904_v39  ;;  %12839 = vmatmul.mubr.f32.gmra.mxu0 %v15849_v55  ;;  %v15869_v30 = vpop.f32.mrf.mxu0  ;;  %v4858_v25 = vld [vmem:[#allocation3 + $0x11c] sm:$0xf]  ;;  %v15871_v5 = vld [vmem:[#allocation3 + $0x10e] sm:$0xff]  ;;  %v5439_v31 = vld [vmem:[#allocation3 + $0x26] sm:$0xff] }
 0x317   : > { %12447 = vmatprep.mubr.f32.mxu1 %v4857_v0  ;;  %12841 = vmatprep.mubr.f32.mxu0 %v15862_v62  ;;  %v3246_v45 = vpop.f32.mrf.mxu1  ;;  %18493 = vst [vmem:[#allocation101_spill] sm:$0xff] %v15869_v30  ;;  %18494 = vst [vmem:[#allocation102_spill] sm:$0xff] %v15871_v5 }
 0x318   : > { %18489 = vst [vmem:[#allocation34_spill] sm:$0xff] %v15857_v26  ;;  %v15867_v61 = vadd.f32 %v3246_v45, %v2987_v20  ;;  %12560 = vmatprep.subr.mxu1 %v9903_v58  ;;  %12955 = vmatpush3.msra.mxu0 %v9986_v23  ;;  %v15879_v0 = vpop.f32.mrf.mxu0  ;;  %v15882_v20 = vld [vmem:[#allocation3 + $0x116] sm:$0xff]  ;;  %v18496_v45 = vld [vmem:[#allocation37_spill] sm:$0xff]  ;;  %v6386_v23 = vld [vmem:[#allocation3 + $0x11e] sm:$0xff] }
 0x319   : > { %v11969_v39 = vpop.f32.mrf.mxu1  ;;  %12448 = vmatmul.mubr.f32.gmra.mxu1 %v4858_v25  ;;  %18495 = vst [vmem:[#allocation103_spill] sm:$0xff] %v15879_v0  ;;  %v2989_v25 = vadd.f32 %v18496_v45, %v15520_v56  ;;  %12956 = vmatprep.subr.mxu0 %v9985_v47  ;;  %v9949_v26 = vld [vmem:[%s18280_s3 + $0x770] sm:$0xff] }
 0x31a   : > { %18492 = vst [vmem:[#allocation36_spill] sm:$0xff] %v15867_v61  ;;  %12561 = vmatpush3.msra.mxu1 %v9903_v58  ;;  %12842 = vmatmul.mubr.f32.gmra.mxu0 %v15871_v5  ;;  %v15889_v61 = vpop.f32.mrf.mxu0  ;;  %v18499_v58 = vld [vmem:[#allocation38_spill] sm:$0xff] }
 0x31b   : > { %12562 = vmatprep.mubr.f32.mxu1 %v5439_v31  ;;  %12844 = vmatprep.mubr.f32.mxu0 %v15882_v20  ;;  %v3256_v39 = vpop.f32.mrf.mxu1  ;;  %18498 = vst [vmem:[#allocation104_spill] sm:$0xff] %v15889_v61  ;;  %v3572_v0 = vadd.f32 %v18499_v58, %v15532_v4  ;;  %v5440_v5 = vld [vmem:[#allocation3 + $0x2e] sm:$0xff]  ;;  %v6387_v31 = vld [vmem:[#allocation3 + $0x126] sm:$0xff]  ;;  %v9984_v4 = vld [vmem:[%s18280_s3 + $0x888] sm:$0xff] }
 0x31c   : > { %v15887_v30 = vadd.f32 %v3256_v39, %v2989_v25  ;;  %12690 = vmatprep.subr.mxu1 %v9950_v38  ;;  %12957 = vmatpush3.msra.mxu0 %v9985_v47  ;;  %v15898_v25 = vpop.f32.mrf.mxu0  ;;  %v18501_v39 = vld [vmem:[#allocation39_spill] sm:$0xff] }
 0x31d   : > { %v12084_v56 = vpop.f32.mrf.mxu1  ;;  %12563 = vmatmul.mubr.f32.vlgmr.msra.gmra.mxu1 %v5440_v5  ;;  %18500 = vst [vmem:[#allocation38_spill] sm:$0xff] %v15898_v25  ;;  %v3571_v61 = vadd.f32 %v18501_v39, %v15538_v50  ;;  %v6388_v5 = vld [vmem:[#allocation3 + $0x12e] sm:$0xf]  ;;  %12958 = vmatprep.subr.mxu0 %v9984_v4 }
 0x31e   : > { %18497 = vst [vmem:[#allocation37_spill] sm:$0xff] %v15887_v30  ;;  %v15896_v45 = vadd.f32 %v12084_v56, %v3572_v0  ;;  %12691 = vmatpush3.msra.mxu1 %v9950_v38  ;;  %12845 = vmatmul.mubr.f32.gmra.mxu0 %v6386_v23  ;;  %v15908_v47 = vpop.f32.mrf.mxu0  ;;  %v18503_v38 = vld [vmem:[#allocation40_spill] sm:$0xff]  ;;  %v9983_v50 = vld [vmem:[%s18280_s3 + $0x880] sm:$0xff] }
 0x31f   : > { %12565 = vmatprep.mubr.f32.mxu1 %v15550_v14  ;;  %v3718_v58 = vpop.f32.mrf.mxu1  ;;  %12692 = vmatprep.subr.mxu1 %v9949_v26  ;;  %18502 = vst [vmem:[#allocation39_spill] sm:$0xff] %v15908_v47  ;;  %v3574_v0 = vadd.f32 %v18503_v38, %v15548_v52  ;;  %v15922_v52 = vld [vmem:[#allocation3 + $0x38] sm:$0xff]  ;;  %v18506_v38 = vld [vmem:[#allocation42_spill] sm:$0xff]  ;;  %v16194_v47 = vld [vmem:[#allocation3 + $0xe0] sm:$0xff] }
 0x320   : > { %v15906_v30 = vadd.f32 %v3718_v58, %v3571_v61  ;;  %12847 = vmatprep.mubr.f32.mxu0 %v6387_v31  ;;  %12693 = vmatpush3.msra.mxu1 %v9949_v26  ;;  %v9948_v61 = vld [vmem:[%s18280_s3 + $0x768] sm:$0xff]  ;;  %v12369_v56 = vpop.f32.mrf.mxu0  ;;  %v18504_v26 = vld [vmem:[#allocation41_spill] sm:$0xff] }
 0x321   : > { %v12087_v23 = vpop.f32.mrf.mxu1  ;;  %12566 = vmatmul.mubr.f32.gmra.mxu1 %v15561_v10  ;;  %v3573_v10 = vadd.f32 %v18504_v26, %v15557_v43  ;;  %12959 = vmatpush3.msra.mxu0 %v9984_v4  ;;  %v9947_v43 = vld [vmem:[%s18280_s3 + $0x760] sm:$0xff]  ;;  %v10030_v4 = vld [vmem:[%s18280_s3 + $0x9f8] sm:$0xff] }
 0x322   : > { %v15919_v14 = vadd.f32 %v12087_v23, %v3574_v0  ;;  %12848 = vmatmul.mubr.f32.gmra.mxu0 %v6388_v5  ;;  %12568 = vmatprep.mubr.f32.mxu1 %v15574_v46  ;;  %v15929_v58 = vpop.f32.mrf.mxu0  ;;  %v3576_v5 = vadd.f32 %v18506_v38, %v15569_v19  ;;  %v15934_v0 = vld [vmem:[#allocation3 + $0x40] sm:$0xff]  ;;  %v15947_v19 = vld [vmem:[#allocation3 + $0x48] sm:$0xff] }
 0x323   : > { %12962 = vmatprep.mubr.f32.mxu0 %v15922_v52  ;;  %v3728_v31 = vpop.f32.mrf.mxu1  ;;  %18505 = vst [vmem:[#allocation40_spill] sm:$0xff] %v15929_v58  ;;  %12960 = vmatprep.subr.mxu0 %v9983_v50  ;;  %v18510_v38 = vld [vmem:[#allocation44_spill] sm:$0xff] }
 0x324   : > { %v15927_v39 = vadd.f32 %v3728_v31, %v3573_v10  ;;  %12694 = vmatprep.subr.mxu1 %v9948_v61  ;;  %12961 = vmatpush3.msra.mxu0 %v9983_v50  ;;  %v15944_v56 = vpop.f32.mrf.mxu0 }
 0x325   : > { %v12090_v46 = vpop.f32.mrf.mxu1  ;;  %12569 = vmatmul.mubr.f32.gmra.mxu1 %v15585_v29  ;;  %18507 = vst [vmem:[#allocation41_spill] sm:$0xff] %v15944_v56  ;;  %v18508_v29 = vld [vmem:[#allocation43_spill] sm:$0xff]  ;;  %13090 = vmatprep.subr.mxu0 %v10030_v4  ;;  %v16168_v56 = vld [vmem:[#allocation3 + $0xd0] sm:$0xff] }
 0x326   : > { %v15942_v23 = vadd.f32 %v12090_v46, %v3576_v5  ;;  %12695 = vmatpush3.msra.mxu1 %v9948_v61  ;;  %12963 = vmatmul.mubr.f32.vlgmr.msra.gmra.mxu0 %v15934_v0  ;;  %v3575_v50 = vadd.f32 %v18508_v29, %v15579_v22  ;;  %v15955_v31 = vpop.f32.mrf.mxu0  ;;  %v3578_v61 = vadd.f32 %v18510_v38, %v15593_v15  ;;  %v15960_v46 = vld [vmem:[#allocation3 + $0x50] sm:$0xff]  ;;  %v9946_v22 = vld [vmem:[%s18280_s3 + $0x758] sm:$0xff]  ;;  %v15973_v15 = vld [vmem:[#allocation3 + $0x58] sm:$0xff] }
 0x327   : > { %12571 = vmatprep.mubr.f32.mxu1 %v15598_v27  ;;  %12965 = vmatprep.mubr.f32.mxu0 %v15947_v19  ;;  %v3738_v26 = vpop.f32.mrf.mxu1  ;;  %18509 = vst [vmem:[#allocation42_spill] sm:$0xff] %v15955_v31  ;;  %v10029_v27 = vld [vmem:[%s18280_s3 + $0x9f0] sm:$0xff] }
 0x328   : > { %v15953_v10 = vadd.f32 %v3738_v26, %v3575_v50  ;;  %12696 = vmatprep.subr.mxu1 %v9947_v43  ;;  %13091 = vmatpush3.msra.mxu0 %v10030_v4  ;;  %v15970_v50 = vpop.f32.mrf.mxu0 }
 0x329   : > { %v12093_v5 = vpop.f32.mrf.mxu1  ;;  %12572 = vmatmul.mubr.f32.gmra.mxu1 %v15609_v8  ;;  %18511 = vst [vmem:[#allocation43_spill] sm:$0xff] %v15970_v50  ;;  %v18512_v8 = vld [vmem:[#allocation45_spill] sm:$0xff]  ;;  %13092 = vmatprep.subr.mxu0 %v10029_v27  ;;  %v15986_v50 = vld [vmem:[#allocation3 + $0x60] sm:$0xff] }
 0x32a   : > { %v15968_v29 = vadd.f32 %v12093_v5, %v3578_v61  ;;  %12697 = vmatpush3.msra.mxu1 %v9947_v43  ;;  %12966 = vmatmul.mubr.f32.gmra.mxu0 %v15960_v46  ;;  %v3577_v26 = vadd.f32 %v18512_v8, %v15603_v9  ;;  %v15981_v31 = vpop.f32.mrf.mxu0  ;;  %v18514_v61 = vld [vmem:[#allocation46_spill] sm:$0xff]  ;;  %v9945_v9 = vld [vmem:[%s18280_s3 + $0x750] sm:$0xff] }
 0x32b   : > { %12574 = vmatprep.mubr.f32.mxu1 %v15622_v53  ;;  %12968 = vmatprep.mubr.f32.mxu0 %v15973_v15  ;;  %v3748_v4 = vpop.f32.mrf.mxu1  ;;  %18513 = vst [vmem:[#allocation44_spill] sm:$0xff] %v15981_v31  ;;  %v3580_v43 = vadd.f32 %v18514_v61, %v15617_v36  ;;  %v10028_v53 = vld [vmem:[%s18280_s3 + $0x9e8] sm:$0xff]  ;;  %v15999_v36 = vld [vmem:[#allocation3 + $0x68] sm:$0xff] }
 0x32c   : > { %v15979_v38 = vadd.f32 %v3748_v4, %v3577_v26  ;;  %12698 = vmatprep.subr.mxu1 %v9946_v22  ;;  %13093 = vmatpush3.msra.mxu0 %v10029_v27  ;;  %v15996_v26 = vpop.f32.mrf.mxu0 }
 0x32d   : > { %v12096_v5 = vpop.f32.mrf.mxu1  ;;  %12575 = vmatmul.mubr.f32.gmra.mxu1 %v15633_v13  ;;  %18515 = vst [vmem:[#allocation45_spill] sm:$0xff] %v15996_v26  ;;  %v18516_v13 = vld [vmem:[#allocation47_spill] sm:$0xff]  ;;  %13094 = vmatprep.subr.mxu0 %v10028_v53  ;;  %v16012_v26 = vld [vmem:[#allocation3 + $0x70] sm:$0xff] }
 0x32e   : > { %v15994_v8 = vadd.f32 %v12096_v5, %v3580_v43  ;;  %12699 = vmatpush3.msra.mxu1 %v9946_v22  ;;  %12969 = vmatmul.mubr.f32.gmra.mxu0 %v15986_v50  ;;  %v3579_v4 = vadd.f32 %v18516_v13, %v15627_v17  ;;  %v16007_v31 = vpop.f32.mrf.mxu0  ;;  %v18518_v43 = vld [vmem:[#allocation48_spill] sm:$0xff]  ;;  %v9944_v17 = vld [vmem:[%s18280_s3 + $0x748] sm:$0xff] }
 0x32f   : > { %12577 = vmatprep.mubr.f32.mxu1 %v15646_v63  ;;  %12971 = vmatprep.mubr.f32.mxu0 %v15999_v36  ;;  %v3758_v27 = vpop.f32.mrf.mxu1  ;;  %18517 = vst [vmem:[#allocation46_spill] sm:$0xff] %v16007_v31  ;;  %v3582_v22 = vadd.f32 %v18518_v43, %v15641_v18  ;;  %v10027_v63 = vld [vmem:[%s18280_s3 + $0x9e0] sm:$0xff]  ;;  %v16025_v18 = vld [vmem:[#allocation3 + $0x78] sm:$0xff] }
 0x330   : > { %v16005_v61 = vadd.f32 %v3758_v27, %v3579_v4  ;;  %12700 = vmatprep.subr.mxu1 %v9945_v9  ;;  %13095 = vmatpush3.msra.mxu0 %v10028_v53  ;;  %v16022_v4 = vpop.f32.mrf.mxu0 }
 0x331   : > { %v12099_v5 = vpop.f32.mrf.mxu1  ;;  %12578 = vmatmul.mubr.f32.gmra.mxu1 %v15657_v34  ;;  %18519 = vst [vmem:[#allocation47_spill] sm:$0xff] %v16022_v4  ;;  %v18520_v34 = vld [vmem:[#allocation49_spill] sm:$0xff]  ;;  %13096 = vmatprep.subr.mxu0 %v10027_v63  ;;  %v16038_v4 = vld [vmem:[#allocation3 + $0x80] sm:$0xff] }
 0x332   : > { %v16020_v13 = vadd.f32 %v12099_v5, %v3582_v22  ;;  %12701 = vmatpush3.msra.mxu1 %v9945_v9  ;;  %12972 = vmatmul.mubr.f32.gmra.mxu0 %v16012_v26  ;;  %v3581_v27 = vadd.f32 %v18520_v34, %v15651_v48  ;;  %v16033_v31 = vpop.f32.mrf.mxu0  ;;  %v18522_v22 = vld [vmem:[#allocation50_spill] sm:$0xff] }
 0x333   : > { %12580 = vmatprep.mubr.f32.mxu1 %v15670_v51  ;;  %12974 = vmatprep.mubr.f32.mxu0 %v16025_v18  ;;  %v3768_v53 = vpop.f32.mrf.mxu1  ;;  %18521 = vst [vmem:[#allocation48_spill] sm:$0xff] %v16033_v31  ;;  %v3584_v9 = vadd.f32 %v18522_v22, %v15665_v16  ;;  %v9943_v48 = vld [vmem:[%s18280_s3 + $0x740] sm:$0xff]  ;;  %v10026_v51 = vld [vmem:[%s18280_s3 + $0x9d8] sm:$0xff] }
 0x334   : > { %v16031_v43 = vadd.f32 %v3768_v53, %v3581_v27  ;;  %12702 = vmatprep.subr.mxu1 %v9944_v17  ;;  %13097 = vmatpush3.msra.mxu0 %v10027_v63  ;;  %v16048_v27 = vpop.f32.mrf.mxu0  ;;  %v16051_v16 = vld [vmem:[#allocation3 + $0x88] sm:$0xff] }
 0x335   : > { %v12102_v5 = vpop.f32.mrf.mxu1  ;;  %12581 = vmatmul.mubr.f32.gmra.mxu1 %v15681_v42  ;;  %18523 = vst [vmem:[#allocation49_spill] sm:$0xff] %v16048_v27  ;;  %v18524_v42 = vld [vmem:[#allocation52_spill] sm:$0xff]  ;;  %13098 = vmatprep.subr.mxu0 %v10026_v51  ;;  %v16064_v27 = vld [vmem:[#allocation3 + $0x90] sm:$0xff] }
 0x336   : > { %v16046_v34 = vadd.f32 %v12102_v5, %v3584_v9  ;;  %12703 = vmatpush3.msra.mxu1 %v9944_v17  ;;  %12975 = vmatmul.mubr.f32.gmra.mxu0 %v16038_v4  ;;  %v3583_v53 = vadd.f32 %v18524_v42, %v15675_v2  ;;  %v16059_v31 = vpop.f32.mrf.mxu0  ;;  %v18526_v9 = vld [vmem:[#allocation53_spill] sm:$0xff] }
 0x337   : > { %12583 = vmatprep.mubr.f32.mxu1 %v15694_v54  ;;  %12977 = vmatprep.mubr.f32.mxu0 %v16051_v16  ;;  %v3778_v63 = vpop.f32.mrf.mxu1  ;;  %18525 = vst [vmem:[#allocation50_spill] sm:$0xff] %v16059_v31  ;;  %v3586_v17 = vadd.f32 %v18526_v9, %v15689_v21  ;;  %v9942_v2 = vld [vmem:[%s18280_s3 + $0x738] sm:$0xff]  ;;  %v10025_v54 = vld [vmem:[%s18280_s3 + $0x9d0] sm:$0xff]  ;;  %v16077_v21 = vld [vmem:[#allocation3 + $0x98] sm:$0xff] }
 0x338   : > { %v16057_v22 = vadd.f32 %v3778_v63, %v3583_v53  ;;  %12704 = vmatprep.subr.mxu1 %v9943_v48  ;;  %13099 = vmatpush3.msra.mxu0 %v10026_v51  ;;  %v16074_v53 = vpop.f32.mrf.mxu0 }
 0x339   : > { %v12105_v5 = vpop.f32.mrf.mxu1  ;;  %12584 = vmatmul.mubr.f32.gmra.mxu1 %v15705_v44  ;;  %18527 = vst [vmem:[#allocation52_spill] sm:$0xff] %v16074_v53  ;;  %v18528_v44 = vld [vmem:[#allocation55_spill] sm:$0xff]  ;;  %13100 = vmatprep.subr.mxu0 %v10025_v54  ;;  %v16090_v53 = vld [vmem:[#allocation3 + $0xa0] sm:$0xff] }
 0x33a   : > { %v16072_v42 = vadd.f32 %v12105_v5, %v3586_v17  ;;  %12705 = vmatpush3.msra.mxu1 %v9943_v48  ;;  %12978 = vmatmul.mubr.f32.gmra.mxu0 %v16064_v27  ;;  %v3585_v63 = vadd.f32 %v18528_v44, %v15699_v40  ;;  %v16085_v31 = vpop.f32.mrf.mxu0  ;;  %v18530_v17 = vld [vmem:[#allocation58_spill] sm:$0xff]  ;;  %v9941_v40 = vld [vmem:[%s18280_s3 + $0x730] sm:$0xff] }
 0x33b   : > { %12586 = vmatprep.mubr.f32.mxu1 %v15718_v35  ;;  %12980 = vmatprep.mubr.f32.mxu0 %v16077_v21  ;;  %v3788_v51 = vpop.f32.mrf.mxu1  ;;  %18529 = vst [vmem:[#allocation53_spill] sm:$0xff] %v16085_v31  ;;  %v3588_v48 = vadd.f32 %v18530_v17, %v15713_v6  ;;  %v10024_v35 = vld [vmem:[%s18280_s3 + $0x9c8] sm:$0xff]  ;;  %v16103_v6 = vld [vmem:[#allocation3 + $0xa8] sm:$0xff] }
 0x33c   : > { %v16083_v9 = vadd.f32 %v3788_v51, %v3585_v63  ;;  %12706 = vmatprep.subr.mxu1 %v9942_v2  ;;  %13101 = vmatpush3.msra.mxu0 %v10025_v54  ;;  %v16100_v63 = vpop.f32.mrf.mxu0 }
 0x33d   : > { %v12108_v5 = vpop.f32.mrf.mxu1  ;;  %12587 = vmatmul.mubr.f32.gmra.mxu1 %v15729_v3  ;;  %18531 = vst [vmem:[#allocation55_spill] sm:$0xff] %v16100_v63  ;;  %v18532_v3 = vld [vmem:[#allocation60_spill] sm:$0xff]  ;;  %13102 = vmatprep.subr.mxu0 %v10024_v35  ;;  %v16116_v63 = vld [vmem:[#allocation3 + $0xb0] sm:$0xff] }
 0x33e   : > { %v16098_v44 = vadd.f32 %v12108_v5, %v3588_v48  ;;  %12707 = vmatpush3.msra.mxu1 %v9942_v2  ;;  %12981 = vmatmul.mubr.f32.gmra.mxu0 %v16090_v53  ;;  %v3587_v51 = vadd.f32 %v18532_v3, %v15723_v24  ;;  %v16111_v31 = vpop.f32.mrf.mxu0  ;;  %v18534_v48 = vld [vmem:[#allocation64_spill] sm:$0xff]  ;;  %v9940_v24 = vld [vmem:[%s18280_s3 + $0x728] sm:$0xff] }
 0x33f   : > { %12589 = vmatprep.mubr.f32.mxu1 %v15742_v11  ;;  %12983 = vmatprep.mubr.f32.mxu0 %v16103_v6  ;;  %v3798_v54 = vpop.f32.mrf.mxu1  ;;  %18533 = vst [vmem:[#allocation58_spill] sm:$0xff] %v16111_v31  ;;  %v3590_v2 = vadd.f32 %v18534_v48, %v15737_v12  ;;  %v10023_v11 = vld [vmem:[%s18280_s3 + $0x9c0] sm:$0xff]  ;;  %v16129_v12 = vld [vmem:[#allocation3 + $0xb8] sm:$0xff] }
 0x340   : > { %v16109_v17 = vadd.f32 %v3798_v54, %v3587_v51  ;;  %12708 = vmatprep.subr.mxu1 %v9941_v40  ;;  %13103 = vmatpush3.msra.mxu0 %v10024_v35  ;;  %v16126_v51 = vpop.f32.mrf.mxu0 }
 0x341   : > { %v12111_v5 = vpop.f32.mrf.mxu1  ;;  %12590 = vmatmul.mubr.f32.gmra.mxu1 %v15753_v37  ;;  %18535 = vst [vmem:[#allocation60_spill] sm:$0xff] %v16126_v51  ;;  %v18536_v37 = vld [vmem:[#allocation66_spill] sm:$0xff]  ;;  %13104 = vmatprep.subr.mxu0 %v10023_v11  ;;  %v16142_v51 = vld [vmem:[#allocation3 + $0xc0] sm:$0xff] }
 0x342   : > { %v16124_v3 = vadd.f32 %v12111_v5, %v3590_v2  ;;  %12709 = vmatpush3.msra.mxu1 %v9941_v40  ;;  %12984 = vmatmul.mubr.f32.gmra.mxu0 %v16116_v63  ;;  %v3589_v54 = vadd.f32 %v18536_v37, %v15747_v41  ;;  %v16137_v31 = vpop.f32.mrf.mxu0  ;;  %v18538_v2 = vld [vmem:[#allocation69_spill] sm:$0xff]  ;;  %v9939_v41 = vld [vmem:[%s18280_s3 + $0x720] sm:$0xff] }
 0x343   : > { %12592 = vmatprep.mubr.f32.mxu1 %v15766_v28  ;;  %12986 = vmatprep.mubr.f32.mxu0 %v16129_v12  ;;  %v3808_v35 = vpop.f32.mrf.mxu1  ;;  %18537 = vst [vmem:[#allocation64_spill] sm:$0xff] %v16137_v31  ;;  %v3592_v40 = vadd.f32 %v18538_v2, %v15761_v33  ;;  %v10022_v28 = vld [vmem:[%s18280_s3 + $0x9b8] sm:$0xff] }
 0x344   : > { %v16135_v48 = vadd.f32 %v3808_v35, %v3589_v54  ;;  %12710 = vmatprep.subr.mxu1 %v9940_v24  ;;  %13105 = vmatpush3.msra.mxu0 %v10023_v11  ;;  %v16152_v54 = vpop.f32.mrf.mxu0  ;;  %v16155_v33 = vld [vmem:[#allocation3 + $0xc8] sm:$0xff] }
 0x345   : > { %v12114_v5 = vpop.f32.mrf.mxu1  ;;  %12593 = vmatmul.mubr.f32.gmra.mxu1 %v15777_v32  ;;  %18539 = vst [vmem:[#allocation66_spill] sm:$0xff] %v16152_v54  ;;  %v18540_v32 = vld [vmem:[#allocation71_spill] sm:$0xff]  ;;  %13106 = vmatprep.subr.mxu0 %v10022_v28 }
 0x346   : > { %v16150_v37 = vadd.f32 %v12114_v5, %v3592_v40  ;;  %12711 = vmatpush3.msra.mxu1 %v9940_v24  ;;  %12987 = vmatmul.mubr.f32.gmra.mxu0 %v16142_v51  ;;  %v3591_v35 = vadd.f32 %v18540_v32, %v15771_v60  ;;  %v16163_v31 = vpop.f32.mrf.mxu0  ;;  %v18542_v40 = vld [vmem:[#allocation20_spill] sm:$0xff]  ;;  %v18543_v5 = vld [vmem:[#allocation73_spill] sm:$0xff] }
 0x347   : > { %12595 = vmatprep.mubr.f32.mxu1 %v15790_v59  ;;  %12989 = vmatprep.mubr.f32.mxu0 %v16155_v33  ;;  %v3818_v11 = vpop.f32.mrf.mxu1  ;;  %18541 = vst [vmem:[#allocation69_spill] sm:$0xff] %v16163_v31  ;;  %v3594_v24 = vadd.f32 %v18543_v5, %v18542_v40  ;;  %v9938_v60 = vld [vmem:[%s18280_s3 + $0x718] sm:$0xff]  ;;  %v10021_v59 = vld [vmem:[%s18280_s3 + $0x9b0] sm:$0xff]  ;;  %v18546_v40 = vld [vmem:[#allocation75_spill] sm:$0xff] }
 0x348   : > { %v16161_v2 = vadd.f32 %v3818_v11, %v3591_v35  ;;  %12712 = vmatprep.subr.mxu1 %v9939_v41  ;;  %13107 = vmatpush3.msra.mxu0 %v10022_v28  ;;  %v16178_v35 = vpop.f32.mrf.mxu0  ;;  %v16181_v11 = vld [vmem:[#allocation3 + $0xd8] sm:$0xff] }
 0x349   : > { %v12117_v54 = vpop.f32.mrf.mxu1  ;;  %12596 = vmatmul.mubr.f32.gmra.mxu1 %v15801_v57  ;;  %18544 = vst [vmem:[#allocation71_spill] sm:$0xff] %v16178_v35  ;;  %v18545_v57 = vld [vmem:[#allocation22_spill] sm:$0xff]  ;;  %13108 = vmatprep.subr.mxu0 %v10021_v59 }
 0x34a   : > { %v16176_v32 = vadd.f32 %v12117_v54, %v3594_v24  ;;  %12713 = vmatpush3.msra.mxu1 %v9939_v41  ;;  %12990 = vmatmul.mubr.f32.gmra.mxu0 %v16168_v56  ;;  %v3593_v5 = vadd.f32 %v18546_v40, %v18545_v57  ;;  %v16189_v58 = vpop.f32.mrf.mxu0  ;;  %v18548_v54 = vld [vmem:[#allocation26_spill] sm:$0xff]  ;;  %v18549_v24 = vld [vmem:[#allocation77_spill] sm:$0xff]  ;;  %v10020_v57 = vld [vmem:[%s18280_s3 + $0x9a8] sm:$0xff] }
 0x34b   : > { %12598 = vmatprep.mubr.f32.mxu1 %v15814_v7  ;;  %12992 = vmatprep.mubr.f32.mxu0 %v16181_v11  ;;  %v3828_v28 = vpop.f32.mrf.mxu1  ;;  %18547 = vst [vmem:[#allocation20_spill] sm:$0xff] %v16189_v58  ;;  %v3596_v41 = vadd.f32 %v18549_v24, %v18548_v54  ;;  %v9937_v7 = vld [vmem:[%s18280_s3 + $0x710] sm:$0xff]  ;;  %v18553_v54 = vld [vmem:[#allocation79_spill] sm:$0xff] }
 0x34c   : > { %v16187_v31 = vadd.f32 %v3828_v28, %v3593_v5  ;;  %12714 = vmatprep.subr.mxu1 %v9938_v60  ;;  %13109 = vmatpush3.msra.mxu0 %v10021_v59  ;;  %v16204_v5 = vpop.f32.mrf.mxu0  ;;  %v16207_v28 = vld [vmem:[#allocation3 + $0xe8] sm:$0xff] }
 0x34d   : > { %v12120_v35 = vpop.f32.mrf.mxu1  ;;  %12599 = vmatmul.mubr.f32.gmra.mxu1 %v15825_v49  ;;  %18551 = vst [vmem:[#allocation22_spill] sm:$0xff] %v16204_v5  ;;  %v18552_v49 = vld [vmem:[#allocation28_spill] sm:$0xff]  ;;  %13110 = vmatprep.subr.mxu0 %v10020_v57 }
 0x34e   : > { %v16202_v40 = vadd.f32 %v12120_v35, %v3596_v41  ;;  %12715 = vmatpush3.msra.mxu1 %v9938_v60  ;;  %12993 = vmatmul.mubr.f32.gmra.mxu0 %v16194_v47  ;;  %v3595_v24 = vadd.f32 %v18553_v54, %v18552_v49  ;;  %v16215_v25 = vpop.f32.mrf.mxu0  ;;  %v18556_v35 = vld [vmem:[#allocation30_spill] sm:$0xff] }
 0x34f   : > { %12601 = vmatprep.mubr.f32.mxu1 %v15838_v1  ;;  %12995 = vmatprep.mubr.f32.mxu0 %v16207_v28  ;;  %v3838_v59 = vpop.f32.mrf.mxu1  ;;  %18555 = vst [vmem:[#allocation26_spill] sm:$0xff] %v16215_v25  ;;  %v18557_v41 = vld [vmem:[#allocation82_spill] sm:$0xff]  ;;  %v9936_v1 = vld [vmem:[%s18280_s3 + $0x708] sm:$0xff] }
 0x350   : > { %18550 = vst [vmem:[#allocation73_spill] sm:$0xff] %v16202_v40  ;;  %v16213_v58 = vadd.f32 %v3838_v59, %v3595_v24  ;;  %12716 = vmatprep.subr.mxu1 %v9937_v7  ;;  %v3598_v60 = vadd.f32 %v18557_v41, %v18556_v35  ;;  %v16220_v40 = vld [vmem:[#allocation3 + $0xf0] sm:$0xff]  ;;  %13111 = vmatpush3.msra.mxu0 %v10020_v57  ;;  %v16230_v24 = vpop.f32.mrf.mxu0  ;;  %v16233_v59 = vld [vmem:[#allocation3 + $0xf8] sm:$0xff] }
 0x351   : > { %v12123_v5 = vpop.f32.mrf.mxu1  ;;  %12602 = vmatmul.mubr.f32.gmra.mxu1 %v15849_v55  ;;  %18558 = vst [vmem:[#allocation77_spill] sm:$0xff] %v16220_v40  ;;  %v10019_v49 = vld [vmem:[%s18280_s3 + $0x9a0] sm:$0xff]  ;;  %18560 = vst [vmem:[#allocation79_spill] sm:$0xff] %v16230_v24  ;;  %v18561_v55 = vld [vmem:[#allocation32_spill] sm:$0xff] }
 0x352   : > { %18554 = vst [vmem:[#allocation75_spill] sm:$0xff] %v16213_v58  ;;  %v16228_v54 = vadd.f32 %v12123_v5, %v3598_v60  ;;  %12717 = vmatpush3.msra.mxu1 %v9937_v7  ;;  %12996 = vmatmul.mubr.f32.gmra.mxu0 %v16220_v40  ;;  %v18562_v35 = vld [vmem:[#allocation83_spill] sm:$0xff]  ;;  %v16241_v58 = vpop.f32.mrf.mxu0  ;;  %v18565_v5 = vld [vmem:[#allocation34_spill] sm:$0xff]  ;;  %v18566_v60 = vld [vmem:[#allocation85_spill] sm:$0xff] }
 0x353   : > { %v3597_v41 = vadd.f32 %v18562_v35, %v18561_v55  ;;  %12604 = vmatprep.mubr.f32.mxu1 %v15862_v62  ;;  %12998 = vmatprep.mubr.f32.mxu0 %v16233_v59  ;;  %v3848_v57 = vpop.f32.mrf.mxu1  ;;  %18564 = vst [vmem:[#allocation82_spill] sm:$0xff] %v16241_v58  ;;  %v3600_v7 = vadd.f32 %v18566_v60, %v18565_v5  ;;  %v16246_v40 = vld [vmem:[#allocation3 + $0x100] sm:$0xff]  ;;  %v9935_v62 = vld [vmem:[%s18280_s3 + $0x700] sm:$0xff]  ;;  %v10018_v55 = vld [vmem:[%s18280_s3 + $0x998] sm:$0xff] }
 0x354   : > { %18559 = vst [vmem:[#allocation28_spill] sm:$0xff] %v16228_v54  ;;  %12718 = vmatprep.subr.mxu1 %v9936_v1  ;;  %13112 = vmatprep.subr.mxu0 %v10019_v49  ;;  %v18567_v54 = vld [vmem:[#allocation102_spill] sm:$0xff]  ;;  %v5470_v58 = vld [vmem:[#allocation3 + $0x11e] sm:$0xf] }
 0x355   : > { %v16239_v25 = vadd.f32 %v3848_v57, %v3597_v41  ;;  %v12126_v24 = vpop.f32.mrf.mxu1  ;;  %12605 = vmatmul.mubr.f32.gmra.mxu1 %v18567_v54  ;;  %13113 = vmatpush3.msra.mxu0 %v10019_v49  ;;  %v16256_v41 = vpop.f32.mrf.mxu0  ;;  %v16259_v57 = vld [vmem:[#allocation3 + $0x108] sm:$0xff]  ;;  %v18571_v54 = vld [vmem:[#allocation36_spill] sm:$0xff]  ;;  %v18572_v5 = vld [vmem:[#allocation86_spill] sm:$0xff] }
 0x356   : > { %v16254_v35 = vadd.f32 %v12126_v24, %v3600_v7  ;;  %18569 = vst [vmem:[#allocation83_spill] sm:$0xff] %v16256_v41  ;;  %12719 = vmatpush3.msra.mxu1 %v9936_v1  ;;  %12999 = vmatmul.mubr.f32.gmra.mxu0 %v16246_v40  ;;  %18570 = vst [vmem:[#allocation34_spill] sm:$0xff] %v16259_v57  ;;  %v3599_v60 = vadd.f32 %v18572_v5, %v18571_v54  ;;  %v16269_v7 = vld [vmem:[#allocation3 + $0x110] sm:$0xff]  ;;  %v9982_v54 = vld [vmem:[%s18280_s3 + $0x878] sm:$0xff] }
 0x357   : > { %18563 = vst [vmem:[#allocation30_spill] sm:$0xff] %v16239_v25  ;;  %12607 = vmatprep.mubr.f32.mxu1 %v15882_v20  ;;  %13001 = vmatprep.mubr.f32.mxu0 %v16259_v57  ;;  %v3858_v49 = vpop.f32.mrf.mxu1  ;;  %v16267_v24 = vpop.f32.mrf.mxu0  ;;  %18575 = vst [vmem:[#allocation36_spill] sm:$0xff] %v16269_v7  ;;  %v10017_v20 = vld [vmem:[%s18280_s3 + $0x990] sm:$0xff] }
 0x358   : > { %18568 = vst [vmem:[#allocation32_spill] sm:$0xff] %v16254_v35  ;;  %v16265_v25 = vadd.f32 %v3858_v49, %v3599_v60  ;;  %18574 = vst [vmem:[#allocation102_spill] sm:$0xff] %v16267_v24  ;;  %12720 = vmatprep.subr.mxu1 %v9935_v62  ;;  %13114 = vmatprep.subr.mxu0 %v10018_v55  ;;  %v6051_v60 = vld [vmem:[#allocation3 + $0x28] sm:$0xff]  ;;  %v16280_v49 = vld [vmem:[#allocation3 + $0x118] sm:$0xff] }
 0x359   : > { %v12129_v1 = vpop.f32.mrf.mxu1  ;;  %12608 = vmatmul.mubr.f32.gmra.mxu1 %v5470_v58  ;;  %13115 = vmatpush3.msra.mxu0 %v10018_v55  ;;  %v16277_v5 = vpop.f32.mrf.mxu0  ;;  %v18577_v58 = vld [vmem:[#allocation37_spill] sm:$0xff]  ;;  %v6052_v35 = vld [vmem:[#allocation3 + $0x30] sm:$0xff] }
 0x35a   : > { %18573 = vst [vmem:[#allocation85_spill] sm:$0xff] %v16265_v25  ;;  %18576 = vst [vmem:[#allocation86_spill] sm:$0xff] %v16277_v5  ;;  %12721 = vmatpush3.msra.mxu1 %v9935_v62  ;;  %13002 = vmatmul.mubr.f32.gmra.mxu0 %v16269_v7  ;;  %v18578_v1 = vld [vmem:[#allocation87_spill] sm:$0xff]  ;;  %v18580_v5 = vld [vmem:[#allocation88_spill] sm:$0xff] }
 0x35b   : > { %v3601_v24 = vadd.f32 %v18578_v1, %v18577_v58  ;;  %12722 = vmatprep.mubr.f32.mxu1 %v6051_v60  ;;  %13004 = vmatprep.mubr.f32.mxu0 %v16280_v49  ;;  %v3868_v41 = vpop.f32.mrf.mxu1  ;;  %v16287_v25 = vpop.f32.mrf.mxu0  ;;  %v4184_v62 = vadd.f32 %v18580_v5, %v15896_v45  ;;  %v9981_v7 = vld [vmem:[%s18280_s3 + $0x870] sm:$0xff]  ;;  %v10016_v45 = vld [vmem:[%s18280_s3 + $0x988] sm:$0xff] }
 0x35c   : > { %18579 = vst [vmem:[#allocation37_spill] sm:$0xff] %v16287_v25  ;;  %12850 = vmatprep.subr.mxu1 %v9982_v54  ;;  %13116 = vmatprep.subr.mxu0 %v10017_v20 }
 0x35d   : > { %v16285_v55 = vadd.f32 %v3868_v41, %v3601_v24  ;;  %v12244_v57 = vpop.f32.mrf.mxu1  ;;  %12723 = vmatmul.mubr.f32.vlgmr.msra.gmra.mxu1 %v6052_v35  ;;  %13117 = vmatpush3.msra.mxu0 %v10017_v20  ;;  %v16296_v58 = vpop.f32.mrf.mxu0  ;;  %v13615_v41 = vld [vmem:[#allocation3] sm:$0xff]  ;;  %v18582_v24 = vld [vmem:[#allocation89_spill] sm:$0xff]  ;;  %v7000_v35 = vld [vmem:[#allocation3 + $0x130] sm:$0xf] }
 0x35e   : > { %v16294_v60 = vadd.f32 %v12244_v57, %v4184_v62  ;;  %18581 = vst [vmem:[#allocation87_spill] sm:$0xff] %v16296_v58  ;;  %12851 = vmatpush3.msra.mxu1 %v9982_v54  ;;  %13005 = vmatmul.mubr.f32.gmra.mxu0 %v13615_v41  ;;  %v4183_v1 = vadd.f32 %v18582_v24, %v15906_v30  ;;  %v18584_v54 = vld [vmem:[#allocation90_spill] sm:$0xff] }
 0x35f   : > { %12725 = vmatprep.mubr.f32.mxu1 %v15922_v52  ;;  %v4330_v5 = vpop.f32.mrf.mxu1  ;;  %12852 = vmatprep.subr.mxu1 %v9981_v7  ;;  %v16306_v57 = vpop.f32.mrf.mxu0  ;;  %v4186_v62 = vadd.f32 %v18584_v54, %v15919_v14  ;;  %v10015_v30 = vld [vmem:[%s18280_s3 + $0x980] sm:$0xff]  ;;  %v9980_v52 = vld [vmem:[%s18280_s3 + $0x868] sm:$0xff] }
 0x360   : > { %v16304_v20 = vadd.f32 %v4330_v5, %v4183_v1  ;;  %18583 = vst [vmem:[#allocation88_spill] sm:$0xff] %v16306_v57  ;;  %13007 = vmatprep.mubr.f32.mxu0 %v13615_v41  ;;  %12853 = vmatpush3.msra.mxu1 %v9981_v7  ;;  %v7581_v14 = vld [vmem:[#allocation3 + $0x3a] sm:$0xff] }
 0x361   : > { %v12247_v58 = vpop.f32.mrf.mxu1  ;;  %12726 = vmatmul.mubr.f32.gmra.mxu1 %v15934_v0  ;;  %13118 = vmatprep.subr.mxu0 %v10016_v45  ;;  %v18585_v7 = vld [vmem:[#allocation91_spill] sm:$0xff]  ;;  %v16855_v57 = vld [vmem:[#allocation3 + $0xe1] sm:$0xff] }
 0x362   : > { %v16317_v24 = vadd.f32 %v12247_v58, %v4186_v62  ;;  %v12529_v1 = vpop.f32.mrf.mxu0  ;;  %13008 = vmatmul.mubr.f32.gmra.mxu0 %v7000_v35  ;;  %12728 = vmatprep.mubr.f32.mxu1 %v15947_v19  ;;  %v4185_v41 = vadd.f32 %v18585_v7, %v15927_v39  ;;  %v18587_v58 = vld [vmem:[#allocation92_spill] sm:$0xff]  ;;  %v9979_v39 = vld [vmem:[%s18280_s3 + $0x860] sm:$0xff] }
 0x363   : > { %13119 = vmatpush3.msra.mxu0 %v10016_v45  ;;  %13122 = vmatprep.mubr.f32.mxu0 %v7581_v14  ;;  %v4340_v0 = vpop.f32.mrf.mxu1  ;;  %v4188_v62 = vadd.f32 %v18587_v58, %v15942_v23  ;;  %v7582_v19 = vld [vmem:[#allocation3 + $0x42] sm:$0xff]  ;;  %v7583_v23 = vld [vmem:[#allocation3 + $0x4a] sm:$0xff] }
 0x364   : > { %v16322_v5 = vadd.f32 %v4340_v0, %v4185_v41  ;;  %v16324_v54 = vpop.f32.mrf.mxu0  ;;  %13120 = vmatprep.subr.mxu0 %v10015_v30  ;;  %12854 = vmatprep.subr.mxu1 %v9980_v52  ;;  %v10062_v45 = vld [vmem:[%s18280_s3 + $0xaf8] sm:$0xff]  ;;  %v18591_v58 = vld [vmem:[#allocation94_spill] sm:$0xff] }
 0x365   : > { %18586 = vst [vmem:[#allocation89_spill] sm:$0xff] %v16324_v54  ;;  %13121 = vmatpush3.msra.mxu0 %v10015_v30  ;;  %v12250_v35 = vpop.f32.mrf.mxu1  ;;  %12729 = vmatmul.mubr.f32.gmra.mxu1 %v15960_v46  ;;  %v18589_v30 = vld [vmem:[#allocation93_spill] sm:$0xff] }
 0x366   : > { %v16335_v1 = vadd.f32 %v12250_v35, %v4188_v62  ;;  %v16337_v14 = vpop.f32.mrf.mxu0  ;;  %12855 = vmatpush3.msra.mxu1 %v9980_v52  ;;  %13123 = vmatmul.mubr.f32.vlgmr.msra.gmra.mxu0 %v7582_v19  ;;  %v4187_v7 = vadd.f32 %v18589_v30, %v15953_v10  ;;  %v4190_v62 = vadd.f32 %v18591_v58, %v15968_v29  ;;  %v7584_v52 = vld [vmem:[#allocation3 + $0x52] sm:$0xff]  ;;  %v9978_v10 = vld [vmem:[%s18280_s3 + $0x858] sm:$0xff]  ;;  %v7585_v29 = vld [vmem:[#allocation3 + $0x5a] sm:$0xff] }
 0x367   : > { %18588 = vst [vmem:[#allocation90_spill] sm:$0xff] %v16337_v14  ;;  %12731 = vmatprep.mubr.f32.mxu1 %v15973_v15  ;;  %13125 = vmatprep.mubr.f32.mxu0 %v7583_v23  ;;  %v4350_v46 = vpop.f32.mrf.mxu1  ;;  %v10061_v15 = vld [vmem:[%s18280_s3 + $0xaf0] sm:$0xff]  ;;  %v18593_v30 = vld [vmem:[#allocation95_spill] sm:$0xff] }
 0x368   : > { %v16342_v41 = vadd.f32 %v4350_v46, %v4187_v7  ;;  %v16344_v0 = vpop.f32.mrf.mxu0  ;;  %12856 = vmatprep.subr.mxu1 %v9979_v39  ;;  %13250 = vmatprep.subr.mxu0 %v10062_v45  ;;  %v18595_v58 = vld [vmem:[#allocation96_spill] sm:$0xff]  ;;  %v16831_v14 = vld [vmem:[#allocation3 + $0xd1] sm:$0xff] }
 0x369   : > { %18590 = vst [vmem:[#allocation91_spill] sm:$0xff] %v16344_v0  ;;  %v12253_v35 = vpop.f32.mrf.mxu1  ;;  %12732 = vmatmul.mubr.f32.gmra.mxu1 %v15986_v50  ;;  %13251 = vmatpush3.msra.mxu0 %v10062_v45  ;;  %v4189_v50 = vadd.f32 %v18593_v30, %v15979_v38  ;;  %v9977_v38 = vld [vmem:[%s18280_s3 + $0x850] sm:$0xff]  ;;  %v18597_v30 = vld [vmem:[#allocation97_spill] sm:$0xff] }
 0x36a   : > { %v16355_v19 = vadd.f32 %v12253_v35, %v4190_v62  ;;  %v16357_v23 = vpop.f32.mrf.mxu0  ;;  %12857 = vmatpush3.msra.mxu1 %v9979_v39  ;;  %13126 = vmatmul.mubr.f32.gmra.mxu0 %v7584_v52  ;;  %v4192_v62 = vadd.f32 %v18595_v58, %v15994_v8  ;;  %v7586_v39 = vld [vmem:[#allocation3 + $0x62] sm:$0xff]  ;;  %v7587_v8 = vld [vmem:[#allocation3 + $0x6a] sm:$0xff] }
 0x36b   : > { %18592 = vst [vmem:[#allocation92_spill] sm:$0xff] %v16357_v23  ;;  %12734 = vmatprep.mubr.f32.mxu1 %v15999_v36  ;;  %13128 = vmatprep.mubr.f32.mxu0 %v7585_v29  ;;  %v4360_v7 = vpop.f32.mrf.mxu1  ;;  %v10060_v36 = vld [vmem:[%s18280_s3 + $0xae8] sm:$0xff]  ;;  %v18599_v58 = vld [vmem:[#allocation98_spill] sm:$0xff]  ;;  %v16807_v23 = vld [vmem:[#allocation3 + $0xc1] sm:$0xff] }
 0x36c   : > { %v16362_v46 = vadd.f32 %v4360_v7, %v4189_v50  ;;  %v16364_v45 = vpop.f32.mrf.mxu0  ;;  %12858 = vmatprep.subr.mxu1 %v9978_v10  ;;  %13252 = vmatprep.subr.mxu0 %v10061_v15 }
 0x36d   : > { %18594 = vst [vmem:[#allocation93_spill] sm:$0xff] %v16364_v45  ;;  %v12256_v35 = vpop.f32.mrf.mxu1  ;;  %12735 = vmatmul.mubr.f32.gmra.mxu1 %v16012_v26  ;;  %13253 = vmatpush3.msra.mxu0 %v10061_v15  ;;  %v4191_v26 = vadd.f32 %v18597_v30, %v16005_v61  ;;  %v9976_v61 = vld [vmem:[%s18280_s3 + $0x848] sm:$0xff] }
 0x36e   : > { %v16375_v52 = vadd.f32 %v12256_v35, %v4192_v62  ;;  %v16377_v29 = vpop.f32.mrf.mxu0  ;;  %12859 = vmatpush3.msra.mxu1 %v9978_v10  ;;  %13129 = vmatmul.mubr.f32.gmra.mxu0 %v7586_v39  ;;  %v4194_v62 = vadd.f32 %v18599_v58, %v16020_v13  ;;  %v7588_v10 = vld [vmem:[#allocation3 + $0x72] sm:$0xff]  ;;  %v7589_v13 = vld [vmem:[#allocation3 + $0x7a] sm:$0xff] }
 0x36f   : > { %18596 = vst [vmem:[#allocation94_spill] sm:$0xff] %v16377_v29  ;;  %12737 = vmatprep.mubr.f32.mxu1 %v16025_v18  ;;  %13131 = vmatprep.mubr.f32.mxu0 %v7587_v8  ;;  %v4370_v50 = vpop.f32.mrf.mxu1  ;;  %v10059_v18 = vld [vmem:[%s18280_s3 + $0xae0] sm:$0xff]  ;;  %v18601_v30 = vld [vmem:[#allocation99_spill] sm:$0xff]  ;;  %v18603_v58 = vld [vmem:[#allocation100_spill] sm:$0xff] }
 0x370   : > { %v16382_v7 = vadd.f32 %v4370_v50, %v4191_v26  ;;  %v16384_v15 = vpop.f32.mrf.mxu0  ;;  %12860 = vmatprep.subr.mxu1 %v9977_v38  ;;  %13254 = vmatprep.subr.mxu0 %v10060_v36  ;;  %v16783_v29 = vld [vmem:[#allocation3 + $0xb1] sm:$0xff] }
 0x371   : > { %18598 = vst [vmem:[#allocation95_spill] sm:$0xff] %v16384_v15  ;;  %v12259_v35 = vpop.f32.mrf.mxu1  ;;  %12738 = vmatmul.mubr.f32.gmra.mxu1 %v16038_v4  ;;  %13255 = vmatpush3.msra.mxu0 %v10060_v36  ;;  %v4193_v4 = vadd.f32 %v18601_v30, %v16031_v43  ;;  %v9975_v43 = vld [vmem:[%s18280_s3 + $0x840] sm:$0xff]  ;;  %v18605_v30 = vld [vmem:[#allocation51_spill] sm:$0xff] }
 0x372   : > { %v16395_v39 = vadd.f32 %v12259_v35, %v4194_v62  ;;  %v16397_v8 = vpop.f32.mrf.mxu0  ;;  %12861 = vmatpush3.msra.mxu1 %v9977_v38  ;;  %13132 = vmatmul.mubr.f32.gmra.mxu0 %v7588_v10  ;;  %v4196_v62 = vadd.f32 %v18603_v58, %v16046_v34  ;;  %v7590_v38 = vld [vmem:[#allocation3 + $0x82] sm:$0xff]  ;;  %v7591_v34 = vld [vmem:[#allocation3 + $0x8a] sm:$0xff] }
 0x373   : > { %18600 = vst [vmem:[#allocation96_spill] sm:$0xff] %v16397_v8  ;;  %12740 = vmatprep.mubr.f32.mxu1 %v16051_v16  ;;  %13134 = vmatprep.mubr.f32.mxu0 %v7589_v13  ;;  %v4380_v26 = vpop.f32.mrf.mxu1  ;;  %v10058_v16 = vld [vmem:[%s18280_s3 + $0xad8] sm:$0xff] }
 0x374   : > { %v16402_v50 = vadd.f32 %v4380_v26, %v4193_v4  ;;  %v16404_v36 = vpop.f32.mrf.mxu0  ;;  %12862 = vmatprep.subr.mxu1 %v9976_v61  ;;  %13256 = vmatprep.subr.mxu0 %v10059_v18  ;;  %v18607_v58 = vld [vmem:[#allocation57_spill] sm:$0xff] }
 0x375   : > { %18602 = vst [vmem:[#allocation97_spill] sm:$0xff] %v16404_v36  ;;  %v12262_v35 = vpop.f32.mrf.mxu1  ;;  %12741 = vmatmul.mubr.f32.gmra.mxu1 %v16064_v27  ;;  %13257 = vmatpush3.msra.mxu0 %v10059_v18  ;;  %v4195_v27 = vadd.f32 %v18605_v30, %v16057_v22  ;;  %v9974_v22 = vld [vmem:[%s18280_s3 + $0x838] sm:$0xff]  ;;  %v18609_v30 = vld [vmem:[#allocation23_spill] sm:$0xff] }
 0x376   : > { %v16415_v10 = vadd.f32 %v12262_v35, %v4196_v62  ;;  %v16417_v13 = vpop.f32.mrf.mxu0  ;;  %12863 = vmatpush3.msra.mxu1 %v9976_v61  ;;  %13135 = vmatmul.mubr.f32.gmra.mxu0 %v7590_v38  ;;  %v4198_v62 = vadd.f32 %v18607_v58, %v16072_v42  ;;  %v7592_v61 = vld [vmem:[#allocation3 + $0x92] sm:$0xff]  ;;  %v7593_v42 = vld [vmem:[#allocation3 + $0x9a] sm:$0xff]  ;;  %v18611_v58 = vld [vmem:[#allocation61_spill] sm:$0xff] }
 0x377   : > { %18604 = vst [vmem:[#allocation98_spill] sm:$0xff] %v16417_v13  ;;  %12743 = vmatprep.mubr.f32.mxu1 %v16077_v21  ;;  %13137 = vmatprep.mubr.f32.mxu0 %v7591_v34  ;;  %v4390_v4 = vpop.f32.mrf.mxu1  ;;  %v10057_v21 = vld [vmem:[%s18280_s3 + $0xad0] sm:$0xff]  ;;  %v16735_v13 = vld [vmem:[#allocation3 + $0x91] sm:$0xff] }
 0x378   : > { %v16422_v26 = vadd.f32 %v4390_v4, %v4195_v27  ;;  %v16424_v18 = vpop.f32.mrf.mxu0  ;;  %12864 = vmatprep.subr.mxu1 %v9975_v43  ;;  %13258 = vmatprep.subr.mxu0 %v10058_v16  ;;  %v16759_v8 = vld [vmem:[#allocation3 + $0xa1] sm:$0xff] }
 0x379   : > { %18606 = vst [vmem:[#allocation99_spill] sm:$0xff] %v16424_v18  ;;  %v12265_v35 = vpop.f32.mrf.mxu1  ;;  %12744 = vmatmul.mubr.f32.gmra.mxu1 %v16090_v53  ;;  %13259 = vmatpush3.msra.mxu0 %v10058_v16  ;;  %v4197_v53 = vadd.f32 %v18609_v30, %v16083_v9  ;;  %v9973_v9 = vld [vmem:[%s18280_s3 + $0x830] sm:$0xff] }
 0x37a   : > { %v16435_v38 = vadd.f32 %v12265_v35, %v4198_v62  ;;  %v16437_v34 = vpop.f32.mrf.mxu0  ;;  %12865 = vmatpush3.msra.mxu1 %v9975_v43  ;;  %13138 = vmatmul.mubr.f32.gmra.mxu0 %v7592_v61  ;;  %v4200_v62 = vadd.f32 %v18611_v58, %v16098_v44  ;;  %v7594_v43 = vld [vmem:[#allocation3 + $0xa2] sm:$0xff]  ;;  %v7595_v44 = vld [vmem:[#allocation3 + $0xaa] sm:$0xff] }
 0x37b   : > { %18608 = vst [vmem:[#allocation100_spill] sm:$0xff] %v16437_v34  ;;  %12746 = vmatprep.mubr.f32.mxu1 %v16103_v6  ;;  %13140 = vmatprep.mubr.f32.mxu0 %v7593_v42  ;;  %v4400_v27 = vpop.f32.mrf.mxu1  ;;  %v10056_v6 = vld [vmem:[%s18280_s3 + $0xac8] sm:$0xff]  ;;  %v18613_v30 = vld [vmem:[#allocation56_spill] sm:$0xff]  ;;  %v18615_v58 = vld [vmem:[#allocation54_spill] sm:$0xff] }
 0x37c   : > { %v16442_v4 = vadd.f32 %v4400_v27, %v4197_v53  ;;  %v16444_v16 = vpop.f32.mrf.mxu0  ;;  %12866 = vmatprep.subr.mxu1 %v9974_v22  ;;  %13260 = vmatprep.subr.mxu0 %v10057_v21  ;;  %v16711_v34 = vld [vmem:[#allocation3 + $0x81] sm:$0xff] }
 0x37d   : > { %18610 = vst [vmem:[#allocation51_spill] sm:$0xff] %v16444_v16  ;;  %v12268_v35 = vpop.f32.mrf.mxu1  ;;  %12747 = vmatmul.mubr.f32.gmra.mxu1 %v16116_v63  ;;  %13261 = vmatpush3.msra.mxu0 %v10057_v21  ;;  %v4199_v63 = vadd.f32 %v18613_v30, %v16109_v17  ;;  %v9972_v17 = vld [vmem:[%s18280_s3 + $0x828] sm:$0xff] }
 0x37e   : > { %v16455_v61 = vadd.f32 %v12268_v35, %v4200_v62  ;;  %v16457_v42 = vpop.f32.mrf.mxu0  ;;  %12867 = vmatpush3.msra.mxu1 %v9974_v22  ;;  %13141 = vmatmul.mubr.f32.gmra.mxu0 %v7594_v43  ;;  %v4202_v62 = vadd.f32 %v18615_v58, %v16124_v3  ;;  %v7596_v22 = vld [vmem:[#allocation3 + $0xb2] sm:$0xff]  ;;  %v7597_v3 = vld [vmem:[#allocation3 + $0xba] sm:$0xff]  ;;  %v18619_v58 = vld [vmem:[#allocation25_spill] sm:$0xff] }
 0x37f   : > { %18612 = vst [vmem:[#allocation57_spill] sm:$0xff] %v16457_v42  ;;  %12749 = vmatprep.mubr.f32.mxu1 %v16129_v12  ;;  %13143 = vmatprep.mubr.f32.mxu0 %v7595_v44  ;;  %v4410_v53 = vpop.f32.mrf.mxu1  ;;  %v10055_v12 = vld [vmem:[%s18280_s3 + $0xac0] sm:$0xff]  ;;  %v18617_v30 = vld [vmem:[#allocation63_spill] sm:$0xff] }
 0x380   : > { %v16462_v27 = vadd.f32 %v4410_v53, %v4199_v63  ;;  %v16464_v21 = vpop.f32.mrf.mxu0  ;;  %12868 = vmatprep.subr.mxu1 %v9973_v9  ;;  %13262 = vmatprep.subr.mxu0 %v10056_v6  ;;  %v16687_v42 = vld [vmem:[#allocation3 + $0x71] sm:$0xff] }
 0x381   : > { %18614 = vst [vmem:[#allocation23_spill] sm:$0xff] %v16464_v21  ;;  %v12271_v35 = vpop.f32.mrf.mxu1  ;;  %12750 = vmatmul.mubr.f32.gmra.mxu1 %v16142_v51  ;;  %13263 = vmatpush3.msra.mxu0 %v10056_v6  ;;  %v4201_v51 = vadd.f32 %v18617_v30, %v16135_v48  ;;  %v9971_v48 = vld [vmem:[%s18280_s3 + $0x820] sm:$0xff]  ;;  %v18621_v30 = vld [vmem:[#allocation67_spill] sm:$0xff] }
 0x382   : > { %v16475_v43 = vadd.f32 %v12271_v35, %v4202_v62  ;;  %v16477_v44 = vpop.f32.mrf.mxu0  ;;  %12869 = vmatpush3.msra.mxu1 %v9973_v9  ;;  %13144 = vmatmul.mubr.f32.gmra.mxu0 %v7596_v22  ;;  %v4204_v62 = vadd.f32 %v18619_v58, %v16150_v37  ;;  %v7598_v9 = vld [vmem:[#allocation3 + $0xc2] sm:$0xff]  ;;  %v7599_v37 = vld [vmem:[#allocation3 + $0xca] sm:$0xff] }
 0x383   : > { %18616 = vst [vmem:[#allocation61_spill] sm:$0xff] %v16477_v44  ;;  %12752 = vmatprep.mubr.f32.mxu1 %v16155_v33  ;;  %13146 = vmatprep.mubr.f32.mxu0 %v7597_v3  ;;  %v4420_v63 = vpop.f32.mrf.mxu1  ;;  %v10054_v33 = vld [vmem:[%s18280_s3 + $0xab8] sm:$0xff]  ;;  %v18623_v58 = vld [vmem:[#allocation62_spill] sm:$0xff] }
 0x384   : > { %v16482_v53 = vadd.f32 %v4420_v63, %v4201_v51  ;;  %v16484_v6 = vpop.f32.mrf.mxu0  ;;  %12870 = vmatprep.subr.mxu1 %v9972_v17  ;;  %13264 = vmatprep.subr.mxu0 %v10055_v12  ;;  %v16663_v44 = vld [vmem:[#allocation3 + $0x61] sm:$0xff] }
 0x385   : > { %18618 = vst [vmem:[#allocation56_spill] sm:$0xff] %v16484_v6  ;;  %v12274_v35 = vpop.f32.mrf.mxu1  ;;  %12753 = vmatmul.mubr.f32.gmra.mxu1 %v16168_v56  ;;  %13265 = vmatpush3.msra.mxu0 %v10055_v12  ;;  %v4203_v56 = vadd.f32 %v18621_v30, %v16161_v2  ;;  %v9970_v2 = vld [vmem:[%s18280_s3 + $0x818] sm:$0xff]  ;;  %v18625_v30 = vld [vmem:[#allocation59_spill] sm:$0xff] }
 0x386   : > { %v16495_v22 = vadd.f32 %v12274_v35, %v4204_v62  ;;  %v16497_v3 = vpop.f32.mrf.mxu0  ;;  %12871 = vmatpush3.msra.mxu1 %v9972_v17  ;;  %13147 = vmatmul.mubr.f32.gmra.mxu0 %v7598_v9  ;;  %v4206_v62 = vadd.f32 %v18623_v58, %v16176_v32  ;;  %v7600_v17 = vld [vmem:[#allocation3 + $0xd2] sm:$0xff]  ;;  %v7601_v32 = vld [vmem:[#allocation3 + $0xda] sm:$0xff]  ;;  %v18627_v58 = vld [vmem:[#allocation73_spill] sm:$0xff] }
 0x387   : > { %18620 = vst [vmem:[#allocation54_spill] sm:$0xff] %v16497_v3  ;;  %12755 = vmatprep.mubr.f32.mxu1 %v16181_v11  ;;  %13149 = vmatprep.mubr.f32.mxu0 %v7599_v37  ;;  %v4430_v51 = vpop.f32.mrf.mxu1  ;;  %v10053_v11 = vld [vmem:[%s18280_s3 + $0xab0] sm:$0xff] }
 0x388   : > { %v16502_v63 = vadd.f32 %v4430_v51, %v4203_v56  ;;  %v16504_v12 = vpop.f32.mrf.mxu0  ;;  %12872 = vmatprep.subr.mxu1 %v9971_v48  ;;  %13266 = vmatprep.subr.mxu0 %v10054_v33  ;;  %v18641_v3 = vld [vmem:[#allocation32_spill] sm:$0xff] }
 0x389   : > { %18622 = vst [vmem:[#allocation63_spill] sm:$0xff] %v16504_v12  ;;  %v12277_v35 = vpop.f32.mrf.mxu1  ;;  %12756 = vmatmul.mubr.f32.gmra.mxu1 %v16194_v47  ;;  %13267 = vmatpush3.msra.mxu0 %v10054_v33  ;;  %v4205_v47 = vadd.f32 %v18625_v30, %v16187_v31  ;;  %v9969_v31 = vld [vmem:[%s18280_s3 + $0x810] sm:$0xff] }
 0x38a   : > { %v16515_v9 = vadd.f32 %v12277_v35, %v4206_v62  ;;  %v16517_v37 = vpop.f32.mrf.mxu0  ;;  %12873 = vmatpush3.msra.mxu1 %v9971_v48  ;;  %13150 = vmatmul.mubr.f32.gmra.mxu0 %v7600_v17  ;;  %v18628_v62 = vld [vmem:[#allocation65_spill] sm:$0xff]  ;;  %v18634_v12 = vld [vmem:[#allocation28_spill] sm:$0xff] }
 0x38b   : > { %18624 = vst [vmem:[#allocation25_spill] sm:$0xff] %v16517_v37  ;;  %12758 = vmatprep.mubr.f32.mxu1 %v16207_v28  ;;  %13152 = vmatprep.mubr.f32.mxu0 %v7601_v32  ;;  %v4440_v56 = vpop.f32.mrf.mxu1  ;;  %v4208_v35 = vadd.f32 %v18628_v62, %v18627_v58  ;;  %v18629_v48 = vld [vmem:[#allocation77_spill] sm:$0xff]  ;;  %v10052_v28 = vld [vmem:[%s18280_s3 + $0xaa8] sm:$0xff]  ;;  %v18632_v58 = vld [vmem:[#allocation68_spill] sm:$0xff] }
 0x38c   : > { %v16522_v51 = vadd.f32 %v4440_v56, %v4205_v47  ;;  %v16524_v33 = vpop.f32.mrf.mxu0  ;;  %12874 = vmatprep.subr.mxu1 %v9970_v2  ;;  %13268 = vmatprep.subr.mxu0 %v10053_v11  ;;  %v7602_v17 = vld [vmem:[#allocation3 + $0xe2] sm:$0xff]  ;;  %v7603_v47 = vld [vmem:[#allocation3 + $0xea] sm:$0xff]  ;;  %v18631_v56 = vld [vmem:[#allocation75_spill] sm:$0xff] }
 0x38d   : > { %18626 = vst [vmem:[#allocation67_spill] sm:$0xff] %v16524_v33  ;;  %v12280_v37 = vpop.f32.mrf.mxu1  ;;  %12759 = vmatmul.mubr.f32.gmra.mxu1 %v18629_v48  ;;  %13269 = vmatpush3.msra.mxu0 %v10053_v11  ;;  %v4207_v62 = vadd.f32 %v18632_v58, %v18631_v56  ;;  %v18637_v58 = vld [vmem:[#allocation30_spill] sm:$0xff] }
 0x38e   : > { %v16535_v32 = vadd.f32 %v12280_v37, %v4208_v35  ;;  %v16537_v30 = vpop.f32.mrf.mxu0  ;;  %12875 = vmatpush3.msra.mxu1 %v9970_v2  ;;  %13153 = vmatmul.mubr.f32.gmra.mxu0 %v7602_v17  ;;  %v18635_v37 = vld [vmem:[#allocation70_spill] sm:$0xff]  ;;  %v9968_v17 = vld [vmem:[%s18280_s3 + $0x808] sm:$0xff] }
 0x38f   : > { %18630 = vst [vmem:[#allocation62_spill] sm:$0xff] %v16537_v30  ;;  %12761 = vmatprep.mubr.f32.mxu1 %v16233_v59  ;;  %13155 = vmatprep.mubr.f32.mxu0 %v7603_v47  ;;  %v4450_v48 = vpop.f32.mrf.mxu1  ;;  %v4210_v35 = vadd.f32 %v18635_v37, %v18634_v12  ;;  %v7604_v2 = vld [vmem:[#allocation3 + $0xf2] sm:$0xff]  ;;  %v7605_v12 = vld [vmem:[#allocation3 + $0xfa] sm:$0xff] }
 0x390   : > { %v16542_v33 = vadd.f32 %v4450_v48, %v4207_v62  ;;  %v16544_v11 = vpop.f32.mrf.mxu0  ;;  %12876 = vmatprep.subr.mxu1 %v9969_v31  ;;  %13270 = vmatprep.subr.mxu0 %v10052_v28  ;;  %v10051_v59 = vld [vmem:[%s18280_s3 + $0xaa0] sm:$0xff]  ;;  %v18638_v62 = vld [vmem:[#allocation72_spill] sm:$0xff] }
 0x391   : > { %18633 = vst [vmem:[#allocation59_spill] sm:$0xff] %v16544_v11  ;;  %v12283_v30 = vpop.f32.mrf.mxu1  ;;  %12762 = vmatmul.mubr.f32.gmra.mxu1 %v16246_v40  ;;  %13271 = vmatpush3.msra.mxu0 %v10052_v28  ;;  %v4209_v40 = vadd.f32 %v18638_v62, %v18637_v58  ;;  %v18639_v48 = vld [vmem:[#allocation34_spill] sm:$0xff] }
 0x392   : > { %v16555_v47 = vadd.f32 %v12283_v30, %v4210_v35  ;;  %v16557_v56 = vpop.f32.mrf.mxu0  ;;  %12877 = vmatpush3.msra.mxu1 %v9969_v31  ;;  %13156 = vmatmul.mubr.f32.gmra.mxu0 %v7604_v2  ;;  %v18642_v30 = vld [vmem:[#allocation74_spill] sm:$0xff]  ;;  %v18643_v31 = vld [vmem:[#allocation36_spill] sm:$0xff] }
 0x393   : > { %18636 = vst [vmem:[#allocation73_spill] sm:$0xff] %v16557_v56  ;;  %12764 = vmatprep.mubr.f32.mxu1 %v18639_v48  ;;  %13158 = vmatprep.mubr.f32.mxu0 %v7605_v12  ;;  %v4460_v37 = vpop.f32.mrf.mxu1  ;;  %v4212_v35 = vadd.f32 %v18642_v30, %v18641_v3  ;;  %v7606_v2 = vld [vmem:[#allocation3 + $0x102] sm:$0xff]  ;;  %v9967_v58 = vld [vmem:[%s18280_s3 + $0x800] sm:$0xff] }
 0x394   : > { %v16562_v11 = vadd.f32 %v4460_v37, %v4209_v40  ;;  %v16564_v28 = vpop.f32.mrf.mxu0  ;;  %12878 = vmatprep.subr.mxu1 %v9968_v17  ;;  %13272 = vmatprep.subr.mxu0 %v10051_v59  ;;  %v10050_v12 = vld [vmem:[%s18280_s3 + $0xa98] sm:$0xff]  ;;  %v18646_v37 = vld [vmem:[#allocation80_spill] sm:$0xff] }
 0x395   : > { %18640 = vst [vmem:[#allocation65_spill] sm:$0xff] %v16564_v28  ;;  %v12286_v56 = vpop.f32.mrf.mxu1  ;;  %12765 = vmatmul.mubr.f32.gmra.mxu1 %v18643_v31  ;;  %13273 = vmatpush3.msra.mxu0 %v10051_v59  ;;  %v7607_v3 = vld [vmem:[#allocation3 + $0x10a] sm:$0xff]  ;;  %v6082_v31 = vld [vmem:[#allocation3 + $0x120] sm:$0xf] }
 0x396   : > { %v16575_v62 = vadd.f32 %v12286_v56, %v4212_v35  ;;  %v16577_v40 = vpop.f32.mrf.mxu0  ;;  %12879 = vmatpush3.msra.mxu1 %v9968_v17  ;;  %13159 = vmatmul.mubr.f32.gmra.mxu0 %v7606_v2  ;;  %v18645_v48 = vld [vmem:[#allocation85_spill] sm:$0xff]  ;;  %v7608_v35 = vld [vmem:[#allocation3 + $0x112] sm:$0xff] }
 0x397   : > { %18644 = vst [vmem:[#allocation77_spill] sm:$0xff] %v16577_v40  ;;  %v4211_v30 = vadd.f32 %v18646_v37, %v18645_v48  ;;  %12767 = vmatprep.mubr.f32.mxu1 %v16280_v49  ;;  %13161 = vmatprep.mubr.f32.mxu0 %v7607_v3  ;;  %v4470_v28 = vpop.f32.mrf.mxu1  ;;  %v10014_v17 = vld [vmem:[%s18280_s3 + $0x978] sm:$0xff]  ;;  %v10049_v49 = vld [vmem:[%s18280_s3 + $0xa90] sm:$0xff] }
 0x398   : > { %v16584_v6 = vpop.f32.mrf.mxu0  ;;  %12880 = vmatprep.subr.mxu1 %v9967_v58  ;;  %13274 = vmatprep.subr.mxu0 %v10050_v12  ;;  %v7609_v3 = vld [vmem:[#allocation3 + $0x11a] sm:$0xff] }
 0x399   : > { %v16582_v59 = vadd.f32 %v4470_v28, %v4211_v30  ;;  %18647 = vst [vmem:[#allocation75_spill] sm:$0xff] %v16584_v6  ;;  %v12289_v56 = vpop.f32.mrf.mxu1  ;;  %12768 = vmatmul.mubr.f32.gmra.mxu1 %v6082_v31  ;;  %13275 = vmatpush3.msra.mxu0 %v10050_v12  ;;  %v6663_v28 = vld [vmem:[#allocation3 + $0x37] sm:$0xff]  ;;  %v18649_v48 = vld [vmem:[#allocation76_spill] sm:$0xff] }
 0x39a   : > { %v16592_v2 = vpop.f32.mrf.mxu0  ;;  %12881 = vmatpush3.msra.mxu1 %v9967_v58  ;;  %13162 = vmatmul.mubr.f32.gmra.mxu0 %v7608_v35  ;;  %v4213_v37 = vadd.f32 %v18649_v48, %v16285_v55  ;;  %v7610_v31 = vld [vmem:[#allocation3 + $0x122] sm:$0xff]  ;;  %v7611_v55 = vld [vmem:[#allocation3 + $0x12a] sm:$0xff] }
 0x39b   : > { %18648 = vst [vmem:[#allocation68_spill] sm:$0xff] %v16592_v2  ;;  %12882 = vmatprep.mubr.f32.mxu1 %v6663_v28  ;;  %13164 = vmatprep.mubr.f32.mxu0 %v7609_v3  ;;  %v4480_v30 = vpop.f32.mrf.mxu1  ;;  %v18651_v6 = vld [vmem:[#allocation84_spill] sm:$0xff] }
 0x39c   : > { %v16596_v56 = vadd.f32 %v4480_v30, %v4213_v37  ;;  %v16598_v12 = vpop.f32.mrf.mxu0  ;;  %13010 = vmatprep.subr.mxu1 %v10014_v17  ;;  %v4796_v40 = vadd.f32 %v18651_v6, %v16294_v60  ;;  %v6664_v2 = vld [vmem:[#allocation3 + $0x3f] sm:$0xff]  ;;  %13276 = vmatprep.subr.mxu0 %v10049_v49  ;;  %v6665_v48 = vld [vmem:[#allocation3 + $0x47] sm:$0xff]  ;;  %v18653_v37 = vld [vmem:[#allocation78_spill] sm:$0xff] }
 0x39d   : > { %18650 = vst [vmem:[#allocation28_spill] sm:$0xff] %v16598_v12  ;;  %v10013_v58 = vld [vmem:[%s18280_s3 + $0x970] sm:$0xff]  ;;  %v12404_v35 = vpop.f32.mrf.mxu1  ;;  %12883 = vmatmul.mubr.f32.vlgmr.msra.gmra.mxu1 %v6664_v2  ;;  %13277 = vmatpush3.msra.mxu0 %v10049_v49  ;;  %v4795_v60 = vadd.f32 %v18653_v37, %v16304_v20  ;;  %v10048_v6 = vld [vmem:[%s18280_s3 + $0xa88] sm:$0xff]  ;;  %v7612_v2 = vld [vmem:[#allocation3 + $0x132] sm:$0xf] }
 0x39e   : > { %v16605_v28 = vadd.f32 %v12404_v35, %v4796_v40  ;;  %v16607_v3 = vpop.f32.mrf.mxu0  ;;  %13011 = vmatpush3.msra.mxu1 %v10014_v17  ;;  %13165 = vmatmul.mubr.f32.gmra.mxu0 %v7610_v31  ;;  %v18655_v17 = vld [vmem:[#allocation81_spill] sm:$0xff]  ;;  %v6667_v20 = vld [vmem:[#allocation3 + $0x57] sm:$0xff] }
 0x39f   : > { %18652 = vst [vmem:[#allocation70_spill] sm:$0xff] %v16607_v3  ;;  %12885 = vmatprep.mubr.f32.mxu1 %v6665_v48  ;;  %v4942_v30 = vpop.f32.mrf.mxu1  ;;  %13012 = vmatprep.subr.mxu1 %v10013_v58  ;;  %v4798_v49 = vadd.f32 %v18655_v17, %v16317_v24  ;;  %v6666_v31 = vld [vmem:[#allocation3 + $0x4f] sm:$0xff]  ;;  %v10012_v37 = vld [vmem:[%s18280_s3 + $0x968] sm:$0xff] }
 0x3a0   : > { %v16614_v12 = vadd.f32 %v4942_v30, %v4795_v60  ;;  %v16616_v40 = vpop.f32.mrf.mxu0  ;;  %13167 = vmatprep.mubr.f32.mxu0 %v7611_v55  ;;  %13013 = vmatpush3.msra.mxu1 %v10013_v58  ;;  %v10047_v48 = vld [vmem:[%s18280_s3 + $0xa80] sm:$0xff]  ;;  %v18656_v58 = vld [vmem:[#allocation5_spill] sm:$0xff] }
 0x3a1   : > { %18654 = vst [vmem:[#allocation30_spill] sm:$0xff] %v16616_v40  ;;  %v12407_v35 = vpop.f32.mrf.mxu1  ;;  %12886 = vmatmul.mubr.f32.gmra.mxu1 %v6666_v31  ;;  %13278 = vmatprep.subr.mxu0 %v10048_v6  ;;  %v16628_v24 = vld [vmem:[#allocation3 + $0x49] sm:$0xff]  ;;  %v4797_v30 = vadd.f32 %v18656_v58, %v16322_v5 }
 0x3a2   : > { %v16626_v60 = vadd.f32 %v12407_v35, %v4798_v49  ;;  %v12689_v55 = vpop.f32.mrf.mxu0  ;;  %13168 = vmatmul.mubr.f32.gmra.mxu0 %v7612_v2  ;;  %12888 = vmatprep.mubr.f32.mxu1 %v6667_v20  ;;  %v18658_v49 = vld [vmem:[#allocation6_spill] sm:$0xff]  ;;  %v6668_v2 = vld [vmem:[#allocation3 + $0x5f] sm:$0xff] }
 0x3a3   : > { %13279 = vmatpush3.msra.mxu0 %v10048_v6  ;;  %13282 = vmatprep.mubr.f32.mxu0 %v16628_v24  ;;  %v4952_v17 = vpop.f32.mrf.mxu1  ;;  %v4800_v35 = vadd.f32 %v18658_v49, %v16335_v1  ;;  %v16639_v55 = vld [vmem:[#allocation3 + $0x51] sm:$0xff]  ;;  %v10094_v6 = vld [vmem:[%s18280_s3 + $0xbf8] sm:$0xff] }
 0x3a4   : > { %v16633_v31 = vadd.f32 %v4952_v17, %v4797_v30  ;;  %v16635_v40 = vpop.f32.mrf.mxu0  ;;  %13280 = vmatprep.subr.mxu0 %v10047_v48  ;;  %13014 = vmatprep.subr.mxu1 %v10012_v37  ;;  %v10011_v5 = vld [vmem:[%s18280_s3 + $0x960] sm:$0xff]  ;;  %v6669_v1 = vld [vmem:[#allocation3 + $0x67] sm:$0xff]  ;;  %v18660_v17 = vld [vmem:[#allocation7_spill] sm:$0xff] }
 0x3a5   : > { %18657 = vst [vmem:[#allocation72_spill] sm:$0xff] %v16635_v40  ;;  %13281 = vmatpush3.msra.mxu0 %v10047_v48  ;;  %v12410_v20 = vpop.f32.mrf.mxu1  ;;  %12889 = vmatmul.mubr.f32.gmra.mxu1 %v6668_v2  ;;  %v16652_v48 = vld [vmem:[#allocation3 + $0x59] sm:$0xff]  ;;  %v4799_v49 = vadd.f32 %v18660_v17, %v16342_v41  ;;  %v10010_v41 = vld [vmem:[%s18280_s3 + $0x958] sm:$0xff] }
 0x3a6   : > { %v16647_v58 = vadd.f32 %v12410_v20, %v4800_v35  ;;  %v16649_v30 = vpop.f32.mrf.mxu0  ;;  %13015 = vmatpush3.msra.mxu1 %v10012_v37  ;;  %13283 = vmatmul.mubr.f32.vlgmr.msra.gmra.mxu0 %v16639_v55  ;;  %v18662_v35 = vld [vmem:[#allocation8_spill] sm:$0xff]  ;;  %v6670_v20 = vld [vmem:[#allocation3 + $0x6f] sm:$0xff] }
 0x3a7   : > { %18659 = vst [vmem:[#allocation34_spill] sm:$0xff] %v16649_v30  ;;  %12891 = vmatprep.mubr.f32.mxu1 %v6669_v1  ;;  %13285 = vmatprep.mubr.f32.mxu0 %v16652_v48  ;;  %v4962_v2 = vpop.f32.mrf.mxu1  ;;  %v4802_v37 = vadd.f32 %v18662_v35, %v16355_v19  ;;  %v10093_v1 = vld [vmem:[%s18280_s3 + $0xbf0] sm:$0xff]  ;;  %v6671_v19 = vld [vmem:[#allocation3 + $0x77] sm:$0xff]  ;;  %v18664_v35 = vld [vmem:[#allocation9_spill] sm:$0xff] }
 0x3a8   : > { %v16657_v40 = vadd.f32 %v4962_v2, %v4799_v49  ;;  %v16659_v3 = vpop.f32.mrf.mxu0  ;;  %13016 = vmatprep.subr.mxu1 %v10011_v5  ;;  %13410 = vmatprep.subr.mxu0 %v10094_v6  ;;  %v16676_v2 = vld [vmem:[#allocation3 + $0x69] sm:$0xff] }
 0x3a9   : > { %18661 = vst [vmem:[#allocation32_spill] sm:$0xff] %v16659_v3  ;;  %v12413_v30 = vpop.f32.mrf.mxu1  ;;  %12892 = vmatmul.mubr.f32.gmra.mxu1 %v6670_v20  ;;  %13411 = vmatpush3.msra.mxu0 %v10094_v6  ;;  %v4801_v20 = vadd.f32 %v18664_v35, %v16362_v46  ;;  %v10009_v46 = vld [vmem:[%s18280_s3 + $0x950] sm:$0xff] }
 0x3aa   : > { %v16671_v17 = vadd.f32 %v12413_v30, %v4802_v37  ;;  %v16673_v49 = vpop.f32.mrf.mxu0  ;;  %13017 = vmatpush3.msra.mxu1 %v10011_v5  ;;  %13286 = vmatmul.mubr.f32.gmra.mxu0 %v16663_v44  ;;  %v18666_v30 = vld [vmem:[#allocation10_spill] sm:$0xff]  ;;  %v6672_v37 = vld [vmem:[#allocation3 + $0x7f] sm:$0xff] }
 0x3ab   : > { %18663 = vst [vmem:[#allocation74_spill] sm:$0xff] %v16673_v49  ;;  %12894 = vmatprep.mubr.f32.mxu1 %v6671_v19  ;;  %13288 = vmatprep.mubr.f32.mxu0 %v16676_v2  ;;  %v4972_v6 = vpop.f32.mrf.mxu1  ;;  %v4804_v5 = vadd.f32 %v18666_v30, %v16375_v52  ;;  %v10092_v19 = vld [vmem:[%s18280_s3 + $0xbe8] sm:$0xff]  ;;  %v6673_v52 = vld [vmem:[#allocation3 + $0x87] sm:$0xff] }
 0x3ac   : > { %v16681_v3 = vadd.f32 %v4972_v6, %v4801_v20  ;;  %v16683_v21 = vpop.f32.mrf.mxu0  ;;  %13018 = vmatprep.subr.mxu1 %v10010_v41  ;;  %13412 = vmatprep.subr.mxu0 %v10093_v1  ;;  %v16700_v6 = vld [vmem:[#allocation3 + $0x79] sm:$0xff] }
 0x3ad   : > { %18665 = vst [vmem:[#allocation36_spill] sm:$0xff] %v16683_v21  ;;  %v12416_v49 = vpop.f32.mrf.mxu1  ;;  %12895 = vmatmul.mubr.f32.gmra.mxu1 %v6672_v37  ;;  %13413 = vmatpush3.msra.mxu0 %v10093_v1  ;;  %v18668_v30 = vld [vmem:[#allocation11_spill] sm:$0xff] }
 0x3ae   : > { %v16695_v35 = vadd.f32 %v12416_v49, %v4804_v5  ;;  %v16697_v20 = vpop.f32.mrf.mxu0  ;;  %13019 = vmatpush3.msra.mxu1 %v10010_v41  ;;  %13289 = vmatmul.mubr.f32.gmra.mxu0 %v16687_v42  ;;  %v4803_v37 = vadd.f32 %v18668_v30, %v16382_v7  ;;  %v18670_v49 = vld [vmem:[#allocation12_spill] sm:$0xff]  ;;  %v6674_v5 = vld [vmem:[#allocation3 + $0x8f] sm:$0xff]  ;;  %v10008_v7 = vld [vmem:[%s18280_s3 + $0x948] sm:$0xff] }
 0x3af   : > { %18667 = vst [vmem:[#allocation85_spill] sm:$0xff] %v16697_v20  ;;  %12897 = vmatprep.mubr.f32.mxu1 %v6673_v52  ;;  %13291 = vmatprep.mubr.f32.mxu0 %v16700_v6  ;;  %v4982_v1 = vpop.f32.mrf.mxu1  ;;  %v4806_v41 = vadd.f32 %v18670_v49, %v16395_v39  ;;  %v10091_v52 = vld [vmem:[%s18280_s3 + $0xbe0] sm:$0xff]  ;;  %v18672_v49 = vld [vmem:[#allocation13_spill] sm:$0xff] }
 0x3b0   : > { %v16705_v21 = vadd.f32 %v4982_v1, %v4803_v37  ;;  %v16707_v16 = vpop.f32.mrf.mxu0  ;;  %13020 = vmatprep.subr.mxu1 %v10009_v46  ;;  %13414 = vmatprep.subr.mxu0 %v10092_v19  ;;  %v6675_v39 = vld [vmem:[#allocation3 + $0x97] sm:$0xff]  ;;  %v16724_v1 = vld [vmem:[#allocation3 + $0x89] sm:$0xff] }
 0x3b1   : > { %18669 = vst [vmem:[#allocation80_spill] sm:$0xff] %v16707_v16  ;;  %v12419_v20 = vpop.f32.mrf.mxu1  ;;  %12898 = vmatmul.mubr.f32.gmra.mxu1 %v6674_v5  ;;  %13415 = vmatpush3.msra.mxu0 %v10092_v19  ;;  %v4805_v5 = vadd.f32 %v18672_v49, %v16402_v50  ;;  %v10007_v50 = vld [vmem:[%s18280_s3 + $0x940] sm:$0xff] }
 0x3b2   : > { %v16719_v30 = vadd.f32 %v12419_v20, %v4806_v41  ;;  %v16721_v37 = vpop.f32.mrf.mxu0  ;;  %13021 = vmatpush3.msra.mxu1 %v10009_v46  ;;  %13292 = vmatmul.mubr.f32.gmra.mxu0 %v16711_v34  ;;  %v18674_v20 = vld [vmem:[#allocation14_spill] sm:$0xff]  ;;  %v6676_v41 = vld [vmem:[#allocation3 + $0x9f] sm:$0xff] }
 0x3b3   : > { %18671 = vst [vmem:[#allocation76_spill] sm:$0xff] %v16721_v37  ;;  %12900 = vmatprep.mubr.f32.mxu1 %v6675_v39  ;;  %13294 = vmatprep.mubr.f32.mxu0 %v16724_v1  ;;  %v4992_v19 = vpop.f32.mrf.mxu1  ;;  %v4808_v46 = vadd.f32 %v18674_v20, %v16415_v10  ;;  %v10090_v39 = vld [vmem:[%s18280_s3 + $0xbd8] sm:$0xff]  ;;  %v18676_v20 = vld [vmem:[#allocation15_spill] sm:$0xff] }
 0x3b4   : > { %v16729_v16 = vadd.f32 %v4992_v19, %v4805_v5  ;;  %v16731_v18 = vpop.f32.mrf.mxu0  ;;  %13022 = vmatprep.subr.mxu1 %v10008_v7  ;;  %13416 = vmatprep.subr.mxu0 %v10091_v52  ;;  %v6677_v10 = vld [vmem:[#allocation3 + $0xa7] sm:$0xff]  ;;  %v16748_v19 = vld [vmem:[#allocation3 + $0x99] sm:$0xff] }
 0x3b5   : > { %18673 = vst [vmem:[#allocation84_spill] sm:$0xff] %v16731_v18  ;;  %v12422_v37 = vpop.f32.mrf.mxu1  ;;  %12901 = vmatmul.mubr.f32.gmra.mxu1 %v6676_v41  ;;  %13417 = vmatpush3.msra.mxu0 %v10091_v52  ;;  %v4807_v41 = vadd.f32 %v18676_v20, %v16422_v26  ;;  %v10006_v26 = vld [vmem:[%s18280_s3 + $0x938] sm:$0xff] }
 0x3b6   : > { %v16743_v49 = vadd.f32 %v12422_v37, %v4808_v46  ;;  %v16745_v5 = vpop.f32.mrf.mxu0  ;;  %13023 = vmatpush3.msra.mxu1 %v10008_v7  ;;  %13295 = vmatmul.mubr.f32.gmra.mxu0 %v16735_v13  ;;  %v18678_v37 = vld [vmem:[#allocation16_spill] sm:$0xff]  ;;  %v6678_v46 = vld [vmem:[#allocation3 + $0xaf] sm:$0xff] }
 0x3b7   : > { %18675 = vst [vmem:[#allocation78_spill] sm:$0xff] %v16745_v5  ;;  %12903 = vmatprep.mubr.f32.mxu1 %v6677_v10  ;;  %13297 = vmatprep.mubr.f32.mxu0 %v16748_v19  ;;  %v5002_v52 = vpop.f32.mrf.mxu1  ;;  %v4810_v7 = vadd.f32 %v18678_v37, %v16435_v38  ;;  %v10089_v10 = vld [vmem:[%s18280_s3 + $0xbd0] sm:$0xff]  ;;  %v6679_v38 = vld [vmem:[#allocation3 + $0xb7] sm:$0xff]  ;;  %v18680_v37 = vld [vmem:[#allocation17_spill] sm:$0xff] }
 0x3b8   : > { %v16753_v18 = vadd.f32 %v5002_v52, %v4807_v41  ;;  %v16755_v36 = vpop.f32.mrf.mxu0  ;;  %13024 = vmatprep.subr.mxu1 %v10007_v50  ;;  %13418 = vmatprep.subr.mxu0 %v10090_v39  ;;  %v16772_v52 = vld [vmem:[#allocation3 + $0xa9] sm:$0xff] }
 0x3b9   : > { %18677 = vst [vmem:[#allocation81_spill] sm:$0xff] %v16755_v36  ;;  %v12425_v5 = vpop.f32.mrf.mxu1  ;;  %12904 = vmatmul.mubr.f32.gmra.mxu1 %v6678_v46  ;;  %13419 = vmatpush3.msra.mxu0 %v10090_v39  ;;  %v4809_v46 = vadd.f32 %v18680_v37, %v16442_v4  ;;  %v10005_v4 = vld [vmem:[%s18280_s3 + $0x930] sm:$0xff] }
 0x3ba   : > { %v16767_v20 = vadd.f32 %v12425_v5, %v4810_v7  ;;  %v16769_v41 = vpop.f32.mrf.mxu0  ;;  %13025 = vmatpush3.msra.mxu1 %v10007_v50  ;;  %13298 = vmatmul.mubr.f32.gmra.mxu0 %v16759_v8  ;;  %v18682_v5 = vld [vmem:[#allocation18_spill] sm:$0xff]  ;;  %v6680_v7 = vld [vmem:[#allocation3 + $0xbf] sm:$0xff] }
 0x3bb   : > { %18679 = vst [vmem:[#allocation5_spill] sm:$0xff] %v16769_v41  ;;  %12906 = vmatprep.mubr.f32.mxu1 %v6679_v38  ;;  %13300 = vmatprep.mubr.f32.mxu0 %v16772_v52  ;;  %v5012_v39 = vpop.f32.mrf.mxu1  ;;  %v4812_v50 = vadd.f32 %v18682_v5, %v16455_v61  ;;  %v10088_v38 = vld [vmem:[%s18280_s3 + $0xbc8] sm:$0xff]  ;;  %v6681_v61 = vld [vmem:[#allocation3 + $0xc7] sm:$0xff] }
 0x3bc   : > { %v16777_v36 = vadd.f32 %v5012_v39, %v4809_v46  ;;  %v16779_v15 = vpop.f32.mrf.mxu0  ;;  %13026 = vmatprep.subr.mxu1 %v10006_v26  ;;  %13420 = vmatprep.subr.mxu0 %v10089_v10  ;;  %v16796_v39 = vld [vmem:[#allocation3 + $0xb9] sm:$0xff] }
 0x3bd   : > { %18681 = vst [vmem:[#allocation6_spill] sm:$0xff] %v16779_v15  ;;  %v12428_v41 = vpop.f32.mrf.mxu1  ;;  %12907 = vmatmul.mubr.f32.gmra.mxu1 %v6680_v7  ;;  %13421 = vmatpush3.msra.mxu0 %v10089_v10  ;;  %v18684_v5 = vld [vmem:[#allocation19_spill] sm:$0xff] }
 0x3be   : > { %v16791_v37 = vadd.f32 %v12428_v41, %v4812_v50  ;;  %v16793_v46 = vpop.f32.mrf.mxu0  ;;  %13027 = vmatpush3.msra.mxu1 %v10006_v26  ;;  %13301 = vmatmul.mubr.f32.gmra.mxu0 %v16783_v29  ;;  %v4811_v7 = vadd.f32 %v18684_v5, %v16462_v27  ;;  %v18686_v41 = vld [vmem:[#allocation21_spill] sm:$0xff]  ;;  %v10004_v27 = vld [vmem:[%s18280_s3 + $0x928] sm:$0xff] }
 0x3bf   : > { %18683 = vst [vmem:[#allocation7_spill] sm:$0xff] %v16793_v46  ;;  %12909 = vmatprep.mubr.f32.mxu1 %v6681_v61  ;;  %13303 = vmatprep.mubr.f32.mxu0 %v16796_v39  ;;  %v5022_v10 = vpop.f32.mrf.mxu1  ;;  %v4814_v26 = vadd.f32 %v18686_v41, %v16475_v43  ;;  %v6682_v50 = vld [vmem:[#allocation3 + $0xcf] sm:$0xff]  ;;  %v6683_v43 = vld [vmem:[#allocation3 + $0xd7] sm:$0xff]  ;;  %v18688_v41 = vld [vmem:[#allocation24_spill] sm:$0xff] }
 0x3c0   : > { %v16801_v15 = vadd.f32 %v5022_v10, %v4811_v7  ;;  %v16803_v45 = vpop.f32.mrf.mxu0  ;;  %13028 = vmatprep.subr.mxu1 %v10005_v4  ;;  %13422 = vmatprep.subr.mxu0 %v10088_v38  ;;  %v10087_v61 = vld [vmem:[%s18280_s3 + $0xbc0] sm:$0xff] }
 0x3c1   : > { %18685 = vst [vmem:[#allocation8_spill] sm:$0xff] %v16803_v45  ;;  %v12431_v46 = vpop.f32.mrf.mxu1  ;;  %12910 = vmatmul.mubr.f32.gmra.mxu1 %v6682_v50  ;;  %13423 = vmatpush3.msra.mxu0 %v10088_v38  ;;  %v16820_v10 = vld [vmem:[#allocation3 + $0xc9] sm:$0xff]  ;;  %v4813_v50 = vadd.f32 %v18688_v41, %v16482_v53 }
 0x3c2   : > { %v16815_v5 = vadd.f32 %v12431_v46, %v4814_v26  ;;  %v16817_v7 = vpop.f32.mrf.mxu0  ;;  %13029 = vmatpush3.msra.mxu1 %v10005_v4  ;;  %13304 = vmatmul.mubr.f32.gmra.mxu0 %v16807_v23  ;;  %v18690_v46 = vld [vmem:[#allocation27_spill] sm:$0xff]  ;;  %v10003_v53 = vld [vmem:[%s18280_s3 + $0x920] sm:$0xff] }
 0x3c3   : > { %18687 = vst [vmem:[#allocation9_spill] sm:$0xff] %v16817_v7  ;;  %12912 = vmatprep.mubr.f32.mxu1 %v6683_v43  ;;  %13306 = vmatprep.mubr.f32.mxu0 %v16820_v10  ;;  %v5032_v38 = vpop.f32.mrf.mxu1  ;;  %v4816_v4 = vadd.f32 %v18690_v46, %v16495_v22  ;;  %v6684_v26 = vld [vmem:[#allocation3 + $0xdf] sm:$0xff]  ;;  %v10086_v43 = vld [vmem:[%s18280_s3 + $0xbb8] sm:$0xff] }
 0x3c4   : > { %v16825_v45 = vadd.f32 %v5032_v38, %v4813_v50  ;;  %v16827_v0 = vpop.f32.mrf.mxu0  ;;  %13030 = vmatprep.subr.mxu1 %v10004_v27  ;;  %13424 = vmatprep.subr.mxu0 %v10087_v61  ;;  %v6685_v22 = vld [vmem:[#allocation3 + $0xe7] sm:$0xff]  ;;  %v16844_v38 = vld [vmem:[#allocation3 + $0xd9] sm:$0xff] }
 0x3c5   : > { %18689 = vst [vmem:[#allocation10_spill] sm:$0xff] %v16827_v0  ;;  %v12434_v7 = vpop.f32.mrf.mxu1  ;;  %12913 = vmatmul.mubr.f32.gmra.mxu1 %v6684_v26  ;;  %13425 = vmatpush3.msra.mxu0 %v10087_v61  ;;  %v18692_v46 = vld [vmem:[#allocation29_spill] sm:$0xff] }
 0x3c6   : > { %v16839_v41 = vadd.f32 %v12434_v7, %v4816_v4  ;;  %v16841_v50 = vpop.f32.mrf.mxu0  ;;  %13031 = vmatpush3.msra.mxu1 %v10004_v27  ;;  %13307 = vmatmul.mubr.f32.gmra.mxu0 %v16831_v14  ;;  %v4815_v26 = vadd.f32 %v18692_v46, %v16502_v63  ;;  %v18694_v7 = vld [vmem:[#allocation31_spill] sm:$0xff]  ;;  %v6686_v4 = vld [vmem:[#allocation3 + $0xef] sm:$0xff] }
 0x3c7   : > { %18691 = vst [vmem:[#allocation11_spill] sm:$0xff] %v16841_v50  ;;  %12915 = vmatprep.mubr.f32.mxu1 %v6685_v22  ;;  %13309 = vmatprep.mubr.f32.mxu0 %v16844_v38  ;;  %v5042_v61 = vpop.f32.mrf.mxu1  ;;  %v4818_v27 = vadd.f32 %v18694_v7, %v16515_v9  ;;  %v10002_v63 = vld [vmem:[%s18280_s3 + $0x918] sm:$0xff]  ;;  %v10085_v22 = vld [vmem:[%s18280_s3 + $0xbb0] sm:$0xff]  ;;  %v6687_v9 = vld [vmem:[#allocation3 + $0xf7] sm:$0xff] }
 0x3c8   : > { %v16849_v0 = vadd.f32 %v5042_v61, %v4815_v26  ;;  %v16851_v54 = vpop.f32.mrf.mxu0  ;;  %13032 = vmatprep.subr.mxu1 %v10003_v53  ;;  %13426 = vmatprep.subr.mxu0 %v10086_v43  ;;  %v16868_v61 = vld [vmem:[#allocation3 + $0xe9] sm:$0xff] }
 0x3c9   : > { %18693 = vst [vmem:[#allocation12_spill] sm:$0xff] %v16851_v54  ;;  %v12437_v50 = vpop.f32.mrf.mxu1  ;;  %12916 = vmatmul.mubr.f32.gmra.mxu1 %v6686_v4  ;;  %13427 = vmatpush3.msra.mxu0 %v10086_v43  ;;  %v18697_v7 = vld [vmem:[#allocation33_spill] sm:$0xff] }
 0x3ca   : > { %v16863_v46 = vadd.f32 %v12437_v50, %v4818_v27  ;;  %v16865_v26 = vpop.f32.mrf.mxu0  ;;  %13033 = vmatpush3.msra.mxu1 %v10003_v53  ;;  %13310 = vmatmul.mubr.f32.gmra.mxu0 %v16855_v57  ;;  %v4817_v4 = vadd.f32 %v18697_v7, %v16522_v51  ;;  %v18700_v50 = vld [vmem:[#allocation35_spill] sm:$0xff]  ;;  %v10001_v51 = vld [vmem:[%s18280_s3 + $0x910] sm:$0xff] }
 0x3cb   : > { %18696 = vst [vmem:[#allocation14_spill] sm:$0xff] %v16865_v26  ;;  %12918 = vmatprep.mubr.f32.mxu1 %v6687_v9  ;;  %13312 = vmatprep.mubr.f32.mxu0 %v16868_v61  ;;  %v5052_v43 = vpop.f32.mrf.mxu1  ;;  %v4820_v53 = vadd.f32 %v18700_v50, %v16535_v32  ;;  %v6688_v27 = vld [vmem:[#allocation3 + $0xff] sm:$0xff]  ;;  %v6689_v32 = vld [vmem:[#allocation3 + $0x107] sm:$0xff] }
 0x3cc   : > { %18695 = vst [vmem:[#allocation13_spill] sm:$0xff] %v16863_v46  ;;  %v16873_v54 = vadd.f32 %v5052_v43, %v4817_v4  ;;  %v16875_v25 = vpop.f32.mrf.mxu0  ;;  %13034 = vmatprep.subr.mxu1 %v10002_v63  ;;  %13428 = vmatprep.subr.mxu0 %v10085_v22  ;;  %v16879_v46 = vld [vmem:[#allocation3 + $0xf1] sm:$0xff]  ;;  %v16892_v43 = vld [vmem:[#allocation3 + $0xf9] sm:$0xff]  ;;  %v18703_v50 = vld [vmem:[#allocation101_spill] sm:$0xff] }
 0x3cd   : > { %18699 = vst [vmem:[#allocation16_spill] sm:$0xff] %v16875_v25  ;;  %v12440_v26 = vpop.f32.mrf.mxu1  ;;  %12919 = vmatmul.mubr.f32.gmra.mxu1 %v6688_v27  ;;  %13429 = vmatpush3.msra.mxu0 %v10085_v22  ;;  %v10084_v9 = vld [vmem:[%s18280_s3 + $0xba8] sm:$0xff]  ;;  %v4819_v27 = vadd.f32 %v18703_v50, %v16542_v33 }
 0x3ce   : > { %18698 = vst [vmem:[#allocation15_spill] sm:$0xff] %v16873_v54  ;;  %v16887_v7 = vadd.f32 %v12440_v26, %v4820_v53  ;;  %v16889_v4 = vpop.f32.mrf.mxu0  ;;  %13035 = vmatpush3.msra.mxu1 %v10002_v63  ;;  %13313 = vmatmul.mubr.f32.gmra.mxu0 %v16879_v46  ;;  %v18706_v26 = vld [vmem:[#allocation103_spill] sm:$0xff]  ;;  %v6690_v53 = vld [vmem:[#allocation3 + $0x10f] sm:$0xff] }
 0x3cf   : > { %18702 = vst [vmem:[#allocation18_spill] sm:$0xff] %v16889_v4  ;;  %12921 = vmatprep.mubr.f32.mxu1 %v6689_v32  ;;  %13315 = vmatprep.mubr.f32.mxu0 %v16892_v43  ;;  %v5062_v22 = vpop.f32.mrf.mxu1  ;;  %v4822_v63 = vadd.f32 %v18706_v26, %v16555_v47  ;;  %v10000_v33 = vld [vmem:[%s18280_s3 + $0x908] sm:$0xff]  ;;  %v10083_v32 = vld [vmem:[%s18280_s3 + $0xba0] sm:$0xff]  ;;  %v18710_v26 = vld [vmem:[#allocation104_spill] sm:$0xff] }
 0x3d0   : > { %18701 = vst [vmem:[#allocation17_spill] sm:$0xff] %v16887_v7  ;;  %v16897_v25 = vadd.f32 %v5062_v22, %v4819_v27  ;;  %v16899_v54 = vpop.f32.mrf.mxu0  ;;  %13036 = vmatprep.subr.mxu1 %v10001_v51  ;;  %13430 = vmatprep.subr.mxu0 %v10084_v9  ;;  %v16903_v7 = vld [vmem:[#allocation3 + $0x101] sm:$0xff]  ;;  %v6691_v47 = vld [vmem:[#allocation3 + $0x117] sm:$0xff]  ;;  %v16916_v22 = vld [vmem:[#allocation3 + $0x109] sm:$0xff] }
 0x3d1   : > { %18705 = vst [vmem:[#allocation21_spill] sm:$0xff] %v16899_v54  ;;  %v12443_v4 = vpop.f32.mrf.mxu1  ;;  %12922 = vmatmul.mubr.f32.gmra.mxu1 %v6690_v53  ;;  %18707 = vst [vmem:[#allocation24_spill] sm:$0xff] %v16903_v7  ;;  %13431 = vmatpush3.msra.mxu0 %v10084_v9  ;;  %v4821_v53 = vadd.f32 %v18710_v26, %v16562_v11  ;;  %v6692_v54 = vld [vmem:[#allocation3 + $0x11f] sm:$0xff]  ;;  %v9999_v11 = vld [vmem:[%s18280_s3 + $0x900] sm:$0xff] }
 0x3d2   : > { %18704 = vst [vmem:[#allocation19_spill] sm:$0xff] %v16897_v25  ;;  %v16911_v50 = vadd.f32 %v12443_v4, %v4822_v63  ;;  %v16913_v27 = vpop.f32.mrf.mxu0  ;;  %13037 = vmatpush3.msra.mxu1 %v10001_v51  ;;  %13316 = vmatmul.mubr.f32.gmra.mxu0 %v16903_v7  ;;  %v18713_v51 = vld [vmem:[#allocation38_spill] sm:$0xff] }
 0x3d3   : > { %18709 = vst [vmem:[#allocation29_spill] sm:$0xff] %v16913_v27  ;;  %12924 = vmatprep.mubr.f32.mxu1 %v6691_v47  ;;  %13318 = vmatprep.mubr.f32.mxu0 %v16916_v22  ;;  %v5072_v9 = vpop.f32.mrf.mxu1  ;;  %v4824_v63 = vadd.f32 %v18713_v51, %v16575_v62  ;;  %v6693_v27 = vld [vmem:[#allocation3 + $0x127] sm:$0xff]  ;;  %v16927_v7 = vld [vmem:[#allocation3 + $0x111] sm:$0xff]  ;;  %v16940_v62 = vld [vmem:[#allocation3 + $0x119] sm:$0xff] }
 0x3d4   : > { %18708 = vst [vmem:[#allocation27_spill] sm:$0xff] %v16911_v50  ;;  %v16921_v25 = vadd.f32 %v5072_v9, %v4821_v53  ;;  %v16923_v4 = vpop.f32.mrf.mxu0  ;;  %13038 = vmatprep.subr.mxu1 %v10000_v33  ;;  %13432 = vmatprep.subr.mxu0 %v10083_v32  ;;  %v10082_v47 = vld [vmem:[%s18280_s3 + $0xb98] sm:$0xff] }
 0x3d5   : > { %18712 = vst [vmem:[#allocation33_spill] sm:$0xff] %v16923_v4  ;;  %v12446_v50 = vpop.f32.mrf.mxu1  ;;  %12925 = vmatmul.mubr.f32.gmra.mxu1 %v6692_v54  ;;  %13433 = vmatpush3.msra.mxu0 %v10083_v32  ;;  %v18715_v54 = vld [vmem:[#allocation39_spill] sm:$0xff]  ;;  %v6694_v51 = vld [vmem:[#allocation3 + $0x12f] sm:$0xf]  ;;  %v16945_v4 = vld [vmem:[#allocation3 + $0x121] sm:$0xff] }
 0x3d6   : > { %18711 = vst [vmem:[#allocation31_spill] sm:$0xff] %v16921_v25  ;;  %v16935_v26 = vadd.f32 %v12446_v50, %v4824_v63  ;;  %v16937_v53 = vpop.f32.mrf.mxu0  ;;  %13039 = vmatpush3.msra.mxu1 %v10000_v33  ;;  %13319 = vmatmul.mubr.f32.gmra.mxu0 %v16927_v7  ;;  %v4823_v9 = vadd.f32 %v18715_v54, %v16582_v59  ;;  %18716 = vst [vmem:[#allocation101_spill] sm:$0xff] %v16945_v4  ;;  %v10046_v33 = vld [vmem:[%s18280_s3 + $0xa78] sm:$0xff] }
 0x3d7   : > { %18714 = vst [vmem:[#allocation35_spill] sm:$0xff] %v16937_v53  ;;  %13321 = vmatprep.mubr.f32.mxu0 %v16940_v62  ;;  %v5082_v32 = vpop.f32.mrf.mxu1  ;;  %12927 = vmatprep.mubr.f32.mxu1 %v6693_v27  ;;  %v16954_v59 = vld [vmem:[#allocation3 + $0x129] sm:$0xff]  ;;  %v10081_v27 = vld [vmem:[%s18280_s3 + $0xb90] sm:$0xff] }
 0x3d8   : > { %v16947_v25 = vadd.f32 %v5082_v32, %v4823_v9  ;;  %v16949_v50 = vpop.f32.mrf.mxu0  ;;  %13040 = vmatprep.subr.mxu1 %v9999_v11  ;;  %13434 = vmatprep.subr.mxu0 %v10082_v47  ;;  %v7275_v9 = vld [vmem:[#allocation3 + $0x39] sm:$0xff] }
 0x3d9   : > { %18718 = vst [vmem:[#allocation104_spill] sm:$0xff] %v16949_v50  ;;  %v12449_v63 = vpop.f32.mrf.mxu1  ;;  %12928 = vmatmul.mubr.f32.gmra.mxu1 %v6694_v51  ;;  %13435 = vmatpush3.msra.mxu0 %v10082_v47  ;;  %v18720_v32 = vld [vmem:[#allocation40_spill] sm:$0xff]  ;;  %v8222_v51 = vld [vmem:[#allocation3 + $0x131] sm:$0xff] }
 0x3da   : > { %18717 = vst [vmem:[#allocation103_spill] sm:$0xff] %v16947_v25  ;;  %v16959_v54 = vpop.f32.mrf.mxu0  ;;  %13041 = vmatpush3.msra.mxu1 %v9999_v11  ;;  %13322 = vmatmul.mubr.f32.gmra.mxu0 %v16945_v4  ;;  %v4825_v50 = vadd.f32 %v18720_v32, %v16596_v56  ;;  %v18723_v25 = vld [vmem:[#allocation41_spill] sm:$0xff]  ;;  %v10045_v4 = vld [vmem:[%s18280_s3 + $0xa70] sm:$0xff] }
 0x3db   : > { %18719 = vst [vmem:[#allocation38_spill] sm:$0xff] %v16959_v54  ;;  %13042 = vmatprep.mubr.f32.mxu1 %v7275_v9  ;;  %v5092_v53 = vpop.f32.mrf.mxu1  ;;  %13170 = vmatprep.subr.mxu1 %v10046_v33  ;;  %v5408_v54 = vadd.f32 %v18723_v25, %v16605_v28  ;;  %v7276_v11 = vld [vmem:[#allocation3 + $0x41] sm:$0xff]  ;;  %v8223_v9 = vld [vmem:[#allocation3 + $0x139] sm:$0xff] }
 0x3dc   : > { %v16964_v63 = vadd.f32 %v5092_v53, %v4825_v50  ;;  %v16966_v47 = vpop.f32.mrf.mxu0  ;;  %13324 = vmatprep.mubr.f32.mxu0 %v16954_v59  ;;  %13436 = vmatprep.subr.mxu0 %v10081_v27  ;;  %v18724_v50 = vld [vmem:[#allocation42_spill] sm:$0xff]  ;;  %v10080_v25 = vld [vmem:[%s18280_s3 + $0xb88] sm:$0xff] }
 0x3dd   : > { %18722 = vst [vmem:[#allocation40_spill] sm:$0xff] %v16966_v47  ;;  %v12564_v56 = vpop.f32.mrf.mxu1  ;;  %13043 = vmatmul.mubr.f32.vlgmr.msra.gmra.mxu1 %v7276_v11  ;;  %13437 = vmatpush3.msra.mxu0 %v10081_v27  ;;  %v5407_v47 = vadd.f32 %v18724_v50, %v16614_v12  ;;  %v8224_v11 = vld [vmem:[#allocation3 + $0x141] sm:$0xf]  ;;  %v10079_v12 = vld [vmem:[%s18280_s3 + $0xb80] sm:$0xff] }
 0x3de   : > { %18721 = vst [vmem:[#allocation39_spill] sm:$0xff] %v16964_v63  ;;  %v16974_v32 = vadd.f32 %v12564_v56, %v5408_v54  ;;  %v16976_v53 = vpop.f32.mrf.mxu0  ;;  %13171 = vmatpush3.msra.mxu1 %v10046_v33  ;;  %13325 = vmatmul.mubr.f32.gmra.mxu0 %v8222_v51  ;;  %v18725_v33 = vld [vmem:[#allocation43_spill] sm:$0xff] }
 0x3df   : > { %13045 = vmatprep.mubr.f32.mxu1 %v16628_v24  ;;  %v5554_v28 = vpop.f32.mrf.mxu1  ;;  %13172 = vmatprep.subr.mxu1 %v10045_v4  ;;  %v5410_v54 = vadd.f32 %v18725_v33, %v16626_v60  ;;  %v10044_v24 = vld [vmem:[%s18280_s3 + $0xa68] sm:$0xff]  ;;  %v8805_v60 = vld [vmem:[#allocation3 + $0x4b] sm:$0xff] }
 0x3e0   : > { %v16984_v63 = vadd.f32 %v5554_v28, %v5407_v47  ;;  %v16986_v27 = vpop.f32.mrf.mxu0  ;;  %13327 = vmatprep.mubr.f32.mxu0 %v8223_v9  ;;  %13173 = vmatpush3.msra.mxu1 %v10045_v4  ;;  %v18726_v4 = vld [vmem:[#allocation44_spill] sm:$0xff]  ;;  %v18727_v33 = vld [vmem:[#allocation45_spill] sm:$0xff] }
 0x3e1   : > { %v12567_v51 = vpop.f32.mrf.mxu1  ;;  %13046 = vmatmul.mubr.f32.gmra.mxu1 %v16639_v55  ;;  %13438 = vmatprep.subr.mxu0 %v10080_v25  ;;  %v5409_v9 = vadd.f32 %v18726_v4, %v16633_v31  ;;  %v10043_v31 = vld [vmem:[%s18280_s3 + $0xa60] sm:$0xff] }
 0x3e2   : > { %v16997_v47 = vadd.f32 %v12567_v51, %v5410_v54  ;;  %v12849_v56 = vpop.f32.mrf.mxu0  ;;  %13328 = vmatmul.mubr.f32.gmra.mxu0 %v8224_v11  ;;  %13048 = vmatprep.mubr.f32.mxu1 %v16652_v48  ;;  %v5412_v54 = vadd.f32 %v18727_v33, %v16647_v58  ;;  %v8806_v48 = vld [vmem:[#allocation3 + $0x53] sm:$0xff]  ;;  %v8807_v58 = vld [vmem:[#allocation3 + $0x5b] sm:$0xff] }
 0x3e3   : > { %13439 = vmatpush3.msra.mxu0 %v10080_v25  ;;  %13442 = vmatprep.mubr.f32.mxu0 %v8805_v60  ;;  %v5564_v55 = vpop.f32.mrf.mxu1  ;;  %v17015_v25 = vld [vmem:[%s18280_s3 + $0xc78] sm:$0xff] }
 0x3e4   : > { %v17002_v50 = vadd.f32 %v5564_v55, %v5409_v9  ;;  %v17004_v28 = vpop.f32.mrf.mxu0  ;;  %13440 = vmatprep.subr.mxu0 %v10079_v12  ;;  %13174 = vmatprep.subr.mxu1 %v10044_v24  ;;  %v18729_v55 = vld [vmem:[#allocation47_spill] sm:$0xff] }
 0x3e5   : > { %13441 = vmatpush3.msra.mxu0 %v10079_v12  ;;  %v12570_v11 = vpop.f32.mrf.mxu1  ;;  %13049 = vmatmul.mubr.f32.gmra.mxu1 %v16663_v44  ;;  %v18728_v12 = vld [vmem:[#allocation46_spill] sm:$0xff]  ;;  %v5414_v33 = vadd.f32 %v18729_v55, %v16671_v17  ;;  %v18733_v55 = vld [vmem:[#allocation49_spill] sm:$0xff] }
 0x3e6   : > { %v17017_v51 = vadd.f32 %v12570_v11, %v5412_v54  ;;  %v17019_v56 = vpop.f32.mrf.mxu0  ;;  %13175 = vmatpush3.msra.mxu1 %v10044_v24  ;;  %13443 = vmatmul.mubr.f32.vlgmr.msra.gmra.mxu0 %v8806_v48  ;;  %v5411_v44 = vadd.f32 %v18728_v12, %v16657_v40  ;;  %v8808_v54 = vld [vmem:[#allocation3 + $0x63] sm:$0xff]  ;;  %v8809_v17 = vld [vmem:[#allocation3 + $0x6b] sm:$0xff] }
 0x3e7   : > { %13051 = vmatprep.mubr.f32.mxu1 %v16676_v2  ;;  %13445 = vmatprep.mubr.f32.mxu0 %v8807_v58  ;;  %v5574_v60 = vpop.f32.mrf.mxu1  ;;  %v10042_v40 = vld [vmem:[%s18280_s3 + $0xa58] sm:$0xff]  ;;  %v10109_v2 = vld [vmem:[%s18280_s3 + $0xc70] sm:$0xff] }
 0x3e8   : > { %v17024_v4 = vadd.f32 %v5574_v60, %v5411_v44  ;;  %v17026_v9 = vpop.f32.mrf.mxu0  ;;  %13176 = vmatprep.subr.mxu1 %v10043_v31  ;;  %13490 = vmatprep.subr.mxu0 %v17015_v25 }
 0x3e9   : > { %v12573_v24 = vpop.f32.mrf.mxu1  ;;  %13052 = vmatmul.mubr.f32.gmra.mxu1 %v16687_v42  ;;  %13491 = vmatpush3.msra.mxu0 %v17015_v25  ;;  %v18731_v42 = vld [vmem:[#allocation48_spill] sm:$0xff] }
 0x3ea   : > { %v17039_v11 = vadd.f32 %v12573_v24, %v5414_v33  ;;  %v17041_v48 = vpop.f32.mrf.mxu0  ;;  %13177 = vmatpush3.msra.mxu1 %v10043_v31  ;;  %13446 = vmatmul.mubr.f32.gmra.mxu0 %v8808_v54  ;;  %v5413_v58 = vadd.f32 %v18731_v42, %v16681_v3  ;;  %v5416_v33 = vadd.f32 %v18733_v55, %v16695_v35  ;;  %v8810_v31 = vld [vmem:[#allocation3 + $0x73] sm:$0xff]  ;;  %v10041_v3 = vld [vmem:[%s18280_s3 + $0xa50] sm:$0xff] }
 0x3eb   : > { %18730 = vst [vmem:[#allocation41_spill] sm:$0xff] %v17041_v48  ;;  %13054 = vmatprep.mubr.f32.mxu1 %v16700_v6  ;;  %13448 = vmatprep.mubr.f32.mxu0 %v8809_v17  ;;  %v5584_v12 = vpop.f32.mrf.mxu1  ;;  %v10108_v6 = vld [vmem:[%s18280_s3 + $0xc68] sm:$0xff]  ;;  %v18735_v42 = vld [vmem:[#allocation50_spill] sm:$0xff]  ;;  %v18737_v55 = vld [vmem:[#allocation52_spill] sm:$0xff] }
 0x3ec   : > { %v17046_v44 = vadd.f32 %v5584_v12, %v5413_v58  ;;  %v17048_v60 = vpop.f32.mrf.mxu0  ;;  %13178 = vmatprep.subr.mxu1 %v10042_v40  ;;  %13492 = vmatprep.subr.mxu0 %v10109_v2  ;;  %v8811_v35 = vld [vmem:[#allocation3 + $0x7b] sm:$0xff] }
 0x3ed   : > { %18732 = vst [vmem:[#allocation42_spill] sm:$0xff] %v17048_v60  ;;  %v12576_v24 = vpop.f32.mrf.mxu1  ;;  %13055 = vmatmul.mubr.f32.gmra.mxu1 %v16711_v34  ;;  %13493 = vmatpush3.msra.mxu0 %v10109_v2  ;;  %v5415_v34 = vadd.f32 %v18735_v42, %v16705_v21  ;;  %v10040_v21 = vld [vmem:[%s18280_s3 + $0xa48] sm:$0xff]  ;;  %v7888_v60 = vld [vmem:[#allocation3 + $0x50] sm:$0xff]  ;;  %v7894_v48 = vld [vmem:[#allocation3 + $0x80] sm:$0xff] }
 0x3ee   : > { %v17059_v54 = vadd.f32 %v12576_v24, %v5416_v33  ;;  %v17061_v17 = vpop.f32.mrf.mxu0  ;;  %13179 = vmatpush3.msra.mxu1 %v10042_v40  ;;  %13449 = vmatmul.mubr.f32.gmra.mxu0 %v8810_v31  ;;  %v5418_v33 = vadd.f32 %v18737_v55, %v16719_v30  ;;  %v8812_v40 = vld [vmem:[#allocation3 + $0x83] sm:$0xff]  ;;  %v8813_v30 = vld [vmem:[#allocation3 + $0x8b] sm:$0xff]  ;;  %v18741_v55 = vld [vmem:[#allocation55_spill] sm:$0xff] }
 0x3ef   : > { %18734 = vst [vmem:[#allocation43_spill] sm:$0xff] %v17061_v17  ;;  %13057 = vmatprep.mubr.f32.mxu1 %v16724_v1  ;;  %13451 = vmatprep.mubr.f32.mxu0 %v8811_v35  ;;  %v5594_v58 = vpop.f32.mrf.mxu1  ;;  %v17079_v1 = vld [vmem:[%s18280_s3 + $0xc60] sm:$0xff] }
 0x3f0   : > { %v17066_v12 = vadd.f32 %v5594_v58, %v5415_v34  ;;  %v17068_v2 = vpop.f32.mrf.mxu0  ;;  %13180 = vmatprep.subr.mxu1 %v10041_v3  ;;  %13494 = vmatprep.subr.mxu0 %v10108_v6 }
 0x3f1   : > { %18736 = vst [vmem:[#allocation44_spill] sm:$0xff] %v17068_v2  ;;  %v12579_v24 = vpop.f32.mrf.mxu1  ;;  %13058 = vmatmul.mubr.f32.gmra.mxu1 %v16735_v13  ;;  %13495 = vmatpush3.msra.mxu0 %v10108_v6  ;;  %v18739_v13 = vld [vmem:[#allocation53_spill] sm:$0xff] }
 0x3f2   : > { %v17081_v31 = vadd.f32 %v12579_v24, %v5418_v33  ;;  %v17083_v35 = vpop.f32.mrf.mxu0  ;;  %13181 = vmatpush3.msra.mxu1 %v10041_v3  ;;  %13452 = vmatmul.mubr.f32.gmra.mxu0 %v8812_v40  ;;  %v5417_v42 = vadd.f32 %v18739_v13, %v16729_v16  ;;  %v5420_v33 = vadd.f32 %v18741_v55, %v16743_v49  ;;  %v8814_v24 = vld [vmem:[#allocation3 + $0x93] sm:$0xff] }
 0x3f3   : > { %18738 = vst [vmem:[#allocation45_spill] sm:$0xff] %v17083_v35  ;;  %13060 = vmatprep.mubr.f32.mxu1 %v16748_v19  ;;  %13454 = vmatprep.mubr.f32.mxu0 %v8813_v30  ;;  %v5604_v34 = vpop.f32.mrf.mxu1  ;;  %v10039_v16 = vld [vmem:[%s18280_s3 + $0xa40] sm:$0xff]  ;;  %v17103_v19 = vld [vmem:[%s18280_s3 + $0xc58] sm:$0xff]  ;;  %v8815_v30 = vld [vmem:[#allocation3 + $0x9b] sm:$0xff] }
 0x3f4   : > { %v17088_v6 = vadd.f32 %v5604_v34, %v5417_v42  ;;  %v17090_v58 = vpop.f32.mrf.mxu0  ;;  %13182 = vmatprep.subr.mxu1 %v10040_v21  ;;  %13496 = vmatprep.subr.mxu0 %v17079_v1 }
 0x3f5   : > { %18740 = vst [vmem:[#allocation46_spill] sm:$0xff] %v17090_v58  ;;  %v12582_v3 = vpop.f32.mrf.mxu1  ;;  %13061 = vmatmul.mubr.f32.gmra.mxu1 %v16759_v8  ;;  %13497 = vmatpush3.msra.mxu0 %v17079_v1  ;;  %v18743_v8 = vld [vmem:[#allocation58_spill] sm:$0xff]  ;;  %v8832_v58 = vld [vmem:[#allocation3 + $0x123] sm:$0xff] }
 0x3f6   : > { %v17105_v40 = vadd.f32 %v12582_v3, %v5420_v33  ;;  %v17107_v49 = vpop.f32.mrf.mxu0  ;;  %13183 = vmatpush3.msra.mxu1 %v10040_v21  ;;  %13455 = vmatmul.mubr.f32.gmra.mxu0 %v8814_v24  ;;  %v5419_v13 = vadd.f32 %v18743_v8, %v16753_v18  ;;  %v18745_v33 = vld [vmem:[#allocation60_spill] sm:$0xff]  ;;  %v10038_v18 = vld [vmem:[%s18280_s3 + $0xa38] sm:$0xff] }
 0x3f7   : > { %18742 = vst [vmem:[#allocation47_spill] sm:$0xff] %v17107_v49  ;;  %13063 = vmatprep.mubr.f32.mxu1 %v16772_v52  ;;  %13457 = vmatprep.mubr.f32.mxu0 %v8815_v30  ;;  %v5614_v42 = vpop.f32.mrf.mxu1  ;;  %v5422_v3 = vadd.f32 %v18745_v33, %v16767_v20  ;;  %v8816_v24 = vld [vmem:[#allocation3 + $0xa3] sm:$0xff]  ;;  %v8817_v8 = vld [vmem:[#allocation3 + $0xab] sm:$0xff]  ;;  %v18774_v49 = vld [vmem:[#allocation27_spill] sm:$0xff] }
 0x3f8   : > { %v17112_v34 = vadd.f32 %v5614_v42, %v5419_v13  ;;  %v17114_v55 = vpop.f32.mrf.mxu0  ;;  %13184 = vmatprep.subr.mxu1 %v10039_v16  ;;  %13498 = vmatprep.subr.mxu0 %v17103_v19  ;;  %v17127_v52 = vld [vmem:[%s18280_s3 + $0xc50] sm:$0xff] }
 0x3f9   : > { %18744 = vst [vmem:[#allocation48_spill] sm:$0xff] %v17114_v55  ;;  %v12585_v21 = vpop.f32.mrf.mxu1  ;;  %13064 = vmatmul.mubr.f32.gmra.mxu1 %v16783_v29  ;;  %13499 = vmatpush3.msra.mxu0 %v17103_v19  ;;  %v18747_v29 = vld [vmem:[#allocation64_spill] sm:$0xff] }
 0x3fa   : > { %v17129_v30 = vadd.f32 %v12585_v21, %v5422_v3  ;;  %v17131_v20 = vpop.f32.mrf.mxu0  ;;  %13185 = vmatpush3.msra.mxu1 %v10039_v16  ;;  %13458 = vmatmul.mubr.f32.gmra.mxu0 %v8816_v24  ;;  %v5421_v13 = vadd.f32 %v18747_v29, %v16777_v36  ;;  %v18749_v3 = vld [vmem:[#allocation66_spill] sm:$0xff]  ;;  %v10037_v36 = vld [vmem:[%s18280_s3 + $0xa30] sm:$0xff] }
 0x3fb   : > { %18746 = vst [vmem:[#allocation49_spill] sm:$0xff] %v17131_v20  ;;  %13066 = vmatprep.mubr.f32.mxu1 %v16796_v39  ;;  %13460 = vmatprep.mubr.f32.mxu0 %v8817_v8  ;;  %v5624_v42 = vpop.f32.mrf.mxu1  ;;  %v5424_v21 = vadd.f32 %v18749_v3, %v16791_v37  ;;  %v8818_v24 = vld [vmem:[#allocation3 + $0xb3] sm:$0xff]  ;;  %v8819_v29 = vld [vmem:[#allocation3 + $0xbb] sm:$0xff] }
 0x3fc   : > { %v17136_v33 = vadd.f32 %v5624_v42, %v5421_v13  ;;  %v17138_v55 = vpop.f32.mrf.mxu0  ;;  %13186 = vmatprep.subr.mxu1 %v10038_v18  ;;  %13500 = vmatprep.subr.mxu0 %v17127_v52  ;;  %v17151_v39 = vld [vmem:[%s18280_s3 + $0xc48] sm:$0xff] }
 0x3fd   : > { %18748 = vst [vmem:[#allocation50_spill] sm:$0xff] %v17138_v55  ;;  %v12588_v16 = vpop.f32.mrf.mxu1  ;;  %13067 = vmatmul.mubr.f32.gmra.mxu1 %v16807_v23  ;;  %13501 = vmatpush3.msra.mxu0 %v17127_v52  ;;  %v18751_v23 = vld [vmem:[#allocation69_spill] sm:$0xff] }
 0x3fe   : > { %v17153_v8 = vadd.f32 %v12588_v16, %v5424_v21  ;;  %v17155_v37 = vpop.f32.mrf.mxu0  ;;  %13187 = vmatpush3.msra.mxu1 %v10038_v18  ;;  %13461 = vmatmul.mubr.f32.gmra.mxu0 %v8818_v24  ;;  %v5423_v13 = vadd.f32 %v18751_v23, %v16801_v15  ;;  %v18753_v21 = vld [vmem:[#allocation71_spill] sm:$0xff]  ;;  %v8820_v24 = vld [vmem:[#allocation3 + $0xc3] sm:$0xff]  ;;  %v8821_v23 = vld [vmem:[#allocation3 + $0xcb] sm:$0xff] }
 0x3ff   : > { %18750 = vst [vmem:[#allocation52_spill] sm:$0xff] %v17155_v37  ;;  %13069 = vmatprep.mubr.f32.mxu1 %v16820_v10  ;;  %13463 = vmatprep.mubr.f32.mxu0 %v8819_v29  ;;  %v5634_v42 = vpop.f32.mrf.mxu1  ;;  %v5426_v16 = vadd.f32 %v18753_v21, %v16815_v5  ;;  %v10036_v15 = vld [vmem:[%s18280_s3 + $0xa28] sm:$0xff]  ;;  %v17175_v10 = vld [vmem:[%s18280_s3 + $0xc40] sm:$0xff]  ;;  %v18767_v37 = vld [vmem:[#allocation17_spill] sm:$0xff] }
 0x400   : > { %v17160_v3 = vadd.f32 %v5634_v42, %v5423_v13  ;;  %v17162_v55 = vpop.f32.mrf.mxu0  ;;  %13188 = vmatprep.subr.mxu1 %v10037_v36  ;;  %13502 = vmatprep.subr.mxu0 %v17151_v39 }
 0x401   : > { %18752 = vst [vmem:[#allocation53_spill] sm:$0xff] %v17162_v55  ;;  %v12591_v18 = vpop.f32.mrf.mxu1  ;;  %13070 = vmatmul.mubr.f32.gmra.mxu1 %v16831_v14  ;;  %13503 = vmatpush3.msra.mxu0 %v17151_v39  ;;  %v18755_v14 = vld [vmem:[#allocation20_spill] sm:$0xff] }
 0x402   : > { %v17177_v29 = vadd.f32 %v12591_v18, %v5426_v16  ;;  %v17179_v5 = vpop.f32.mrf.mxu0  ;;  %13189 = vmatpush3.msra.mxu1 %v10037_v36  ;;  %13464 = vmatmul.mubr.f32.gmra.mxu0 %v8820_v24  ;;  %v5425_v13 = vadd.f32 %v18755_v14, %v16825_v45  ;;  %v18757_v16 = vld [vmem:[#allocation22_spill] sm:$0xff]  ;;  %v8823_v14 = vld [vmem:[#allocation3 + $0xdb] sm:$0xff] }
 0x403   : > { %18754 = vst [vmem:[#allocation55_spill] sm:$0xff] %v17179_v5  ;;  %13072 = vmatprep.mubr.f32.mxu1 %v16844_v38  ;;  %13466 = vmatprep.mubr.f32.mxu0 %v8821_v23  ;;  %v5644_v42 = vpop.f32.mrf.mxu1  ;;  %v5428_v18 = vadd.f32 %v18757_v16, %v16839_v41  ;;  %v8822_v24 = vld [vmem:[#allocation3 + $0xd3] sm:$0xff]  ;;  %v17199_v38 = vld [vmem:[%s18280_s3 + $0xc38] sm:$0xff] }
 0x404   : > { %v17184_v21 = vadd.f32 %v5644_v42, %v5425_v13  ;;  %v17186_v55 = vpop.f32.mrf.mxu0  ;;  %13190 = vmatprep.subr.mxu1 %v10036_v15  ;;  %13504 = vmatprep.subr.mxu0 %v17175_v10  ;;  %v10035_v45 = vld [vmem:[%s18280_s3 + $0xa20] sm:$0xff]  ;;  %v18761_v5 = vld [vmem:[#allocation13_spill] sm:$0xff] }
 0x405   : > { %18756 = vst [vmem:[#allocation58_spill] sm:$0xff] %v17186_v55  ;;  %v12594_v36 = vpop.f32.mrf.mxu1  ;;  %13073 = vmatmul.mubr.f32.gmra.mxu1 %v16855_v57  ;;  %13505 = vmatpush3.msra.mxu0 %v17175_v10  ;;  %v18759_v57 = vld [vmem:[#allocation26_spill] sm:$0xff] }
 0x406   : > { %v17201_v23 = vadd.f32 %v12594_v36, %v5428_v18  ;;  %v17203_v41 = vpop.f32.mrf.mxu0  ;;  %13191 = vmatpush3.msra.mxu1 %v10036_v15  ;;  %13467 = vmatmul.mubr.f32.gmra.mxu0 %v8822_v24  ;;  %v5427_v13 = vadd.f32 %v18759_v57, %v16849_v0  ;;  %v18762_v18 = vld [vmem:[#allocation79_spill] sm:$0xff]  ;;  %v8824_v24 = vld [vmem:[#allocation3 + $0xe3] sm:$0xff]  ;;  %v8825_v57 = vld [vmem:[#allocation3 + $0xeb] sm:$0xff] }
 0x407   : > { %18758 = vst [vmem:[#allocation60_spill] sm:$0xff] %v17203_v41  ;;  %13075 = vmatprep.mubr.f32.mxu1 %v16868_v61  ;;  %13469 = vmatprep.mubr.f32.mxu0 %v8823_v14  ;;  %v5654_v42 = vpop.f32.mrf.mxu1  ;;  %v5430_v36 = vadd.f32 %v18762_v18, %v18761_v5  ;;  %v10034_v0 = vld [vmem:[%s18280_s3 + $0xa18] sm:$0xff]  ;;  %v17223_v61 = vld [vmem:[%s18280_s3 + $0xc30] sm:$0xff] }
 0x408   : > { %v17208_v16 = vadd.f32 %v5654_v42, %v5427_v13  ;;  %v17210_v55 = vpop.f32.mrf.mxu0  ;;  %13192 = vmatprep.subr.mxu1 %v10035_v45  ;;  %13506 = vmatprep.subr.mxu0 %v17199_v38  ;;  %v18765_v13 = vld [vmem:[#allocation82_spill] sm:$0xff] }
 0x409   : > { %18760 = vst [vmem:[#allocation64_spill] sm:$0xff] %v17210_v55  ;;  %v12597_v15 = vpop.f32.mrf.mxu1  ;;  %13076 = vmatmul.mubr.f32.gmra.mxu1 %v16879_v46  ;;  %13507 = vmatpush3.msra.mxu0 %v17199_v38  ;;  %v18764_v46 = vld [vmem:[#allocation15_spill] sm:$0xff] }
 0x40a   : > { %v17225_v14 = vadd.f32 %v12597_v15, %v5430_v36  ;;  %v17227_v5 = vpop.f32.mrf.mxu0  ;;  %13193 = vmatpush3.msra.mxu1 %v10035_v45  ;;  %13470 = vmatmul.mubr.f32.gmra.mxu0 %v8824_v24  ;;  %v5429_v42 = vadd.f32 %v18765_v13, %v18764_v46  ;;  %v18768_v36 = vld [vmem:[#allocation83_spill] sm:$0xff]  ;;  %v18769_v24 = vld [vmem:[#allocation24_spill] sm:$0xff] }
 0x40b   : > { %18763 = vst [vmem:[#allocation66_spill] sm:$0xff] %v17227_v5  ;;  %13078 = vmatprep.mubr.f32.mxu1 %v16892_v43  ;;  %13472 = vmatprep.mubr.f32.mxu0 %v8825_v57  ;;  %v5664_v18 = vpop.f32.mrf.mxu1  ;;  %v5432_v15 = vadd.f32 %v18768_v36, %v18767_v37  ;;  %v8826_v5 = vld [vmem:[#allocation3 + $0xf3] sm:$0xff]  ;;  %v10033_v43 = vld [vmem:[%s18280_s3 + $0xa10] sm:$0xff] }
 0x40c   : > { %v17232_v55 = vadd.f32 %v5664_v18, %v5429_v42  ;;  %v17234_v41 = vpop.f32.mrf.mxu0  ;;  %13194 = vmatprep.subr.mxu1 %v10034_v0  ;;  %13508 = vmatprep.subr.mxu0 %v17223_v61  ;;  %v17247_v57 = vld [vmem:[%s18280_s3 + $0xc28] sm:$0xff]  ;;  %v18772_v18 = vld [vmem:[#allocation102_spill] sm:$0xff] }
 0x40d   : > { %18766 = vst [vmem:[#allocation69_spill] sm:$0xff] %v17234_v41  ;;  %v12600_v45 = vpop.f32.mrf.mxu1  ;;  %13079 = vmatmul.mubr.f32.gmra.mxu1 %v18769_v24  ;;  %13509 = vmatpush3.msra.mxu0 %v17223_v61  ;;  %v8827_v13 = vld [vmem:[#allocation3 + $0xfb] sm:$0xff] }
 0x40e   : > { %v17249_v46 = vadd.f32 %v12600_v45, %v5432_v15  ;;  %v17251_v37 = vpop.f32.mrf.mxu0  ;;  %13195 = vmatpush3.msra.mxu1 %v10034_v0  ;;  %13473 = vmatmul.mubr.f32.gmra.mxu0 %v8826_v5  ;;  %v18771_v42 = vld [vmem:[#allocation19_spill] sm:$0xff]  ;;  %v18775_v15 = vld [vmem:[#allocation86_spill] sm:$0xff]  ;;  %v8828_v5 = vld [vmem:[#allocation3 + $0x103] sm:$0xff] }
 0x40f   : > { %18770 = vst [vmem:[#allocation71_spill] sm:$0xff] %v17251_v37  ;;  %v5431_v36 = vadd.f32 %v18772_v18, %v18771_v42  ;;  %13081 = vmatprep.mubr.f32.mxu1 %v16916_v22  ;;  %13475 = vmatprep.mubr.f32.mxu0 %v8827_v13  ;;  %v5674_v24 = vpop.f32.mrf.mxu1  ;;  %v5434_v45 = vadd.f32 %v18775_v15, %v18774_v49  ;;  %v10032_v22 = vld [vmem:[%s18280_s3 + $0xa08] sm:$0xff]  ;;  %v17271_v13 = vld [vmem:[%s18280_s3 + $0xc20] sm:$0xff] }
 0x410   : > { %v17258_v20 = vpop.f32.mrf.mxu0  ;;  %13196 = vmatprep.subr.mxu1 %v10033_v43  ;;  %13510 = vmatprep.subr.mxu0 %v17247_v57  ;;  %v8829_v18 = vld [vmem:[#allocation3 + $0x10b] sm:$0xff] }
 0x411   : > { %v17256_v41 = vadd.f32 %v5674_v24, %v5431_v36  ;;  %18773 = vst [vmem:[#allocation20_spill] sm:$0xff] %v17258_v20  ;;  %v12603_v0 = vpop.f32.mrf.mxu1  ;;  %13082 = vmatmul.mubr.f32.gmra.mxu1 %v16927_v7  ;;  %13511 = vmatpush3.msra.mxu0 %v17247_v57  ;;  %v18777_v7 = vld [vmem:[#allocation31_spill] sm:$0xff]  ;;  %v18778_v36 = vld [vmem:[#allocation37_spill] sm:$0xff] }
 0x412   : > { %v17273_v42 = vadd.f32 %v12603_v0, %v5434_v45  ;;  %v17275_v49 = vpop.f32.mrf.mxu0  ;;  %13197 = vmatpush3.msra.mxu1 %v10033_v43  ;;  %13476 = vmatmul.mubr.f32.gmra.mxu0 %v8828_v5  ;;  %v5433_v24 = vadd.f32 %v18778_v36, %v18777_v7  ;;  %v18780_v45 = vld [vmem:[#allocation87_spill] sm:$0xff]  ;;  %v18781_v5 = vld [vmem:[#allocation101_spill] sm:$0xff] }
 0x413   : > { %18776 = vst [vmem:[#allocation22_spill] sm:$0xff] %v17275_v49  ;;  %13084 = vmatprep.mubr.f32.mxu1 %v16940_v62  ;;  %13478 = vmatprep.mubr.f32.mxu0 %v8829_v18  ;;  %v5684_v15 = vpop.f32.mrf.mxu1  ;;  %v5436_v0 = vadd.f32 %v18780_v45, %v16935_v26  ;;  %v8830_v49 = vld [vmem:[#allocation3 + $0x113] sm:$0xff]  ;;  %v17295_v18 = vld [vmem:[%s18280_s3 + $0xc18] sm:$0xff]  ;;  %v8831_v36 = vld [vmem:[#allocation3 + $0x11b] sm:$0xff] }
 0x414   : > { %v17280_v20 = vadd.f32 %v5684_v15, %v5433_v24  ;;  %v17282_v37 = vpop.f32.mrf.mxu0  ;;  %13198 = vmatprep.subr.mxu1 %v10032_v22  ;;  %13512 = vmatprep.subr.mxu0 %v17271_v13  ;;  %v10031_v62 = vld [vmem:[%s18280_s3 + $0xa00] sm:$0xff]  ;;  %v18783_v24 = vld [vmem:[#allocation103_spill] sm:$0xff]  ;;  %v18784_v15 = vld [vmem:[#allocation88_spill] sm:$0xff] }
 0x415   : > { %18779 = vst [vmem:[#allocation26_spill] sm:$0xff] %v17282_v37  ;;  %v12606_v43 = vpop.f32.mrf.mxu1  ;;  %13085 = vmatmul.mubr.f32.gmra.mxu1 %v18781_v5  ;;  %13513 = vmatpush3.msra.mxu0 %v17271_v13  ;;  %v5435_v45 = vadd.f32 %v18784_v15, %v18783_v24  ;;  %v7306_v5 = vld [vmem:[#allocation3 + $0x131] sm:$0xf]  ;;  %v18788_v24 = vld [vmem:[#allocation89_spill] sm:$0xff] }
 0x416   : > { %v17297_v7 = vadd.f32 %v12606_v43, %v5436_v0  ;;  %v17299_v26 = vpop.f32.mrf.mxu0  ;;  %13199 = vmatpush3.msra.mxu1 %v10032_v22  ;;  %13479 = vmatmul.mubr.f32.gmra.mxu0 %v8830_v49  ;;  %v10078_v22 = vld [vmem:[%s18280_s3 + $0xb78] sm:$0xff] }
 0x417   : > { %18782 = vst [vmem:[#allocation13_spill] sm:$0xff] %v17299_v26  ;;  %13481 = vmatprep.mubr.f32.mxu0 %v8831_v36  ;;  %v5694_v37 = vpop.f32.mrf.mxu1  ;;  %13087 = vmatprep.mubr.f32.mxu1 %v16954_v59  ;;  %v8833_v0 = vld [vmem:[#allocation3 + $0x12b] sm:$0xff]  ;;  %v17316_v59 = vld [vmem:[%s18280_s3 + $0xc10] sm:$0xff]  ;;  %v18787_v36 = vld [vmem:[#allocation39_spill] sm:$0xff] }
 0x418   : > { %v17304_v35 = vadd.f32 %v5694_v37, %v5435_v45  ;;  %v17306_v2 = vpop.f32.mrf.mxu0  ;;  %13200 = vmatprep.subr.mxu1 %v10031_v62  ;;  %13514 = vmatprep.subr.mxu0 %v17295_v18  ;;  %v7887_v43 = vld [vmem:[#allocation3 + $0x48] sm:$0xff]  ;;  %v5437_v15 = vadd.f32 %v18788_v24, %v18787_v36  ;;  %v18790_v26 = vld [vmem:[#allocation90_spill] sm:$0xff] }
 0x419   : > { %18785 = vst [vmem:[#allocation79_spill] sm:$0xff] %v17306_v2  ;;  %v12609_v49 = vpop.f32.mrf.mxu1  ;;  %13088 = vmatmul.mubr.f32.gmra.mxu1 %v7306_v5  ;;  %13515 = vmatpush3.msra.mxu0 %v17295_v18  ;;  %v8834_v5 = vld [vmem:[#allocation3 + $0x133] sm:$0xff]  ;;  %v6020_v17 = vadd.f32 %v18790_v26, %v16974_v32 }
 0x41a   : > { %v17318_v37 = vpop.f32.mrf.mxu0  ;;  %13201 = vmatpush3.msra.mxu1 %v10031_v62  ;;  %13482 = vmatmul.mubr.f32.gmra.mxu0 %v8832_v58  ;;  %v10077_v58 = vld [vmem:[%s18280_s3 + $0xb70] sm:$0xff]  ;;  %v18792_v32 = vld [vmem:[#allocation91_spill] sm:$0xff] }
 0x41b   : > { %18786 = vst [vmem:[#allocation15_spill] sm:$0xff] %v17318_v37  ;;  %13202 = vmatprep.mubr.f32.mxu1 %v7887_v43  ;;  %v5704_v45 = vpop.f32.mrf.mxu1  ;;  %13330 = vmatprep.subr.mxu1 %v10078_v22  ;;  %v8835_v43 = vld [vmem:[#allocation3 + $0x13b] sm:$0xff]  ;;  %v6019_v26 = vadd.f32 %v18792_v32, %v16984_v63  ;;  %v7891_v32 = vld [vmem:[#allocation3 + $0x68] sm:$0xff] }
 0x41c   : > { %v17322_v49 = vadd.f32 %v5704_v45, %v5437_v15  ;;  %v17324_v2 = vpop.f32.mrf.mxu0  ;;  %13484 = vmatprep.mubr.f32.mxu0 %v8833_v0  ;;  %13516 = vmatprep.subr.mxu0 %v17316_v59  ;;  %v7889_v0 = vld [vmem:[#allocation3 + $0x58] sm:$0xff]  ;;  %v8836_v45 = vld [vmem:[#allocation3 + $0x143] sm:$0xf] }
 0x41d   : > { %18789 = vst [vmem:[#allocation82_spill] sm:$0xff] %v17324_v2  ;;  %v12724_v62 = vpop.f32.mrf.mxu1  ;;  %13203 = vmatmul.mubr.f32.vlgmr.msra.gmra.mxu1 %v7888_v60  ;;  %13517 = vmatpush3.msra.mxu0 %v17316_v59  ;;  %v17342_v15 = vld [vmem:[%s18280_s3 + $0xc08] sm:$0xff] }
 0x41e   : > { %v17333_v36 = vadd.f32 %v12724_v62, %v6020_v17  ;;  %v17335_v24 = vpop.f32.mrf.mxu0  ;;  %13331 = vmatpush3.msra.mxu1 %v10078_v22  ;;  %13485 = vmatmul.mubr.f32.gmra.mxu0 %v8834_v5  ;;  %v18794_v22 = vld [vmem:[#allocation92_spill] sm:$0xff] }
 0x41f   : > { %18791 = vst [vmem:[#allocation17_spill] sm:$0xff] %v17335_v24  ;;  %13205 = vmatprep.mubr.f32.mxu1 %v7889_v0  ;;  %v6166_v60 = vpop.f32.mrf.mxu1  ;;  %13332 = vmatprep.subr.mxu1 %v10077_v58  ;;  %v6022_v5 = vadd.f32 %v18794_v22, %v16997_v47  ;;  %v7890_v62 = vld [vmem:[#allocation3 + $0x60] sm:$0xff]  ;;  %v17354_v0 = vld [vmem:[%s18280_s3 + $0xc00] sm:$0xff] }
 0x420   : > { %v17344_v2 = vadd.f32 %v6166_v60, %v6019_v26  ;;  %v17346_v17 = vpop.f32.mrf.mxu0  ;;  %13487 = vmatprep.mubr.f32.mxu0 %v8835_v43  ;;  %13333 = vmatpush3.msra.mxu1 %v10077_v58  ;;  %v10076_v26 = vld [vmem:[%s18280_s3 + $0xb68] sm:$0xff]  ;;  %v9111_v47 = vld [vmem:[#allocation3 + $0x4c] sm:$0xff] }
 0x421   : > { %18793 = vst [vmem:[#allocation83_spill] sm:$0xff] %v17346_v17  ;;  %v12727_v63 = vpop.f32.mrf.mxu1  ;;  %13206 = vmatmul.mubr.f32.gmra.mxu1 %v7890_v62  ;;  %13518 = vmatprep.subr.mxu0 %v17342_v15  ;;  %v18795_v58 = vld [vmem:[#allocation93_spill] sm:$0xff] }
 0x422   : > { %v17359_v43 = vadd.f32 %v12727_v63, %v6022_v5  ;;  %v13009_v60 = vpop.f32.mrf.mxu0  ;;  %13488 = vmatmul.mubr.f32.gmra.mxu0 %v8836_v45  ;;  %13208 = vmatprep.mubr.f32.mxu1 %v7891_v32  ;;  %v6021_v22 = vadd.f32 %v18795_v58, %v17002_v50  ;;  %v18797_v5 = vld [vmem:[#allocation94_spill] sm:$0xff] }
 0x423   : > { %13519 = vmatpush3.msra.mxu0 %v17342_v15  ;;  %13522 = vmatprep.mubr.f32.mxu0 %v9111_v47  ;;  %v6176_v62 = vpop.f32.mrf.mxu1  ;;  %v6024_v63 = vadd.f32 %v18797_v5, %v17017_v51  ;;  %v7892_v45 = vld [vmem:[#allocation3 + $0x70] sm:$0xff]  ;;  %v18799_v51 = vld [vmem:[#allocation95_spill] sm:$0xff] }
 0x424   : > { %v17364_v17 = vadd.f32 %v6176_v62, %v6021_v22  ;;  %v17366_v24 = vpop.f32.mrf.mxu0  ;;  %13520 = vmatprep.subr.mxu0 %v17354_v0  ;;  %13334 = vmatprep.subr.mxu1 %v10076_v26  ;;  %v9112_v50 = vld [vmem:[#allocation3 + $0x54] sm:$0xff]  ;;  %v9113_v62 = vld [vmem:[#allocation3 + $0x5c] sm:$0xff]  ;;  %v6023_v5 = vadd.f32 %v18799_v51, %v17024_v4 }
 0x425   : > { %18796 = vst [vmem:[#allocation24_spill] sm:$0xff] %v17366_v24  ;;  %13521 = vmatpush3.msra.mxu0 %v17354_v0  ;;  %v12730_v32 = vpop.f32.mrf.mxu1  ;;  %13209 = vmatmul.mubr.f32.gmra.mxu1 %v7892_v45  ;;  %v10075_v60 = vld [vmem:[%s18280_s3 + $0xb60] sm:$0xff]  ;;  %v7893_v22 = vld [vmem:[#allocation3 + $0x78] sm:$0xff] }
 0x426   : > { %v17375_v47 = vadd.f32 %v12730_v32, %v6024_v63  ;;  %v17377_v58 = vpop.f32.mrf.mxu0  ;;  %13335 = vmatpush3.msra.mxu1 %v10076_v26  ;;  %13523 = vmatmul.mubr.f32.vlgmr.msra.gmra.mxu0 %v9112_v50  ;;  %v18801_v63 = vld [vmem:[#allocation96_spill] sm:$0xff]  ;;  %v10074_v26 = vld [vmem:[%s18280_s3 + $0xb58] sm:$0xff] }
 0x427   : > { %18798 = vst [vmem:[#allocation19_spill] sm:$0xff] %v17377_v58  ;;  %13211 = vmatprep.mubr.f32.mxu1 %v7893_v22  ;;  %13525 = vmatprep.mubr.f32.mxu0 %v9113_v62  ;;  %v6186_v24 = vpop.f32.mrf.mxu1  ;;  %v6026_v32 = vadd.f32 %v18801_v63, %v17039_v11  ;;  %v9114_v58 = vld [vmem:[#allocation3 + $0x64] sm:$0xff] }
 0x428   : > { %v17381_v45 = vadd.f32 %v6186_v24, %v6023_v5  ;;  %v17383_v37 = vpop.f32.mrf.mxu0  ;;  %13336 = vmatprep.subr.mxu1 %v10075_v60  ;;  %v7895_v24 = vld [vmem:[#allocation3 + $0x88] sm:$0xff]  ;;  %v10073_v11 = vld [vmem:[%s18280_s3 + $0xb50] sm:$0xff] }
 0x429   : > { %18800 = vst [vmem:[#allocation102_spill] sm:$0xff] %v17383_v37  ;;  %v12733_v50 = vpop.f32.mrf.mxu1  ;;  %13212 = vmatmul.mubr.f32.gmra.mxu1 %v7894_v48  ;;  %v18803_v62 = vld [vmem:[#allocation97_spill] sm:$0xff] }
 0x42a   : > { %v17390_v4 = vadd.f32 %v12733_v50, %v6026_v32  ;;  %v17392_v22 = vpop.f32.mrf.mxu0  ;;  %13337 = vmatpush3.msra.mxu1 %v10075_v60  ;;  %13526 = vmatmul.mubr.f32.gmra.mxu0 %v9114_v58  ;;  %v6025_v51 = vadd.f32 %v18803_v62, %v17046_v44  ;;  %v18805_v32 = vld [vmem:[#allocation98_spill] sm:$0xff]  ;;  %v10072_v44 = vld [vmem:[%s18280_s3 + $0xb48] sm:$0xff] }
 0x42b   : > { %18802 = vst [vmem:[#allocation27_spill] sm:$0xff] %v17392_v22  ;;  %13214 = vmatprep.mubr.f32.mxu1 %v7895_v24  ;;  %v6196_v5 = vpop.f32.mrf.mxu1  ;;  %13338 = vmatprep.subr.mxu1 %v10074_v26  ;;  %v6028_v50 = vadd.f32 %v18805_v32, %v17059_v54  ;;  %v7896_v60 = vld [vmem:[#allocation3 + $0x90] sm:$0xff]  ;;  %v7897_v62 = vld [vmem:[#allocation3 + $0x98] sm:$0xff] }
 0x42c   : > { %v17399_v63 = vadd.f32 %v6196_v5, %v6025_v51  ;;  %v17401_v48 = vpop.f32.mrf.mxu0  ;;  %13339 = vmatpush3.msra.mxu1 %v10074_v26  ;;  %v18806_v51 = vld [vmem:[#allocation99_spill] sm:$0xff]  ;;  %v10071_v54 = vld [vmem:[%s18280_s3 + $0xb40] sm:$0xff] }
 0x42d   : > { %18804 = vst [vmem:[#allocation86_spill] sm:$0xff] %v17401_v48  ;;  %v12736_v58 = vpop.f32.mrf.mxu1  ;;  %13215 = vmatmul.mubr.f32.gmra.mxu1 %v7896_v60  ;;  %13340 = vmatprep.subr.mxu1 %v10073_v11  ;;  %v6027_v5 = vadd.f32 %v18806_v51, %v17066_v12  ;;  %v7898_v48 = vld [vmem:[#allocation3 + $0xa0] sm:$0xff]  ;;  %v10070_v12 = vld [vmem:[%s18280_s3 + $0xb38] sm:$0xff] }
 0x42e   : > { %v17408_v24 = vadd.f32 %v12736_v58, %v6028_v50  ;;  %v17410_v22 = vpop.f32.mrf.mxu0  ;;  %13217 = vmatprep.mubr.f32.mxu1 %v7897_v62  ;;  %13341 = vmatpush3.msra.mxu1 %v10073_v11  ;;  %v18808_v50 = vld [vmem:[#allocation100_spill] sm:$0xff]  ;;  %v7899_v62 = vld [vmem:[#allocation3 + $0xa8] sm:$0xff] }
 0x42f   : > { %v6206_v26 = vpop.f32.mrf.mxu1  ;;  %13342 = vmatprep.subr.mxu1 %v10072_v44  ;;  %v6030_v58 = vadd.f32 %v18808_v50, %v17081_v31  ;;  %v10069_v31 = vld [vmem:[%s18280_s3 + $0xb30] sm:$0xff] }
 0x430   : > { %v17417_v32 = vadd.f32 %v6206_v26, %v6027_v5  ;;  %v17419_v60 = vpop.f32.mrf.mxu0  ;;  %13343 = vmatpush3.msra.mxu1 %v10072_v44  ;;  %v18810_v5 = vld [vmem:[#allocation51_spill] sm:$0xff] }
 0x431   : > { %18807 = vst [vmem:[#allocation31_spill] sm:$0xff] %v17419_v60  ;;  %v12739_v11 = vpop.f32.mrf.mxu1  ;;  %13218 = vmatmul.mubr.f32.gmra.mxu1 %v7898_v48  ;;  %13344 = vmatprep.subr.mxu1 %v10071_v54  ;;  %v6029_v26 = vadd.f32 %v18810_v5, %v17088_v6  ;;  %v7900_v60 = vld [vmem:[#allocation3 + $0xb0] sm:$0xff]  ;;  %v10068_v6 = vld [vmem:[%s18280_s3 + $0xb28] sm:$0xff] }
 0x432   : > { %v17426_v51 = vadd.f32 %v12739_v11, %v6030_v58  ;;  %v17428_v37 = vpop.f32.mrf.mxu0  ;;  %13220 = vmatprep.mubr.f32.mxu1 %v7899_v62  ;;  %13345 = vmatpush3.msra.mxu1 %v10071_v54  ;;  %v18812_v58 = vld [vmem:[#allocation57_spill] sm:$0xff]  ;;  %v7901_v62 = vld [vmem:[#allocation3 + $0xb8] sm:$0xff] }
 0x433   : > { %18809 = vst [vmem:[#allocation37_spill] sm:$0xff] %v17428_v37  ;;  %v6216_v44 = vpop.f32.mrf.mxu1  ;;  %13346 = vmatprep.subr.mxu1 %v10070_v12  ;;  %v6032_v11 = vadd.f32 %v18812_v58, %v17105_v40  ;;  %v10067_v40 = vld [vmem:[%s18280_s3 + $0xb20] sm:$0xff] }
 0x434   : > { %v17435_v50 = vadd.f32 %v6216_v44, %v6029_v26  ;;  %v17437_v48 = vpop.f32.mrf.mxu0  ;;  %13347 = vmatpush3.msra.mxu1 %v10070_v12  ;;  %v18814_v26 = vld [vmem:[#allocation23_spill] sm:$0xff] }
 0x435   : > { %18811 = vst [vmem:[#allocation87_spill] sm:$0xff] %v17437_v48  ;;  %v12742_v54 = vpop.f32.mrf.mxu1  ;;  %13221 = vmatmul.mubr.f32.gmra.mxu1 %v7900_v60  ;;  %13348 = vmatprep.subr.mxu1 %v10069_v31  ;;  %v6031_v44 = vadd.f32 %v18814_v26, %v17112_v34  ;;  %v7902_v48 = vld [vmem:[#allocation3 + $0xc0] sm:$0xff]  ;;  %v10066_v34 = vld [vmem:[%s18280_s3 + $0xb18] sm:$0xff] }
 0x436   : > { %v17444_v5 = vadd.f32 %v12742_v54, %v6032_v11  ;;  %v17446_v37 = vpop.f32.mrf.mxu0  ;;  %13223 = vmatprep.mubr.f32.mxu1 %v7901_v62  ;;  %13349 = vmatpush3.msra.mxu1 %v10069_v31  ;;  %v18816_v11 = vld [vmem:[#allocation61_spill] sm:$0xff] }
 0x437   : > { %18813 = vst [vmem:[#allocation101_spill] sm:$0xff] %v17446_v37  ;;  %v6226_v12 = vpop.f32.mrf.mxu1  ;;  %13350 = vmatprep.subr.mxu1 %v10068_v6  ;;  %v6034_v54 = vadd.f32 %v18816_v11, %v17129_v30  ;;  %v7903_v62 = vld [vmem:[#allocation3 + $0xc8] sm:$0xff]  ;;  %v10065_v30 = vld [vmem:[%s18280_s3 + $0xb10] sm:$0xff] }
 0x438   : > { %v17453_v58 = vadd.f32 %v6226_v12, %v6031_v44  ;;  %v17455_v60 = vpop.f32.mrf.mxu0  ;;  %13351 = vmatpush3.msra.mxu1 %v10068_v6  ;;  %v18818_v44 = vld [vmem:[#allocation56_spill] sm:$0xff] }
 0x439   : > { %18815 = vst [vmem:[#allocation103_spill] sm:$0xff] %v17455_v60  ;;  %v12745_v31 = vpop.f32.mrf.mxu1  ;;  %13224 = vmatmul.mubr.f32.gmra.mxu1 %v7902_v48  ;;  %13352 = vmatprep.subr.mxu1 %v10067_v40  ;;  %v6033_v12 = vadd.f32 %v18818_v44, %v17136_v33  ;;  %v7904_v60 = vld [vmem:[#allocation3 + $0xd0] sm:$0xff]  ;;  %v10064_v33 = vld [vmem:[%s18280_s3 + $0xb08] sm:$0xff] }
 0x43a   : > { %v17462_v26 = vadd.f32 %v12745_v31, %v6034_v54  ;;  %v17464_v37 = vpop.f32.mrf.mxu0  ;;  %13226 = vmatprep.mubr.f32.mxu1 %v7903_v62  ;;  %13353 = vmatpush3.msra.mxu1 %v10067_v40  ;;  %v18820_v54 = vld [vmem:[#allocation54_spill] sm:$0xff]  ;;  %v7905_v62 = vld [vmem:[#allocation3 + $0xd8] sm:$0xff] }
 0x43b   : > { %18817 = vst [vmem:[#allocation88_spill] sm:$0xff] %v17464_v37  ;;  %v6236_v6 = vpop.f32.mrf.mxu1  ;;  %13354 = vmatprep.subr.mxu1 %v10066_v34  ;;  %v6036_v31 = vadd.f32 %v18820_v54, %v17153_v8  ;;  %v10063_v8 = vld [vmem:[%s18280_s3 + $0xb00] sm:$0xff] }
 0x43c   : > { %v17471_v11 = vadd.f32 %v6236_v6, %v6033_v12  ;;  %v17473_v48 = vpop.f32.mrf.mxu0  ;;  %13355 = vmatpush3.msra.mxu1 %v10066_v34  ;;  %v18822_v12 = vld [vmem:[#allocation63_spill] sm:$0xff] }
 0x43d   : > { %18819 = vst [vmem:[#allocation39_spill] sm:$0xff] %v17473_v48  ;;  %v12748_v40 = vpop.f32.mrf.mxu1  ;;  %13227 = vmatmul.mubr.f32.gmra.mxu1 %v7904_v60  ;;  %13356 = vmatprep.subr.mxu1 %v10065_v30  ;;  %v6035_v6 = vadd.f32 %v18822_v12, %v17160_v3  ;;  %v7906_v48 = vld [vmem:[#allocation3 + $0xe0] sm:$0xff]  ;;  %v18826_v12 = vld [vmem:[#allocation67_spill] sm:$0xff] }
 0x43e   : > { %v17480_v44 = vadd.f32 %v12748_v40, %v6036_v31  ;;  %v17482_v37 = vpop.f32.mrf.mxu0  ;;  %13229 = vmatprep.mubr.f32.mxu1 %v7905_v62  ;;  %13357 = vmatpush3.msra.mxu1 %v10065_v30  ;;  %v18824_v31 = vld [vmem:[#allocation25_spill] sm:$0xff] }
 0x43f   : > { %18821 = vst [vmem:[#allocation89_spill] sm:$0xff] %v17482_v37  ;;  %v6246_v34 = vpop.f32.mrf.mxu1  ;;  %13358 = vmatprep.subr.mxu1 %v10064_v33  ;;  %v6038_v40 = vadd.f32 %v18824_v31, %v17177_v29  ;;  %v7907_v37 = vld [vmem:[#allocation3 + $0xe8] sm:$0xff]  ;;  %v7908_v31 = vld [vmem:[#allocation3 + $0xf0] sm:$0xff] }
 0x440   : > { %v17489_v54 = vadd.f32 %v6246_v34, %v6035_v6  ;;  %v17491_v60 = vpop.f32.mrf.mxu0  ;;  %13359 = vmatpush3.msra.mxu1 %v10064_v33  ;;  %v6037_v6 = vadd.f32 %v18826_v12, %v17184_v21  ;;  %v18830_v21 = vld [vmem:[#allocation59_spill] sm:$0xff] }
 0x441   : > { %18823 = vst [vmem:[#allocation90_spill] sm:$0xff] %v17491_v60  ;;  %v12751_v62 = vpop.f32.mrf.mxu1  ;;  %13230 = vmatmul.mubr.f32.gmra.mxu1 %v7906_v48  ;;  %13360 = vmatprep.subr.mxu1 %v10063_v8  ;;  %v18828_v48 = vld [vmem:[#allocation62_spill] sm:$0xff] }
 0x442   : > { %v17495_v3 = vadd.f32 %v12751_v62, %v6038_v40  ;;  %v17497_v30 = vpop.f32.mrf.mxu0  ;;  %13232 = vmatprep.mubr.f32.mxu1 %v7907_v37  ;;  %13361 = vmatpush3.msra.mxu1 %v10063_v8  ;;  %v6040_v33 = vadd.f32 %v18828_v48, %v17201_v23  ;;  %v7909_v62 = vld [vmem:[#allocation3 + $0xf8] sm:$0xff]  ;;  %v6039_v8 = vadd.f32 %v18830_v21, %v17208_v16  ;;  %v7910_v48 = vld [vmem:[#allocation3 + $0x100] sm:$0xff] }
 0x443   : > { %18825 = vst [vmem:[#allocation91_spill] sm:$0xff] %v17497_v30  ;;  %v6256_v34 = vpop.f32.mrf.mxu1  ;;  %13570 = vmatprep.subr.mxu1 %v17015_v25 }
 0x444   : > { %v17502_v60 = vadd.f32 %v6256_v34, %v6037_v6  ;;  %v17504_v29 = vpop.f32.mrf.mxu0  ;;  %v18832_v34 = vld [vmem:[#allocation73_spill] sm:$0xff] }
 0x445   : > { %18827 = vst [vmem:[#allocation92_spill] sm:$0xff] %v17504_v29  ;;  %v12754_v40 = vpop.f32.mrf.mxu1  ;;  %13233 = vmatmul.mubr.f32.gmra.mxu1 %v7908_v31  ;;  %v6042_v23 = vadd.f32 %v18832_v34, %v17225_v14  ;;  %v7911_v31 = vld [vmem:[#allocation3 + $0x108] sm:$0xff]  ;;  %v7912_v34 = vld [vmem:[#allocation3 + $0x110] sm:$0xff] }
 0x446   : > { %v17508_v30 = vadd.f32 %v12754_v40, %v6040_v33  ;;  %v17510_v37 = vpop.f32.mrf.mxu0  ;;  %13235 = vmatprep.mubr.f32.mxu1 %v7909_v62  ;;  %v18834_v62 = vld [vmem:[#allocation65_spill] sm:$0xff] }
 0x447   : > { %18829 = vst [vmem:[#allocation93_spill] sm:$0xff] %v17510_v37  ;;  %v6266_v25 = vpop.f32.mrf.mxu1  ;;  %v6041_v16 = vadd.f32 %v18834_v62, %v17232_v55 }
 0x448   : > { %v17514_v12 = vadd.f32 %v6266_v25, %v6039_v8  ;;  %v17516_v6 = vpop.f32.mrf.mxu0 }
 0x449   : > { %18831 = vst [vmem:[#allocation94_spill] sm:$0xff] %v17516_v6  ;;  %v12757_v29 = vpop.f32.mrf.mxu1  ;;  %13236 = vmatmul.mubr.f32.gmra.mxu1 %v7910_v48  ;;  %v18836_v6 = vld [vmem:[#allocation77_spill] sm:$0xff]  ;;  %v7913_v48 = vld [vmem:[#allocation3 + $0x118] sm:$0xff] }
 0x44a   : > { %v17520_v33 = vadd.f32 %v12757_v29, %v6042_v23  ;;  %v17522_v40 = vpop.f32.mrf.mxu0  ;;  %13238 = vmatprep.mubr.f32.mxu1 %v7911_v31  ;;  %v6044_v14 = vadd.f32 %v18836_v6, %v17249_v46  ;;  %v18838_v31 = vld [vmem:[#allocation75_spill] sm:$0xff] }
 0x44b   : > { %18833 = vst [vmem:[#allocation95_spill] sm:$0xff] %v17522_v40  ;;  %v6276_v21 = vpop.f32.mrf.mxu1  ;;  %v6043_v55 = vadd.f32 %v18838_v31, %v17256_v41  ;;  %v13616_v40 = vld [vmem:[#allocation3] sm:$0xff] }
 0x44c   : > { %v17526_v8 = vadd.f32 %v6276_v21, %v6041_v16  ;;  %v17528_v25 = vpop.f32.mrf.mxu0 }
 0x44d   : > { %18835 = vst [vmem:[#allocation96_spill] sm:$0xff] %v17528_v25  ;;  %v12760_v37 = vpop.f32.mrf.mxu1  ;;  %13239 = vmatmul.mubr.f32.gmra.mxu1 %v7912_v34  ;;  %v18840_v25 = vld [vmem:[#allocation68_spill] sm:$0xff] }
 0x44e   : > { %v17532_v29 = vadd.f32 %v12760_v37, %v6044_v14  ;;  %v17534_v23 = vpop.f32.mrf.mxu0  ;;  %13241 = vmatprep.mubr.f32.mxu1 %v7913_v48  ;;  %v6046_v46 = vadd.f32 %v18840_v25, %v17273_v42  ;;  %v18842_v14 = vld [vmem:[#allocation28_spill] sm:$0xff] }
 0x44f   : > { %18837 = vst [vmem:[#allocation97_spill] sm:$0xff] %v17534_v23  ;;  %v6286_v62 = vpop.f32.mrf.mxu1  ;;  %v6045_v48 = vadd.f32 %v18842_v14, %v17280_v20  ;;  %v7918_v20 = vld [vmem:[#allocation3 + $0x140] sm:$0xf] }
 0x450   : > { %v17538_v16 = vadd.f32 %v6286_v62, %v6043_v55  ;;  %v17540_v21 = vpop.f32.mrf.mxu0  ;;  %v18844_v62 = vld [vmem:[#allocation70_spill] sm:$0xff] }
 0x451   : > { %18839 = vst [vmem:[#allocation98_spill] sm:$0xff] %v17540_v21  ;;  %v12763_v6 = vpop.f32.mrf.mxu1  ;;  %13242 = vmatmul.mubr.f32.gmra.mxu1 %v13616_v40  ;;  %v6048_v21 = vadd.f32 %v18844_v62, %v17297_v7 }
 0x452   : > { %v17544_v34 = vadd.f32 %v12763_v6, %v6046_v46  ;;  %v17546_v37 = vpop.f32.mrf.mxu0  ;;  %13244 = vmatprep.mubr.f32.mxu1 %v13616_v40  ;;  %v18846_v6 = vld [vmem:[#allocation30_spill] sm:$0xff] }
 0x453   : > { %18841 = vst [vmem:[#allocation99_spill] sm:$0xff] %v17546_v37  ;;  %v6296_v41 = vpop.f32.mrf.mxu1  ;;  %v6047_v37 = vadd.f32 %v18846_v6, %v17304_v35  ;;  %v8500_v6 = vld [vmem:[#allocation3 + $0x52] sm:$0xff] }
 0x454   : > { %v17550_v31 = vadd.f32 %v6296_v41, %v6045_v48  ;;  %v17552_v55 = vpop.f32.mrf.mxu0 }
 0x455   : > { %18843 = vst [vmem:[#allocation100_spill] sm:$0xff] %v17552_v55  ;;  %v12766_v42 = vpop.f32.mrf.mxu1  ;;  %13245 = vmatmul.mubr.f32.gmra.mxu1 %v13616_v40  ;;  %v8499_v55 = vld [vmem:[#allocation3 + $0x4a] sm:$0xff] }
 0x456   : > { %v17556_v25 = vadd.f32 %v12766_v42, %v6048_v21  ;;  %v17558_v46 = vpop.f32.mrf.mxu0  ;;  %13247 = vmatprep.mubr.f32.mxu1 %v13616_v40  ;;  %v18848_v21 = vld [vmem:[#allocation72_spill] sm:$0xff]  ;;  %v18850_v40 = vld [vmem:[#allocation34_spill] sm:$0xff] }
 0x457   : > { %18845 = vst [vmem:[#allocation51_spill] sm:$0xff] %v17558_v46  ;;  %v6306_v14 = vpop.f32.mrf.mxu1  ;;  %v6049_v62 = vadd.f32 %v18848_v21, %v17322_v49  ;;  %v13617_v49 = vld [vmem:[%s18280_s3 + $0xc78] sm:$0xff] }
 0x458   : > { %v17562_v23 = vadd.f32 %v6306_v14, %v6047_v37  ;;  %v17564_v48 = vpop.f32.mrf.mxu0  ;;  %v6632_v37 = vadd.f32 %v18850_v40, %v17333_v36  ;;  %v13618_v36 = vld [vmem:[%s18280_s3 + $0xc70] sm:$0xff] }
 0x459   : > { %18847 = vst [vmem:[#allocation57_spill] sm:$0xff] %v17564_v48  ;;  %v12769_v41 = vpop.f32.mrf.mxu1  ;;  %13248 = vmatmul.mubr.f32.gmra.mxu1 %v7918_v20 }
 0x45a   : > { %v17566_v7 = vpop.f32.mrf.mxu0  ;;  %13362 = vmatprep.mubr.f32.mxu1 %v8499_v55  ;;  %v8501_v41 = vld [vmem:[#allocation3 + $0x5a] sm:$0xff] }
 0x45b   : > { %v6316_v42 = vpop.f32.mrf.mxu1  ;;  %v18852_v55 = vld [vmem:[#allocation32_spill] sm:$0xff] }
 0x45c   : > { %v17570_v46 = vadd.f32 %v6316_v42, %v6049_v62  ;;  %v17572_v35 = vpop.f32.mrf.mxu0  ;;  %v6631_v21 = vadd.f32 %v18852_v55, %v17344_v2  ;;  %v13619_v2 = vld [vmem:[%s18280_s3 + $0xc68] sm:$0xff] }
 0x45d   : > { %18849 = vst [vmem:[#allocation23_spill] sm:$0xff] %v17572_v35  ;;  %v12884_v14 = vpop.f32.mrf.mxu1  ;;  %13363 = vmatmul.mubr.f32.vlgmr.msra.gmra.mxu1 %v8500_v6  ;;  %v8504_v35 = vld [vmem:[#allocation3 + $0x72] sm:$0xff] }
 0x45e   : > { %v17576_v20 = vadd.f32 %v12884_v14, %v6632_v37  ;;  %v17578_v48 = vpop.f32.mrf.mxu0  ;;  %13586 = vmatpush3.msra.mxu1 %v13617_v49  ;;  %13365 = vmatprep.mubr.f32.mxu1 %v8501_v41  ;;  %v18854_v37 = vld [vmem:[#allocation74_spill] sm:$0xff]  ;;  %v8502_v14 = vld [vmem:[#allocation3 + $0x62] sm:$0xff] }
 0x45f   : > { %18851 = vst [vmem:[#allocation61_spill] sm:$0xff] %v17578_v48  ;;  %v6778_v62 = vpop.f32.mrf.mxu1  ;;  %13571 = vmatprep.subr.mxu1 %v13618_v36  ;;  %v6634_v6 = vadd.f32 %v18854_v37, %v17359_v43  ;;  %v8503_v41 = vld [vmem:[#allocation3 + $0x6a] sm:$0xff] }
 0x460   : > { %v17588_v42 = vadd.f32 %v6778_v62, %v6631_v21  ;;  %v17590_v40 = vpop.f32.mrf.mxu0  ;;  %13587 = vmatpush3.msra.mxu1 %v13618_v36  ;;  %v18855_v21 = vld [vmem:[#allocation36_spill] sm:$0xff]  ;;  %v18856_v37 = vld [vmem:[#allocation85_spill] sm:$0xff] }
 0x461   : > { %18853 = vst [vmem:[#allocation56_spill] sm:$0xff] %v17590_v40  ;;  %v12887_v49 = vpop.f32.mrf.mxu1  ;;  %13366 = vmatmul.mubr.f32.gmra.mxu1 %v8502_v14  ;;  %13572 = vmatprep.subr.mxu1 %v13619_v2  ;;  %v6633_v62 = vadd.f32 %v18855_v21, %v17364_v17  ;;  %v6636_v14 = vadd.f32 %v18856_v37, %v17375_v47 }
 0x462   : > { %v17597_v55 = vadd.f32 %v12887_v49, %v6634_v6  ;;  %v13169_v48 = vpop.f32.mrf.mxu0  ;;  %13368 = vmatprep.mubr.f32.mxu1 %v8503_v41  ;;  %13588 = vmatpush3.msra.mxu1 %v13619_v2 }
 0x463   : > { %v6788_v40 = vpop.f32.mrf.mxu1  ;;  %13573 = vmatprep.subr.mxu1 %v17079_v1  ;;  %v8505_v48 = vld [vmem:[#allocation3 + $0x7a] sm:$0xff] }
 0x464   : > { %v17602_v43 = vadd.f32 %v6788_v40, %v6633_v62  ;;  %v17604_v36 = vpop.f32.mrf.mxu0  ;;  %13589 = vmatpush3.msra.mxu1 %v17079_v1  ;;  %v18857_v40 = vld [vmem:[#allocation80_spill] sm:$0xff] }
 0x465   : > { %v12890_v6 = vpop.f32.mrf.mxu1  ;;  %13369 = vmatmul.mubr.f32.gmra.mxu1 %v8504_v35  ;;  %13574 = vmatprep.subr.mxu1 %v17103_v19  ;;  %v6635_v41 = vadd.f32 %v18857_v40, %v17381_v45  ;;  %v18858_v35 = vld [vmem:[#allocation76_spill] sm:$0xff] }
 0x466   : > { %v17610_v17 = vadd.f32 %v12890_v6, %v6636_v14  ;;  %v17612_v49 = vpop.f32.mrf.mxu0  ;;  %13371 = vmatprep.mubr.f32.mxu1 %v8505_v48  ;;  %13590 = vmatpush3.msra.mxu1 %v17103_v19  ;;  %v6638_v21 = vadd.f32 %v18858_v35, %v17390_v4  ;;  %v8506_v62 = vld [vmem:[#allocation3 + $0x82] sm:$0xff]  ;;  %v8507_v14 = vld [vmem:[#allocation3 + $0x8a] sm:$0xff]  ;;  %v8508_v35 = vld [vmem:[#allocation3 + $0x92] sm:$0xff] }
 0x467   : > { %v6798_v2 = vpop.f32.mrf.mxu1  ;;  %13575 = vmatprep.subr.mxu1 %v17127_v52  ;;  %v18859_v6 = vld [vmem:[#allocation84_spill] sm:$0xff] }
 0x468   : > { %v17618_v47 = vadd.f32 %v6798_v2, %v6635_v41  ;;  %v17620_v1 = vpop.f32.mrf.mxu0  ;;  %13591 = vmatpush3.msra.mxu1 %v17127_v52  ;;  %v6637_v48 = vadd.f32 %v18859_v6, %v17399_v63  ;;  %v18860_v41 = vld [vmem:[#allocation78_spill] sm:$0xff] }
 0x469   : > { %v12893_v37 = vpop.f32.mrf.mxu1  ;;  %13372 = vmatmul.mubr.f32.gmra.mxu1 %v8506_v62  ;;  %13576 = vmatprep.subr.mxu1 %v17151_v39  ;;  %v6640_v2 = vadd.f32 %v18860_v41, %v17408_v24  ;;  %v8509_v62 = vld [vmem:[#allocation3 + $0x9a] sm:$0xff]  ;;  %v8510_v41 = vld [vmem:[#allocation3 + $0xa2] sm:$0xff] }
 0x46a   : > { %v17626_v45 = vadd.f32 %v12893_v37, %v6638_v21  ;;  %v17628_v19 = vpop.f32.mrf.mxu0  ;;  %13374 = vmatprep.mubr.f32.mxu1 %v8507_v14  ;;  %13592 = vmatpush3.msra.mxu1 %v17151_v39  ;;  %v18861_v37 = vld [vmem:[#allocation81_spill] sm:$0xff] }
 0x46b   : > { %v6808_v40 = vpop.f32.mrf.mxu1  ;;  %13577 = vmatprep.subr.mxu1 %v17175_v10  ;;  %v6639_v14 = vadd.f32 %v18861_v37, %v17417_v32 }
 0x46c   : > { %v17634_v4 = vadd.f32 %v6808_v40, %v6637_v48  ;;  %v17636_v52 = vpop.f32.mrf.mxu0  ;;  %13593 = vmatpush3.msra.mxu1 %v17175_v10  ;;  %v18862_v48 = vld [vmem:[#allocation5_spill] sm:$0xff] }
 0x46d   : > { %v12896_v21 = vpop.f32.mrf.mxu1  ;;  %13375 = vmatmul.mubr.f32.gmra.mxu1 %v8508_v35  ;;  %13578 = vmatprep.subr.mxu1 %v17199_v38  ;;  %v6642_v40 = vadd.f32 %v18862_v48, %v17426_v51  ;;  %v8511_v35 = vld [vmem:[#allocation3 + $0xaa] sm:$0xff]  ;;  %v8512_v48 = vld [vmem:[#allocation3 + $0xb2] sm:$0xff] }
 0x46e   : > { %v17642_v63 = vadd.f32 %v12896_v21, %v6640_v2  ;;  %v17644_v39 = vpop.f32.mrf.mxu0  ;;  %13377 = vmatprep.mubr.f32.mxu1 %v8509_v62  ;;  %13594 = vmatpush3.msra.mxu1 %v17199_v38  ;;  %v18863_v21 = vld [vmem:[#allocation6_spill] sm:$0xff] }
 0x46f   : > { %v6818_v6 = vpop.f32.mrf.mxu1  ;;  %13579 = vmatprep.subr.mxu1 %v17223_v61  ;;  %v6641_v62 = vadd.f32 %v18863_v21, %v17435_v50 }
 0x470   : > { %v17650_v24 = vadd.f32 %v6818_v6, %v6639_v14  ;;  %v17652_v10 = vpop.f32.mrf.mxu0  ;;  %13595 = vmatpush3.msra.mxu1 %v17223_v61  ;;  %v18864_v14 = vld [vmem:[#allocation7_spill] sm:$0xff] }
 0x471   : > { %v12899_v2 = vpop.f32.mrf.mxu1  ;;  %13378 = vmatmul.mubr.f32.gmra.mxu1 %v8510_v41  ;;  %13580 = vmatprep.subr.mxu1 %v17247_v57  ;;  %v6644_v6 = vadd.f32 %v18864_v14, %v17444_v5  ;;  %v8513_v41 = vld [vmem:[#allocation3 + $0xba] sm:$0xff]  ;;  %v8514_v14 = vld [vmem:[#allocation3 + $0xc2] sm:$0xff] }
 0x472   : > { %v17658_v32 = vadd.f32 %v12899_v2, %v6642_v40  ;;  %v17660_v38 = vpop.f32.mrf.mxu0  ;;  %13380 = vmatprep.mubr.f32.mxu1 %v8511_v35  ;;  %13596 = vmatpush3.msra.mxu1 %v17247_v57  ;;  %v18866_v2 = vld [vmem:[#allocation8_spill] sm:$0xff] }
 0x473   : > { %v6828_v37 = vpop.f32.mrf.mxu1  ;;  %13581 = vmatprep.subr.mxu1 %v17271_v13  ;;  %v6643_v35 = vadd.f32 %v18866_v2, %v17453_v58 }
 0x474   : > { %v17666_v51 = vadd.f32 %v6828_v37, %v6641_v62  ;;  %v17668_v61 = vpop.f32.mrf.mxu0  ;;  %13597 = vmatpush3.msra.mxu1 %v17271_v13  ;;  %v18868_v62 = vld [vmem:[#allocation9_spill] sm:$0xff] }
 0x475   : > { %v12902_v40 = vpop.f32.mrf.mxu1  ;;  %13381 = vmatmul.mubr.f32.gmra.mxu1 %v8512_v48  ;;  %13582 = vmatprep.subr.mxu1 %v17295_v18  ;;  %v6646_v37 = vadd.f32 %v18868_v62, %v17462_v26  ;;  %v8515_v48 = vld [vmem:[#allocation3 + $0xca] sm:$0xff]  ;;  %v8516_v62 = vld [vmem:[#allocation3 + $0xd2] sm:$0xff] }
 0x476   : > { %v17674_v50 = vadd.f32 %v12902_v40, %v6644_v6  ;;  %v17676_v57 = vpop.f32.mrf.mxu0  ;;  %13383 = vmatprep.mubr.f32.mxu1 %v8513_v41  ;;  %13598 = vmatpush3.msra.mxu1 %v17295_v18  ;;  %v18870_v40 = vld [vmem:[#allocation10_spill] sm:$0xff] }
 0x477   : > { %18865 = vst [vmem:[#allocation54_spill] sm:$0xff] %v17676_v57  ;;  %v6838_v21 = vpop.f32.mrf.mxu1  ;;  %13583 = vmatprep.subr.mxu1 %v17316_v59  ;;  %v6645_v41 = vadd.f32 %v18870_v40, %v17471_v11  ;;  %v18949_v57 = vld [vmem:[#allocation87_spill] sm:$0xff] }
 0x478   : > { %v17682_v5 = vadd.f32 %v6838_v21, %v6643_v35  ;;  %v17684_v13 = vpop.f32.mrf.mxu0  ;;  %13599 = vmatpush3.msra.mxu1 %v17316_v59  ;;  %v18872_v35 = vld [vmem:[#allocation11_spill] sm:$0xff] }
 0x479   : > { %18867 = vst [vmem:[#allocation63_spill] sm:$0xff] %v17684_v13  ;;  %v12905_v6 = vpop.f32.mrf.mxu1  ;;  %13384 = vmatmul.mubr.f32.gmra.mxu1 %v8514_v14  ;;  %13584 = vmatprep.subr.mxu1 %v17342_v15  ;;  %v6648_v21 = vadd.f32 %v18872_v35, %v17480_v44  ;;  %v8517_v14 = vld [vmem:[#allocation3 + $0xda] sm:$0xff]  ;;  %v18876_v44 = vld [vmem:[#allocation14_spill] sm:$0xff] }
 0x47a   : > { %v17690_v58 = vadd.f32 %v12905_v6, %v6646_v37  ;;  %v17692_v18 = vpop.f32.mrf.mxu0  ;;  %13386 = vmatprep.mubr.f32.mxu1 %v8515_v48  ;;  %13600 = vmatpush3.msra.mxu1 %v17342_v15  ;;  %v18874_v15 = vld [vmem:[#allocation12_spill] sm:$0xff]  ;;  %v6650_v35 = vadd.f32 %v18876_v44, %v17495_v3  ;;  %v8520_v44 = vld [vmem:[#allocation3 + $0xf2] sm:$0xff] }
 0x47b   : > { %18869 = vst [vmem:[#allocation25_spill] sm:$0xff] %v17692_v18  ;;  %v6848_v2 = vpop.f32.mrf.mxu1  ;;  %13585 = vmatprep.subr.mxu1 %v17354_v0  ;;  %v6647_v48 = vadd.f32 %v18874_v15, %v17489_v54  ;;  %v8529_v18 = vld [vmem:[#allocation3 + $0x13a] sm:$0xff] }
 0x47c   : > { %v17698_v26 = vadd.f32 %v6848_v2, %v6645_v41  ;;  %v17700_v59 = vpop.f32.mrf.mxu0  ;;  %13601 = vmatpush3.msra.mxu1 %v17354_v0  ;;  %v8518_v0 = vld [vmem:[#allocation3 + $0xe2] sm:$0xff] }
 0x47d   : > { %18871 = vst [vmem:[#allocation67_spill] sm:$0xff] %v17700_v59  ;;  %v12908_v37 = vpop.f32.mrf.mxu1  ;;  %13387 = vmatmul.mubr.f32.gmra.mxu1 %v8516_v62  ;;  %v8519_v62 = vld [vmem:[#allocation3 + $0xea] sm:$0xff] }
 0x47e   : > { %v17705_v6 = vadd.f32 %v12908_v37, %v6648_v21  ;;  %v17707_v11 = vpop.f32.mrf.mxu0  ;;  %13389 = vmatprep.mubr.f32.mxu1 %v8517_v14  ;;  %v18878_v14 = vld [vmem:[#allocation16_spill] sm:$0xff] }
 0x47f   : > { %18873 = vst [vmem:[#allocation62_spill] sm:$0xff] %v17707_v11  ;;  %v6858_v40 = vpop.f32.mrf.mxu1  ;;  %v6649_v54 = vadd.f32 %v18878_v14, %v17502_v60 }
 0x480   : > { %v17711_v41 = vadd.f32 %v6858_v40, %v6647_v48  ;;  %v17713_v2 = vpop.f32.mrf.mxu0 }
 0x481   : > { %18875 = vst [vmem:[#allocation59_spill] sm:$0xff] %v17713_v2  ;;  %v12911_v59 = vpop.f32.mrf.mxu1  ;;  %13390 = vmatmul.mubr.f32.gmra.mxu1 %v8518_v0  ;;  %v18880_v2 = vld [vmem:[#allocation18_spill] sm:$0xff]  ;;  %v8521_v0 = vld [vmem:[#allocation3 + $0xfa] sm:$0xff] }
 0x482   : > { %v17717_v21 = vadd.f32 %v12911_v59, %v6650_v35  ;;  %v17719_v37 = vpop.f32.mrf.mxu0  ;;  %13392 = vmatprep.mubr.f32.mxu1 %v8519_v62  ;;  %v6652_v3 = vadd.f32 %v18880_v2, %v17508_v30  ;;  %v18882_v62 = vld [vmem:[#allocation21_spill] sm:$0xff] }
 0x483   : > { %18877 = vst [vmem:[#allocation73_spill] sm:$0xff] %v17719_v37  ;;  %v6868_v15 = vpop.f32.mrf.mxu1  ;;  %v6651_v60 = vadd.f32 %v18882_v62, %v17514_v12  ;;  %v8522_v2 = vld [vmem:[#allocation3 + $0x102] sm:$0xff] }
 0x484   : > { %v17723_v48 = vadd.f32 %v6868_v15, %v6649_v54  ;;  %v17725_v40 = vpop.f32.mrf.mxu0 }
 0x485   : > { %18879 = vst [vmem:[#allocation65_spill] sm:$0xff] %v17725_v40  ;;  %v12914_v11 = vpop.f32.mrf.mxu1  ;;  %13393 = vmatmul.mubr.f32.gmra.mxu1 %v8520_v44  ;;  %v18884_v40 = vld [vmem:[#allocation29_spill] sm:$0xff] }
 0x486   : > { %v17729_v59 = vadd.f32 %v12914_v11, %v6652_v3  ;;  %v17731_v35 = vpop.f32.mrf.mxu0  ;;  %13395 = vmatprep.mubr.f32.mxu1 %v8521_v0  ;;  %v6654_v30 = vadd.f32 %v18884_v40, %v17520_v33  ;;  %v8523_v44 = vld [vmem:[#allocation3 + $0x10a] sm:$0xff]  ;;  %v8524_v40 = vld [vmem:[#allocation3 + $0x112] sm:$0xff] }
 0x487   : > { %18881 = vst [vmem:[#allocation77_spill] sm:$0xff] %v17731_v35  ;;  %v6878_v14 = vpop.f32.mrf.mxu1  ;;  %v18886_v0 = vld [vmem:[#allocation33_spill] sm:$0xff] }
 0x488   : > { %v17735_v54 = vadd.f32 %v6878_v14, %v6651_v60  ;;  %v17737_v15 = vpop.f32.mrf.mxu0  ;;  %v6653_v12 = vadd.f32 %v18886_v0, %v17526_v8  ;;  %v8526_v0 = vld [vmem:[#allocation3 + $0x122] sm:$0xff] }
 0x489   : > { %18883 = vst [vmem:[#allocation75_spill] sm:$0xff] %v17737_v15  ;;  %v12917_v37 = vpop.f32.mrf.mxu1  ;;  %13396 = vmatmul.mubr.f32.gmra.mxu1 %v8522_v2  ;;  %v18888_v15 = vld [vmem:[#allocation35_spill] sm:$0xff] }
 0x48a   : > { %v17741_v11 = vadd.f32 %v12917_v37, %v6654_v30  ;;  %v17743_v3 = vpop.f32.mrf.mxu0  ;;  %13398 = vmatprep.mubr.f32.mxu1 %v8523_v44  ;;  %v6656_v33 = vadd.f32 %v18888_v15, %v17532_v29  ;;  %v8525_v2 = vld [vmem:[#allocation3 + $0x11a] sm:$0xff]  ;;  %v18892_v29 = vld [vmem:[#allocation38_spill] sm:$0xff] }
 0x48b   : > { %18885 = vst [vmem:[#allocation68_spill] sm:$0xff] %v17743_v3  ;;  %v6888_v62 = vpop.f32.mrf.mxu1  ;;  %v18890_v44 = vld [vmem:[#allocation104_spill] sm:$0xff]  ;;  %v6658_v15 = vadd.f32 %v18892_v29, %v17544_v34  ;;  %v6660_v34 = vadd.f32 %v16976_v53, %v17556_v25  ;;  %v6661_v25 = vadd.f32 %v17004_v28, %v17570_v46  ;;  %v7243_v28 = vadd.f32 %v17026_v9, %v17588_v42 }
 0x48c   : > { %v17747_v60 = vadd.f32 %v6888_v62, %v6653_v12  ;;  %v17749_v14 = vpop.f32.mrf.mxu0  ;;  %v6655_v8 = vadd.f32 %v18890_v44, %v17538_v16  ;;  %v8527_v62 = vld [vmem:[#allocation3 + $0x12a] sm:$0xff]  ;;  %v8528_v16 = vld [vmem:[#allocation3 + $0x132] sm:$0xff] }
 0x48d   : > { %18887 = vst [vmem:[#allocation28_spill] sm:$0xff] %v17749_v14  ;;  %v12920_v35 = vpop.f32.mrf.mxu1  ;;  %13399 = vmatmul.mubr.f32.gmra.mxu1 %v8524_v40 }
 0x48e   : > { %v17753_v37 = vadd.f32 %v12920_v35, %v6656_v33  ;;  %v17755_v30 = vpop.f32.mrf.mxu0  ;;  %13401 = vmatprep.mubr.f32.mxu1 %v8525_v2  ;;  %v18894_v2 = vld [vmem:[#allocation40_spill] sm:$0xff] }
 0x48f   : > { %18889 = vst [vmem:[#allocation70_spill] sm:$0xff] %v17755_v30  ;;  %v6898_v12 = vpop.f32.mrf.mxu1  ;;  %v6657_v30 = vadd.f32 %v18894_v2, %v17550_v31  ;;  %v6659_v31 = vadd.f32 %v16986_v27, %v17562_v23  ;;  %v7244_v23 = vadd.f32 %v17019_v56, %v17576_v20  ;;  %v9118_v20 = vld [vmem:[#allocation3 + $0x84] sm:$0xff] }
 0x490   : > { %v17759_v3 = vadd.f32 %v6898_v12, %v6655_v8  ;;  %v17761_v14 = vpop.f32.mrf.mxu0 }
 0x491   : > { %18891 = vst [vmem:[#allocation30_spill] sm:$0xff] %v17761_v14  ;;  %v12923_v40 = vpop.f32.mrf.mxu1  ;;  %13402 = vmatmul.mubr.f32.gmra.mxu1 %v8526_v0  ;;  %v9128_v14 = vld [vmem:[#allocation3 + $0xd4] sm:$0xff] }
 0x492   : > { %v17765_v35 = vadd.f32 %v12923_v40, %v6658_v15  ;;  %v17767_v33 = vpop.f32.mrf.mxu0  ;;  %13404 = vmatprep.mubr.f32.mxu1 %v8527_v62  ;;  %v8530_v62 = vld [vmem:[#allocation3 + $0x142] sm:$0xf] }
 0x493   : > { %18893 = vst [vmem:[#allocation72_spill] sm:$0xff] %v17767_v33  ;;  %v6908_v44 = vpop.f32.mrf.mxu1 }
 0x494   : > { %v17771_v8 = vadd.f32 %v6908_v44, %v6657_v30  ;;  %v17773_v12 = vpop.f32.mrf.mxu0 }
 0x495   : > { %18895 = vst [vmem:[#allocation34_spill] sm:$0xff] %v17773_v12  ;;  %v12926_v29 = vpop.f32.mrf.mxu1  ;;  %13405 = vmatmul.mubr.f32.gmra.mxu1 %v8528_v16  ;;  %v9115_v12 = vld [vmem:[#allocation3 + $0x6c] sm:$0xff] }
 0x496   : > { %v17777_v0 = vadd.f32 %v12926_v29, %v6660_v34  ;;  %v17779_v15 = vpop.f32.mrf.mxu0  ;;  %13407 = vmatprep.mubr.f32.mxu1 %v8529_v18  ;;  %v9116_v18 = vld [vmem:[#allocation3 + $0x74] sm:$0xff] }
 0x497   : > { %18896 = vst [vmem:[#allocation32_spill] sm:$0xff] %v17779_v15  ;;  %v6918_v40 = vpop.f32.mrf.mxu1 }
 0x498   : > { %v17783_v2 = vadd.f32 %v6918_v40, %v6659_v31  ;;  %v17785_v30 = vpop.f32.mrf.mxu0  ;;  %v9117_v31 = vld [vmem:[#allocation3 + $0x7c] sm:$0xff] }
 0x499   : > { %18897 = vst [vmem:[#allocation74_spill] sm:$0xff] %v17785_v30  ;;  %v12929_v44 = vpop.f32.mrf.mxu1  ;;  %13408 = vmatmul.mubr.f32.gmra.mxu1 %v8530_v62  ;;  %v18912_v30 = vld [vmem:[#allocation49_spill] sm:$0xff] }
 0x49a   : > { %v17787_v53 = vpop.f32.mrf.mxu0  ;;  %13528 = vmatprep.mubr.f32.mxu1 %v9115_v12 }
 0x49b   : > { %18898 = vst [vmem:[#allocation36_spill] sm:$0xff] %v17787_v53  ;;  %v6928_v16 = vpop.f32.mrf.mxu1 }
 0x49c   : > { %v17791_v34 = vadd.f32 %v6928_v16, %v6661_v25  ;;  %v17793_v27 = vpop.f32.mrf.mxu0  ;;  %v18902_v25 = vld [vmem:[#allocation41_spill] sm:$0xff] }
 0x49d   : > { %18899 = vst [vmem:[#allocation85_spill] sm:$0xff] %v17793_v27  ;;  %v13044_v29 = vpop.f32.mrf.mxu1  ;;  %13529 = vmatmul.mubr.f32.vlgmr.msra.gmra.mxu1 %v9116_v18  ;;  %v7246_v56 = vadd.f32 %v18902_v25, %v17597_v55  ;;  %v9119_v18 = vld [vmem:[#allocation3 + $0x8c] sm:$0xff]  ;;  %v9120_v55 = vld [vmem:[#allocation3 + $0x94] sm:$0xff] }
 0x49e   : > { %v17797_v62 = vadd.f32 %v13044_v29, %v7244_v23  ;;  %v17799_v40 = vpop.f32.mrf.mxu0  ;;  %13531 = vmatprep.mubr.f32.mxu1 %v9117_v31  ;;  %v18903_v31 = vld [vmem:[#allocation42_spill] sm:$0xff] }
 0x49f   : > { %18900 = vst [vmem:[#allocation80_spill] sm:$0xff] %v17799_v40  ;;  %v7390_v46 = vpop.f32.mrf.mxu1  ;;  %v7245_v40 = vadd.f32 %v18903_v31, %v17602_v43  ;;  %v18907_v31 = vld [vmem:[#allocation45_spill] sm:$0xff] }
 0x4a0   : > { %v17803_v12 = vadd.f32 %v7390_v46, %v7243_v28  ;;  %v17805_v44 = vpop.f32.mrf.mxu0  ;;  %v18905_v46 = vld [vmem:[#allocation43_spill] sm:$0xff] }
 0x4a1   : > { %18901 = vst [vmem:[#allocation76_spill] sm:$0xff] %v17805_v44  ;;  %v13047_v16 = vpop.f32.mrf.mxu1  ;;  %13532 = vmatmul.mubr.f32.gmra.mxu1 %v9118_v20  ;;  %v7248_v44 = vadd.f32 %v18905_v46, %v17610_v17  ;;  %v9121_v20 = vld [vmem:[#allocation3 + $0x9c] sm:$0xff]  ;;  %v7250_v17 = vadd.f32 %v18907_v31, %v17626_v45  ;;  %v9124_v31 = vld [vmem:[#allocation3 + $0xb4] sm:$0xff] }
 0x4a2   : > { %v17809_v23 = vadd.f32 %v13047_v16, %v7246_v56  ;;  %v13329_v29 = vpop.f32.mrf.mxu0  ;;  %13534 = vmatprep.mubr.f32.mxu1 %v9119_v18  ;;  %v18906_v16 = vld [vmem:[#allocation44_spill] sm:$0xff] }
 0x4a3   : > { %v7400_v9 = vpop.f32.mrf.mxu1  ;;  %v7247_v43 = vadd.f32 %v18906_v16, %v17618_v47 }
 0x4a4   : > { %v17813_v42 = vadd.f32 %v7400_v9, %v7245_v40  ;;  %v17815_v28 = vpop.f32.mrf.mxu0  ;;  %v9122_v9 = vld [vmem:[#allocation3 + $0xa4] sm:$0xff] }
 0x4a5   : > { %18904 = vst [vmem:[#allocation84_spill] sm:$0xff] %v17815_v28  ;;  %v13050_v25 = vpop.f32.mrf.mxu1  ;;  %13535 = vmatmul.mubr.f32.gmra.mxu1 %v9120_v55  ;;  %v9123_v55 = vld [vmem:[#allocation3 + $0xac] sm:$0xff]  ;;  %v18909_v28 = vld [vmem:[#allocation47_spill] sm:$0xff] }
 0x4a6   : > { %v17819_v27 = vadd.f32 %v13050_v25, %v7248_v44  ;;  %v17821_v56 = vpop.f32.mrf.mxu0  ;;  %13537 = vmatprep.mubr.f32.mxu1 %v9121_v20  ;;  %v18908_v20 = vld [vmem:[#allocation46_spill] sm:$0xff]  ;;  %v7252_v45 = vadd.f32 %v18909_v28, %v17642_v63  ;;  %v7254_v63 = vadd.f32 %v18912_v30, %v17658_v32  ;;  %v9126_v28 = vld [vmem:[#allocation3 + $0xc4] sm:$0xff]  ;;  %v9129_v30 = vld [vmem:[#allocation3 + $0xdc] sm:$0xff] }
 0x4a7   : > { %v7410_v18 = vpop.f32.mrf.mxu1  ;;  %v7249_v47 = vadd.f32 %v18908_v20, %v17634_v4 }
 0x4a8   : > { %v17825_v40 = vadd.f32 %v7410_v18, %v7247_v43  ;;  %v17827_v29 = vpop.f32.mrf.mxu0 }
 0x4a9   : > { %v13053_v46 = vpop.f32.mrf.mxu1  ;;  %13538 = vmatmul.mubr.f32.gmra.mxu1 %v9122_v9  ;;  %v9125_v9 = vld [vmem:[#allocation3 + $0xbc] sm:$0xff] }
 0x4aa   : > { %v17831_v44 = vadd.f32 %v13053_v46, %v7250_v17  ;;  %v17833_v25 = vpop.f32.mrf.mxu0  ;;  %13540 = vmatprep.mubr.f32.mxu1 %v9123_v55  ;;  %v18910_v55 = vld [vmem:[#allocation48_spill] sm:$0xff] }
 0x4ab   : > { %v7420_v16 = vpop.f32.mrf.mxu1  ;;  %v7251_v4 = vadd.f32 %v18910_v55, %v17650_v24 }
 0x4ac   : > { %v17837_v43 = vadd.f32 %v7420_v16, %v7249_v47  ;;  %v17839_v18 = vpop.f32.mrf.mxu0 }
 0x4ad   : > { %v13056_v53 = vpop.f32.mrf.mxu1  ;;  %13541 = vmatmul.mubr.f32.gmra.mxu1 %v9124_v31  ;;  %v9127_v31 = vld [vmem:[#allocation3 + $0xcc] sm:$0xff] }
 0x4ae   : > { %v17843_v17 = vadd.f32 %v13056_v53, %v7252_v45  ;;  %v17845_v46 = vpop.f32.mrf.mxu0  ;;  %13543 = vmatprep.mubr.f32.mxu1 %v9125_v9  ;;  %v18913_v45 = vld [vmem:[#allocation50_spill] sm:$0xff] }
 0x4af   : > { %v7430_v20 = vpop.f32.mrf.mxu1  ;;  %v7253_v9 = vadd.f32 %v18913_v45, %v17666_v51 }
 0x4b0   : > { %v17849_v47 = vadd.f32 %v7430_v20, %v7251_v4  ;;  %v17851_v16 = vpop.f32.mrf.mxu0  ;;  %v18915_v4 = vld [vmem:[#allocation52_spill] sm:$0xff] }
 0x4b1   : > { %18911 = vst [vmem:[#allocation78_spill] sm:$0xff] %v17851_v16  ;;  %v13059_v15 = vpop.f32.mrf.mxu1  ;;  %13544 = vmatmul.mubr.f32.gmra.mxu1 %v9126_v28  ;;  %v7256_v20 = vadd.f32 %v18915_v4, %v17674_v50  ;;  %v9131_v4 = vld [vmem:[#allocation3 + $0xec] sm:$0xff] }
 0x4b2   : > { %v17855_v53 = vadd.f32 %v13059_v15, %v7254_v63  ;;  %13546 = vmatprep.mubr.f32.mxu1 %v9127_v31  ;;  %v17859_v33 = vpop.f32.mrf.mxu0  ;;  %v18916_v15 = vld [vmem:[#allocation53_spill] sm:$0xff] }
 0x4b3   : > { %18914 = vst [vmem:[#allocation81_spill] sm:$0xff] %v17859_v33  ;;  %v7440_v24 = vpop.f32.mrf.mxu1  ;;  %v7255_v63 = vadd.f32 %v18916_v15, %v17682_v5  ;;  %v9130_v33 = vld [vmem:[#allocation3 + $0xe4] sm:$0xff] }
 0x4b4   : > { %v17861_v55 = vadd.f32 %v7440_v24, %v7253_v9  ;;  %v17869_v31 = vpop.f32.mrf.mxu0  ;;  %v18918_v9 = vld [vmem:[#allocation55_spill] sm:$0xff] }
 0x4b5   : > { %v13062_v32 = vpop.f32.mrf.mxu1  ;;  %13547 = vmatmul.mubr.f32.gmra.mxu1 %v9128_v14  ;;  %18917 = vst [vmem:[#allocation5_spill] sm:$0xff] %v17869_v31  ;;  %v7258_v24 = vadd.f32 %v18918_v9, %v17690_v58  ;;  %v9132_v31 = vld [vmem:[#allocation3 + $0xf4] sm:$0xff]  ;;  %v9133_v9 = vld [vmem:[#allocation3 + $0xfc] sm:$0xff] }
 0x4b6   : > { %v17865_v28 = vadd.f32 %v13062_v32, %v7256_v20  ;;  %13549 = vmatprep.mubr.f32.mxu1 %v9129_v30  ;;  %v18919_v20 = vld [vmem:[#allocation58_spill] sm:$0xff]  ;;  %v17879_v30 = vpop.f32.mrf.mxu0 }
 0x4b7   : > { %v7450_v51 = vpop.f32.mrf.mxu1  ;;  %v7257_v32 = vadd.f32 %v18919_v20, %v17698_v26  ;;  %18920 = vst [vmem:[#allocation6_spill] sm:$0xff] %v17879_v30  ;;  %v9134_v30 = vld [vmem:[#allocation3 + $0x104] sm:$0xff] }
 0x4b8   : > { %v17871_v45 = vadd.f32 %v7450_v51, %v7255_v63  ;;  %v18921_v63 = vld [vmem:[#allocation60_spill] sm:$0xff] }
 0x4b9   : > { %v13065_v50 = vpop.f32.mrf.mxu1  ;;  %13550 = vmatmul.mubr.f32.gmra.mxu1 %v9130_v33  ;;  %v7260_v51 = vadd.f32 %v18921_v63, %v17705_v6  ;;  %v9135_v63 = vld [vmem:[#allocation3 + $0x10c] sm:$0xff] }
 0x4ba   : > { %v17875_v14 = vadd.f32 %v13065_v50, %v7258_v24  ;;  %13552 = vmatprep.mubr.f32.mxu1 %v9131_v4  ;;  %v18922_v24 = vld [vmem:[#allocation64_spill] sm:$0xff]  ;;  %v17889_v4 = vpop.f32.mrf.mxu0 }
 0x4bb   : > { %v7460_v5 = vpop.f32.mrf.mxu1  ;;  %v7259_v50 = vadd.f32 %v18922_v24, %v17711_v41  ;;  %18923 = vst [vmem:[#allocation7_spill] sm:$0xff] %v17889_v4  ;;  %v9136_v4 = vld [vmem:[#allocation3 + $0x114] sm:$0xff] }
 0x4bc   : > { %v17881_v15 = vadd.f32 %v7460_v5, %v7257_v32  ;;  %v18924_v32 = vld [vmem:[#allocation66_spill] sm:$0xff] }
 0x4bd   : > { %v13068_v58 = vpop.f32.mrf.mxu1  ;;  %13553 = vmatmul.mubr.f32.gmra.mxu1 %v9132_v31  ;;  %v7262_v5 = vadd.f32 %v18924_v32, %v17717_v21  ;;  %v9137_v32 = vld [vmem:[#allocation3 + $0x11c] sm:$0xff] }
 0x4be   : > { %v17885_v33 = vadd.f32 %v13068_v58, %v7260_v51  ;;  %13555 = vmatprep.mubr.f32.mxu1 %v9133_v9  ;;  %v18925_v51 = vld [vmem:[#allocation69_spill] sm:$0xff]  ;;  %v17899_v9 = vpop.f32.mrf.mxu0 }
 0x4bf   : > { %v7470_v26 = vpop.f32.mrf.mxu1  ;;  %v7261_v58 = vadd.f32 %v18925_v51, %v17723_v48  ;;  %18926 = vst [vmem:[#allocation8_spill] sm:$0xff] %v17899_v9  ;;  %v9139_v9 = vld [vmem:[#allocation3 + $0x12c] sm:$0xff] }
 0x4c0   : > { %v17891_v20 = vadd.f32 %v7470_v26, %v7259_v50  ;;  %v18927_v50 = vld [vmem:[#allocation71_spill] sm:$0xff]  ;;  %v17909_v48 = vpop.f32.mrf.mxu0 }
 0x4c1   : > { %v13071_v6 = vpop.f32.mrf.mxu1  ;;  %13556 = vmatmul.mubr.f32.gmra.mxu1 %v9134_v30  ;;  %v7264_v26 = vadd.f32 %v18927_v50, %v17729_v59  ;;  %18929 = vst [vmem:[#allocation9_spill] sm:$0xff] %v17909_v48  ;;  %v9141_v48 = vld [vmem:[#allocation3 + $0x13c] sm:$0xff] }
 0x4c2   : > { %v17895_v31 = vadd.f32 %v13071_v6, %v7262_v5  ;;  %13558 = vmatprep.mubr.f32.mxu1 %v9135_v63  ;;  %v18928_v5 = vld [vmem:[#allocation20_spill] sm:$0xff] }
 0x4c3   : > { %v7480_v41 = vpop.f32.mrf.mxu1  ;;  %v7263_v6 = vadd.f32 %v18928_v5, %v17735_v54  ;;  %v9138_v63 = vld [vmem:[#allocation3 + $0x124] sm:$0xff]  ;;  %v17919_v54 = vpop.f32.mrf.mxu0 }
 0x4c4   : > { %v17901_v24 = vadd.f32 %v7480_v41, %v7261_v58  ;;  %v18930_v41 = vld [vmem:[#allocation22_spill] sm:$0xff]  ;;  %18932 = vst [vmem:[#allocation10_spill] sm:$0xff] %v17919_v54 }
 0x4c5   : > { %v13074_v21 = vpop.f32.mrf.mxu1  ;;  %13559 = vmatmul.mubr.f32.gmra.mxu1 %v9136_v4  ;;  %v7266_v59 = vadd.f32 %v18930_v41, %v17741_v11 }
 0x4c6   : > { %v17905_v30 = vadd.f32 %v13074_v21, %v7264_v26  ;;  %13561 = vmatprep.mubr.f32.mxu1 %v9137_v32  ;;  %v18931_v26 = vld [vmem:[#allocation26_spill] sm:$0xff] }
 0x4c7   : > { %v7490_v51 = vpop.f32.mrf.mxu1  ;;  %v7265_v21 = vadd.f32 %v18931_v26, %v17747_v60  ;;  %v9140_v32 = vld [vmem:[#allocation3 + $0x134] sm:$0xff]  ;;  %v9142_v60 = vld [vmem:[#allocation3 + $0x144] sm:$0xf] }
 0x4c8   : > { %v17911_v58 = vadd.f32 %v7490_v51, %v7263_v6  ;;  %v18933_v6 = vld [vmem:[#allocation13_spill] sm:$0xff]  ;;  %v18936_v26 = vld [vmem:[#allocation15_spill] sm:$0xff] }
 0x4c9   : > { %v13077_v50 = vpop.f32.mrf.mxu1  ;;  %13562 = vmatmul.mubr.f32.gmra.mxu1 %v9138_v63  ;;  %v7268_v51 = vadd.f32 %v18933_v6, %v17753_v37  ;;  %v18934_v63 = vld [vmem:[#allocation79_spill] sm:$0xff] }
 0x4ca   : > { %v17915_v4 = vadd.f32 %v13077_v50, %v7266_v59  ;;  %13564 = vmatprep.mubr.f32.mxu1 %v9139_v9  ;;  %v7267_v41 = vadd.f32 %v18934_v63, %v17759_v3  ;;  %v17929_v9 = vpop.f32.mrf.mxu0 }
 0x4cb   : > { %v7500_v5 = vpop.f32.mrf.mxu1  ;;  %18935 = vst [vmem:[#allocation11_spill] sm:$0xff] %v17929_v9 }
 0x4cc   : > { %v17921_v13 = vadd.f32 %v7500_v5, %v7265_v21  ;;  %v7270_v21 = vadd.f32 %v18936_v26, %v17765_v35  ;;  %v17939_v6 = vpop.f32.mrf.mxu0  ;;  %v18940_v35 = vld [vmem:[#allocation83_spill] sm:$0xff] }
 0x4cd   : > { %v13080_v16 = vpop.f32.mrf.mxu1  ;;  %13565 = vmatmul.mubr.f32.gmra.mxu1 %v9140_v32  ;;  %18938 = vst [vmem:[#allocation12_spill] sm:$0xff] %v17939_v6  ;;  %v7271_v26 = vadd.f32 %v18940_v35, %v17783_v2 }
 0x4ce   : > { %v17925_v11 = vadd.f32 %v13080_v16, %v7268_v51  ;;  %13567 = vmatprep.mubr.f32.mxu1 %v9141_v48  ;;  %v18937_v16 = vld [vmem:[#allocation82_spill] sm:$0xff]  ;;  %v18939_v51 = vld [vmem:[#allocation17_spill] sm:$0xff] }
 0x4cf   : > { %v7510_v59 = vpop.f32.mrf.mxu1  ;;  %v7269_v32 = vadd.f32 %v18937_v16, %v17771_v8  ;;  %v7272_v63 = vadd.f32 %v18939_v51, %v17777_v0  ;;  %v18942_v16 = vld [vmem:[#allocation24_spill] sm:$0xff] }
 0x4d0   : > { %v17931_v50 = vadd.f32 %v7510_v59, %v7267_v41  ;;  %v7273_v6 = vadd.f32 %v18942_v16, %v17791_v34  ;;  %v7860_v34 = vadd.f32 %v17410_v22, %v17819_v27  ;;  %v7861_v22 = vadd.f32 %v18949_v57, %v17837_v43  ;;  %v18954_v57 = vld [vmem:[#allocation88_spill] sm:$0xff] }
 0x4d1   : > { %v13083_v5 = vpop.f32.mrf.mxu1  ;;  %13568 = vmatmul.mubr.f32.gmra.mxu1 %v9142_v60  ;;  %v17949_v60 = vpop.f32.mrf.mxu0  ;;  %v7866_v43 = vadd.f32 %v18954_v57, %v17855_v53 }
 0x4d2   : > { %v17935_v37 = vadd.f32 %v13083_v5, %v7270_v21  ;;  %18941 = vst [vmem:[#allocation14_spill] sm:$0xff] %v17949_v60 }
 0x4d3   : > { %v7520_v3 = vpop.f32.mrf.mxu1 }
 0x4d4   : > { %v17941_v48 = vadd.f32 %v7520_v3, %v7269_v32  ;;  %v17955_v32 = vpop.f32.mrf.mxu0 }
 0x4d5   : > { %v13086_v41 = vpop.f32.mrf.mxu1  ;;  %18943 = vst [vmem:[#allocation16_spill] sm:$0xff] %v17955_v32  ;;  %v18948_v32 = vld [vmem:[#allocation37_spill] sm:$0xff] }
 0x4d6   : > { %v17945_v59 = vadd.f32 %v13086_v41, %v7272_v63  ;;  %v17961_v51 = vpop.f32.mrf.mxu0  ;;  %v7862_v60 = vadd.f32 %v18948_v32, %v17831_v44 }
 0x4d7   : > { %v7530_v21 = vpop.f32.mrf.mxu1  ;;  %18944 = vst [vmem:[#allocation18_spill] sm:$0xff] %v17961_v51 }
 0x4d8   : > { %v17951_v5 = vadd.f32 %v7530_v21, %v7271_v26  ;;  %v17967_v41 = vpop.f32.mrf.mxu0 }
 0x4d9   : > { %v13089_v8 = vpop.f32.mrf.mxu1  ;;  %18945 = vst [vmem:[#allocation21_spill] sm:$0xff] %v17967_v41 }
 0x4da   : > { %v17977_v16 = vpop.f32.mrf.mxu0 }
 0x4db   : > { %v7540_v3 = vpop.f32.mrf.mxu1  ;;  %18947 = vst [vmem:[#allocation29_spill] sm:$0xff] %v17977_v16 }
 0x4dc   : > { %v17957_v9 = vadd.f32 %v7540_v3, %v7273_v6  ;;  %v18946_v6 = vld [vmem:[#allocation31_spill] sm:$0xff]  ;;  %v17987_v27 = vpop.f32.mrf.mxu0 }
 0x4dd   : > { %v17959_v0 = vpop.f32.mrf.mxu1  ;;  %v7859_v8 = vadd.f32 %v18946_v6, %v17825_v40  ;;  %18950 = vst [vmem:[#allocation33_spill] sm:$0xff] %v17987_v27  ;;  %v18951_v40 = vld [vmem:[#allocation101_spill] sm:$0xff] }
 0x4de   : > { %v7864_v6 = vadd.f32 %v18951_v40, %v17843_v17  ;;  %v17997_v32 = vpop.f32.mrf.mxu0 }
 0x4df   : > { %v17963_v63 = vpop.f32.mrf.mxu1  ;;  %18953 = vst [vmem:[#allocation35_spill] sm:$0xff] %v17997_v32 }
 0x4e0   : > { %v18007_v40 = vpop.f32.mrf.mxu0 }
 0x4e1   : > { %v17965_v2 = vpop.f32.mrf.mxu1  ;;  %18956 = vst [vmem:[#allocation104_spill] sm:$0xff] %v18007_v40 }
 0x4e2   : > { %v18017_v57 = vpop.f32.mrf.mxu0 }
 0x4e3   : > { %v17969_v35 = vpop.f32.mrf.mxu1  ;;  %18959 = vst [vmem:[#allocation38_spill] sm:$0xff] %v18017_v57 }
 0x4e5   : > { %v13210_v26 = vpop.f32.mrf.mxu1 }
 0x4e6   : > { %v17973_v21 = vadd.f32 %v13210_v26, %v7860_v34 }
 0x4e7   : > { %v8022_v3 = vpop.f32.mrf.mxu1 }
 0x4e8   : > { %v17979_v51 = vadd.f32 %v8022_v3, %v7859_v8  ;;  %v18952_v3 = vld [vmem:[#allocation103_spill] sm:$0xff] }
 0x4e9   : > { %v13213_v41 = vpop.f32.mrf.mxu1  ;;  %v7863_v44 = vadd.f32 %v18952_v3, %v17849_v47  ;;  %v18957_v47 = vld [vmem:[#allocation89_spill] sm:$0xff] }
 0x4ea   : > { %v17983_v54 = vadd.f32 %v13213_v41, %v7862_v60  ;;  %v7868_v3 = vadd.f32 %v18957_v47, %v17865_v28  ;;  %v18027_v47 = vpop.f32.mrf.mxu0 }
 0x4eb   : > { %v8032_v34 = vpop.f32.mrf.mxu1  ;;  %18962 = vst [vmem:[#allocation40_spill] sm:$0xff] %v18027_v47 }
 0x4ec   : > { %v17989_v26 = vadd.f32 %v8032_v34, %v7861_v22  ;;  %v18955_v34 = vld [vmem:[#allocation39_spill] sm:$0xff] }
 0x4ed   : > { %v13216_v16 = vpop.f32.mrf.mxu1  ;;  %v7865_v17 = vadd.f32 %v18955_v34, %v17861_v55  ;;  %v18960_v55 = vld [vmem:[#allocation91_spill] sm:$0xff] }
 0x4ee   : > { %v17993_v8 = vadd.f32 %v13216_v16, %v7864_v6  ;;  %v7870_v34 = vadd.f32 %v18960_v55, %v17875_v14  ;;  %v18037_v55 = vpop.f32.mrf.mxu0 }
 0x4ef   : > { %v8042_v60 = vpop.f32.mrf.mxu1  ;;  %18965 = vst [vmem:[#allocation41_spill] sm:$0xff] %v18037_v55 }
 0x4f0   : > { %v17999_v41 = vadd.f32 %v8042_v60, %v7863_v44  ;;  %v18958_v60 = vld [vmem:[#allocation90_spill] sm:$0xff] }
 0x4f1   : > { %v13219_v27 = vpop.f32.mrf.mxu1  ;;  %v7867_v53 = vadd.f32 %v18958_v60, %v17871_v45  ;;  %v18963_v45 = vld [vmem:[#allocation93_spill] sm:$0xff] }
 0x4f2   : > { %v18003_v22 = vadd.f32 %v13219_v27, %v7866_v43  ;;  %v7872_v60 = vadd.f32 %v18963_v45, %v17885_v33  ;;  %v18047_v45 = vpop.f32.mrf.mxu0 }
 0x4f3   : > { %v8052_v16 = vpop.f32.mrf.mxu1  ;;  %18968 = vst [vmem:[#allocation42_spill] sm:$0xff] %v18047_v45 }
 0x4f4   : > { %v18009_v6 = vadd.f32 %v8052_v16, %v7865_v17  ;;  %v18961_v16 = vld [vmem:[#allocation92_spill] sm:$0xff] }
 0x4f5   : > { %v13222_v32 = vpop.f32.mrf.mxu1  ;;  %v7869_v28 = vadd.f32 %v18961_v16, %v17881_v15  ;;  %v18966_v15 = vld [vmem:[#allocation95_spill] sm:$0xff] }
 0x4f6   : > { %v18013_v44 = vadd.f32 %v13222_v32, %v7868_v3  ;;  %v7874_v16 = vadd.f32 %v18966_v15, %v17895_v31  ;;  %v18057_v15 = vpop.f32.mrf.mxu0 }
 0x4f7   : > { %v8062_v27 = vpop.f32.mrf.mxu1  ;;  %18971 = vst [vmem:[#allocation43_spill] sm:$0xff] %v18057_v15 }
 0x4f8   : > { %v18019_v43 = vadd.f32 %v8062_v27, %v7867_v53  ;;  %v18964_v27 = vld [vmem:[#allocation94_spill] sm:$0xff] }
 0x4f9   : > { %v13225_v40 = vpop.f32.mrf.mxu1  ;;  %v7871_v14 = vadd.f32 %v18964_v27, %v17891_v20  ;;  %v18969_v20 = vld [vmem:[#allocation97_spill] sm:$0xff] }
 0x4fa   : > { %v18023_v17 = vadd.f32 %v13225_v40, %v7870_v34  ;;  %v7876_v27 = vadd.f32 %v18969_v20, %v17905_v30  ;;  %v18067_v20 = vpop.f32.mrf.mxu0 }
 0x4fb   : > { %v8072_v32 = vpop.f32.mrf.mxu1  ;;  %18974 = vst [vmem:[#allocation44_spill] sm:$0xff] %v18067_v20 }
 0x4fc   : > { %v18029_v3 = vadd.f32 %v8072_v32, %v7869_v28  ;;  %v18967_v32 = vld [vmem:[#allocation96_spill] sm:$0xff] }
 0x4fd   : > { %v13228_v57 = vpop.f32.mrf.mxu1  ;;  %v7873_v33 = vadd.f32 %v18967_v32, %v17901_v24  ;;  %v18972_v24 = vld [vmem:[#allocation99_spill] sm:$0xff] }
 0x4fe   : > { %v18033_v53 = vadd.f32 %v13228_v57, %v7872_v60  ;;  %v7878_v32 = vadd.f32 %v18972_v24, %v17915_v4  ;;  %v18077_v24 = vpop.f32.mrf.mxu0 }
 0x4ff   : > { %v8082_v40 = vpop.f32.mrf.mxu1  ;;  %18977 = vst [vmem:[#allocation45_spill] sm:$0xff] %v18077_v24 }
 0x500   : > { %v18039_v34 = vadd.f32 %v8082_v40, %v7871_v14  ;;  %v18970_v40 = vld [vmem:[#allocation98_spill] sm:$0xff] }
 0x501   : > { %v13231_v47 = vpop.f32.mrf.mxu1  ;;  %v7875_v31 = vadd.f32 %v18970_v40, %v17911_v58  ;;  %v18975_v58 = vld [vmem:[#allocation51_spill] sm:$0xff] }
 0x502   : > { %v18043_v28 = vadd.f32 %v13231_v47, %v7874_v16  ;;  %v7880_v40 = vadd.f32 %v18975_v58, %v17925_v11  ;;  %v13489_v58 = vpop.f32.mrf.mxu0 }
 0x503   : > { %v8092_v57 = vpop.f32.mrf.mxu1 }
 0x504   : > { %v18049_v60 = vadd.f32 %v8092_v57, %v7873_v33  ;;  %v18973_v57 = vld [vmem:[#allocation100_spill] sm:$0xff] }
 0x505   : > { %v13234_v55 = vpop.f32.mrf.mxu1  ;;  %v7877_v30 = vadd.f32 %v18973_v57, %v17921_v13  ;;  %v7882_v13 = vadd.f32 %v17566_v7, %v17935_v37  ;;  %v18981_v7 = vld [vmem:[#allocation56_spill] sm:$0xff] }
 0x506   : > { %v18053_v14 = vadd.f32 %v13234_v55, %v7876_v27  ;;  %v7883_v37 = vadd.f32 %v18981_v7, %v17951_v5 }
 0x507   : > { %v8102_v47 = vpop.f32.mrf.mxu1 }
 0x508   : > { %v18059_v16 = vadd.f32 %v8102_v47, %v7875_v31  ;;  %v18976_v47 = vld [vmem:[#allocation57_spill] sm:$0xff] }
 0x509   : > { %v13237_v45 = vpop.f32.mrf.mxu1  ;;  %v7879_v4 = vadd.f32 %v18976_v47, %v17931_v50  ;;  %v18979_v50 = vld [vmem:[#allocation61_spill] sm:$0xff] }
 0x50a   : > { %v18063_v33 = vadd.f32 %v13237_v45, %v7878_v32  ;;  %v7884_v47 = vadd.f32 %v18979_v50, %v17945_v59  ;;  %v7885_v50 = vadd.f32 %v17604_v36, %v17957_v9 }
 0x50b   : > { %v8112_v55 = vpop.f32.mrf.mxu1 }
 0x50c   : > { %v18069_v27 = vadd.f32 %v8112_v55, %v7877_v30  ;;  %v18978_v55 = vld [vmem:[#allocation23_spill] sm:$0xff] }
 0x50d   : > { %v13240_v15 = vpop.f32.mrf.mxu1  ;;  %v7881_v11 = vadd.f32 %v18978_v55, %v17941_v48  ;;  %v18983_v55 = vld [vmem:[#allocation102_spill] sm:$0xff] }
 0x50e   : > { %v18073_v31 = vadd.f32 %v13240_v15, %v7880_v40 }
 0x50f   : > { %v8122_v45 = vpop.f32.mrf.mxu1 }
 0x510   : > { %v18079_v32 = vadd.f32 %v8122_v45, %v7879_v4  ;;  %v18980_v4 = vld [vmem:[#allocation19_spill] sm:$0xff] }
 0x511   : > { %v13243_v57 = vpop.f32.mrf.mxu1  ;;  %v7856_v45 = vadd.f32 %v18980_v4, %v17797_v62  ;;  %v18985_v62 = vld [vmem:[#allocation27_spill] sm:$0xff] }
 0x512   : > { %v18083_v30 = vadd.f32 %v13243_v57, %v7882_v13  ;;  %v18097_v13 = vpop.f32.mrf.mxu0 }
 0x513   : > { %v8132_v15 = vpop.f32.mrf.mxu1  ;;  %18982 = vst [vmem:[#allocation46_spill] sm:$0xff] %v18097_v13  ;;  %v8162_v48 = vadd.f32 %v17959_v0, %v7856_v45  ;;  %v18986_v0 = vld [vmem:[#allocation86_spill] sm:$0xff]  ;;  %v8474_v13 = vadd.f32 %v17660_v38, %v17983_v54 }
 0x514   : > { %v18087_v40 = vadd.f32 %v8132_v15, %v7881_v11  ;;  %v7855_v11 = vadd.f32 %v18983_v55, %v17803_v12  ;;  %v13524_v5 = vpop.f32.mrf.mxu0  ;;  %v7857_v45 = vadd.f32 %v18986_v0, %v17813_v42 }
 0x515   : > { %v13246_v24 = vpop.f32.mrf.mxu1  ;;  %v8468_v12 = vadd.f32 %v17612_v49, %v8162_v48 }
 0x516   : > { %v18093_v20 = vadd.f32 %v13246_v24, %v7884_v47  ;;  %v8161_v15 = vadd.f32 %v17963_v63, %v7855_v11  ;;  %v7858_v24 = vadd.f32 %v18985_v62, %v17809_v23  ;;  %v8163_v63 = vadd.f32 %v17969_v35, %v7857_v45  ;;  %v9226_v55 = vpop.f32.mrf.mxu0 }
 0x517   : > { %v8142_v57 = vpop.f32.mrf.mxu1 }
 0x518   : > { %v18102_v58 = vadd.f32 %v8142_v57, %v7883_v37  ;;  %v8164_v4 = vadd.f32 %v17965_v2, %v7858_v24  ;;  %v8467_v23 = vadd.f32 %v17620_v1, %v8161_v15  ;;  %v8469_v49 = vadd.f32 %v17636_v52, %v8163_v63  ;;  %v13527_v48 = vpop.f32.mrf.mxu0 }
 0x519   : > { %v13249_v59 = vpop.f32.mrf.mxu1 }
 0x51a   : > { %18984 = vst [vmem:[#allocation47_spill] sm:$0xff] %v18102_v58  ;;  %v8470_v2 = vadd.f32 %v17628_v19, %v8164_v4 }
 0x51b   : > { %v8152_v47 = vpop.f32.mrf.mxu1 }
 0x51c   : > { %v18112_v7 = vadd.f32 %v8152_v47, %v7885_v50 }
 0x51d   : > { %v13364_v37 = vpop.f32.mrf.mxu1 }
 0x51e   : > { %18987 = vst [vmem:[#allocation48_spill] sm:$0xff] %v18112_v7  ;;  %v8774_v57 = vadd.f32 %v13364_v37, %v8468_v12 }
 0x51f   : > { %v8614_v11 = vpop.f32.mrf.mxu1 }
 0x520   : > { %v9080_v36 = vadd.f32 %v17821_v56, %v8774_v57  ;;  %v8773_v9 = vadd.f32 %v8614_v11, %v8467_v23 }
 0x521   : > { %v13367_v59 = vpop.f32.mrf.mxu1 }
 0x522   : > { %v9386_v62 = vadd.f32 %v13524_v5, %v9080_v36  ;;  %v9079_v42 = vadd.f32 %v17827_v29, %v8773_v9  ;;  %v8776_v24 = vadd.f32 %v13367_v59, %v8470_v2  ;;  %v9236_v5 = vpop.f32.mrf.mxu0 }
 0x523   : > { %v8624_v50 = vpop.f32.mrf.mxu1 }
 0x524   : > { %v9418_v35 = vmax.f32 %v9386_v62, 0.0  ;;  %v9385_v47 = vadd.f32 %v9226_v55, %v9079_v42  ;;  %v9082_v1 = vadd.f32 %v17833_v25, %v8776_v24  ;;  %v8775_v15 = vadd.f32 %v8624_v50, %v8469_v49 }
 0x525   : > { %v13370_v0 = vpop.f32.mrf.mxu1 }
 0x526   : > { %9450 = vst [vmem:[#allocation4 + $0x8] sm:$0xff] %v9418_v35  ;;  %v9417_v56 = vmax.f32 %v9385_v47, 0.0  ;;  %v9388_v45 = vadd.f32 %v13527_v48, %v9082_v1  ;;  %v9081_v19 = vadd.f32 %v17839_v18, %v8775_v15 }
 0x527   : > { %v8634_v4 = vpop.f32.mrf.mxu1 }
 0x528   : > { %9449 = vst [vmem:[#allocation4] sm:$0xff] %v9417_v56  ;;  %v9420_v29 = vmax.f32 %v9388_v45, 0.0  ;;  %v9387_v12 = vadd.f32 %v9236_v5, %v9081_v19 }
 0x529   : > { %v13373_v52 = vpop.f32.mrf.mxu1 }
 0x52a   : > { %9452 = vst [vmem:[#allocation4 + $0x18] sm:$0xff] %v9420_v29  ;;  %v9419_v37 = vmax.f32 %v9387_v12, 0.0  ;;  %v8780_v58 = vadd.f32 %v13373_v52, %v8474_v13  ;;  %v18995_v52 = vld [vmem:[#allocation81_spill] sm:$0xff] }
 0x52b   : > { %v8644_v63 = vpop.f32.mrf.mxu1 }
 0x52c   : > { %9451 = vst [vmem:[#allocation4 + $0x10] sm:$0xff] %v9419_v37 }
 0x52d   : > { %v13376_v57 = vpop.f32.mrf.mxu1 }
 0x52f   : > { %v8654_v25 = vpop.f32.mrf.mxu1  ;;  %v9481_v23 = vld [vmem:[#allocation4] ss:$2 sm:$0x7f]  ;;  %v9483_v55 = vld [vmem:[#allocation4 + $0x1] ss:$2 sm:$0x7f] }
 0x530   : > { %v9488_v18 = vmax.f32 %v9481_v23, %v9483_v55  ;;  %v8472_v55 = vadd.f32 %v17644_v39, %v17973_v21 }
 0x531   : > { %v13379_v11 = vpop.f32.mrf.mxu1 }
 0x533   : > { %v9485_v36 = vld [vmem:[#allocation4 + $0x12] ss:$2 sm:$0x7f]  ;;  %v9487_v9 = vld [vmem:[#allocation4 + $0x13] ss:$2 sm:$0x7f]  ;;  %v8664_v2 = vpop.f32.mrf.mxu1 }
 0x534   : > { %v9489_v59 = vmax.f32 %v9485_v36, %v9487_v9  ;;  %v8778_v9 = vadd.f32 %v13370_v0, %v8472_v55  ;;  %v18992_v0 = vld [vmem:[#allocation54_spill] sm:$0xff] }
 0x535   : > { %v18129_v62 = vpop.f32.mrf.mxu1  ;;  %v8476_v55 = vadd.f32 %v18992_v0, %v17993_v8 }
 0x536   : > { %v9490_v42 = vmax.f32 %v9488_v18, %v9489_v59  ;;  %v8471_v18 = vadd.f32 %v17652_v10, %v17979_v51  ;;  %v18993_v10 = vld [vmem:[#allocation78_spill] sm:$0xff] }
 0x537   : > { %v18131_v24 = vpop.f32.mrf.mxu1  ;;  %v8782_v54 = vadd.f32 %v13376_v57, %v8476_v55  ;;  %v18999_v55 = vld [vmem:[#allocation6_spill] sm:$0xff] }
 0x538   : > { %9491 = vst [vmem:[%s18127_s23] sm:$0x7f] %v9490_v42  ;;  %v8777_v42 = vadd.f32 %v8634_v4, %v8471_v18  ;;  %v18994_v4 = vld [vmem:[#allocation63_spill] sm:$0xff] }
 0x539   : > { %v18134_v49 = vpop.f32.mrf.mxu1  ;;  %v8475_v18 = vadd.f32 %v18994_v4, %v17999_v41 }
 0x53a   : > { %v9083_v51 = vadd.f32 %v18993_v10, %v8777_v42  ;;  %v18998_v42 = vld [vmem:[#allocation67_spill] sm:$0xff]  ;;  %v19000_v10 = vld [vmem:[#allocation62_spill] sm:$0xff] }
 0x53b   : > { %v18136_v48 = vpop.f32.mrf.mxu1 }
 0x53d   : > { %v18138_v50 = vpop.f32.mrf.mxu1 }
 0x53f   : > { %v18140_v35 = vpop.f32.mrf.mxu1 }
 0x541   : > { %v18142_v47 = vpop.f32.mrf.mxu1 }
 0x543   : > { %v18144_v1 = vpop.f32.mrf.mxu1 }
 0x545   : > { %v18146_v15 = vpop.f32.mrf.mxu1 }
 0x547   : > { %v18148_v56 = vpop.f32.mrf.mxu1 }
 0x549   : > { %v18150_v45 = vpop.f32.mrf.mxu1 }
 0x54b   : > { %v18152_v19 = vpop.f32.mrf.mxu1 }
 0x54d   : > { %v18154_v5 = vpop.f32.mrf.mxu1 }
 0x54f   : > { %v18156_v29 = vpop.f32.mrf.mxu1 }
 0x551   : > { %v18158_v12 = vpop.f32.mrf.mxu1 }
 0x553   : > { %v18160_v37 = vpop.f32.mrf.mxu1 }
 0x554   : > { %18988 = vst [vmem:[#allocation49_spill] sm:$0xff] %v18160_v37  ;;  %v9084_v37 = vadd.f32 %v17845_v46, %v8778_v9 }
 0x555   : > { %v18162_v23 = vpop.f32.mrf.mxu1 }
 0x556   : > { %18989 = vst [vmem:[#allocation50_spill] sm:$0xff] %v18162_v23  ;;  %v8473_v23 = vadd.f32 %v17668_v61, %v17989_v26  ;;  %v18996_v61 = vld [vmem:[#allocation25_spill] sm:$0xff] }
 0x557   : > { %v18166_v36 = vpop.f32.mrf.mxu1  ;;  %v8478_v46 = vadd.f32 %v18996_v61, %v18003_v22  ;;  %v8480_v22 = vadd.f32 %v19000_v10, %v18013_v44  ;;  %v19004_v44 = vld [vmem:[#allocation73_spill] sm:$0xff] }
 0x558   : > { %18990 = vst [vmem:[#allocation52_spill] sm:$0xff] %v18166_v36  ;;  %v8779_v21 = vadd.f32 %v8644_v63, %v8473_v23  ;;  %v8781_v63 = vadd.f32 %v8654_v25, %v8475_v18  ;;  %v19001_v18 = vld [vmem:[#allocation7_spill] sm:$0xff] }
 0x559   : > { %v13409_v59 = vpop.f32.mrf.mxu1  ;;  %v8784_v0 = vadd.f32 %v13379_v11, %v8478_v46  ;;  %v8786_v11 = vadd.f32 %v18129_v62, %v8480_v22  ;;  %v8482_v46 = vadd.f32 %v19004_v44, %v18023_v17  ;;  %v19008_v17 = vld [vmem:[#allocation77_spill] sm:$0xff]  ;;  %v19009_v22 = vld [vmem:[#allocation11_spill] sm:$0xff]  ;;  %v19014_v44 = vld [vmem:[#allocation28_spill] sm:$0xff] }
 0x55b   : > { %v18172_v7 = vpop.f32.mrf.mxu1 }
 0x55c   : > { %18991 = vst [vmem:[#allocation53_spill] sm:$0xff] %v18172_v7  ;;  %v9086_v7 = vadd.f32 %v18995_v52, %v8780_v58  ;;  %v9088_v58 = vadd.f32 %v18999_v55, %v8782_v54  ;;  %v19003_v54 = vld [vmem:[#allocation8_spill] sm:$0xff] }
 0x55d   : > { %v13530_v39 = vpop.f32.mrf.mxu1  ;;  %v9090_v61 = vadd.f32 %v19003_v54, %v8784_v0  ;;  %v19007_v0 = vld [vmem:[#allocation10_spill] sm:$0xff] }
 0x55e   : > { %v9390_v36 = vadd.f32 %v13530_v39, %v9084_v37  ;;  %v18997_v37 = vld [vmem:[#allocation5_spill] sm:$0xff]  ;;  %v8477_v39 = vadd.f32 %v18998_v42, %v18009_v6  ;;  %v8788_v42 = vadd.f32 %v18134_v49, %v8482_v46  ;;  %v19010_v49 = vld [vmem:[#allocation75_spill] sm:$0xff]  ;;  %v19013_v54 = vld [vmem:[#allocation14_spill] sm:$0xff]  ;;  %v8485_v46 = vadd.f32 %v19014_v44, %v18049_v60 }
 0x55f   : > { %v9246_v38 = vpop.f32.mrf.mxu1  ;;  %v9085_v9 = vadd.f32 %v18997_v37, %v8779_v21  ;;  %v9087_v21 = vadd.f32 %v19001_v18, %v8781_v63  ;;  %v19025_v44 = vld [vmem:[#allocation35_spill] sm:$0xff] }
 0x560   : > { %v9422_v59 = vmax.f32 %v9390_v36, 0.0  ;;  %v9389_v13 = vadd.f32 %v9246_v38, %v9083_v51  ;;  %v8783_v25 = vadd.f32 %v8664_v2, %v8477_v39  ;;  %v19002_v38 = vld [vmem:[#allocation59_spill] sm:$0xff] }
 0x561   : > { %v13533_v26 = vpop.f32.mrf.mxu1  ;;  %v8479_v6 = vadd.f32 %v19002_v38, %v18019_v43  ;;  %v19006_v43 = vld [vmem:[#allocation65_spill] sm:$0xff] }
 0x562   : > { %9454 = vst [vmem:[#allocation4 + $0x28] sm:$0xff] %v9422_v59  ;;  %v9421_v23 = vmax.f32 %v9389_v13, 0.0  ;;  %v9392_v8 = vadd.f32 %v13533_v26, %v9086_v7 }
 0x563   : > { %v9256_v41 = vpop.f32.mrf.mxu1  ;;  %v8785_v26 = vadd.f32 %v18131_v24, %v8479_v6 }
 0x564   : > { %9453 = vst [vmem:[#allocation4 + $0x20] sm:$0xff] %v9421_v23  ;;  %v9424_v57 = vmax.f32 %v9392_v8, 0.0  ;;  %v9391_v36 = vadd.f32 %v9256_v41, %v9085_v9  ;;  %v19005_v8 = vld [vmem:[#allocation9_spill] sm:$0xff]  ;;  %v8481_v9 = vadd.f32 %v19006_v43, %v18029_v3 }
 0x565   : > { %v13536_v51 = vpop.f32.mrf.mxu1  ;;  %v9089_v37 = vadd.f32 %v19005_v8, %v8783_v25  ;;  %v8483_v25 = vadd.f32 %v19010_v49, %v18039_v34 }
 0x566   : > { %9456 = vst [vmem:[#allocation4 + $0x38] sm:$0xff] %v9424_v57  ;;  %v9423_v4 = vmax.f32 %v9391_v36, 0.0  ;;  %v9394_v7 = vadd.f32 %v13536_v51, %v9088_v58  ;;  %v9092_v57 = vadd.f32 %v19007_v0, %v8786_v11  ;;  %v8484_v36 = vadd.f32 %v19008_v17, %v18033_v53 }
 0x567   : > { %v9266_v59 = vpop.f32.mrf.mxu1  ;;  %v8787_v55 = vadd.f32 %v18136_v48, %v8481_v9  ;;  %v9091_v51 = vadd.f32 %v19009_v22, %v8785_v26  ;;  %v8789_v53 = vadd.f32 %v18140_v35, %v8483_v25  ;;  %v19012_v48 = vld [vmem:[#allocation68_spill] sm:$0xff]  ;;  %v19016_v9 = vld [vmem:[#allocation70_spill] sm:$0xff] }
 0x568   : > { %9455 = vst [vmem:[#allocation4 + $0x30] sm:$0xff] %v9423_v4  ;;  %v9426_v13 = vmax.f32 %v9394_v7, 0.0  ;;  %v9393_v52 = vadd.f32 %v9266_v59, %v9087_v21  ;;  %v8790_v3 = vadd.f32 %v18138_v50, %v8484_v36  ;;  %v19011_v21 = vld [vmem:[#allocation12_spill] sm:$0xff]  ;;  %v8486_v6 = vadd.f32 %v19012_v48, %v18043_v28  ;;  %v19018_v36 = vld [vmem:[#allocation30_spill] sm:$0xff] }
 0x569   : > { %v13539_v2 = vpop.f32.mrf.mxu1  ;;  %v9094_v38 = vadd.f32 %v19011_v21, %v8788_v42  ;;  %v19015_v35 = vld [vmem:[#allocation16_spill] sm:$0xff] }
 0x56a   : > { %9458 = vst [vmem:[#allocation4 + $0x48] sm:$0xff] %v9426_v13  ;;  %v9425_v23 = vmax.f32 %v9393_v52, 0.0  ;;  %v9396_v63 = vadd.f32 %v13539_v2, %v9090_v61  ;;  %v9093_v61 = vadd.f32 %v19013_v54, %v8787_v55  ;;  %v8792_v34 = vadd.f32 %v18142_v47, %v8486_v6  ;;  %v19024_v54 = vld [vmem:[#allocation32_spill] sm:$0xff] }
 0x56b   : > { %v9276_v62 = vpop.f32.mrf.mxu1 }
 0x56c   : > { %9457 = vst [vmem:[#allocation4 + $0x40] sm:$0xff] %v9425_v23  ;;  %v9428_v39 = vmax.f32 %v9396_v63, 0.0  ;;  %v9395_v41 = vadd.f32 %v9276_v62, %v9089_v37  ;;  %v9096_v63 = vadd.f32 %v19015_v35, %v8790_v3  ;;  %v8488_v62 = vadd.f32 %v19016_v9, %v18053_v14  ;;  %v19019_v14 = vld [vmem:[#allocation21_spill] sm:$0xff]  ;;  %v19026_v35 = vld [vmem:[#allocation74_spill] sm:$0xff] }
 0x56d   : > { %v13542_v24 = vpop.f32.mrf.mxu1  ;;  %v9098_v22 = vadd.f32 %v19019_v14, %v8792_v34 }
 0x56e   : > { %9460 = vst [vmem:[#allocation4 + $0x58] sm:$0xff] %v9428_v39  ;;  %v9427_v58 = vmax.f32 %v9395_v41, 0.0  ;;  %v9398_v10 = vadd.f32 %v13542_v24, %v9092_v57  ;;  %v19017_v39 = vld [vmem:[#allocation18_spill] sm:$0xff]  ;;  %v8791_v41 = vadd.f32 %v18144_v1, %v8485_v46  ;;  %v8794_v17 = vadd.f32 %v18146_v15, %v8488_v62  ;;  %v19020_v1 = vld [vmem:[#allocation72_spill] sm:$0xff] }
 0x56f   : > { %v9286_v4 = vpop.f32.mrf.mxu1  ;;  %v9493_v59 = vld [vmem:[#allocation4 + $0x24] ss:$2 sm:$0x7f]  ;;  %v9495_v11 = vld [vmem:[#allocation4 + $0x25] ss:$2 sm:$0x7f]  ;;  %v9095_v47 = vadd.f32 %v19017_v39, %v8789_v53  ;;  %v8487_v24 = vadd.f32 %v19018_v36, %v18059_v16  ;;  %v8490_v3 = vadd.f32 %v19020_v1, %v18063_v33 }
 0x570   : > { %9459 = vst [vmem:[#allocation4 + $0x50] sm:$0xff] %v9427_v58  ;;  %v9430_v7 = vmax.f32 %v9398_v10, 0.0  ;;  %v9397_v18 = vadd.f32 %v9286_v4, %v9091_v51  ;;  %v9500_v8 = vmax.f32 %v9493_v59, %v9495_v11 }
 0x571   : > { %v13545_v13 = vpop.f32.mrf.mxu1  ;;  %v8793_v51 = vadd.f32 %v18148_v56, %v8487_v24  ;;  %v8796_v21 = vadd.f32 %v18150_v45, %v8490_v3  ;;  %v19023_v56 = vld [vmem:[#allocation33_spill] sm:$0xff] }
 0x572   : > { %9462 = vst [vmem:[#allocation4 + $0x68] sm:$0xff] %v9430_v7  ;;  %v9429_v52 = vmax.f32 %v9397_v18, 0.0  ;;  %v9400_v50 = vadd.f32 %v13545_v13, %v9094_v38  ;;  %v19021_v18 = vld [vmem:[#allocation29_spill] sm:$0xff]  ;;  %v19022_v38 = vld [vmem:[#allocation34_spill] sm:$0xff]  ;;  %v9100_v11 = vadd.f32 %v19023_v56, %v8794_v17 }
 0x573   : > { %v9497_v2 = vld [vmem:[#allocation4 + $0x36] ss:$2 sm:$0x7f]  ;;  %v9499_v26 = vld [vmem:[#allocation4 + $0x37] ss:$2 sm:$0x7f]  ;;  %v9296_v23 = vpop.f32.mrf.mxu1  ;;  %v9097_v16 = vadd.f32 %v19021_v18, %v8791_v41  ;;  %v8489_v53 = vadd.f32 %v19022_v38, %v18069_v27  ;;  %v9099_v45 = vadd.f32 %v19025_v44, %v8793_v51 }
 0x574   : > { %v9501_v28 = vmax.f32 %v9497_v2, %v9499_v26  ;;  %9461 = vst [vmem:[#allocation4 + $0x60] sm:$0xff] %v9429_v52  ;;  %v9432_v37 = vmax.f32 %v9400_v50, 0.0  ;;  %v9399_v43 = vadd.f32 %v9296_v23, %v9093_v61  ;;  %v8492_v61 = vadd.f32 %v19024_v54, %v18073_v31  ;;  %v19027_v31 = vld [vmem:[#allocation104_spill] sm:$0xff]  ;;  %v19035_v18 = vld [vmem:[#allocation50_spill] sm:$0xff] }
 0x575   : > { %v13548_v42 = vpop.f32.mrf.mxu1  ;;  %v8795_v46 = vadd.f32 %v18152_v19, %v8489_v53  ;;  %v19028_v19 = vld [vmem:[#allocation36_spill] sm:$0xff] }
 0x576   : > { %v9502_v60 = vmax.f32 %v9500_v8, %v9501_v28  ;;  %9464 = vst [vmem:[#allocation4 + $0x78] sm:$0xff] %v9432_v37  ;;  %v9431_v0 = vmax.f32 %v9399_v43, 0.0  ;;  %v9402_v57 = vadd.f32 %v13548_v42, %v9096_v63  ;;  %v8798_v23 = vadd.f32 %v18154_v5, %v8492_v61  ;;  %v19032_v51 = vld [vmem:[#allocation80_spill] sm:$0xff] }
 0x577   : > { %v9306_v55 = vpop.f32.mrf.mxu1  ;;  %v9505_v49 = vld [vmem:[#allocation4 + $0x48] ss:$2 sm:$0x7f]  ;;  %v9507_v25 = vld [vmem:[#allocation4 + $0x49] ss:$2 sm:$0x7f]  ;;  %v8491_v63 = vadd.f32 %v19026_v35, %v18079_v32  ;;  %v9102_v43 = vadd.f32 %v19027_v31, %v8796_v21  ;;  %v8494_v62 = vadd.f32 %v19028_v19, %v18083_v30  ;;  %v8496_v1 = vadd.f32 %v19032_v51, %v18093_v20 }
 0x578   : > { %9503 = vst [vmem:[%s18127_s23 + $0x7] sm:$0x7f] %v9502_v60  ;;  %9463 = vst [vmem:[#allocation4 + $0x70] sm:$0xff] %v9431_v0  ;;  %v9434_v58 = vmax.f32 %v9402_v57, 0.0  ;;  %v9401_v10 = vadd.f32 %v9306_v55, %v9095_v47  ;;  %v9512_v13 = vmax.f32 %v9505_v49, %v9507_v25  ;;  %v19029_v60 = vld [vmem:[#allocation38_spill] sm:$0xff]  ;;  %v19030_v57 = vld [vmem:[#allocation85_spill] sm:$0xff] }
 0x579   : > { %v13551_v4 = vpop.f32.mrf.mxu1  ;;  %v8797_v9 = vadd.f32 %v18156_v29, %v8491_v63  ;;  %v9101_v32 = vadd.f32 %v19029_v60, %v8795_v46  ;;  %v8800_v0 = vadd.f32 %v18158_v12, %v8494_v62  ;;  %v8493_v17 = vadd.f32 %v19030_v57, %v18087_v40  ;;  %v19031_v29 = vld [vmem:[#allocation40_spill] sm:$0xff]  ;;  %v19033_v49 = vld [vmem:[#allocation41_spill] sm:$0xff]  ;;  %v19036_v21 = vld [vmem:[#allocation47_spill] sm:$0xff] }
 0x57a   : > { %9466 = vst [vmem:[#allocation4 + $0x88] sm:$0xff] %v9434_v58  ;;  %v9433_v15 = vmax.f32 %v9401_v10, 0.0  ;;  %v9404_v7 = vadd.f32 %v13551_v4, %v9098_v22  ;;  %v9104_v58 = vadd.f32 %v19031_v29, %v8798_v23  ;;  %v19034_v25 = vld [vmem:[#allocation49_spill] sm:$0xff]  ;;  %v19037_v38 = vld [vmem:[#allocation76_spill] sm:$0xff]  ;;  %v19038_v20 = vld [vmem:[#allocation42_spill] sm:$0xff] }
 0x57b   : > { %v9509_v48 = vld [vmem:[#allocation4 + $0x5a] ss:$2 sm:$0x7f]  ;;  %v9511_v6 = vld [vmem:[#allocation4 + $0x5b] ss:$2 sm:$0x7f]  ;;  %v9316_v59 = vpop.f32.mrf.mxu1  ;;  %v9103_v12 = vadd.f32 %v19033_v49, %v8797_v9  ;;  %v8799_v4 = vadd.f32 %v19034_v25, %v8493_v17  ;;  %v8495_v53 = vadd.f32 %v19037_v38, %v19036_v21  ;;  %v9106_v56 = vadd.f32 %v19038_v20, %v8800_v0 }
 0x57c   : > { %v9513_v33 = vmax.f32 %v9509_v48, %v9511_v6  ;;  %9465 = vst [vmem:[#allocation4 + $0x80] sm:$0xff] %v9433_v15  ;;  %v9436_v52 = vmax.f32 %v9404_v7, 0.0  ;;  %v9403_v50 = vadd.f32 %v9316_v59, %v9097_v16  ;;  %v8802_v16 = vadd.f32 %v19035_v18, %v8496_v1  ;;  %v19042_v46 = vld [vmem:[#allocation84_spill] sm:$0xff]  ;;  %v19044_v9 = vld [vmem:[#allocation45_spill] sm:$0xff]  ;;  %v19046_v17 = vld [vmem:[#allocation46_spill] sm:$0xff] }
 0x57d   : > { %v13554_v34 = vpop.f32.mrf.mxu1  ;;  %v19043_v35 = vld [vmem:[#allocation44_spill] sm:$0xff]  ;;  %v19045_v62 = vld [vmem:[#allocation53_spill] sm:$0xff] }
 0x57e   : > { %v9514_v27 = vmax.f32 %v9512_v13, %v9513_v33  ;;  %9468 = vst [vmem:[#allocation4 + $0x98] sm:$0xff] %v9436_v52  ;;  %v9435_v2 = vmax.f32 %v9403_v50, 0.0  ;;  %v9406_v26 = vadd.f32 %v13554_v34, %v9100_v11  ;;  %v19039_v11 = vld [vmem:[#allocation52_spill] sm:$0xff]  ;;  %v19040_v34 = vld [vmem:[#allocation43_spill] sm:$0xff]  ;;  %v9108_v63 = vadd.f32 %v19043_v35, %v8802_v16 }
 0x57f   : > { %v9326_v8 = vpop.f32.mrf.mxu1  ;;  %v9517_v42 = vld [vmem:[#allocation4 + $0x6c] ss:$2 sm:$0x7f]  ;;  %v9519_v39 = vld [vmem:[#allocation4 + $0x6d] ss:$2 sm:$0x7f]  ;;  %v8801_v13 = vadd.f32 %v19039_v11, %v8495_v53  ;;  %v9105_v44 = vadd.f32 %v19040_v34, %v8799_v4 }
 0x580   : > { %9515 = vst [vmem:[%s18127_s23 + $0xe] sm:$0x7f] %v9514_v27  ;;  %9467 = vst [vmem:[#allocation4 + $0x90] sm:$0xff] %v9435_v2  ;;  %v9438_v28 = vmax.f32 %v9406_v26, 0.0  ;;  %v9405_v37 = vadd.f32 %v9326_v8, %v9099_v45  ;;  %v9524_v10 = vmax.f32 %v9517_v42, %v9519_v39  ;;  %v19041_v45 = vld [vmem:[#allocation48_spill] sm:$0xff] }
 0x581   : > { %v13557_v47 = vpop.f32.mrf.mxu1  ;;  %v8497_v27 = vadd.f32 %v19042_v46, %v19041_v45  ;;  %v9107_v19 = vadd.f32 %v19044_v9, %v8801_v13 }
 0x582   : > { %9470 = vst [vmem:[#allocation4 + $0xa8] sm:$0xff] %v9438_v28  ;;  %v9437_v5 = vmax.f32 %v9405_v37, 0.0  ;;  %v9408_v41 = vadd.f32 %v13557_v47, %v9102_v43 }
 0x583   : > { %v9521_v36 = vld [vmem:[#allocation4 + $0x7e] ss:$2 sm:$0x7f]  ;;  %v9523_v24 = vld [vmem:[#allocation4 + $0x7f] ss:$2 sm:$0x7f]  ;;  %v9336_v55 = vpop.f32.mrf.mxu1  ;;  %v8803_v42 = vadd.f32 %v19045_v62, %v8497_v27 }
 0x584   : > { %v9525_v30 = vmax.f32 %v9521_v36, %v9523_v24  ;;  %9469 = vst [vmem:[#allocation4 + $0xa0] sm:$0xff] %v9437_v5  ;;  %v9440_v14 = vmax.f32 %v9408_v41, 0.0  ;;  %v9407_v22 = vadd.f32 %v9336_v55, %v9101_v32 }
 0x585   : > { %v13560_v3 = vpop.f32.mrf.mxu1  ;;  %v9109_v36 = vadd.f32 %v19046_v17, %v8803_v42 }
 0x586   : > { %v9526_v40 = vmax.f32 %v9524_v10, %v9525_v30  ;;  %9472 = vst [vmem:[#allocation4 + $0xb8] sm:$0xff] %v9440_v14  ;;  %v9439_v15 = vmax.f32 %v9407_v22, 0.0  ;;  %v9410_v7 = vadd.f32 %v13560_v3, %v9104_v58 }
 0x587   : > { %v9346_v48 = vpop.f32.mrf.mxu1  ;;  %v9529_v33 = vld [vmem:[#allocation4 + $0x90] ss:$2 sm:$0x7f]  ;;  %v9531_v52 = vld [vmem:[#allocation4 + $0x91] ss:$2 sm:$0x7f] }
 0x588   : > { %9527 = vst [vmem:[%s18127_s23 + $0x15] sm:$0x7f] %v9526_v40  ;;  %9471 = vst [vmem:[#allocation4 + $0xb0] sm:$0xff] %v9439_v15  ;;  %v9442_v6 = vmax.f32 %v9410_v7, 0.0  ;;  %v9409_v59 = vadd.f32 %v9346_v48, %v9103_v12  ;;  %v9536_v8 = vmax.f32 %v9529_v33, %v9531_v52 }
 0x589   : > { %v13563_v50 = vpop.f32.mrf.mxu1 }
 0x58a   : > { %9474 = vst [vmem:[#allocation4 + $0xc8] sm:$0xff] %v9442_v6  ;;  %v9441_v54 = vmax.f32 %v9409_v59, 0.0  ;;  %v9412_v61 = vadd.f32 %v13563_v50, %v9106_v56 }
 0x58b   : > { %v9533_v2 = vld [vmem:[#allocation4 + $0xa2] ss:$2 sm:$0x7f]  ;;  %v9535_v26 = vld [vmem:[#allocation4 + $0xa3] ss:$2 sm:$0x7f]  ;;  %v9356_v23 = vpop.f32.mrf.mxu1 }
 0x58c   : > { %v9537_v28 = vmax.f32 %v9533_v2, %v9535_v26  ;;  %9473 = vst [vmem:[#allocation4 + $0xc0] sm:$0xff] %v9441_v54  ;;  %v9444_v37 = vmax.f32 %v9412_v61, 0.0  ;;  %v9411_v31 = vadd.f32 %v9356_v23, %v9105_v44 }
 0x58d   : > { %v13566_v43 = vpop.f32.mrf.mxu1 }
 0x58e   : > { %v9538_v39 = vmax.f32 %v9536_v8, %v9537_v28  ;;  %9476 = vst [vmem:[#allocation4 + $0xd8] sm:$0xff] %v9444_v37  ;;  %v9443_v47 = vmax.f32 %v9411_v31, 0.0  ;;  %v9414_v5 = vadd.f32 %v13566_v43, %v9108_v63 }
 0x58f   : > { %v9366_v41 = vpop.f32.mrf.mxu1 }
 0x590   : > { %9539 = vst [vmem:[%s18127_s23 + $0x1c] sm:$0x7f] %v9538_v39  ;;  %9475 = vst [vmem:[#allocation4 + $0xd0] sm:$0xff] %v9443_v47  ;;  %v9446_v60 = vmax.f32 %v9414_v5, 0.0  ;;  %v9413_v32 = vadd.f32 %v9366_v41, %v9107_v19 }
 0x591   : > { %v13569_v0 = vpop.f32.mrf.mxu1 }
 0x592   : > { %9478 = vst [vmem:[#allocation4 + $0xe8] sm:$0xff] %v9446_v60  ;;  %v9445_v57 = vmax.f32 %v9413_v32, 0.0 }
 0x593   : > { %v9376_v24 = vpop.f32.mrf.mxu1  ;;  %v9541_v29 = vld [vmem:[#allocation4 + $0xb4] ss:$2 sm:$0x7f]  ;;  %v9543_v58 = vld [vmem:[#allocation4 + $0xb5] ss:$2 sm:$0x7f] }
 0x594   : > { %9477 = vst [vmem:[#allocation4 + $0xe0] sm:$0xff] %v9445_v57  ;;  %v9415_v55 = vadd.f32 %v9376_v24, %v9109_v36  ;;  %v9548_v22 = vmax.f32 %v9541_v29, %v9543_v58 }
 0x596   : > { %v9447_v10 = vmax.f32 %v9415_v55, 0.0 }
 0x597   : > { %v9545_v30 = vld [vmem:[#allocation4 + $0xc6] ss:$2 sm:$0x7f]  ;;  %v9547_v14 = vld [vmem:[#allocation4 + $0xc7] ss:$2 sm:$0x7f] }
 0x598   : > { %v9549_v51 = vmax.f32 %v9545_v30, %v9547_v14  ;;  %9479 = vst [vmem:[#allocation4 + $0xf0] sm:$0xff] %v9447_v10 }
 0x59a   : > { %v9550_v1 = vmax.f32 %v9548_v22, %v9549_v51 }
 0x59b   : > { %v9553_v3 = vld [vmem:[#allocation4 + $0xd8] ss:$2 sm:$0x7f]  ;;  %v9555_v49 = vld [vmem:[#allocation4 + $0xd9] ss:$2 sm:$0x7f] }
 0x59c   : > { %9551 = vst [vmem:[%s18127_s23 + $0x23] sm:$0x7f] %v9550_v1  ;;  %v9560_v4 = vmax.f32 %v9553_v3, %v9555_v49 }
 0x59f   : > { %v9557_v12 = vld [vmem:[#allocation4 + $0xea] ss:$2 sm:$0x7f]  ;;  %v9559_v25 = vld [vmem:[#allocation4 + $0xeb] ss:$2 sm:$0x7f] }
 0x5a0   : > { %v9561_v40 = vmax.f32 %v9557_v12, %v9559_v25 }
 0x5a2   : > { %v9562_v15 = vmax.f32 %v9560_v4, %v9561_v40 }
 0x5a4   : > { %9563 = vst [vmem:[%s18127_s23 + $0x2a] sm:$0x7f] %v9562_v15 }
 0x5a5 PF: > { %s15_s18 = sadd.s32 1, %s13626_s18  }
 0x5a6   : > { %p12_p4 = scmp.ge.s32.totalorder %s15_s18, 4  }
 0x5a8   :  { %14 = sbr.rel (!%p12_p4) target bundleno = 1 (0x1), region = 232 }

</bundles_post_ra>
